<compile_context>
chip_gen: v7x
topology: tpu7x:2x2x1
jax: 0.10.0
libtpu: 0.0.40
codegen_flags: <defaults>
</compile_context>

<pallas_src>
import functools
import math

import jax
import jax.numpy as jnp
from jax import lax
from jax.experimental import pallas as pl
from jax.experimental.pallas import tpu as pltpu


# ----------------------------- kernel ---------------------------------------


def _rmsnorm(x, w, eps):
    # x: (M, H) f32, w: (1, H) f32
    var = jnp.mean(x * x, axis=-1, keepdims=True)
    return w * (x * lax.rsqrt(var + eps))


def _decoder_layer_kernel(*refs, batch, seq_len, num_heads, num_kv_heads,
                          head_dim, inter_size, eps, has_mask):
    if has_mask:
        (x_ref, cos_q_ref, sin_q_ref, cos_k_ref, sin_k_ref, mask_ref,
         w_in_ref, wqkv_ref, wo_ref, w_post_ref, wgu_ref, wd_ref,
         out_ref, attn_ref) = refs
    else:
        (x_ref, cos_q_ref, sin_q_ref, cos_k_ref, sin_k_ref,
         w_in_ref, wqkv_ref, wo_ref, w_post_ref, wgu_ref, wd_ref,
         out_ref, attn_ref) = refs
        mask_ref = None

    f32 = jnp.float32
    bf16 = jnp.bfloat16
    B, S, D = batch, seq_len, head_dim
    nH, kvH = num_heads, num_kv_heads
    rep = nH // kvH
    I = inter_size

    x = x_ref[...]                                    # (B*S, H) f32

    # ---- input RMSNorm (f32) + fused QKV projection (bf16 MXU, f32 accum) ----
    h = _rmsnorm(x, w_in_ref[...], eps)
    qkv = jnp.dot(h.astype(bf16), wqkv_ref[...],
                  preferred_element_type=f32)         # (B*S, (nH+2kvH)*D)
    q_all = qkv[:, : nH * D]                          # scale folded into cos_q/sin_q
    k_all = qkv[:, nH * D:(nH + kvH) * D]
    v_all = qkv[:, (nH + kvH) * D:]

    # RoPE tables (q-side tables are pre-scaled by 1/sqrt(D); sin is sign-folded
    # so rotate_half(x)*sin == roll(x, D/2)*sin_signed)
    cos_q = cos_q_ref[...]
    sin_q = sin_q_ref[...]
    cos_k = cos_k_ref[...]
    sin_k = sin_k_ref[...]

    if has_mask:
        mask = mask_ref[...]                          # (S, S) additive, f32
        mask_rep = mask if rep == 1 else jnp.concatenate([mask] * rep, axis=0)
    else:
        mask_rep = None

    # ---- GQA attention: per batch / kv group, rep query heads stacked on rows ----
    for b in range(B):
        r0 = b * S
        for g in range(kvH):
            kh = k_all[r0:r0 + S, g * D:(g + 1) * D]            # (S, D)
            kh = kh * cos_k + pltpu.roll(kh, shift=D // 2, axis=1) * sin_k
            khb = kh.astype(bf16)
            vhb = v_all[r0:r0 + S, g * D:(g + 1) * D].astype(bf16)

            q_heads = []
            for r in range(rep):
                hd = g * rep + r
                qh = q_all[r0:r0 + S, hd * D:(hd + 1) * D]
                qh = qh * cos_q + pltpu.roll(qh, shift=D // 2, axis=1) * sin_q
                q_heads.append(qh)
            qg = q_heads[0] if rep == 1 else jnp.concatenate(q_heads, axis=0)

            # scores: contract last axes directly (no materialized kh.T)
            s_mat = lax.dot_general(
                qg.astype(bf16), khb,
                dimension_numbers=(((1,), (1,)), ((), ())),
                preferred_element_type=f32)                     # (rep*S, S)
            if has_mask:
                s_mat = s_mat + mask_rep
            s_mat = s_mat - jnp.max(s_mat, axis=-1, keepdims=True)
            p = jnp.exp(s_mat)
            l = jnp.sum(p, axis=-1, keepdims=True)              # (rep*S, 1)

            og = jnp.dot(p.astype(bf16), vhb,
                         preferred_element_type=f32)            # (rep*S, D)
            og = og * pl.reciprocal(l, approx=True)             # normalize post-PV

            for r in range(rep):
                hd = g * rep + r
                attn_ref[r0:r0 + S, hd * D:(hd + 1) * D] = (
                    og[r * S:(r + 1) * S, :].astype(bf16))

    # ---- single Wo matmul (K = H) + first residual ----
    attn_out = jnp.dot(attn_ref[...], wo_ref[...], preferred_element_type=f32)
    x1 = x + attn_out

    # ---- post-attention RMSNorm + SwiGLU MLP (fused gate|up matmul) ----
    h2 = _rmsnorm(x1, w_post_ref[...], eps)
    gu = jnp.dot(h2.astype(bf16), wgu_ref[...], preferred_element_type=f32)  # (M, 2I)
    gate = gu[:, :I]
    up = gu[:, I:]
    act = gate * jax.nn.sigmoid(gate) * up            # SiLU(gate) * up, f32
    mlp = jnp.dot(act.astype(bf16), wd_ref[...], preferred_element_type=f32)

    out_ref[...] = x1 + mlp


# ----------------------------- wrappers ---------------------------------------


def prepare_decoder_params(params, cos, sin, *, head_dim):
    """One-time parameter prep: fuse + cast weights, fold scale / sign into tables."""
    D = head_dim
    scale = 1.0 / math.sqrt(D)
    sin_signed = jnp.concatenate([-sin[:, :D // 2], sin[:, D // 2:]], axis=-1)
    return {
        "w_in": params["w_in"],
        "w_post": params["w_post"],
        "wqkv": jnp.concatenate(
            [params["wq"], params["wk"], params["wv"]], axis=1).astype(jnp.bfloat16),
        "wo": params["wo"].astype(jnp.bfloat16),
        "wgu": jnp.concatenate(
            [params["wg"], params["wu"]], axis=1).astype(jnp.bfloat16),
        "wd": params["wd"].astype(jnp.bfloat16),
        "cos_q": cos * scale,            # 1/sqrt(D) folded into q-side RoPE
        "sin_q": sin_signed * scale,
        "cos_k": cos,
        "sin_k": sin_signed,
    }


def decoder_layer(x, prepared, mask=None, *, num_heads, num_kv_heads, eps):
    B, S, H = x.shape
    D = H // num_heads
    I = prepared["wgu"].shape[1] // 2
    M = B * S
    has_mask = mask is not None

    kernel = functools.partial(
        _decoder_layer_kernel,
        batch=B, seq_len=S, num_heads=num_heads, num_kv_heads=num_kv_heads,
        head_dim=D, inter_size=I, eps=eps, has_mask=has_mask)

    def const(shape):
        return pl.BlockSpec(shape, lambda i, _s=shape: tuple(0 for _ in _s))

    in_specs = [
        const((M, H)),                                        # x (flattened B*S rows)
        const((S, D)), const((S, D)),                         # cos_q, sin_q (scaled)
        const((S, D)), const((S, D)),                         # cos_k, sin_k
    ]
    inputs = [x.reshape(M, H),
              prepared["cos_q"], prepared["sin_q"],
              prepared["cos_k"], prepared["sin_k"]]
    if has_mask:
        in_specs.append(const((S, S)))                        # additive mask
        inputs.append(mask)
    in_specs += [
        const((1, H)),                                        # input-norm weight
        const((H, (num_heads + 2 * num_kv_heads) * D)),       # fused Wq|Wk|Wv (bf16)
        const((H, H)),                                        # Wo (bf16)
        const((1, H)),                                        # post-attn-norm weight
        const((H, 2 * I)),                                    # fused Wgate|Wup (bf16)
        const((I, H)),                                        # Wdown (bf16)
    ]
    inputs += [prepared["w_in"], prepared["wqkv"], prepared["wo"],
               prepared["w_post"], prepared["wgu"], prepared["wd"]]

    grid_spec = pltpu.PrefetchScalarGridSpec(
        num_scalar_prefetch=0,
        grid=(1,),                                            # B folded into the block
        in_specs=in_specs,
        out_specs=pl.BlockSpec((M, H), lambda i: (0, 0)),
        scratch_shapes=[pltpu.VMEM((M, H), jnp.bfloat16)],    # per-head attn output
    )

    out = pl.pallas_call(
        kernel,
        grid_spec=grid_spec,
        out_shape=jax.ShapeDtypeStruct((M, H), jnp.float32),
        compiler_params=pltpu.CompilerParams(
            dimension_semantics=("arbitrary",)),
    )(*inputs)
    return out.reshape(B, S, H)


# ------------------------- pure-JAX reference --------------------------------


def _ref_rmsnorm(x, w, eps):
    var = jnp.mean(x * x, axis=-1, keepdims=True)
    return w * (x * lax.rsqrt(var + eps))


def _ref_rotate_half(x):
    d = x.shape[-1]
    return jnp.concatenate([-x[..., d // 2:], x[..., : d // 2]], axis=-1)


def decoder_layer_ref(x, params, mask, cos, sin, *, num_heads, num_kv_heads, eps):
    B, S, H = x.shape
    D = H // num_heads
    rep = num_heads // num_kv_heads

    h = _ref_rmsnorm(x, params["w_in"][0], eps)
    q = (h @ params["wq"]).reshape(B, S, num_heads, D).transpose(0, 2, 1, 3)
    k = (h @ params["wk"]).reshape(B, S, num_kv_heads, D).transpose(0, 2, 1, 3)
    v = (h @ params["wv"]).reshape(B, S, num_kv_heads, D).transpose(0, 2, 1, 3)

    c = cos[None, None]
    s = sin[None, None]
    q = q * c + _ref_rotate_half(q) * s
    k = k * c + _ref_rotate_half(k) * s
    k = jnp.repeat(k, rep, axis=1)
    v = jnp.repeat(v, rep, axis=1)

    w = jnp.einsum("bhqd,bhkd->bhqk", q, k) / math.sqrt(D)
    if mask is not None:
        w = w + mask[None, None]
    w = jax.nn.softmax(w, axis=-1)
    o = jnp.einsum("bhqk,bhkd->bhqd", w, v)
    o = o.transpose(0, 2, 1, 3).reshape(B, S, H)
    attn = o @ params["wo"]

    x1 = x + attn
    h2 = _ref_rmsnorm(x1, params["w_post"][0], eps)
    gate = h2 @ params["wg"]
    gate = gate * jax.nn.sigmoid(gate)
    up = h2 @ params["wu"]
    mlp = (gate * up) @ params["wd"]
    return x1 + mlp


# ----------------------------- main -------------------------------------------


if __name__ == "__main__":
    # Small but lane-aligned config: head_dim = 128 (full lane width).
    B, S, H = 2, 16, 512
    num_heads, num_kv_heads = 4, 2
    D = H // num_heads          # 128
    I = 1024
    eps = 1e-5
    rope_theta = 10000.0

    key = jax.random.PRNGKey(0)
    ks = jax.random.split(key, 8)

    def w(k, shape):
        return jax.random.normal(k, shape, dtype=jnp.float32) * 0.02

    # weights stored (in, out) == torch Linear weight (out, in) transposed
    params = {
        "w_in": jnp.ones((1, H), dtype=jnp.float32),
        "w_post": jnp.ones((1, H), dtype=jnp.float32),
        "wq": w(ks[0], (H, num_heads * D)),
        "wk": w(ks[1], (H, num_kv_heads * D)),
        "wv": w(ks[2], (H, num_kv_heads * D)),
        "wo": w(ks[3], (H, H)),
        "wg": w(ks[4], (H, I)),
        "wu": w(ks[5], (H, I)),
        "wd": w(ks[6], (I, H)),
    }

    x = jax.random.normal(ks[7], (B, S, H), dtype=jnp.float32)

    # RoPE cos/sin cache (matches RotaryEmbedding with concat(freqs, freqs))
    inv_freq = 1.0 / (rope_theta ** (jnp.arange(0, D, 2, dtype=jnp.float32) / D))
    t = jnp.arange(S, dtype=jnp.float32)
    freqs = jnp.outer(t, inv_freq)
    emb = jnp.concatenate([freqs, freqs], axis=-1)
    cos = jnp.cos(emb)
    sin = jnp.sin(emb)

    # One-time weight fusion / cast / RoPE-table prep (not per call).
    prepared = jax.tree_util.tree_map(
        jax.block_until_ready, prepare_decoder_params(params, cos, sin, head_dim=D))

    # --- attention_mask=None path (module default): mask skipped entirely ---
    out = decoder_layer(
        x, prepared, mask=None,
        num_heads=num_heads, num_kv_heads=num_kv_heads, eps=eps)
    out = jax.block_until_ready(out)
    ref = jax.block_until_ready(decoder_layer_ref(
        x, params, None, cos, sin,
        num_heads=num_heads, num_kv_heads=num_kv_heads, eps=eps))
    assert out.shape == (B, S, H)
    diff = jnp.max(jnp.abs(out - ref))
    # bf16 matmul operands + approx reciprocal vs f32 reference -> loose tolerance
    assert jnp.allclose(out, ref, atol=2e-2, rtol=2e-2), f"max abs diff {diff}"

    # --- causal additive-mask path ---
    causal = jnp.where(jnp.tril(jnp.ones((S, S), dtype=bool)), 0.0, -1e9).astype(jnp.float32)
    out_m = decoder_layer(
        x, prepared, mask=causal,
        num_heads=num_heads, num_kv_heads=num_kv_heads, eps=eps)
    out_m = jax.block_until_ready(out_m)
    ref_m = jax.block_until_ready(decoder_layer_ref(
        x, params, causal, cos, sin,
        num_heads=num_heads, num_kv_heads=num_kv_heads, eps=eps))
    diff_m = jnp.max(jnp.abs(out_m - ref_m))
    assert jnp.allclose(out_m, ref_m, atol=2e-2, rtol=2e-2), f"max abs diff {diff_m}"

    print("KERNEL_OK")
</pallas_src>

<mosaic_0001>
module attributes {stable_mosaic.version = 11 : i64} {
  func.func @_decoder_layer_kernel(%arg0: i32, %arg1: memref<32x512xf32, #tpu.memory_space<vmem>>, %arg2: memref<16x128xf32, #tpu.memory_space<vmem>>, %arg3: memref<16x128xf32, #tpu.memory_space<vmem>>, %arg4: memref<16x128xf32, #tpu.memory_space<vmem>>, %arg5: memref<16x128xf32, #tpu.memory_space<vmem>>, %arg6: memref<1x512xf32, #tpu.memory_space<vmem>>, %arg7: memref<512x1024xbf16, #tpu.memory_space<vmem>>, %arg8: memref<512x512xbf16, #tpu.memory_space<vmem>>, %arg9: memref<1x512xf32, #tpu.memory_space<vmem>>, %arg10: memref<512x2048xbf16, #tpu.memory_space<vmem>>, %arg11: memref<1024x512xbf16, #tpu.memory_space<vmem>>, %arg12: memref<32x512xf32, #tpu.memory_space<vmem>>, %arg13: memref<32x512xbf16, #tpu.memory_space<vmem>>) attributes {dimension_semantics = [#tpu.dimension_semantics<arbitrary>], iteration_bounds = array<i64: 1>, scalar_prefetch = 0 : i64, scratch_operands = 1 : i64, tpu.core_type = #tpu.core_type<tc>, window_params = [{pipeline_mode = #tpu.pipeline_mode<synchronous>, transform_indices = @transform_0, window_bounds = array<i64: 32, 512>}, {pipeline_mode = #tpu.pipeline_mode<synchronous>, transform_indices = @transform_1, window_bounds = array<i64: 16, 128>}, {pipeline_mode = #tpu.pipeline_mode<synchronous>, transform_indices = @transform_2, window_bounds = array<i64: 16, 128>}, {pipeline_mode = #tpu.pipeline_mode<synchronous>, transform_indices = @transform_3, window_bounds = array<i64: 16, 128>}, {pipeline_mode = #tpu.pipeline_mode<synchronous>, transform_indices = @transform_4, window_bounds = array<i64: 16, 128>}, {pipeline_mode = #tpu.pipeline_mode<synchronous>, transform_indices = @transform_5, window_bounds = array<i64: 1, 512>}, {pipeline_mode = #tpu.pipeline_mode<synchronous>, transform_indices = @transform_6, window_bounds = array<i64: 512, 1024>}, {pipeline_mode = #tpu.pipeline_mode<synchronous>, transform_indices = @transform_7, window_bounds = array<i64: 512, 512>}, {pipeline_mode = #tpu.pipeline_mode<synchronous>, transform_indices = @transform_8, window_bounds = array<i64: 1, 512>}, {pipeline_mode = #tpu.pipeline_mode<synchronous>, transform_indices = @transform_9, window_bounds = array<i64: 512, 2048>}, {pipeline_mode = #tpu.pipeline_mode<synchronous>, transform_indices = @transform_10, window_bounds = array<i64: 1024, 512>}, {pipeline_mode = #tpu.pipeline_mode<synchronous>, transform_indices = @transform_11, window_bounds = array<i64: 32, 512>}]} {
    %c0 = arith.constant 0 : index
    %c0_0 = arith.constant 0 : index
    %0 = vector.load %arg1[%c0, %c0_0] : memref<32x512xf32, #tpu.memory_space<vmem>>, vector<32x512xf32>
    %c0_1 = arith.constant 0 : index
    %c0_2 = arith.constant 0 : index
    %1 = vector.load %arg6[%c0_1, %c0_2] : memref<1x512xf32, #tpu.memory_space<vmem>>, vector<1x512xf32>
    %2 = arith.mulf %0, %0 : vector<32x512xf32>
    %cst = arith.constant dense<0.000000e+00> : vector<32xf32>
    %3 = vector.multi_reduction <add>, %2, %cst [1] : vector<32x512xf32> to vector<32xf32>
    %4 = vector.shape_cast %3 : vector<32xf32> to vector<32x1xf32>
    %cst_3 = arith.constant 5.120000e+02 : f32
    %5 = vector.broadcast %cst_3 : f32 to vector<32x1xf32>
    %6 = arith.divf %4, %5 : vector<32x1xf32>
    %cst_4 = arith.constant 9.99999974E-6 : f32
    %7 = vector.broadcast %cst_4 : f32 to vector<32x1xf32>
    %8 = arith.addf %6, %7 : vector<32x1xf32>
    %9 = math.rsqrt %8 : vector<32x1xf32>
    %10 = vector.broadcast %9 : vector<32x1xf32> to vector<32x512xf32>
    %11 = arith.mulf %0, %10 : vector<32x512xf32>
    %12 = vector.broadcast %1 : vector<1x512xf32> to vector<32x512xf32>
    %13 = arith.mulf %12, %11 : vector<32x512xf32>
    %14 = arith.truncf %13 : vector<32x512xf32> to vector<32x512xbf16>
    %c0_5 = arith.constant 0 : index
    %c0_6 = arith.constant 0 : index
    %15 = vector.load %arg7[%c0_5, %c0_6] : memref<512x1024xbf16, #tpu.memory_space<vmem>>, vector<512x1024xbf16>
    %cst_7 = arith.constant dense<0.000000e+00> : vector<32x1024xf32>
    %16 = tpu.matmul %14, %15, %cst_7 {dimension_numbers = #tpu.dot_dimension_numbers<[1], [0], [0], [1], [0, 0, 1, 1], [], []>} : vector<32x512xbf16>, vector<512x1024xbf16>, vector<32x1024xf32> -> vector<32x1024xf32>
    %17 = vector.extract_strided_slice %16 {offsets = [0, 0], sizes = [32, 512], strides = [1, 1]} : vector<32x1024xf32> to vector<32x512xf32>
    %18 = vector.extract_strided_slice %16 {offsets = [0, 512], sizes = [32, 256], strides = [1, 1]} : vector<32x1024xf32> to vector<32x256xf32>
    %19 = vector.extract_strided_slice %16 {offsets = [0, 768], sizes = [32, 256], strides = [1, 1]} : vector<32x1024xf32> to vector<32x256xf32>
    %c0_8 = arith.constant 0 : index
    %c0_9 = arith.constant 0 : index
    %20 = vector.load %arg2[%c0_8, %c0_9] : memref<16x128xf32, #tpu.memory_space<vmem>>, vector<16x128xf32>
    %c0_10 = arith.constant 0 : index
    %c0_11 = arith.constant 0 : index
    %21 = vector.load %arg3[%c0_10, %c0_11] : memref<16x128xf32, #tpu.memory_space<vmem>>, vector<16x128xf32>
    %c0_12 = arith.constant 0 : index
    %c0_13 = arith.constant 0 : index
    %22 = vector.load %arg4[%c0_12, %c0_13] : memref<16x128xf32, #tpu.memory_space<vmem>>, vector<16x128xf32>
    %c0_14 = arith.constant 0 : index
    %c0_15 = arith.constant 0 : index
    %23 = vector.load %arg5[%c0_14, %c0_15] : memref<16x128xf32, #tpu.memory_space<vmem>>, vector<16x128xf32>
    %24 = vector.extract_strided_slice %18 {offsets = [0, 0], sizes = [16, 128], strides = [1, 1]} : vector<32x256xf32> to vector<16x128xf32>
    %25 = arith.mulf %24, %22 : vector<16x128xf32>
    %c64_i32 = arith.constant 64 : i32
    %26 = tpu.dynamic_rotate %24 by %c64_i32 dim 1 : vector<16x128xf32>, i32 -> vector<16x128xf32>
    %27 = arith.mulf %26, %23 : vector<16x128xf32>
    %28 = arith.addf %25, %27 : vector<16x128xf32>
    %29 = arith.truncf %28 : vector<16x128xf32> to vector<16x128xbf16>
    %30 = vector.extract_strided_slice %19 {offsets = [0, 0], sizes = [16, 128], strides = [1, 1]} : vector<32x256xf32> to vector<16x128xf32>
    %31 = arith.truncf %30 : vector<16x128xf32> to vector<16x128xbf16>
    %32 = vector.extract_strided_slice %17 {offsets = [0, 0], sizes = [16, 128], strides = [1, 1]} : vector<32x512xf32> to vector<16x128xf32>
    %33 = arith.mulf %32, %20 : vector<16x128xf32>
    %c64_i32_16 = arith.constant 64 : i32
    %34 = tpu.dynamic_rotate %32 by %c64_i32_16 dim 1 : vector<16x128xf32>, i32 -> vector<16x128xf32>
    %35 = arith.mulf %34, %21 : vector<16x128xf32>
    %36 = arith.addf %33, %35 : vector<16x128xf32>
    %37 = vector.extract_strided_slice %17 {offsets = [0, 128], sizes = [16, 128], strides = [1, 1]} : vector<32x512xf32> to vector<16x128xf32>
    %38 = arith.mulf %37, %20 : vector<16x128xf32>
    %c64_i32_17 = arith.constant 64 : i32
    %39 = tpu.dynamic_rotate %37 by %c64_i32_17 dim 1 : vector<16x128xf32>, i32 -> vector<16x128xf32>
    %40 = arith.mulf %39, %21 : vector<16x128xf32>
    %41 = arith.addf %38, %40 : vector<16x128xf32>
    %42 = tpu.concatenate %36, %41 in 0 : vector<16x128xf32>, vector<16x128xf32> -> vector<32x128xf32>
    %43 = arith.truncf %42 : vector<32x128xf32> to vector<32x128xbf16>
    %cst_18 = arith.constant dense<0.000000e+00> : vector<32x16xf32>
    %44 = tpu.matmul %43, %29, %cst_18 {dimension_numbers = #tpu.dot_dimension_numbers<[1], [1], [0], [0], [0, 0, 1, 0], [], []>} : vector<32x128xbf16>, vector<16x128xbf16>, vector<32x16xf32> -> vector<32x16xf32>
    %cst_19 = arith.constant dense<0xFF800000> : vector<32xf32>
    %45 = vector.multi_reduction <maximumf>, %44, %cst_19 [1] : vector<32x16xf32> to vector<32xf32>
    %46 = vector.shape_cast %45 : vector<32xf32> to vector<32x1xf32>
    %47 = vector.broadcast %46 : vector<32x1xf32> to vector<32x16xf32>
    %48 = arith.subf %44, %47 : vector<32x16xf32>
    %49 = math.exp %48 : vector<32x16xf32>
    %cst_20 = arith.constant dense<0.000000e+00> : vector<32xf32>
    %50 = vector.multi_reduction <add>, %49, %cst_20 [1] : vector<32x16xf32> to vector<32xf32>
    %51 = vector.shape_cast %50 : vector<32xf32> to vector<32x1xf32>
    %52 = arith.truncf %49 : vector<32x16xf32> to vector<32x16xbf16>
    %cst_21 = arith.constant dense<0.000000e+00> : vector<32x128xf32>
    %53 = tpu.matmul %52, %31, %cst_21 {dimension_numbers = #tpu.dot_dimension_numbers<[1], [0], [0], [1], [0, 0, 1, 1], [], []>} : vector<32x16xbf16>, vector<16x128xbf16>, vector<32x128xf32> -> vector<32x128xf32>
    %54 = tpu.reciprocal %51 {approx = true} : vector<32x1xf32> -> vector<32x1xf32>
    %55 = vector.broadcast %54 : vector<32x1xf32> to vector<32x128xf32>
    %56 = arith.mulf %53, %55 : vector<32x128xf32>
    %57 = vector.extract_strided_slice %56 {offsets = [0, 0], sizes = [16, 128], strides = [1, 1]} : vector<32x128xf32> to vector<16x128xf32>
    %58 = arith.truncf %57 : vector<16x128xf32> to vector<16x128xbf16>
    %c0_22 = arith.constant 0 : index
    %c0_23 = arith.constant 0 : index
    %59 = vector.load %arg13[%c0_22, %c0_23] : memref<32x512xbf16, #tpu.memory_space<vmem>>, vector<16x128xbf16>
    tpu.vector_store %arg13[%c0_22, %c0_23], %58 {strides = array<i32>} : memref<32x512xbf16, #tpu.memory_space<vmem>>, vector<16x128xbf16>,
    %60 = vector.extract_strided_slice %56 {offsets = [16, 0], sizes = [16, 128], strides = [1, 1]} : vector<32x128xf32> to vector<16x128xf32>
    %61 = arith.truncf %60 : vector<16x128xf32> to vector<16x128xbf16>
    %c0_24 = arith.constant 0 : index
    %c128 = arith.constant 128 : index
    %62 = vector.load %arg13[%c0_24, %c128] : memref<32x512xbf16, #tpu.memory_space<vmem>>, vector<16x128xbf16>
    tpu.vector_store %arg13[%c0_24, %c128], %61 {strides = array<i32>} : memref<32x512xbf16, #tpu.memory_space<vmem>>, vector<16x128xbf16>,
    %63 = vector.extract_strided_slice %18 {offsets = [0, 128], sizes = [16, 128], strides = [1, 1]} : vector<32x256xf32> to vector<16x128xf32>
    %64 = arith.mulf %63, %22 : vector<16x128xf32>
    %c64_i32_25 = arith.constant 64 : i32
    %65 = tpu.dynamic_rotate %63 by %c64_i32_25 dim 1 : vector<16x128xf32>, i32 -> vector<16x128xf32>
    %66 = arith.mulf %65, %23 : vector<16x128xf32>
    %67 = arith.addf %64, %66 : vector<16x128xf32>
    %68 = arith.truncf %67 : vector<16x128xf32> to vector<16x128xbf16>
    %69 = vector.extract_strided_slice %19 {offsets = [0, 128], sizes = [16, 128], strides = [1, 1]} : vector<32x256xf32> to vector<16x128xf32>
    %70 = arith.truncf %69 : vector<16x128xf32> to vector<16x128xbf16>
    %71 = vector.extract_strided_slice %17 {offsets = [0, 256], sizes = [16, 128], strides = [1, 1]} : vector<32x512xf32> to vector<16x128xf32>
    %72 = arith.mulf %71, %20 : vector<16x128xf32>
    %c64_i32_26 = arith.constant 64 : i32
    %73 = tpu.dynamic_rotate %71 by %c64_i32_26 dim 1 : vector<16x128xf32>, i32 -> vector<16x128xf32>
    %74 = arith.mulf %73, %21 : vector<16x128xf32>
    %75 = arith.addf %72, %74 : vector<16x128xf32>
    %76 = vector.extract_strided_slice %17 {offsets = [0, 384], sizes = [16, 128], strides = [1, 1]} : vector<32x512xf32> to vector<16x128xf32>
    %77 = arith.mulf %76, %20 : vector<16x128xf32>
    %c64_i32_27 = arith.constant 64 : i32
    %78 = tpu.dynamic_rotate %76 by %c64_i32_27 dim 1 : vector<16x128xf32>, i32 -> vector<16x128xf32>
    %79 = arith.mulf %78, %21 : vector<16x128xf32>
    %80 = arith.addf %77, %79 : vector<16x128xf32>
    %81 = tpu.concatenate %75, %80 in 0 : vector<16x128xf32>, vector<16x128xf32> -> vector<32x128xf32>
    %82 = arith.truncf %81 : vector<32x128xf32> to vector<32x128xbf16>
    %cst_28 = arith.constant dense<0.000000e+00> : vector<32x16xf32>
    %83 = tpu.matmul %82, %68, %cst_28 {dimension_numbers = #tpu.dot_dimension_numbers<[1], [1], [0], [0], [0, 0, 1, 0], [], []>} : vector<32x128xbf16>, vector<16x128xbf16>, vector<32x16xf32> -> vector<32x16xf32>
    %cst_29 = arith.constant dense<0xFF800000> : vector<32xf32>
    %84 = vector.multi_reduction <maximumf>, %83, %cst_29 [1] : vector<32x16xf32> to vector<32xf32>
    %85 = vector.shape_cast %84 : vector<32xf32> to vector<32x1xf32>
    %86 = vector.broadcast %85 : vector<32x1xf32> to vector<32x16xf32>
    %87 = arith.subf %83, %86 : vector<32x16xf32>
    %88 = math.exp %87 : vector<32x16xf32>
    %cst_30 = arith.constant dense<0.000000e+00> : vector<32xf32>
    %89 = vector.multi_reduction <add>, %88, %cst_30 [1] : vector<32x16xf32> to vector<32xf32>
    %90 = vector.shape_cast %89 : vector<32xf32> to vector<32x1xf32>
    %91 = arith.truncf %88 : vector<32x16xf32> to vector<32x16xbf16>
    %cst_31 = arith.constant dense<0.000000e+00> : vector<32x128xf32>
    %92 = tpu.matmul %91, %70, %cst_31 {dimension_numbers = #tpu.dot_dimension_numbers<[1], [0], [0], [1], [0, 0, 1, 1], [], []>} : vector<32x16xbf16>, vector<16x128xbf16>, vector<32x128xf32> -> vector<32x128xf32>
    %93 = tpu.reciprocal %90 {approx = true} : vector<32x1xf32> -> vector<32x1xf32>
    %94 = vector.broadcast %93 : vector<32x1xf32> to vector<32x128xf32>
    %95 = arith.mulf %92, %94 : vector<32x128xf32>
    %96 = vector.extract_strided_slice %95 {offsets = [0, 0], sizes = [16, 128], strides = [1, 1]} : vector<32x128xf32> to vector<16x128xf32>
    %97 = arith.truncf %96 : vector<16x128xf32> to vector<16x128xbf16>
    %c0_32 = arith.constant 0 : index
    %c256 = arith.constant 256 : index
    %98 = vector.load %arg13[%c0_32, %c256] : memref<32x512xbf16, #tpu.memory_space<vmem>>, vector<16x128xbf16>
    tpu.vector_store %arg13[%c0_32, %c256], %97 {strides = array<i32>} : memref<32x512xbf16, #tpu.memory_space<vmem>>, vector<16x128xbf16>,
    %99 = vector.extract_strided_slice %95 {offsets = [16, 0], sizes = [16, 128], strides = [1, 1]} : vector<32x128xf32> to vector<16x128xf32>
    %100 = arith.truncf %99 : vector<16x128xf32> to vector<16x128xbf16>
    %c0_33 = arith.constant 0 : index
    %c384 = arith.constant 384 : index
    %101 = vector.load %arg13[%c0_33, %c384] : memref<32x512xbf16, #tpu.memory_space<vmem>>, vector<16x128xbf16>
    tpu.vector_store %arg13[%c0_33, %c384], %100 {strides = array<i32>} : memref<32x512xbf16, #tpu.memory_space<vmem>>, vector<16x128xbf16>,
    %102 = vector.extract_strided_slice %18 {offsets = [16, 0], sizes = [16, 128], strides = [1, 1]} : vector<32x256xf32> to vector<16x128xf32>
    %103 = arith.mulf %102, %22 : vector<16x128xf32>
    %c64_i32_34 = arith.constant 64 : i32
    %104 = tpu.dynamic_rotate %102 by %c64_i32_34 dim 1 : vector<16x128xf32>, i32 -> vector<16x128xf32>
    %105 = arith.mulf %104, %23 : vector<16x128xf32>
    %106 = arith.addf %103, %105 : vector<16x128xf32>
    %107 = arith.truncf %106 : vector<16x128xf32> to vector<16x128xbf16>
    %108 = vector.extract_strided_slice %19 {offsets = [16, 0], sizes = [16, 128], strides = [1, 1]} : vector<32x256xf32> to vector<16x128xf32>
    %109 = arith.truncf %108 : vector<16x128xf32> to vector<16x128xbf16>
    %110 = vector.extract_strided_slice %17 {offsets = [16, 0], sizes = [16, 128], strides = [1, 1]} : vector<32x512xf32> to vector<16x128xf32>
    %111 = arith.mulf %110, %20 : vector<16x128xf32>
    %c64_i32_35 = arith.constant 64 : i32
    %112 = tpu.dynamic_rotate %110 by %c64_i32_35 dim 1 : vector<16x128xf32>, i32 -> vector<16x128xf32>
    %113 = arith.mulf %112, %21 : vector<16x128xf32>
    %114 = arith.addf %111, %113 : vector<16x128xf32>
    %115 = vector.extract_strided_slice %17 {offsets = [16, 128], sizes = [16, 128], strides = [1, 1]} : vector<32x512xf32> to vector<16x128xf32>
    %116 = arith.mulf %115, %20 : vector<16x128xf32>
    %c64_i32_36 = arith.constant 64 : i32
    %117 = tpu.dynamic_rotate %115 by %c64_i32_36 dim 1 : vector<16x128xf32>, i32 -> vector<16x128xf32>
    %118 = arith.mulf %117, %21 : vector<16x128xf32>
    %119 = arith.addf %116, %118 : vector<16x128xf32>
    %120 = tpu.concatenate %114, %119 in 0 : vector<16x128xf32>, vector<16x128xf32> -> vector<32x128xf32>
    %121 = arith.truncf %120 : vector<32x128xf32> to vector<32x128xbf16>
    %cst_37 = arith.constant dense<0.000000e+00> : vector<32x16xf32>
    %122 = tpu.matmul %121, %107, %cst_37 {dimension_numbers = #tpu.dot_dimension_numbers<[1], [1], [0], [0], [0, 0, 1, 0], [], []>} : vector<32x128xbf16>, vector<16x128xbf16>, vector<32x16xf32> -> vector<32x16xf32>
    %cst_38 = arith.constant dense<0xFF800000> : vector<32xf32>
    %123 = vector.multi_reduction <maximumf>, %122, %cst_38 [1] : vector<32x16xf32> to vector<32xf32>
    %124 = vector.shape_cast %123 : vector<32xf32> to vector<32x1xf32>
    %125 = vector.broadcast %124 : vector<32x1xf32> to vector<32x16xf32>
    %126 = arith.subf %122, %125 : vector<32x16xf32>
    %127 = math.exp %126 : vector<32x16xf32>
    %cst_39 = arith.constant dense<0.000000e+00> : vector<32xf32>
    %128 = vector.multi_reduction <add>, %127, %cst_39 [1] : vector<32x16xf32> to vector<32xf32>
    %129 = vector.shape_cast %128 : vector<32xf32> to vector<32x1xf32>
    %130 = arith.truncf %127 : vector<32x16xf32> to vector<32x16xbf16>
    %cst_40 = arith.constant dense<0.000000e+00> : vector<32x128xf32>
    %131 = tpu.matmul %130, %109, %cst_40 {dimension_numbers = #tpu.dot_dimension_numbers<[1], [0], [0], [1], [0, 0, 1, 1], [], []>} : vector<32x16xbf16>, vector<16x128xbf16>, vector<32x128xf32> -> vector<32x128xf32>
    %132 = tpu.reciprocal %129 {approx = true} : vector<32x1xf32> -> vector<32x1xf32>
    %133 = vector.broadcast %132 : vector<32x1xf32> to vector<32x128xf32>
    %134 = arith.mulf %131, %133 : vector<32x128xf32>
    %135 = vector.extract_strided_slice %134 {offsets = [0, 0], sizes = [16, 128], strides = [1, 1]} : vector<32x128xf32> to vector<16x128xf32>
    %136 = arith.truncf %135 : vector<16x128xf32> to vector<16x128xbf16>
    %c16 = arith.constant 16 : index
    %c0_41 = arith.constant 0 : index
    %137 = vector.load %arg13[%c16, %c0_41] : memref<32x512xbf16, #tpu.memory_space<vmem>>, vector<16x128xbf16>
    tpu.vector_store %arg13[%c16, %c0_41], %136 {strides = array<i32>} : memref<32x512xbf16, #tpu.memory_space<vmem>>, vector<16x128xbf16>,
    %138 = vector.extract_strided_slice %134 {offsets = [16, 0], sizes = [16, 128], strides = [1, 1]} : vector<32x128xf32> to vector<16x128xf32>
    %139 = arith.truncf %138 : vector<16x128xf32> to vector<16x128xbf16>
    %c16_42 = arith.constant 16 : index
    %c128_43 = arith.constant 128 : index
    %140 = vector.load %arg13[%c16_42, %c128_43] : memref<32x512xbf16, #tpu.memory_space<vmem>>, vector<16x128xbf16>
    tpu.vector_store %arg13[%c16_42, %c128_43], %139 {strides = array<i32>} : memref<32x512xbf16, #tpu.memory_space<vmem>>, vector<16x128xbf16>,
    %141 = vector.extract_strided_slice %18 {offsets = [16, 128], sizes = [16, 128], strides = [1, 1]} : vector<32x256xf32> to vector<16x128xf32>
    %142 = arith.mulf %141, %22 : vector<16x128xf32>
    %c64_i32_44 = arith.constant 64 : i32
    %143 = tpu.dynamic_rotate %141 by %c64_i32_44 dim 1 : vector<16x128xf32>, i32 -> vector<16x128xf32>
    %144 = arith.mulf %143, %23 : vector<16x128xf32>
    %145 = arith.addf %142, %144 : vector<16x128xf32>
    %146 = arith.truncf %145 : vector<16x128xf32> to vector<16x128xbf16>
    %147 = vector.extract_strided_slice %19 {offsets = [16, 128], sizes = [16, 128], strides = [1, 1]} : vector<32x256xf32> to vector<16x128xf32>
    %148 = arith.truncf %147 : vector<16x128xf32> to vector<16x128xbf16>
    %149 = vector.extract_strided_slice %17 {offsets = [16, 256], sizes = [16, 128], strides = [1, 1]} : vector<32x512xf32> to vector<16x128xf32>
    %150 = arith.mulf %149, %20 : vector<16x128xf32>
    %c64_i32_45 = arith.constant 64 : i32
    %151 = tpu.dynamic_rotate %149 by %c64_i32_45 dim 1 : vector<16x128xf32>, i32 -> vector<16x128xf32>
    %152 = arith.mulf %151, %21 : vector<16x128xf32>
    %153 = arith.addf %150, %152 : vector<16x128xf32>
    %154 = vector.extract_strided_slice %17 {offsets = [16, 384], sizes = [16, 128], strides = [1, 1]} : vector<32x512xf32> to vector<16x128xf32>
    %155 = arith.mulf %154, %20 : vector<16x128xf32>
    %c64_i32_46 = arith.constant 64 : i32
    %156 = tpu.dynamic_rotate %154 by %c64_i32_46 dim 1 : vector<16x128xf32>, i32 -> vector<16x128xf32>
    %157 = arith.mulf %156, %21 : vector<16x128xf32>
    %158 = arith.addf %155, %157 : vector<16x128xf32>
    %159 = tpu.concatenate %153, %158 in 0 : vector<16x128xf32>, vector<16x128xf32> -> vector<32x128xf32>
    %160 = arith.truncf %159 : vector<32x128xf32> to vector<32x128xbf16>
    %cst_47 = arith.constant dense<0.000000e+00> : vector<32x16xf32>
    %161 = tpu.matmul %160, %146, %cst_47 {dimension_numbers = #tpu.dot_dimension_numbers<[1], [1], [0], [0], [0, 0, 1, 0], [], []>} : vector<32x128xbf16>, vector<16x128xbf16>, vector<32x16xf32> -> vector<32x16xf32>
    %cst_48 = arith.constant dense<0xFF800000> : vector<32xf32>
    %162 = vector.multi_reduction <maximumf>, %161, %cst_48 [1] : vector<32x16xf32> to vector<32xf32>
    %163 = vector.shape_cast %162 : vector<32xf32> to vector<32x1xf32>
    %164 = vector.broadcast %163 : vector<32x1xf32> to vector<32x16xf32>
    %165 = arith.subf %161, %164 : vector<32x16xf32>
    %166 = math.exp %165 : vector<32x16xf32>
    %cst_49 = arith.constant dense<0.000000e+00> : vector<32xf32>
    %167 = vector.multi_reduction <add>, %166, %cst_49 [1] : vector<32x16xf32> to vector<32xf32>
    %168 = vector.shape_cast %167 : vector<32xf32> to vector<32x1xf32>
    %169 = arith.truncf %166 : vector<32x16xf32> to vector<32x16xbf16>
    %cst_50 = arith.constant dense<0.000000e+00> : vector<32x128xf32>
    %170 = tpu.matmul %169, %148, %cst_50 {dimension_numbers = #tpu.dot_dimension_numbers<[1], [0], [0], [1], [0, 0, 1, 1], [], []>} : vector<32x16xbf16>, vector<16x128xbf16>, vector<32x128xf32> -> vector<32x128xf32>
    %171 = tpu.reciprocal %168 {approx = true} : vector<32x1xf32> -> vector<32x1xf32>
    %172 = vector.broadcast %171 : vector<32x1xf32> to vector<32x128xf32>
    %173 = arith.mulf %170, %172 : vector<32x128xf32>
    %174 = vector.extract_strided_slice %173 {offsets = [0, 0], sizes = [16, 128], strides = [1, 1]} : vector<32x128xf32> to vector<16x128xf32>
    %175 = arith.truncf %174 : vector<16x128xf32> to vector<16x128xbf16>
    %c16_51 = arith.constant 16 : index
    %c256_52 = arith.constant 256 : index
    %176 = vector.load %arg13[%c16_51, %c256_52] : memref<32x512xbf16, #tpu.memory_space<vmem>>, vector<16x128xbf16>
    tpu.vector_store %arg13[%c16_51, %c256_52], %175 {strides = array<i32>} : memref<32x512xbf16, #tpu.memory_space<vmem>>, vector<16x128xbf16>,
    %177 = vector.extract_strided_slice %173 {offsets = [16, 0], sizes = [16, 128], strides = [1, 1]} : vector<32x128xf32> to vector<16x128xf32>
    %178 = arith.truncf %177 : vector<16x128xf32> to vector<16x128xbf16>
    %c16_53 = arith.constant 16 : index
    %c384_54 = arith.constant 384 : index
    %179 = vector.load %arg13[%c16_53, %c384_54] : memref<32x512xbf16, #tpu.memory_space<vmem>>, vector<16x128xbf16>
    tpu.vector_store %arg13[%c16_53, %c384_54], %178 {strides = array<i32>} : memref<32x512xbf16, #tpu.memory_space<vmem>>, vector<16x128xbf16>,
    %c0_55 = arith.constant 0 : index
    %c0_56 = arith.constant 0 : index
    %180 = vector.load %arg13[%c0_55, %c0_56] : memref<32x512xbf16, #tpu.memory_space<vmem>>, vector<32x512xbf16>
    %c0_57 = arith.constant 0 : index
    %c0_58 = arith.constant 0 : index
    %181 = vector.load %arg8[%c0_57, %c0_58] : memref<512x512xbf16, #tpu.memory_space<vmem>>, vector<512x512xbf16>
    %cst_59 = arith.constant dense<0.000000e+00> : vector<32x512xf32>
    %182 = tpu.matmul %180, %181, %cst_59 {dimension_numbers = #tpu.dot_dimension_numbers<[1], [0], [0], [1], [0, 0, 1, 1], [], []>} : vector<32x512xbf16>, vector<512x512xbf16>, vector<32x512xf32> -> vector<32x512xf32>
    %183 = arith.addf %0, %182 : vector<32x512xf32>
    %c0_60 = arith.constant 0 : index
    %c0_61 = arith.constant 0 : index
    %184 = vector.load %arg9[%c0_60, %c0_61] : memref<1x512xf32, #tpu.memory_space<vmem>>, vector<1x512xf32>
    %185 = arith.mulf %183, %183 : vector<32x512xf32>
    %cst_62 = arith.constant dense<0.000000e+00> : vector<32xf32>
    %186 = vector.multi_reduction <add>, %185, %cst_62 [1] : vector<32x512xf32> to vector<32xf32>
    %187 = vector.shape_cast %186 : vector<32xf32> to vector<32x1xf32>
    %cst_63 = arith.constant 5.120000e+02 : f32
    %188 = vector.broadcast %cst_63 : f32 to vector<32x1xf32>
    %189 = arith.divf %187, %188 : vector<32x1xf32>
    %cst_64 = arith.constant 9.99999974E-6 : f32
    %190 = vector.broadcast %cst_64 : f32 to vector<32x1xf32>
    %191 = arith.addf %189, %190 : vector<32x1xf32>
    %192 = math.rsqrt %191 : vector<32x1xf32>
    %193 = vector.broadcast %192 : vector<32x1xf32> to vector<32x512xf32>
    %194 = arith.mulf %183, %193 : vector<32x512xf32>
    %195 = vector.broadcast %184 : vector<1x512xf32> to vector<32x512xf32>
    %196 = arith.mulf %195, %194 : vector<32x512xf32>
    %197 = arith.truncf %196 : vector<32x512xf32> to vector<32x512xbf16>
    %c0_65 = arith.constant 0 : index
    %c0_66 = arith.constant 0 : index
    %198 = vector.load %arg10[%c0_65, %c0_66] : memref<512x2048xbf16, #tpu.memory_space<vmem>>, vector<512x2048xbf16>
    %cst_67 = arith.constant dense<0.000000e+00> : vector<32x2048xf32>
    %199 = tpu.matmul %197, %198, %cst_67 {dimension_numbers = #tpu.dot_dimension_numbers<[1], [0], [0], [1], [0, 0, 1, 1], [], []>} : vector<32x512xbf16>, vector<512x2048xbf16>, vector<32x2048xf32> -> vector<32x2048xf32>
    %200 = vector.extract_strided_slice %199 {offsets = [0, 0], sizes = [32, 1024], strides = [1, 1]} : vector<32x2048xf32> to vector<32x1024xf32>
    %201 = vector.extract_strided_slice %199 {offsets = [0, 1024], sizes = [32, 1024], strides = [1, 1]} : vector<32x2048xf32> to vector<32x1024xf32>
    %202 = arith.negf %200 : vector<32x1024xf32>
    %203 = math.exp %202 : vector<32x1024xf32>
    %cst_68 = arith.constant 1.000000e+00 : f32
    %204 = vector.broadcast %cst_68 : f32 to vector<32x1024xf32>
    %205 = arith.addf %204, %203 : vector<32x1024xf32>
    %206 = arith.divf %204, %205 : vector<32x1024xf32>
    %207 = arith.mulf %200, %206 : vector<32x1024xf32>
    %208 = arith.mulf %207, %201 : vector<32x1024xf32>
    %209 = arith.truncf %208 : vector<32x1024xf32> to vector<32x1024xbf16>
    %c0_69 = arith.constant 0 : index
    %c0_70 = arith.constant 0 : index
    %210 = vector.load %arg11[%c0_69, %c0_70] : memref<1024x512xbf16, #tpu.memory_space<vmem>>, vector<1024x512xbf16>
    %cst_71 = arith.constant dense<0.000000e+00> : vector<32x512xf32>
    %211 = tpu.matmul %209, %210, %cst_71 {dimension_numbers = #tpu.dot_dimension_numbers<[1], [0], [0], [1], [0, 0, 1, 1], [], []>} : vector<32x1024xbf16>, vector<1024x512xbf16>, vector<32x512xf32> -> vector<32x512xf32>
    %212 = arith.addf %183, %211 : vector<32x512xf32>
    %c0_72 = arith.constant 0 : index
    %c0_73 = arith.constant 0 : index
    %213 = vector.load %arg12[%c0_72, %c0_73] : memref<32x512xf32, #tpu.memory_space<vmem>>, vector<32x512xf32>
    tpu.vector_store %arg12[%c0_72, %c0_73], %212 {strides = array<i32>} : memref<32x512xf32, #tpu.memory_space<vmem>>, vector<32x512xf32>,
    return
  }
  func.func @transform_0(%arg0: i32) -> (i32, i32) {
    %c0_i32 = arith.constant 0 : i32
    %c0_i32_0 = arith.constant 0 : i32
    %c0_i32_1 = arith.constant 0 : i32
    return %c0_i32, %c0_i32_0 : i32, i32
  }
  func.func @transform_1(%arg0: i32) -> (i32, i32) {
    %c0_i32 = arith.constant 0 : i32
    %c0_i32_0 = arith.constant 0 : i32
    %c0_i32_1 = arith.constant 0 : i32
    return %c0_i32, %c0_i32_0 : i32, i32
  }
  func.func @transform_2(%arg0: i32) -> (i32, i32) {
    %c0_i32 = arith.constant 0 : i32
    %c0_i32_0 = arith.constant 0 : i32
    %c0_i32_1 = arith.constant 0 : i32
    return %c0_i32, %c0_i32_0 : i32, i32
  }
  func.func @transform_3(%arg0: i32) -> (i32, i32) {
    %c0_i32 = arith.constant 0 : i32
    %c0_i32_0 = arith.constant 0 : i32
    %c0_i32_1 = arith.constant 0 : i32
    return %c0_i32, %c0_i32_0 : i32, i32
  }
  func.func @transform_4(%arg0: i32) -> (i32, i32) {
    %c0_i32 = arith.constant 0 : i32
    %c0_i32_0 = arith.constant 0 : i32
    %c0_i32_1 = arith.constant 0 : i32
    return %c0_i32, %c0_i32_0 : i32, i32
  }
  func.func @transform_5(%arg0: i32) -> (i32, i32) {
    %c0_i32 = arith.constant 0 : i32
    %c0_i32_0 = arith.constant 0 : i32
    %c0_i32_1 = arith.constant 0 : i32
    return %c0_i32, %c0_i32_0 : i32, i32
  }
  func.func @transform_6(%arg0: i32) -> (i32, i32) {
    %c0_i32 = arith.constant 0 : i32
    %c0_i32_0 = arith.constant 0 : i32
    %c0_i32_1 = arith.constant 0 : i32
    return %c0_i32, %c0_i32_0 : i32, i32
  }
  func.func @transform_7(%arg0: i32) -> (i32, i32) {
    %c0_i32 = arith.constant 0 : i32
    %c0_i32_0 = arith.constant 0 : i32
    %c0_i32_1 = arith.constant 0 : i32
    return %c0_i32, %c0_i32_0 : i32, i32
  }
  func.func @transform_8(%arg0: i32) -> (i32, i32) {
    %c0_i32 = arith.constant 0 : i32
    %c0_i32_0 = arith.constant 0 : i32
    %c0_i32_1 = arith.constant 0 : i32
    return %c0_i32, %c0_i32_0 : i32, i32
  }
  func.func @transform_9(%arg0: i32) -> (i32, i32) {
    %c0_i32 = arith.constant 0 : i32
    %c0_i32_0 = arith.constant 0 : i32
    %c0_i32_1 = arith.constant 0 : i32
    return %c0_i32, %c0_i32_0 : i32, i32
  }
  func.func @transform_10(%arg0: i32) -> (i32, i32) {
    %c0_i32 = arith.constant 0 : i32
    %c0_i32_0 = arith.constant 0 : i32
    %c0_i32_1 = arith.constant 0 : i32
    return %c0_i32, %c0_i32_0 : i32, i32
  }
  func.func @transform_11(%arg0: i32) -> (i32, i32) {
    %c0_i32 = arith.constant 0 : i32
    %c0_i32_0 = arith.constant 0 : i32
    %c0_i32_1 = arith.constant 0 : i32
    return %c0_i32, %c0_i32_0 : i32, i32
  }
}

</mosaic_0001>

<bundles_post_ra>
// kernel: tpu_custom_call.1
= control target key start
LH: loop header
LB: loop body
LE: loop exit
PB: predicated region body
PF: predicated region fallthrough
CT: control target
= control target key end

     0   :  { %16 = vsyncpa [#allocation4], 0  ;;  %s13910_s0 = inlined_call_operand.hbm [shape: f32[32,512], index: 0, kind: input, shape index: {}]   ;;  %s13911_s1 = inlined_call_operand.hbm [shape: f32[16,128], index: 1, kind: input, shape index: {}]   ;;  %s13912_s2 = inlined_call_operand.hbm [shape: f32[16,128], index: 2, kind: input, shape index: {}]   ;;  %s13913_s3 = inlined_call_operand.hbm [shape: f32[16,128], index: 3, kind: input, shape index: {}]   ;;  %s13914_s4 = inlined_call_operand.hbm [shape: f32[16,128], index: 4, kind: input, shape index: {}]   ;;  %s13915_s5 = inlined_call_operand.hbm [shape: f32[1,512], index: 5, kind: input, shape index: {}]   ;;  %s13916_s6 = inlined_call_operand.hbm [shape: bf16[512,1024], index: 6, kind: input, shape index: {}]   ;;  %s13917_s7 = inlined_call_operand.hbm [shape: bf16[512,512], index: 7, kind: input, shape index: {}]   ;;  %s13918_s8 = inlined_call_operand.hbm [shape: f32[1,512], index: 8, kind: input, shape index: {}]   ;;  %s13919_s9 = inlined_call_operand.hbm [shape: bf16[512,2048], index: 9, kind: input, shape index: {}]   ;;  %s13920_s10 = inlined_call_operand.hbm [shape: bf16[1024,512], index: 10, kind: input, shape index: {}]   ;;  %s13921_s11 = inlined_call_operand.hbm [shape: f32[32,512], index: 11, kind: output, shape index: {}]  }
   0x1   :  { %17 = vsyncpa [#allocation7], 0 }
   0x2   :  { %18 = vsyncpa [#allocation10], 0 }
   0x3   :  { %19 = vsyncpa [#allocation13], 0 }
   0x4   :  { %20 = vsyncpa [#allocation16], 0 }
   0x5   :  { %21 = vsyncpa [#allocation19], 0 }
   0x6   :  { %22 = vsyncpa [#allocation5], 0  ;;  %s12891_s17 = smov [#allocation6]   ;;  %s12613_s21 = scalar_lea.hbm %s13911_s1, 256 }
   0x7   :  { %s40_s18 = sshll.u32 %s12891_s17, 4  ;;  %p12614_p0 = scmp.ne.s32.totalorder %s13911_s1, %s12613_s21  ;;  %s41_s18 = int_to_ptr.vmem [resolvable:$true] %s40_s18 }
   0x8   :  { %p12617_p1 = scmp.lt.u32.totalorder %s12613_s21, %s13911_s1 }
   0xa   :  { %p12619_p2 = pnand %p12617_p1, %p12614_p0 }
   0xc   :  { %12622 = shalt.err (!%p12619_p2)
}
   0xd   :  { %s12623_s26 = scalar_lea.vmem %s41_s18, 256  ;;  %p12628_p4 = scmp.lt.s32.totalorder %s41_s18, %s41_s18 }
   0xe   :  { %p12624_p3 = scmp.ne.s32.totalorder %s41_s18, %s12623_s26  ;;  %p12629_p5 = scmp.lt.s32.totalorder %s12623_s26, %s12623_s26 }
  0x10   :  { %p12630_p6 = por %p12629_p5, %p12628_p4 }
  0x12   :  { %p12631_p7 = pnand %p12630_p6, %p12624_p3 }
  0x14   :  { %12634 = shalt.err (!%p12631_p7)
}
  0x15   :  { %s12892_s27 = smov 128   ;;  %s12893_s28 = smov 8  }
  0x16   :  { %46 = dma.hbm_to_vmem [thread:$0]  %s13911_s1, 256, %s41_s18, [#allocation7], %s12892_s27, %s12892_s27, %s12893_s28  }
  0x17   :  { %s12894_s12 = smov [#allocation9]   ;;  %s12895_s14 = smov [#allocation12]  }
  0x18   :  { %s64_s13 = sshll.u32 %s12894_s12, 4  ;;  %s89_s15 = sshll.u32 %s12895_s14, 4  ;;  %s65_s13 = int_to_ptr.vmem [resolvable:$true] %s64_s13  ;;  %s90_s15 = int_to_ptr.vmem [resolvable:$true] %s89_s15 }
  0x19   :  { %s12635_s19 = scalar_lea.hbm %s13913_s3, 256 }
  0x1a   :  { %p12636_p8 = scmp.ne.s32.totalorder %s13913_s3, %s12635_s19  ;;  %p12639_p9 = scmp.lt.u32.totalorder %s12635_s19, %s13913_s3 }
  0x1c   :  { %p12641_p10 = pnand %p12639_p9, %p12636_p8 }
  0x1e   :  { %12644 = shalt.err (!%p12641_p10)
}
  0x1f   :  { %s12645_s1 = scalar_lea.vmem %s65_s13, 256  ;;  %p12650_p12 = scmp.lt.s32.totalorder %s65_s13, %s65_s13 }
  0x20   :  { %p12646_p11 = scmp.ne.s32.totalorder %s65_s13, %s12645_s1  ;;  %p12651_p13 = scmp.lt.s32.totalorder %s12645_s1, %s12645_s1 }
  0x22   :  { %p12652_p0 = por %p12651_p13, %p12650_p12 }
  0x24   :  { %p12653_p1 = pnand %p12652_p0, %p12646_p11 }
  0x26   :  { %12656 = shalt.err (!%p12653_p1)
}
  0x27   :  { %70 = dma.hbm_to_vmem [thread:$0]  %s13913_s3, 256, %s65_s13, [#allocation10], %s12892_s27, %s12892_s27, %s12893_s28  }
  0x28   :  { %s12657_s29 = scalar_lea.hbm %s13915_s5, 64 }
  0x29   :  { %p12658_p2 = scmp.ne.s32.totalorder %s13915_s5, %s12657_s29  ;;  %p12661_p3 = scmp.lt.u32.totalorder %s12657_s29, %s13915_s5 }
  0x2b   :  { %p12663_p4 = pnand %p12661_p3, %p12658_p2 }
  0x2d   :  { %12666 = shalt.err (!%p12663_p4)
}
  0x2e   :  { %s12667_s17 = scalar_lea.vmem %s90_s15, 64  ;;  %p12672_p6 = scmp.lt.s32.totalorder %s90_s15, %s90_s15 }
  0x2f   :  { %p12668_p5 = scmp.ne.s32.totalorder %s90_s15, %s12667_s17  ;;  %p12673_p7 = scmp.lt.s32.totalorder %s12667_s17, %s12667_s17 }
  0x31   :  { %p12674_p8 = por %p12673_p7, %p12672_p6 }
  0x33   :  { %p12675_p9 = pnand %p12674_p8, %p12668_p5 }
  0x35   :  { %12678 = shalt.err (!%p12675_p9)
}
  0x36   :  { %92 = dma.hbm_to_vmem [thread:$0]  %s13915_s5, 64, %s90_s15, [#allocation13]  }
  0x37   :  { %s12896_s19 = smov [#allocation15]   ;;  %s12679_s23 = scalar_lea.hbm %s13917_s7, 16384 }
  0x38   :  { %s110_s20 = sshll.u32 %s12896_s19, 4  ;;  %p12680_p10 = scmp.ne.s32.totalorder %s13917_s7, %s12679_s23  ;;  %s111_s20 = int_to_ptr.vmem [resolvable:$true] %s110_s20 }
  0x39   :  { %p12683_p11 = scmp.lt.u32.totalorder %s12679_s23, %s13917_s7 }
  0x3b   :  { %p12685_p12 = pnand %p12683_p11, %p12680_p10 }
  0x3d   :  { %12688 = shalt.err (!%p12685_p12)
}
  0x3e   :  { %s12689_s26 = scalar_lea.vmem %s111_s20, 16384  ;;  %p12694_p0 = scmp.lt.s32.totalorder %s111_s20, %s111_s20 }
  0x3f   :  { %p12690_p13 = scmp.ne.s32.totalorder %s111_s20, %s12689_s26  ;;  %p12695_p1 = scmp.lt.s32.totalorder %s12689_s26, %s12689_s26 }
  0x41   :  { %p12696_p2 = por %p12695_p1, %p12694_p0 }
  0x43   :  { %p12697_p3 = pnand %p12696_p2, %p12690_p13 }
  0x45   :  { %12700 = shalt.err (!%p12697_p3)
}
  0x46   :  { %s12897_s5 = smov 256   ;;  %s12898_s15 = smov 16  }
  0x47   :  { %116 = dma.hbm_to_vmem [thread:$0]  %s13917_s7, 16384, %s111_s20, [#allocation16], %s12897_s5, %s12897_s5, %s12898_s15  }
  0x48   :  { %s12899_s12 = smov [#allocation18]   ;;  %s12701_s3 = scalar_lea.hbm %s13919_s9, 65536 }
  0x49   :  { %s132_s14 = sshll.u32 %s12899_s12, 4  ;;  %p12702_p4 = scmp.ne.s32.totalorder %s13919_s9, %s12701_s3  ;;  %s133_s14 = int_to_ptr.vmem [resolvable:$true] %s132_s14 }
  0x4a   :  { %p12705_p5 = scmp.lt.u32.totalorder %s12701_s3, %s13919_s9 }
  0x4c   :  { %p12707_p6 = pnand %p12705_p5, %p12702_p4 }
  0x4e   :  { %12710 = shalt.err (!%p12707_p6)
}
  0x4f   :  { %s12711_s23 = scalar_lea.vmem %s133_s14, 65536  ;;  %p12716_p8 = scmp.lt.s32.totalorder %s133_s14, %s133_s14 }
  0x50   :  { %p12712_p7 = scmp.ne.s32.totalorder %s133_s14, %s12711_s23  ;;  %p12717_p9 = scmp.lt.s32.totalorder %s12711_s23, %s12711_s23 }
  0x52   :  { %p12718_p10 = por %p12717_p9, %p12716_p8 }
  0x54   :  { %p12719_p11 = pnand %p12718_p10, %p12712_p7 }
  0x56   :  { %12722 = shalt.err (!%p12719_p11)
}
  0x57   :  { %s12900_s7 = smov 1024   ;;  %s12901_s20 = smov 64  }
  0x58   :  { %138 = dma.hbm_to_vmem [thread:$0]  %s13919_s9, 65536, %s133_s14, [#allocation19], %s12900_s7, %s12900_s7, %s12901_s20  }
  0x59   :  { %s12902_s24 = smov [#allocation3]   ;;  %s12723_s30 = scalar_lea.hbm %s13910_s0, 2048 }
  0x5a   :  { %s28_s25 = sshll.u32 %s12902_s24, 4  ;;  %p12724_p12 = scmp.ne.s32.totalorder %s13910_s0, %s12723_s30  ;;  %s29_s25 = int_to_ptr.vmem [resolvable:$true] %s28_s25 }
  0x5b   :  { %p12727_p13 = scmp.lt.u32.totalorder %s12723_s30, %s13910_s0 }
  0x5d   :  { %p12729_p0 = pnand %p12727_p13, %p12724_p12 }
  0x5f   :  { %12732 = shalt.err (!%p12729_p0)
}
  0x60   :  { %s12733_s13 = scalar_lea.vmem %s29_s25, 2048  ;;  %p12738_p2 = scmp.lt.s32.totalorder %s29_s25, %s29_s25 }
  0x61   :  { %p12734_p1 = scmp.ne.s32.totalorder %s29_s25, %s12733_s13  ;;  %p12739_p3 = scmp.lt.s32.totalorder %s12733_s13, %s12733_s13 }
  0x63   :  { %p12740_p4 = por %p12739_p3, %p12738_p2 }
  0x65   :  { %p12741_p5 = pnand %p12740_p4, %p12734_p1 }
  0x67   :  { %12744 = shalt.err (!%p12741_p5)
}
  0x68   :  { %s12903_s9 = smov 512   ;;  %s12904_s14 = smov 32  }
  0x69   :  { %34 = dma.hbm_to_vmem [thread:$0]  %s13910_s0, 2048, %s29_s25, [#allocation4], %s12903_s9, %s12903_s9, %s12904_s14  }
  0x6a   :  { %s12905_s22 = smov [#allocation8]   ;;  %s12906_s7 = smov [#allocation11]  }
  0x6b   :  { %s52_s23 = sshll.u32 %s12905_s22, 4  ;;  %s76_s1 = sshll.u32 %s12906_s7, 4  ;;  %s53_s23 = int_to_ptr.vmem [resolvable:$true] %s52_s23  ;;  %s13056_s1 = int_to_ptr.vmem [resolvable:$true] %s76_s1 }
  0x6c   :  { %s12745_s26 = scalar_lea.hbm %s13912_s2, 256 }
  0x6d   :  { %p12746_p6 = scmp.ne.s32.totalorder %s13912_s2, %s12745_s26  ;;  %p12749_p7 = scmp.lt.u32.totalorder %s12745_s26, %s13912_s2 }
  0x6f   :  { %p12751_p8 = pnand %p12749_p7, %p12746_p6 }
  0x71   :  { %12754 = shalt.err (!%p12751_p8)
}
  0x72   :  { %s12755_s0 = scalar_lea.vmem %s53_s23, 256  ;;  %p12760_p10 = scmp.lt.s32.totalorder %s53_s23, %s53_s23 }
  0x73   :  { %p12756_p9 = scmp.ne.s32.totalorder %s53_s23, %s12755_s0  ;;  %p12761_p11 = scmp.lt.s32.totalorder %s12755_s0, %s12755_s0 }
  0x75   :  { %p12762_p12 = por %p12761_p11, %p12760_p10 }
  0x77   :  { %p12763_p13 = pnand %p12762_p12, %p12756_p9 }
  0x79   :  { %12766 = shalt.err (!%p12763_p13)
}
  0x7a   :  { %58 = dma.hbm_to_vmem [thread:$0]  %s13912_s2, 256, %s53_s23, [#allocation7], %s12892_s27, %s12892_s27, %s12893_s28  }
  0x7b   :  { %s12767_s19 = scalar_lea.hbm %s13914_s4, 256 }
  0x7c   :  { %p12768_p0 = scmp.ne.s32.totalorder %s13914_s4, %s12767_s19  ;;  %p12771_p1 = scmp.lt.u32.totalorder %s12767_s19, %s13914_s4 }
  0x7e   :  { %p12773_p2 = pnand %p12771_p1, %p12768_p0 }
  0x80   :  { %12776 = shalt.err (!%p12773_p2)
}
  0x81   :  { %s12777_s24 = scalar_lea.vmem %s13056_s1, 256  ;;  %p12782_p4 = scmp.lt.s32.totalorder %s13056_s1, %s13056_s1 }
  0x82   :  { %p12778_p3 = scmp.ne.s32.totalorder %s13056_s1, %s12777_s24  ;;  %p12783_p5 = scmp.lt.s32.totalorder %s12777_s24, %s12777_s24 }
  0x84   :  { %p12784_p6 = por %p12783_p5, %p12782_p4 }
  0x86   :  { %p12785_p7 = pnand %p12784_p6, %p12778_p3 }
  0x88   :  { %12788 = shalt.err (!%p12785_p7)
}
  0x89   :  { %82 = dma.hbm_to_vmem [thread:$0]  %s13914_s4, 256, %s13056_s1, [#allocation10], %s12892_s27, %s12892_s27, %s12893_s28  }
  0x8a   :  { %s12907_s26 = smov [#allocation14]   ;;  %s12908_s30 = smov [#allocation17]  }
  0x8b   :  { %s98_s29 = sshll.u32 %s12907_s26, 4  ;;  %s123_s12 = sshll.u32 %s12908_s30, 4  ;;  %s99_s29 = int_to_ptr.vmem [resolvable:$true] %s98_s29  ;;  %s124_s12 = int_to_ptr.vmem [resolvable:$true] %s123_s12 }
  0x8c   :  { %s12789_s25 = scalar_lea.hbm %s13916_s6, 32768 }
  0x8d   :  { %p12790_p8 = scmp.ne.s32.totalorder %s13916_s6, %s12789_s25  ;;  %p12793_p9 = scmp.lt.u32.totalorder %s12789_s25, %s13916_s6 }
  0x8f   :  { %p12795_p10 = pnand %p12793_p9, %p12790_p8 }
  0x91   :  { %12798 = shalt.err (!%p12795_p10)
}
  0x92   :  { %s12799_s4 = scalar_lea.vmem %s99_s29, 32768  ;;  %p12804_p12 = scmp.lt.s32.totalorder %s99_s29, %s99_s29 }
  0x93   :  { %p12800_p11 = scmp.ne.s32.totalorder %s99_s29, %s12799_s4  ;;  %p12805_p13 = scmp.lt.s32.totalorder %s12799_s4, %s12799_s4 }
  0x95   :  { %p12806_p0 = por %p12805_p13, %p12804_p12 }
  0x97   :  { %p12807_p1 = pnand %p12806_p0, %p12800_p11 }
  0x99   :  { %12810 = shalt.err (!%p12807_p1)
}
  0x9a   :  { %104 = dma.hbm_to_vmem [thread:$0]  %s13916_s6, 32768, %s99_s29, [#allocation13], %s12903_s9, %s12903_s9, %s12904_s14  }
  0x9b   :  { %s12811_s22 = scalar_lea.hbm %s13918_s8, 64 }
  0x9c   :  { %p12812_p2 = scmp.ne.s32.totalorder %s13918_s8, %s12811_s22  ;;  %p12815_p3 = scmp.lt.u32.totalorder %s12811_s22, %s13918_s8 }
  0x9e   :  { %p12817_p4 = pnand %p12815_p3, %p12812_p2 }
  0xa0   :  { %12820 = shalt.err (!%p12817_p4)
}
  0xa1   :  { %s12821_s23 = scalar_lea.vmem %s124_s12, 64  ;;  %p12826_p6 = scmp.lt.s32.totalorder %s124_s12, %s124_s12 }
  0xa2   :  { %p12822_p5 = scmp.ne.s32.totalorder %s124_s12, %s12821_s23  ;;  %p12827_p7 = scmp.lt.s32.totalorder %s12821_s23, %s12821_s23 }
  0xa4   :  { %p12828_p8 = por %p12827_p7, %p12826_p6 }
  0xa6   :  { %p12829_p9 = pnand %p12828_p8, %p12822_p5 }
  0xa8   :  { %12832 = shalt.err (!%p12829_p9)
}
  0xa9   :  { %126 = dma.hbm_to_vmem [thread:$0]  %s13918_s8, 64, %s124_s12, [#allocation16]  }
  0xaa   :  { %s12909_s29 = smov [#allocation20]   ;;  %s12833_s25 = scalar_lea.hbm %s13920_s10, 32768 }
  0xab   :  { %s144_s30 = sshll.u32 %s12909_s29, 4  ;;  %p12834_p10 = scmp.ne.s32.totalorder %s13920_s10, %s12833_s25  ;;  %s145_s30 = int_to_ptr.vmem [resolvable:$true] %s144_s30 }
  0xac   :  { %p12837_p11 = scmp.lt.u32.totalorder %s12833_s25, %s13920_s10 }
  0xae   :  { %p12839_p12 = pnand %p12837_p11, %p12834_p10 }
  0xb0   :  { %12842 = shalt.err (!%p12839_p12)
}
  0xb1   :  { %s12843_s4 = scalar_lea.vmem %s145_s30, 32768  ;;  %p12848_p0 = scmp.lt.s32.totalorder %s145_s30, %s145_s30 }
  0xb2   :  { %p12844_p13 = scmp.ne.s32.totalorder %s145_s30, %s12843_s4  ;;  %p12849_p1 = scmp.lt.s32.totalorder %s12843_s4, %s12843_s4 }
  0xb4   :  { %p12850_p2 = por %p12849_p1, %p12848_p0 }
  0xb6   :  { %p12851_p3 = pnand %p12850_p2, %p12844_p13 }
  0xb8   :  { %12854 = shalt.err (!%p12851_p3)
}
  0xb9   :  { %150 = dma.hbm_to_vmem [thread:$0]  %s13920_s10, 32768, %s145_s30, [#allocation19], %s12897_s5, %s12897_s5, %s12898_s15  }
  0xba   :  { %12877 = dma.done.wait [#allocation4], 2048  }
  0xbb   :  { %12878 = vsyncadd [#allocation4], 4294965248 }
  0xbc   :  { %12879 = dma.done.wait [#allocation7], 512  }
  0xbd   :  { %12880 = vsyncadd [#allocation7], 4294966784 }
  0xbe   :  { %12881 = dma.done.wait [#allocation10], 512  }
  0xbf   :  { %12882 = vsyncadd [#allocation10], 4294966784 }
  0xc0   :  { %12883 = dma.done.wait [#allocation13], 32832  }
  0xc1   :  { %12884 = vsyncadd [#allocation13], 4294934464 }
  0xc2   :  { %12885 = dma.done.wait [#allocation16], 16448  }
  0xc3   :  { %12886 = vsyncadd [#allocation16], 4294950848 }
  0xc4   :  { %12887 = dma.done.wait [#allocation19], 98304  }
  0xc5   :  { %12888 = vsyncadd [#allocation19], 4294868992  ;;  %v185_v0 = vld [vmem:[#allocation3] sm:$0xff]  ;;  %v186_v1 = vld [vmem:[#allocation3 + $0x8] sm:$0xff]  ;;  %vm2363_vm0 = vcmask 130048   ;;  %s12910_s10 = smov [#allocation21]  }
  0xc6   :  { %v187_v2 = vld [vmem:[#allocation3 + $0x10] sm:$0xff]  ;;  %v188_v3 = vld [vmem:[#allocation3 + $0x18] sm:$0xff]  ;;  %v202_v4 = vmul.f32 %v185_v0, %v185_v0  ;;  %v203_v5 = vmul.f32 %v186_v1, %v186_v1  ;;  %v189_v7 = vld [vmem:[#allocation3 + $0x20] sm:$0xff]  ;;  %s10336_s5 = sshll.u32 %s12910_s10, 4  ;;  %s10337_s5 = int_to_ptr.vmem [resolvable:$true] %s10336_s5 }
  0xc7   :  { %v204_v6 = vmul.f32 %v187_v2, %v187_v2  ;;  %v190_v8 = vld [vmem:[#allocation3 + $0x28] sm:$0xff]  ;;  %v191_v9 = vld [vmem:[#allocation3 + $0x30] sm:$0xff]  ;;  %v192_v10 = vld [vmem:[#allocation3 + $0x38] sm:$0xff]  ;;  %v206_v11 = vmul.f32 %v189_v7, %v189_v7  ;;  %v205_v14 = vmul.f32 %v188_v3, %v188_v3  ;;  %s12855_s15 = scalar_lea.vmem %s10337_s5, 2048  ;;  %p12860_p5 = scmp.lt.s32.totalorder %s10337_s5, %s10337_s5 }
  0xc8   :  { %v207_v12 = vmul.f32 %v190_v8, %v190_v8  ;;  %v193_v13 = vld [vmem:[#allocation3 + $0x40] sm:$0xff]  ;;  %v218_v15 = vadd.f32 %v203_v5, %v202_v4  ;;  %v208_v16 = vmul.f32 %v191_v9, %v191_v9  ;;  %v194_v17 = vld [vmem:[#allocation3 + $0x48] sm:$0xff]  ;;  %v195_v18 = vld [vmem:[#allocation3 + $0x50] sm:$0xff]  ;;  %v209_v21 = vmul.f32 %v192_v10, %v192_v10  ;;  %p12856_p4 = scmp.ne.s32.totalorder %s10337_s5, %s12855_s15  ;;  %p12861_p6 = scmp.lt.s32.totalorder %s12855_s15, %s12855_s15 }
  0xc9   :  { %v196_v19 = vld [vmem:[#allocation3 + $0x58] sm:$0xff]  ;;  %v210_v20 = vmul.f32 %v193_v13, %v193_v13  ;;  %v211_v23 = vmul.f32 %v194_v17, %v194_v17  ;;  %v212_v24 = vmul.f32 %v195_v18, %v195_v18  ;;  %v197_v25 = vld [vmem:[#allocation3 + $0x60] sm:$0xff]  ;;  %v198_v26 = vld [vmem:[#allocation3 + $0x68] sm:$0xff] }
  0xca   :  { %v223_v22 = vadd.f32 %v207_v12, %v206_v11  ;;  %v199_v27 = vld [vmem:[#allocation3 + $0x70] sm:$0xff]  ;;  %v219_v28 = vadd.f32 %v218_v15, %v204_v6  ;;  %v200_v29 = vld [vmem:[#allocation3 + $0x78] sm:$0xff]  ;;  %v214_v30 = vmul.f32 %v197_v25, %v197_v25  ;;  %v215_v31 = vmul.f32 %v198_v26, %v198_v26  ;;  %v312_v33 = vld [vmem:[#allocation14] sm:$0xff]  ;;  %p12862_p7 = por %p12861_p6, %p12860_p5 }
  0xcb   :  { %v216_v32 = vmul.f32 %v199_v27, %v199_v27  ;;  %v316_v34 = vld [vmem:[#allocation14 + $0x20] sm:$0xff]  ;;  %v213_v36 = vmul.f32 %v196_v19, %v196_v19  ;;  %v228_v37 = vadd.f32 %v211_v23, %v210_v20  ;;  %v313_v39 = vld [vmem:[#allocation14 + $0x8] sm:$0xff]  ;;  %v217_v50 = vmul.f32 %v200_v29, %v200_v29 }
  0xcc   :  { %v224_v35 = vadd.f32 %v223_v22, %v208_v16  ;;  %v10354_v38 = vcombine.high %v312_v33, %v316_v34  ;;  %v317_v40 = vld [vmem:[#allocation14 + $0x28] sm:$0xff]  ;;  %v320_v41 = vld [vmem:[#allocation14 + $0x40] sm:$0xff]  ;;  %v220_v42 = vadd.f32 %v219_v28, %v205_v14  ;;  %v233_v43 = vadd.f32 %v215_v31, %v214_v30  ;;  %p12863_p8 = pnand %p12862_p7, %p12856_p4 }
  0xcd   :  { %v10356_v44 = vcombine.high %v313_v39, %v317_v40  ;;  %v10353_v45 = vcombine.low %v312_v33, %v316_v34  ;;  %v324_v46 = vld [vmem:[#allocation14 + $0x60] sm:$0xff]  ;;  %v321_v47 = vld [vmem:[#allocation14 + $0x48] sm:$0xff]  ;;  %v229_v49 = vadd.f32 %v228_v37, %v212_v24  ;;  %v10355_v51 = vcombine.low %v313_v39, %v317_v40 }
  0xce   :  { %v325_v48 = vld [vmem:[#allocation14 + $0x68] sm:$0xff]  ;;  %1848 = vmatprep.subr.bf16.mxu0 %v10354_v38  ;;  %v10362_v52 = vcombine.high %v320_v41, %v324_v46  ;;  %v328_v53 = vld [vmem:[#allocation14 + $0x80] sm:$0xff]  ;;  %221 = vadd.xlane.f32.xlu0 %v220_v42  ;;  %v225_v56 = vadd.f32 %v224_v35, %v209_v21  ;;  %v234_v57 = vadd.f32 %v233_v43, %v216_v32 }
  0xcf   :  { %v332_v54 = vld [vmem:[#allocation14 + $0xa0] sm:$0xff]  ;;  %v329_v55 = vld [vmem:[#allocation14 + $0x88] sm:$0xff]  ;;  %1954 = vmatprep.subr.bf16.mxu1 %v10356_v44  ;;  %v10364_v58 = vcombine.high %v321_v47, %v325_v48  ;;  %v230_v60 = vadd.f32 %v229_v49, %v213_v36  ;;  %1849 = vmatpush1.bf16.msra.mxu0 %v10353_v45  ;;  %v10361_v61 = vcombine.low %v320_v41, %v324_v46 }
  0xd0   :  { %v333_v59 = vld [vmem:[#allocation14 + $0xa8] sm:$0xff]  ;;  %1955 = vmatpush1.bf16.msra.mxu1 %v10355_v51  ;;  %v10363_v62 = vcombine.low %v321_v47, %v325_v48  ;;  %1850 = vmatprep.subr.bf16.mxu0 %v10362_v52  ;;  %v10370_v63 = vcombine.high %v328_v53, %v332_v54  ;;  %v336_v1 = vld [vmem:[#allocation14 + $0xc0] sm:$0xff]  ;;  %v235_v2 = vadd.f32 %v234_v57, %v217_v50 }
  0xd1   :  { %1956 = vmatprep.subr.bf16.mxu1 %v10364_v58  ;;  %v10372_v0 = vcombine.high %v329_v55, %v333_v59  ;;  %231 = vadd.xlane.f32.xlu1 %v230_v60  ;;  %v340_v3 = vld [vmem:[#allocation14 + $0xe0] sm:$0xff]  ;;  %v337_v4 = vld [vmem:[#allocation14 + $0xc8] sm:$0xff]  ;;  %v10369_v6 = vcombine.low %v328_v53, %v332_v54  ;;  %v10371_v7 = vcombine.low %v329_v55, %v333_v59 }
  0xd2   :  { %v341_v5 = vld [vmem:[#allocation14 + $0xe8] sm:$0xff]  ;;  %226 = vadd.xlane.f32.xlu0 %v225_v56  ;;  %v10378_v8 = vcombine.high %v336_v1, %v340_v3  ;;  %v344_v10 = vld [vmem:[#allocation14 + $0x100] sm:$0xff]  ;;  %v10377_v14 = vcombine.low %v336_v1, %v340_v3 }
  0xd3   :  { %1851 = vmatpush1.bf16.msra.mxu0 %v10361_v61  ;;  %v10380_v9 = vcombine.high %v337_v4, %v341_v5  ;;  %v348_v11 = vld [vmem:[#allocation14 + $0x120] sm:$0xff]  ;;  %v345_v12 = vld [vmem:[#allocation14 + $0x108] sm:$0xff]  ;;  %v10379_v15 = vcombine.low %v337_v4, %v341_v5 }
  0xd4   :  { %1957 = vmatpush1.bf16.msra.mxu1 %v10363_v62  ;;  %1852 = vmatprep.subr.bf16.mxu0 %v10370_v63  ;;  %v349_v13 = vld [vmem:[#allocation14 + $0x128] sm:$0xff]  ;;  %v352_v16 = vld [vmem:[#allocation14 + $0x140] sm:$0xff]  ;;  %v10386_v20 = vcombine.high %v344_v10, %v348_v11  ;;  %v10385_v22 = vcombine.low %v344_v10, %v348_v11 }
  0xd5   :  { %1958 = vmatprep.subr.bf16.mxu1 %v10372_v0  ;;  %236 = vadd.xlane.f32.xlu1 %v235_v2  ;;  %v356_v17 = vld [vmem:[#allocation14 + $0x160] sm:$0xff]  ;;  %v353_v18 = vld [vmem:[#allocation14 + $0x148] sm:$0xff]  ;;  %v10388_v21 = vcombine.high %v345_v12, %v349_v13  ;;  %v10387_v23 = vcombine.low %v345_v12, %v349_v13 }
  0xd6   :  { %v357_v19 = vld [vmem:[#allocation14 + $0x168] sm:$0xff]  ;;  %v360_v24 = vld [vmem:[#allocation14 + $0x180] sm:$0xff]  ;;  %v10394_v28 = vcombine.high %v352_v16, %v356_v17  ;;  %v10393_v30 = vcombine.low %v352_v16, %v356_v17 }
  0xd7   :  { %1853 = vmatpush1.bf16.msra.mxu0 %v10369_v6  ;;  %v364_v25 = vld [vmem:[#allocation14 + $0x1a0] sm:$0xff]  ;;  %v361_v26 = vld [vmem:[#allocation14 + $0x188] sm:$0xff]  ;;  %v10396_v29 = vcombine.high %v353_v18, %v357_v19  ;;  %v10395_v31 = vcombine.low %v353_v18, %v357_v19 }
  0xd8   :  { %1959 = vmatpush1.bf16.msra.mxu1 %v10371_v7  ;;  %1854 = vmatprep.subr.bf16.mxu0 %v10378_v8  ;;  %v365_v27 = vld [vmem:[#allocation14 + $0x1a8] sm:$0xff]  ;;  %v368_v32 = vld [vmem:[#allocation14 + $0x1c0] sm:$0xff]  ;;  %v10402_v36 = vcombine.high %v360_v24, %v364_v25  ;;  %v10401_v38 = vcombine.low %v360_v24, %v364_v25 }
  0xd9   :  { %1960 = vmatprep.subr.bf16.mxu1 %v10380_v9  ;;  %v372_v33 = vld [vmem:[#allocation14 + $0x1e0] sm:$0xff]  ;;  %v369_v34 = vld [vmem:[#allocation14 + $0x1c8] sm:$0xff]  ;;  %v10404_v37 = vcombine.high %v361_v26, %v365_v27  ;;  %v10403_v39 = vcombine.low %v361_v26, %v365_v27 }
  0xda   :  { %v373_v35 = vld [vmem:[#allocation14 + $0x1e8] sm:$0xff]  ;;  %v376_v40 = vld [vmem:[#allocation14 + $0x200] sm:$0xff]  ;;  %v10410_v44 = vcombine.high %v368_v32, %v372_v33  ;;  %v10409_v46 = vcombine.low %v368_v32, %v372_v33 }
  0xdb   :  { %1855 = vmatpush1.bf16.msra.mxu0 %v10377_v14  ;;  %v380_v41 = vld [vmem:[#allocation14 + $0x220] sm:$0xff]  ;;  %v377_v42 = vld [vmem:[#allocation14 + $0x208] sm:$0xff]  ;;  %v10412_v45 = vcombine.high %v369_v34, %v373_v35  ;;  %v10411_v47 = vcombine.low %v369_v34, %v373_v35 }
  0xdc   :  { %1961 = vmatpush1.bf16.msra.mxu1 %v10379_v15  ;;  %1856 = vmatprep.subr.bf16.mxu0 %v10386_v20  ;;  %v381_v43 = vld [vmem:[#allocation14 + $0x228] sm:$0xff]  ;;  %v10418_v48 = vcombine.high %v376_v40, %v380_v41  ;;  %v384_v50 = vld [vmem:[#allocation14 + $0x240] sm:$0xff]  ;;  %v10417_v54 = vcombine.low %v376_v40, %v380_v41 }
  0xdd   :  { %1962 = vmatprep.subr.bf16.mxu1 %v10388_v21  ;;  %v10420_v49 = vcombine.high %v377_v42, %v381_v43  ;;  %v388_v51 = vld [vmem:[#allocation14 + $0x260] sm:$0xff]  ;;  %v385_v52 = vld [vmem:[#allocation14 + $0x248] sm:$0xff]  ;;  %v10419_v55 = vcombine.low %v377_v42, %v381_v43 }
  0xde   :  { %v389_v53 = vld [vmem:[#allocation14 + $0x268] sm:$0xff]  ;;  %v392_v56 = vld [vmem:[#allocation14 + $0x280] sm:$0xff]  ;;  %v10426_v60 = vcombine.high %v384_v50, %v388_v51  ;;  %v10425_v0 = vcombine.low %v384_v50, %v388_v51 }
  0xdf   :  { %1857 = vmatpush1.bf16.msra.mxu0 %v10385_v22  ;;  %v396_v57 = vld [vmem:[#allocation14 + $0x2a0] sm:$0xff]  ;;  %v393_v58 = vld [vmem:[#allocation14 + $0x288] sm:$0xff]  ;;  %v10428_v61 = vcombine.high %v385_v52, %v389_v53  ;;  %v10427_v1 = vcombine.low %v385_v52, %v389_v53 }
  0xe0   :  { %1963 = vmatpush1.bf16.msra.mxu1 %v10387_v23  ;;  %1858 = vmatprep.subr.bf16.mxu0 %v10394_v28  ;;  %v397_v59 = vld [vmem:[#allocation14 + $0x2a8] sm:$0xff]  ;;  %v400_v62 = vld [vmem:[#allocation14 + $0x2c0] sm:$0xff]  ;;  %v10434_v4 = vcombine.high %v392_v56, %v396_v57  ;;  %v10433_v9 = vcombine.low %v392_v56, %v396_v57 }
  0xe1   :  { %1964 = vmatprep.subr.bf16.mxu1 %v10396_v29  ;;  %v404_v63 = vld [vmem:[#allocation14 + $0x2e0] sm:$0xff]  ;;  %v401_v2 = vld [vmem:[#allocation14 + $0x2c8] sm:$0xff]  ;;  %v10436_v5 = vcombine.high %v393_v58, %v397_v59  ;;  %v10435_v10 = vcombine.low %v393_v58, %v397_v59 }
  0xe2   :  { %v405_v3 = vld [vmem:[#allocation14 + $0x2e8] sm:$0xff]  ;;  %v13135_v6 = vld [vmem:[#allocation14 + $0x400] sm:$0xff]  ;;  %v10442_v11 = vcombine.high %v400_v62, %v404_v63  ;;  %v10441_v20 = vcombine.low %v400_v62, %v404_v63 }
  0xe3   :  { %1859 = vmatpush1.bf16.msra.mxu0 %v10393_v30  ;;  %v13137_v7 = vld [vmem:[#allocation14 + $0x420] sm:$0xff]  ;;  %v13139_v8 = vld [vmem:[#allocation14 + $0x408] sm:$0xff]  ;;  %v10444_v16 = vcombine.high %v401_v2, %v405_v3  ;;  %v10443_v21 = vcombine.low %v401_v2, %v405_v3 }
  0xe4   :  { %1965 = vmatpush1.bf16.msra.mxu1 %v10395_v31  ;;  %1860 = vmatprep.subr.bf16.mxu0 %v10402_v36  ;;  %v408_v12 = vld [vmem:[#allocation14 + $0x300] sm:$0xff]  ;;  %v409_v14 = vld [vmem:[#allocation14 + $0x308] sm:$0xff]  ;;  %v10481_v17 = vcombine.low %v13135_v6, %v13137_v7  ;;  %v10482_v50 = vcombine.high %v13135_v6, %v13137_v7 }
  0xe5   :  { %1966 = vmatprep.subr.bf16.mxu1 %v10404_v37  ;;  %v412_v13 = vld [vmem:[#allocation14 + $0x320] sm:$0xff]  ;;  %v13141_v15 = vld [vmem:[#allocation14 + $0x428] sm:$0xff] }
  0xe6   :  { %v10483_v18 = vcombine.low %v13139_v8, %v13141_v15  ;;  %v413_v19 = vld [vmem:[#allocation14 + $0x328] sm:$0xff]  ;;  %v416_v22 = vld [vmem:[#allocation14 + $0x340] sm:$0xff]  ;;  %v10450_v25 = vcombine.high %v408_v12, %v412_v13  ;;  %v10449_v28 = vcombine.low %v408_v12, %v412_v13  ;;  %v10484_v51 = vcombine.high %v13139_v8, %v13141_v15 }
  0xe7   :  { %1861 = vmatpush1.bf16.msra.mxu0 %v10401_v38  ;;  %v420_v23 = vld [vmem:[#allocation14 + $0x360] sm:$0xff]  ;;  %v417_v24 = vld [vmem:[#allocation14 + $0x348] sm:$0xff]  ;;  %v10452_v26 = vcombine.high %v409_v14, %v413_v19  ;;  %v10451_v29 = vcombine.low %v409_v14, %v413_v19 }
  0xe8   :  { %1967 = vmatpush1.bf16.msra.mxu1 %v10403_v39  ;;  %1862 = vmatprep.subr.bf16.mxu0 %v10410_v44  ;;  %v421_v27 = vld [vmem:[#allocation14 + $0x368] sm:$0xff]  ;;  %v424_v30 = vld [vmem:[#allocation14 + $0x380] sm:$0xff]  ;;  %v10458_v33 = vcombine.high %v416_v22, %v420_v23  ;;  %v10457_v36 = vcombine.low %v416_v22, %v420_v23 }
  0xe9   :  { %1968 = vmatprep.subr.bf16.mxu1 %v10412_v45  ;;  %v428_v31 = vld [vmem:[#allocation14 + $0x3a0] sm:$0xff]  ;;  %v425_v32 = vld [vmem:[#allocation14 + $0x388] sm:$0xff]  ;;  %v10460_v34 = vcombine.high %v417_v24, %v421_v27  ;;  %v10459_v37 = vcombine.low %v417_v24, %v421_v27 }
  0xea   :  { %v429_v35 = vld [vmem:[#allocation14 + $0x3a8] sm:$0xff]  ;;  %v432_v38 = vld [vmem:[#allocation14 + $0x3c0] sm:$0xff]  ;;  %v10466_v41 = vcombine.high %v424_v30, %v428_v31  ;;  %v10465_v44 = vcombine.low %v424_v30, %v428_v31 }
  0xeb   :  { %1863 = vmatpush1.bf16.msra.mxu0 %v10409_v46  ;;  %v436_v39 = vld [vmem:[#allocation14 + $0x3e0] sm:$0xff]  ;;  %v433_v40 = vld [vmem:[#allocation14 + $0x3c8] sm:$0xff]  ;;  %v10468_v42 = vcombine.high %v425_v32, %v429_v35  ;;  %v10467_v45 = vcombine.low %v425_v32, %v429_v35 }
  0xec   :  { %1969 = vmatpush1.bf16.msra.mxu1 %v10411_v47  ;;  %1864 = vmatprep.subr.bf16.mxu0 %v10418_v48  ;;  %v437_v43 = vld [vmem:[#allocation14 + $0x3e8] sm:$0xff]  ;;  %v10474_v46 = vcombine.high %v432_v38, %v436_v39  ;;  %v10473_v48 = vcombine.low %v432_v38, %v436_v39  ;;  %v464_v6 = vld [vmem:[#allocation14 + $0x4c0] sm:$0xff] }
  0xed   :  { %1970 = vmatprep.subr.bf16.mxu1 %v10420_v49  ;;  %v10476_v47 = vcombine.high %v433_v40, %v437_v43  ;;  %v10475_v49 = vcombine.low %v433_v40, %v437_v43  ;;  %v12581_v12 = vld [vmem:[#allocation3 + $0x8] sm:$0xff]  ;;  %v12586_v31 = vld [vmem:[#allocation3 + $0x50] sm:$0xff] }
  0xee   :  { %v12589_v38 = vld [vmem:[#allocation3 + $0x30] sm:$0xff]  ;;  %v468_v7 = vld [vmem:[#allocation14 + $0x4e0] sm:$0xff] }
  0xef   :  { %1865 = vmatpush1.bf16.msra.mxu0 %v10417_v54  ;;  %v268_v54 = vlaneseq  ;;  %v449_v43 = vld [vmem:[#allocation14 + $0x448] sm:$0xff] }
  0xf0   :  { %1971 = vmatpush1.bf16.msra.mxu1 %v10419_v55  ;;  %1866 = vmatprep.subr.bf16.mxu0 %v10426_v60 }
  0xf1   :  { %1972 = vmatprep.subr.bf16.mxu1 %v10428_v61  ;;  %v13151_v61 = vshrl.u32 %v268_v54, 7  ;;  %v12591_v54 = vld [vmem:[#allocation3 + $0x68] sm:$0xff] }
  0xf3   :  { %1867 = vmatpush1.bf16.msra.mxu0 %v10425_v0  ;;  %v278_v3 = vsub.s32 2, %v13151_v61 }
  0xf4   :  { %1973 = vmatpush1.bf16.msra.mxu1 %v10427_v1  ;;  %1868 = vmatprep.subr.bf16.mxu0 %v10434_v4  ;;  %v201_v1 = vld [vmem:[#allocation12] sm:$0xf]  ;;  %v274_v4 = vsub.s32 1, %v13151_v61 }
  0xf5   :  { %1974 = vmatprep.subr.bf16.mxu1 %v10436_v5  ;;  %v270_v5 = vsub.s32 0, %v13151_v61 }
  0xf6   :  { %v275_v14 = vrot.slane %v201_v1, %v274_v4 }
  0xf7   :  { %1869 = vmatpush1.bf16.msra.mxu0 %v10433_v9  ;;  %v279_v9 = vrot.slane %v201_v1, %v278_v3  ;;  %v271_v22 = vrot.slane %v201_v1, %v270_v5 }
  0xf8   :  { %1975 = vmatpush1.bf16.msra.mxu1 %v10435_v10  ;;  %1870 = vmatprep.subr.bf16.mxu0 %v10442_v11  ;;  %v282_v11 = vsub.s32 3, %v13151_v61 }
  0xf9   :  { %1976 = vmatprep.subr.bf16.mxu1 %v10444_v16  ;;  %v12582_v16 = vld [vmem:[#allocation3 + $0x10] sm:$0xff] }
  0xfb   :  { %1871 = vmatpush1.bf16.msra.mxu0 %v10441_v20  ;;  %v12583_v20 = vld [vmem:[#allocation3] sm:$0xff] }
  0xfc   :  { %1977 = vmatpush1.bf16.msra.mxu1 %v10443_v21  ;;  %1872 = vmatprep.subr.bf16.mxu0 %v10450_v25 }
  0xfd   :  { %1978 = vmatprep.subr.bf16.mxu1 %v10452_v26  ;;  %v12584_v26 = vld [vmem:[#allocation3 + $0x48] sm:$0xff] }
  0xff   :  { %1873 = vmatpush1.bf16.msra.mxu0 %v10449_v28  ;;  %v13170_v28 = vrot.slane %v201_v1, %v282_v11 }
 0x100   :  { %1979 = vmatpush1.bf16.msra.mxu1 %v10451_v29  ;;  %1874 = vmatprep.subr.bf16.mxu0 %v10458_v33  ;;  %v12585_v29 = vld [vmem:[#allocation3 + $0x58] sm:$0xff]  ;;  %v12587_v33 = vld [vmem:[#allocation3 + $0x28] sm:$0xff] }
 0x101   :  { %1980 = vmatprep.subr.bf16.mxu1 %v10460_v34 }
 0x103   :  { %1875 = vmatpush1.bf16.msra.mxu0 %v10457_v36  ;;  %v12588_v36 = vld [vmem:[#allocation3 + $0x20] sm:$0xff] }
 0x104   :  { %1981 = vmatpush1.bf16.msra.mxu1 %v10459_v37  ;;  %1876 = vmatprep.subr.bf16.mxu0 %v10466_v41  ;;  %v448_v41 = vld [vmem:[#allocation14 + $0x440] sm:$0xff] }
 0x105   :  { %1982 = vmatprep.subr.bf16.mxu1 %v10468_v42  ;;  %v452_v42 = vld [vmem:[#allocation14 + $0x460] sm:$0xff] }
 0x106   :  { %v10490_v1 = vcombine.high %v448_v41, %v452_v42 }
 0x107   :  { %1877 = vmatpush1.bf16.msra.mxu0 %v10465_v44 }
 0x108   :  { %1983 = vmatpush1.bf16.msra.mxu1 %v10467_v45  ;;  %1878 = vmatprep.subr.bf16.mxu0 %v10474_v46  ;;  %v12590_v45 = vld [vmem:[#allocation3 + $0x40] sm:$0xff] }
 0x109   :  { %1984 = vmatprep.subr.bf16.mxu1 %v10476_v47 }
 0x10b   :  { %1879 = vmatpush1.bf16.msra.mxu0 %v10473_v48 }
 0x10c   :  { %1985 = vmatpush1.bf16.msra.mxu1 %v10475_v49  ;;  %1901 = vmatprep.subr.bf16.mxu0 %v10482_v50 }
 0x10d   :  { %2007 = vmatprep.subr.bf16.mxu1 %v10484_v51  ;;  %v453_v51 = vld [vmem:[#allocation14 + $0x468] sm:$0xff] }
 0x15b   :  { %v222_v52 = vpop.xlane.xlu0 %221 }
 0x15c   :  { %v239_v53 = vmul.f32 0.001953125, %v222_v52 }
 0x15e   :  { %v243_v55 = vadd.f32 1e-05, %v239_v53  ;;  %v232_v56 = vpop.xlane.xlu1 %231 }
 0x15f   :  { %v227_v57 = vpop.xlane.xlu0 %226  ;;  %v241_v58 = vmul.f32 0.001953125, %v232_v56  ;;  %v12592_v56 = vld [vmem:[#allocation3 + $0x60] sm:$0xff] }
 0x160   :  { %12373 = vrsqrt.f32 %v243_v55  ;;  %v240_v59 = vmul.f32 0.001953125, %v227_v57 }
 0x161   :  { %v245_v60 = vadd.f32 1e-05, %v241_v58  ;;  %v12593_v58 = vld [vmem:[#allocation3 + $0x78] sm:$0xff] }
 0x162   :  { %v244_v62 = vadd.f32 1e-05, %v240_v59  ;;  %v237_v63 = vpop.xlane.xlu1 %236 }
 0x163   :  { %12375 = vrsqrt.f32 %v245_v60  ;;  %v242_v0 = vmul.f32 0.001953125, %v237_v63  ;;  %v12594_v60 = vld [vmem:[#allocation3 + $0x70] sm:$0xff] }
 0x164   :  { %12377 = vrsqrt.f32 %v244_v62 }
 0x165   :  { %v246_v2 = vadd.f32 1e-05, %v242_v0 }
 0x167   :  { %12379 = vrsqrt.f32 %v246_v2 }
 0x16a   :  { %v13158_v10 = vpop.eup %12373 }
 0x16b   :  { %v252_v13 = vmul.f32 %v12581_v12, %v13158_v10  ;;  %v253_v19 = vmul.f32 %v12582_v16, %v13158_v10  ;;  %v251_v21 = vmul.f32 %v12583_v20, %v13158_v10  ;;  %v10492_v12 = vcombine.high %v449_v43, %v453_v51  ;;  %v456_v16 = vld [vmem:[#allocation14 + $0x480] sm:$0xff]  ;;  %v457_v20 = vld [vmem:[#allocation14 + $0x488] sm:$0xff] }
 0x16d   :  { %v12376_v23 = vpop.eup %12375  ;;  %v290_v24 = vmul.f32 %v279_v9, %v253_v19  ;;  %v289_v35 = vmul.f32 %v275_v14, %v252_v13  ;;  %v288_v40 = vmul.f32 %v271_v22, %v251_v21  ;;  %v460_v19 = vld [vmem:[#allocation14 + $0x4a0] sm:$0xff] }
 0x16e   :  { %v12378_v25 = vpop.eup %12377  ;;  %v260_v27 = vmul.f32 %v12584_v26, %v12376_v23  ;;  %v262_v30 = vmul.f32 %v12585_v29, %v12376_v23  ;;  %v261_v32 = vmul.f32 %v12586_v31, %v12376_v23  ;;  %v259_v46 = vmul.f32 %v12590_v45, %v12376_v23  ;;  %v461_v26 = vld [vmem:[#allocation14 + $0x4a8] sm:$0xff]  ;;  %v12595_v29 = vld [vmem:[#allocation3 + $0x38] sm:$0xff] }
 0x16f   :  { %v256_v34 = vmul.f32 %v12587_v33, %v12378_v25  ;;  %v255_v37 = vmul.f32 %v12588_v36, %v12378_v25  ;;  %v257_v39 = vmul.f32 %v12589_v38, %v12378_v25  ;;  %v10498_v33 = vcombine.high %v456_v16, %v460_v19  ;;  %v472_v38 = vld [vmem:[#allocation14 + $0x500] sm:$0xff] }
 0x170   :  { %v297_v44 = vmul.f32 %v275_v14, %v260_v27  ;;  %v298_v47 = vmul.f32 %v279_v9, %v261_v32  ;;  %v299_v53 = vmul.f32 %v13170_v28, %v262_v30  ;;  %v296_v27 = vmul.f32 %v271_v22, %v259_v46 }
 0x171   :  { %v12380_v48 = vpop.eup %12379  ;;  %v293_v49 = vmul.f32 %v275_v14, %v256_v34  ;;  %v292_v50 = vmul.f32 %v271_v22, %v255_v37  ;;  %v294_v52 = vmul.f32 %v279_v9, %v257_v39  ;;  %v258_v30 = vmul.f32 %v12595_v29, %v12378_v25 }
 0x172   :  { %v264_v55 = vmul.f32 %v12591_v54, %v12380_v48  ;;  %v263_v57 = vmul.f32 %v12592_v56, %v12380_v48  ;;  %v266_v59 = vmul.f32 %v12593_v58, %v12380_v48  ;;  %v265_v62 = vmul.f32 %v12594_v60, %v12380_v48  ;;  %v488_v54 = vld [vmem:[#allocation14 + $0x580] sm:$0xff]  ;;  %v489_v58 = vld [vmem:[#allocation14 + $0x588] sm:$0xff] }
 0x173   :  { %v13173_v63 = vpack.c.bf16 %v293_v49, %v289_v35  ;;  %v13175_v0 = vpack.c.bf16 %v292_v50, %v288_v40  ;;  %v13177_v2 = vpack.c.bf16 %v294_v52, %v290_v24  ;;  %v10491_v32 = vcombine.low %v449_v43, %v453_v51  ;;  %v12596_v35 = vld [vmem:[#allocation3 + $0x18] sm:$0xff]  ;;  %v477_v43 = vld [vmem:[#allocation14 + $0x528] sm:$0xff]  ;;  %v484_v49 = vld [vmem:[#allocation14 + $0x560] sm:$0xff] }
 0x174   :  { %v301_v13 = vmul.f32 %v275_v14, %v264_v55  ;;  %v303_v21 = vmul.f32 %v13170_v28, %v266_v59  ;;  %v302_v23 = vmul.f32 %v279_v9, %v265_v62  ;;  %v300_v14 = vmul.f32 %v271_v22, %v263_v57  ;;  %v481_v50 = vld [vmem:[#allocation14 + $0x548] sm:$0xff]  ;;  %v492_v57 = vld [vmem:[#allocation14 + $0x5a0] sm:$0xff] }
 0x175   :  { %1880 = vmatprep.mubr.bf16.mxu0 %v13173_v63  ;;  %1986 = vmatprep.mubr.bf16.mxu1 %v13173_v63  ;;  %v10489_v9 = vcombine.low %v448_v41, %v452_v42  ;;  %v10500_v34 = vcombine.high %v457_v20, %v461_v26  ;;  %v254_v22 = vmul.f32 %v12596_v35, %v13158_v10  ;;  %v476_v41 = vld [vmem:[#allocation14 + $0x520] sm:$0xff]  ;;  %v473_v42 = vld [vmem:[#allocation14 + $0x508] sm:$0xff] }
 0x176   :  { %1881 = vmatmul.mubr.bf16.vlgmr.msra.gmra.mrb[0].mxu0 %v13175_v0  ;;  %1987 = vmatmul.mubr.bf16.vlgmr.msra.gmra.mrb[0].mxu1 %v13175_v0  ;;  %v13184_v24 = vpack.c.bf16 %v301_v13, %v297_v44  ;;  %v13186_v31 = vpack.c.bf16 %v303_v21, %v299_v53  ;;  %v13194_v25 = vpack.c.bf16 %v302_v23, %v298_v47  ;;  %v480_v47 = vld [vmem:[#allocation14 + $0x540] sm:$0xff]  ;;  %v485_v51 = vld [vmem:[#allocation14 + $0x568] sm:$0xff] }
 0x177   :  { %1902 = vmatpush1.bf16.msra.mxu0 %v10481_v17  ;;  %2008 = vmatpush1.bf16.msra.mxu1 %v10483_v18  ;;  %v465_v17 = vld [vmem:[#allocation14 + $0x4c8] sm:$0xff]  ;;  %v13199_v8 = vpack.c.bf16 %v300_v14, %v296_v27  ;;  %v295_v15 = vmul.f32 %v13170_v28, %v258_v30  ;;  %v10497_v36 = vcombine.low %v456_v16, %v460_v19  ;;  %v500_v16 = vld [vmem:[#allocation14 + $0x5e0] sm:$0xff] }
 0x178   :  { %1903 = vmatprep.subr.bf16.mxu0 %v10490_v1  ;;  %2009 = vmatprep.subr.bf16.mxu1 %v10492_v12  ;;  %v469_v18 = vld [vmem:[#allocation14 + $0x4e8] sm:$0xff]  ;;  %v10499_v37 = vcombine.low %v457_v20, %v461_v26  ;;  %v291_v10 = vmul.f32 %v13170_v28, %v254_v22  ;;  %v10506_v39 = vcombine.high %v464_v6, %v468_v7  ;;  %v496_v1 = vld [vmem:[#allocation14 + $0x5c0] sm:$0xff] }
 0x179   :  { %1890 = vmatprep.mubr.bf16.mxu0 %v13184_v24  ;;  %1996 = vmatprep.mubr.bf16.mxu1 %v13184_v24  ;;  %v10508_v40 = vcombine.high %v465_v17, %v469_v18  ;;  %v10505_v45 = vcombine.low %v464_v6, %v468_v7  ;;  %v10507_v46 = vcombine.low %v465_v17, %v469_v18  ;;  %v493_v59 = vld [vmem:[#allocation14 + $0x5a8] sm:$0xff]  ;;  %v504_v26 = vld [vmem:[#allocation14 + $0x600] sm:$0xff] }
 0x17a   :  { %v13205_v44 = vpack.c.bf16 %v295_v15, %v291_v10  ;;  %v10514_v28 = vcombine.high %v472_v38, %v476_v41  ;;  %v10516_v48 = vcombine.high %v473_v42, %v477_v43  ;;  %v10513_v52 = vcombine.low %v472_v38, %v476_v41  ;;  %v497_v19 = vld [vmem:[#allocation14 + $0x5c8] sm:$0xff]  ;;  %v508_v30 = vld [vmem:[#allocation14 + $0x620] sm:$0xff] }
 0x17b   :  { %1904 = vmatpush1.bf16.msra.mxu0 %v10489_v9  ;;  %2010 = vmatpush1.bf16.msra.mxu1 %v10491_v32  ;;  %v10515_v53 = vcombine.low %v473_v42, %v477_v43  ;;  %v10522_v55 = vcombine.high %v480_v47, %v484_v49  ;;  %v10524_v56 = vcombine.high %v481_v50, %v485_v51  ;;  %v501_v20 = vld [vmem:[#allocation14 + $0x5e8] sm:$0xff]  ;;  %v516_v6 = vld [vmem:[#allocation14 + $0x660] sm:$0xff] }
 0x17c   :  { %1905 = vmatprep.subr.bf16.mxu0 %v10498_v33  ;;  %2011 = vmatprep.subr.bf16.mxu1 %v10500_v34  ;;  %v10521_v60 = vcombine.low %v480_v47, %v484_v49  ;;  %v10523_v62 = vcombine.low %v481_v50, %v485_v51  ;;  %v10530_v12 = vcombine.high %v488_v54, %v492_v57  ;;  %v505_v14 = vld [vmem:[#allocation14 + $0x608] sm:$0xff]  ;;  %v512_v34 = vld [vmem:[#allocation14 + $0x640] sm:$0xff] }
 0x17d   :  { %v10532_v13 = vcombine.high %v489_v58, %v493_v59  ;;  %v10529_v21 = vcombine.low %v488_v54, %v492_v57  ;;  %v10531_v23 = vcombine.low %v489_v58, %v493_v59  ;;  %v10538_v27 = vcombine.high %v496_v1, %v500_v16  ;;  %v509_v9 = vld [vmem:[#allocation14 + $0x628] sm:$0xff]  ;;  %v524_v10 = vld [vmem:[#allocation14 + $0x6a0] sm:$0xff] }
 0x17e   :  { %1891 = vmatmul.mubr.bf16.gmra.mrb[4].mxu0 %v13199_v8  ;;  %1997 = vmatmul.mubr.bf16.gmra.mrb[4].mxu1 %v13199_v8  ;;  %v10540_v29 = vcombine.high %v497_v19, %v501_v20  ;;  %v10537_v32 = vcombine.low %v496_v1, %v500_v16  ;;  %v10539_v33 = vcombine.low %v497_v19, %v501_v20  ;;  %v513_v7 = vld [vmem:[#allocation14 + $0x648] sm:$0xff]  ;;  %v532_v47 = vld [vmem:[#allocation14 + $0x6e0] sm:$0xff] }
 0x17f   :  { %1906 = vmatpush1.bf16.msra.mxu0 %v10497_v36  ;;  %2012 = vmatpush1.bf16.msra.mxu1 %v10499_v37  ;;  %v10546_v35 = vcombine.high %v504_v26, %v508_v30  ;;  %v10548_v22 = vcombine.high %v505_v14, %v509_v9  ;;  %v517_v17 = vld [vmem:[#allocation14 + $0x668] sm:$0xff]  ;;  %v10545_v15 = vcombine.low %v504_v26, %v508_v30  ;;  %v520_v36 = vld [vmem:[#allocation14 + $0x680] sm:$0xff] }
 0x180   :  { %1933 = vmatprep.mubr.bf16.mxu0 %v13205_v44  ;;  %2039 = vmatprep.mubr.bf16.mxu1 %v13205_v44  ;;  %v10547_v18 = vcombine.low %v505_v14, %v509_v9  ;;  %v10554_v37 = vcombine.high %v512_v34, %v516_v6  ;;  %v10556_v38 = vcombine.high %v513_v7, %v517_v17  ;;  %v540_v54 = vld [vmem:[#allocation14 + $0x720] sm:$0xff] }
 0x181   :  { %1907 = vmatprep.subr.bf16.mxu0 %v10506_v39  ;;  %2013 = vmatprep.subr.bf16.mxu1 %v10508_v40  ;;  %v521_v39 = vld [vmem:[#allocation14 + $0x688] sm:$0xff]  ;;  %v10553_v41 = vcombine.low %v512_v34, %v516_v6  ;;  %v10555_v42 = vcombine.low %v513_v7, %v517_v17  ;;  %v10562_v43 = vcombine.high %v520_v36, %v524_v10  ;;  %v548_v1 = vld [vmem:[#allocation14 + $0x760] sm:$0xff] }
 0x182   :  { %v525_v40 = vld [vmem:[#allocation14 + $0x6a8] sm:$0xff]  ;;  %v10561_v49 = vcombine.low %v520_v36, %v524_v10  ;;  %v556_v26 = vld [vmem:[#allocation14 + $0x7a0] sm:$0xff]  ;;  %v318_v36 = vld [vmem:[#allocation14 + $0x30] sm:$0xff] }
 0x183   :  { %1908 = vmatpush1.bf16.msra.mxu0 %v10505_v45  ;;  %2014 = vmatpush1.bf16.msra.mxu1 %v10507_v46  ;;  %v10564_v45 = vcombine.high %v521_v39, %v525_v40  ;;  %v528_v46 = vld [vmem:[#allocation14 + $0x6c0] sm:$0xff]  ;;  %v10563_v50 = vcombine.low %v521_v39, %v525_v40 }
 0x184   :  { %1909 = vmatprep.subr.bf16.mxu0 %v10514_v28  ;;  %2015 = vmatprep.subr.bf16.mxu1 %v10516_v48  ;;  %v529_v28 = vld [vmem:[#allocation14 + $0x6c8] sm:$0xff]  ;;  %v10570_v51 = vcombine.high %v528_v46, %v532_v47  ;;  %v10569_v57 = vcombine.low %v528_v46, %v532_v47  ;;  %v564_v34 = vld [vmem:[#allocation14 + $0x7e0] sm:$0xff]  ;;  %v327_v46 = vld [vmem:[#allocation14 + $0x78] sm:$0xff] }
 0x185   :  { %v533_v48 = vld [vmem:[#allocation14 + $0x6e8] sm:$0xff] }
 0x186   :  { %v10571_v58 = vcombine.low %v529_v28, %v533_v48 }
 0x187   :  { %1910 = vmatpush1.bf16.msra.mxu0 %v10513_v52  ;;  %2016 = vmatpush1.bf16.msra.mxu1 %v10515_v53  ;;  %v10572_v52 = vcombine.high %v529_v28, %v533_v48  ;;  %v536_v53 = vld [vmem:[#allocation14 + $0x700] sm:$0xff] }
 0x188   :  { %1911 = vmatprep.subr.bf16.mxu0 %v10522_v55  ;;  %2017 = vmatprep.subr.bf16.mxu1 %v10524_v56  ;;  %v537_v55 = vld [vmem:[#allocation14 + $0x708] sm:$0xff]  ;;  %v10578_v59 = vcombine.high %v536_v53, %v540_v54  ;;  %v10577_v16 = vcombine.low %v536_v53, %v540_v54  ;;  %v335_v53 = vld [vmem:[#allocation14 + $0xb8] sm:$0xff] }
 0x189   :  { %v541_v56 = vld [vmem:[#allocation14 + $0x728] sm:$0xff] }
 0x18a   :  { %v10579_v19 = vcombine.low %v537_v55, %v541_v56 }
 0x18b   :  { %1912 = vmatpush1.bf16.msra.mxu0 %v10521_v60  ;;  %2018 = vmatpush1.bf16.msra.mxu1 %v10523_v62  ;;  %v10580_v60 = vcombine.high %v537_v55, %v541_v56  ;;  %v544_v62 = vld [vmem:[#allocation14 + $0x740] sm:$0xff] }
 0x18c   :  { %1913 = vmatprep.subr.bf16.mxu0 %v10530_v12  ;;  %2019 = vmatprep.subr.bf16.mxu1 %v10532_v13  ;;  %v545_v12 = vld [vmem:[#allocation14 + $0x748] sm:$0xff]  ;;  %v10586_v20 = vcombine.high %v544_v62, %v548_v1  ;;  %v10585_v30 = vcombine.low %v544_v62, %v548_v1  ;;  %v343_v62 = vld [vmem:[#allocation14 + $0xf8] sm:$0xff] }
 0x18d   :  { %v549_v13 = vld [vmem:[#allocation14 + $0x768] sm:$0xff] }
 0x18e   :  { %v10587_v14 = vcombine.low %v545_v12, %v549_v13 }
 0x18f   :  { %1914 = vmatpush1.bf16.msra.mxu0 %v10529_v21  ;;  %2020 = vmatpush1.bf16.msra.mxu1 %v10531_v23  ;;  %v10588_v21 = vcombine.high %v545_v12, %v549_v13  ;;  %v552_v23 = vld [vmem:[#allocation14 + $0x780] sm:$0xff] }
 0x190   :  { %1915 = vmatprep.subr.bf16.mxu0 %v10538_v27  ;;  %2021 = vmatprep.subr.bf16.mxu1 %v10540_v29  ;;  %v553_v27 = vld [vmem:[#allocation14 + $0x788] sm:$0xff]  ;;  %v10594_v9 = vcombine.high %v552_v23, %v556_v26  ;;  %v10593_v6 = vcombine.low %v552_v23, %v556_v26  ;;  %v351_v23 = vld [vmem:[#allocation14 + $0x138] sm:$0xff] }
 0x191   :  { %v557_v29 = vld [vmem:[#allocation14 + $0x7a8] sm:$0xff] }
 0x192   :  { %v10595_v7 = vcombine.low %v553_v27, %v557_v29 }
 0x193   :  { %1916 = vmatpush1.bf16.msra.mxu0 %v10537_v32  ;;  %2022 = vmatpush1.bf16.msra.mxu1 %v10539_v33  ;;  %v10596_v32 = vcombine.high %v553_v27, %v557_v29  ;;  %v560_v33 = vld [vmem:[#allocation14 + $0x7c0] sm:$0xff] }
 0x194   :  { %1917 = vmatprep.subr.bf16.mxu0 %v10546_v35  ;;  %2023 = vmatprep.subr.bf16.mxu1 %v10548_v22  ;;  %v561_v35 = vld [vmem:[#allocation14 + $0x7c8] sm:$0xff]  ;;  %v10602_v17 = vcombine.high %v560_v33, %v564_v34  ;;  %v10601_v10 = vcombine.low %v560_v33, %v564_v34  ;;  %v359_v33 = vld [vmem:[#allocation14 + $0x178] sm:$0xff] }
 0x195   :  { %v565_v22 = vld [vmem:[#allocation14 + $0x7e8] sm:$0xff] }
 0x196   :  { %v10603_v39 = vcombine.low %v561_v35, %v565_v22 }
 0x197   :  { %1918 = vmatpush1.bf16.msra.mxu0 %v10545_v15  ;;  %2024 = vmatpush1.bf16.msra.mxu1 %v10547_v18  ;;  %v10604_v15 = vcombine.high %v561_v35, %v565_v22  ;;  %v314_v18 = vld [vmem:[#allocation14 + $0x10] sm:$0xff] }
 0x198   :  { %1919 = vmatprep.subr.bf16.mxu0 %v10554_v37  ;;  %2025 = vmatprep.subr.bf16.mxu1 %v10556_v38  ;;  %v315_v37 = vld [vmem:[#allocation14 + $0x18] sm:$0xff]  ;;  %v10358_v40 = vcombine.high %v314_v18, %v318_v36  ;;  %v10357_v47 = vcombine.low %v314_v18, %v318_v36 }
 0x199   :  { %v319_v38 = vld [vmem:[#allocation14 + $0x38] sm:$0xff] }
 0x19a   :  { %v10359_v28 = vcombine.low %v315_v37, %v319_v38 }
 0x19b   :  { %1920 = vmatpush1.bf16.msra.mxu0 %v10553_v41  ;;  %2026 = vmatpush1.bf16.msra.mxu1 %v10555_v42  ;;  %v10360_v41 = vcombine.high %v315_v37, %v319_v38  ;;  %v322_v42 = vld [vmem:[#allocation14 + $0x50] sm:$0xff] }
 0x19c   :  { %1921 = vmatprep.subr.bf16.mxu0 %v10562_v43  ;;  %2027 = vmatprep.subr.bf16.mxu1 %v10564_v45  ;;  %v326_v43 = vld [vmem:[#allocation14 + $0x70] sm:$0xff]  ;;  %v323_v45 = vld [vmem:[#allocation14 + $0x58] sm:$0xff] }
 0x19d   :  { %v10366_v48 = vcombine.high %v322_v42, %v326_v43  ;;  %v10365_v54 = vcombine.low %v322_v42, %v326_v43  ;;  %v10367_v55 = vcombine.low %v323_v45, %v327_v46 }
 0x19f   :  { %1922 = vmatpush1.bf16.msra.mxu0 %v10561_v49  ;;  %2028 = vmatpush1.bf16.msra.mxu1 %v10563_v50  ;;  %v10368_v49 = vcombine.high %v323_v45, %v327_v46  ;;  %v330_v50 = vld [vmem:[#allocation14 + $0x90] sm:$0xff] }
 0x1a0   :  { %1923 = vmatprep.subr.bf16.mxu0 %v10570_v51  ;;  %2029 = vmatprep.subr.bf16.mxu1 %v10572_v52  ;;  %v334_v51 = vld [vmem:[#allocation14 + $0xb0] sm:$0xff]  ;;  %v331_v52 = vld [vmem:[#allocation14 + $0x98] sm:$0xff] }
 0x1a1   :  { %v10374_v56 = vcombine.high %v330_v50, %v334_v51  ;;  %v10373_v1 = vcombine.low %v330_v50, %v334_v51  ;;  %v10375_v12 = vcombine.low %v331_v52, %v335_v53 }
 0x1a3   :  { %1924 = vmatpush1.bf16.msra.mxu0 %v10569_v57  ;;  %2030 = vmatpush1.bf16.msra.mxu1 %v10571_v58  ;;  %v10376_v57 = vcombine.high %v331_v52, %v335_v53  ;;  %v338_v58 = vld [vmem:[#allocation14 + $0xd0] sm:$0xff] }
 0x1a4   :  { %1925 = vmatprep.subr.bf16.mxu0 %v10578_v59  ;;  %2031 = vmatprep.subr.bf16.mxu1 %v10580_v60  ;;  %v342_v59 = vld [vmem:[#allocation14 + $0xf0] sm:$0xff]  ;;  %v339_v60 = vld [vmem:[#allocation14 + $0xd8] sm:$0xff] }
 0x1a5   :  { %v10382_v13 = vcombine.high %v338_v58, %v342_v59  ;;  %v10381_v26 = vcombine.low %v338_v58, %v342_v59  ;;  %v10383_v27 = vcombine.low %v339_v60, %v343_v62 }
 0x1a7   :  { %1926 = vmatpush1.bf16.msra.mxu0 %v10577_v16  ;;  %2032 = vmatpush1.bf16.msra.mxu1 %v10579_v19  ;;  %v10384_v16 = vcombine.high %v339_v60, %v343_v62  ;;  %v346_v19 = vld [vmem:[#allocation14 + $0x110] sm:$0xff] }
 0x1a8   :  { %1927 = vmatprep.subr.bf16.mxu0 %v10586_v20  ;;  %2033 = vmatprep.subr.bf16.mxu1 %v10588_v21  ;;  %v350_v20 = vld [vmem:[#allocation14 + $0x130] sm:$0xff]  ;;  %v347_v21 = vld [vmem:[#allocation14 + $0x118] sm:$0xff] }
 0x1a9   :  { %v10390_v29 = vcombine.high %v346_v19, %v350_v20  ;;  %v10389_v34 = vcombine.low %v346_v19, %v350_v20  ;;  %v10391_v35 = vcombine.low %v347_v21, %v351_v23 }
 0x1ab   :  { %1928 = vmatpush1.bf16.msra.mxu0 %v10585_v30  ;;  %2034 = vmatpush1.bf16.msra.mxu1 %v10587_v14  ;;  %v10392_v30 = vcombine.high %v347_v21, %v351_v23  ;;  %v354_v14 = vld [vmem:[#allocation14 + $0x150] sm:$0xff] }
 0x1ac   :  { %1929 = vmatprep.subr.bf16.mxu0 %v10594_v9  ;;  %2035 = vmatprep.subr.bf16.mxu1 %v10596_v32  ;;  %v358_v9 = vld [vmem:[#allocation14 + $0x170] sm:$0xff]  ;;  %v355_v32 = vld [vmem:[#allocation14 + $0x158] sm:$0xff] }
 0x1ad   :  { %v10398_v22 = vcombine.high %v354_v14, %v358_v9  ;;  %v10397_v18 = vcombine.low %v354_v14, %v358_v9  ;;  %v10399_v36 = vcombine.low %v355_v32, %v359_v33 }
 0x1af   :  { %1930 = vmatpush1.bf16.msra.mxu0 %v10593_v6  ;;  %2036 = vmatpush1.bf16.msra.mxu1 %v10595_v7  ;;  %v362_v6 = vld [vmem:[#allocation14 + $0x190] sm:$0xff] }
 0x1b0   :  { %1931 = vmatprep.subr.bf16.mxu0 %v10602_v17  ;;  %2037 = vmatprep.subr.bf16.mxu1 %v10604_v15  ;;  %v366_v7 = vld [vmem:[#allocation14 + $0x1b0] sm:$0xff]  ;;  %v363_v17 = vld [vmem:[#allocation14 + $0x198] sm:$0xff] }
 0x1b1   :  { %v367_v15 = vld [vmem:[#allocation14 + $0x1b8] sm:$0xff]  ;;  %v10406_v37 = vcombine.high %v362_v6, %v366_v7  ;;  %v10405_v42 = vcombine.low %v362_v6, %v366_v7 }
 0x1b2   :  { %v10408_v38 = vcombine.high %v363_v17, %v367_v15  ;;  %v10407_v43 = vcombine.low %v363_v17, %v367_v15 }
 0x1b3   :  { %1932 = vmatpush1.bf16.msra.mxu0 %v10601_v10  ;;  %2038 = vmatpush1.bf16.msra.mxu1 %v10603_v39  ;;  %v370_v10 = vld [vmem:[#allocation14 + $0x1d0] sm:$0xff] }
 0x1b4   :  { %2060 = vmatprep.subr.bf16.mxu0 %v10358_v40  ;;  %2166 = vmatprep.subr.bf16.mxu1 %v10360_v41  ;;  %v374_v39 = vld [vmem:[#allocation14 + $0x1f0] sm:$0xff]  ;;  %v371_v40 = vld [vmem:[#allocation14 + $0x1d8] sm:$0xff] }
 0x1b5   :  { %v375_v41 = vld [vmem:[#allocation14 + $0x1f8] sm:$0xff]  ;;  %v10414_v45 = vcombine.high %v370_v10, %v374_v39  ;;  %v10413_v50 = vcombine.low %v370_v10, %v374_v39 }
 0x1b6   :  { %1934 = vmatmul.mubr.bf16.vlgmr.msra.gmra.mrb[0].mxu0 %v13177_v2  ;;  %2040 = vmatmul.mubr.bf16.vlgmr.msra.gmra.mrb[0].mxu1 %v13177_v2  ;;  %v10416_v46 = vcombine.high %v371_v40, %v375_v41  ;;  %v10415_v51 = vcombine.low %v371_v40, %v375_v41 }
 0x1b7   :  { %1943 = vmatprep.mubr.bf16.mxu0 %v13186_v31  ;;  %2049 = vmatprep.mubr.bf16.mxu1 %v13186_v31 }
 0x1b8   :  { %2061 = vmatpush1.bf16.msra.mxu0 %v10357_v47  ;;  %2167 = vmatpush1.bf16.msra.mxu1 %v10359_v28  ;;  %v378_v47 = vld [vmem:[#allocation14 + $0x210] sm:$0xff] }
 0x1b9   :  { %2062 = vmatprep.subr.bf16.mxu0 %v10366_v48  ;;  %2168 = vmatprep.subr.bf16.mxu1 %v10368_v49  ;;  %v382_v28 = vld [vmem:[#allocation14 + $0x230] sm:$0xff]  ;;  %v379_v48 = vld [vmem:[#allocation14 + $0x218] sm:$0xff] }
 0x1ba   :  { %v383_v49 = vld [vmem:[#allocation14 + $0x238] sm:$0xff]  ;;  %v10422_v52 = vcombine.high %v378_v47, %v382_v28  ;;  %v10421_v58 = vcombine.low %v378_v47, %v382_v28 }
 0x1bb   :  { %v10424_v53 = vcombine.high %v379_v48, %v383_v49  ;;  %v10423_v59 = vcombine.low %v379_v48, %v383_v49 }
 0x1bc   :  { %2063 = vmatpush1.bf16.msra.mxu0 %v10365_v54  ;;  %2169 = vmatpush1.bf16.msra.mxu1 %v10367_v55  ;;  %v386_v54 = vld [vmem:[#allocation14 + $0x250] sm:$0xff] }
 0x1bd   :  { %2064 = vmatprep.subr.bf16.mxu0 %v10374_v56  ;;  %2170 = vmatprep.subr.bf16.mxu1 %v10376_v57  ;;  %v390_v55 = vld [vmem:[#allocation14 + $0x270] sm:$0xff]  ;;  %v387_v56 = vld [vmem:[#allocation14 + $0x258] sm:$0xff] }
 0x1be   :  { %1944 = vmatmul.mubr.bf16.gmra.mrb[4].mxu0 %v13194_v25  ;;  %2050 = vmatmul.mubr.bf16.gmra.mrb[4].mxu1 %v13194_v25  ;;  %v391_v57 = vld [vmem:[#allocation14 + $0x278] sm:$0xff]  ;;  %v10430_v60 = vcombine.high %v386_v54, %v390_v55  ;;  %v10429_v19 = vcombine.low %v386_v54, %v390_v55 }
 0x1bf   :  { %2092 = vmatprep.mubr.bf16.mxu0 %v13173_v63  ;;  %2198 = vmatprep.mubr.bf16.mxu1 %v13173_v63  ;;  %v10400_v63 = vcombine.high %v355_v32, %v359_v33  ;;  %v10432_v62 = vcombine.high %v387_v56, %v391_v57  ;;  %v10431_v20 = vcombine.low %v387_v56, %v391_v57 }
 0x1c0   :  { %2065 = vmatpush1.bf16.msra.mxu0 %v10373_v1  ;;  %2171 = vmatpush1.bf16.msra.mxu1 %v10375_v12  ;;  %v394_v1 = vld [vmem:[#allocation14 + $0x290] sm:$0xff] }
 0x1c1   :  { %2066 = vmatprep.subr.bf16.mxu0 %v10382_v13  ;;  %2172 = vmatprep.subr.bf16.mxu1 %v10384_v16  ;;  %v398_v12 = vld [vmem:[#allocation14 + $0x2b0] sm:$0xff]  ;;  %v395_v13 = vld [vmem:[#allocation14 + $0x298] sm:$0xff] }
 0x1c2   :  { %v399_v16 = vld [vmem:[#allocation14 + $0x2b8] sm:$0xff]  ;;  %v10438_v21 = vcombine.high %v394_v1, %v398_v12  ;;  %v10437_v14 = vcombine.low %v394_v1, %v398_v12 }
 0x1c3   :  { %v10440_v23 = vcombine.high %v395_v13, %v399_v16  ;;  %v10439_v9 = vcombine.low %v395_v13, %v399_v16 }
 0x1c4   :  { %2067 = vmatpush1.bf16.msra.mxu0 %v10381_v26  ;;  %2173 = vmatpush1.bf16.msra.mxu1 %v10383_v27  ;;  %v402_v26 = vld [vmem:[#allocation14 + $0x2d0] sm:$0xff] }
 0x1c5   :  { %2068 = vmatprep.subr.bf16.mxu0 %v10390_v29  ;;  %2174 = vmatprep.subr.bf16.mxu1 %v10392_v30  ;;  %v406_v27 = vld [vmem:[#allocation14 + $0x2f0] sm:$0xff]  ;;  %v403_v29 = vld [vmem:[#allocation14 + $0x2d8] sm:$0xff] }
 0x1c6   :  { %v407_v30 = vld [vmem:[#allocation14 + $0x2f8] sm:$0xff]  ;;  %v10446_v32 = vcombine.high %v402_v26, %v406_v27  ;;  %v10445_v6 = vcombine.low %v402_v26, %v406_v27 }
 0x1c7   :  { %v10448_v33 = vcombine.high %v403_v29, %v407_v30  ;;  %v10447_v7 = vcombine.low %v403_v29, %v407_v30 }
 0x1c8   :  { %2069 = vmatpush1.bf16.msra.mxu0 %v10389_v34  ;;  %2175 = vmatpush1.bf16.msra.mxu1 %v10391_v35  ;;  %v410_v34 = vld [vmem:[#allocation14 + $0x310] sm:$0xff] }
 0x1c9   :  { %2070 = vmatprep.subr.bf16.mxu0 %v10398_v22  ;;  %2176 = vmatprep.subr.bf16.mxu1 %v10400_v63  ;;  %v414_v35 = vld [vmem:[#allocation14 + $0x330] sm:$0xff]  ;;  %v411_v22 = vld [vmem:[#allocation14 + $0x318] sm:$0xff] }
 0x1ca   :  { %v415_v63 = vld [vmem:[#allocation14 + $0x338] sm:$0xff]  ;;  %v10454_v17 = vcombine.high %v410_v34, %v414_v35  ;;  %v10453_v10 = vcombine.low %v410_v34, %v414_v35 }
 0x1cb   :  { %v10456_v15 = vcombine.high %v411_v22, %v415_v63  ;;  %v10455_v39 = vcombine.low %v411_v22, %v415_v63 }
 0x1cc   :  { %2071 = vmatpush1.bf16.msra.mxu0 %v10397_v18  ;;  %2177 = vmatpush1.bf16.msra.mxu1 %v10399_v36  ;;  %v418_v18 = vld [vmem:[#allocation14 + $0x350] sm:$0xff] }
 0x1cd   :  { %2072 = vmatprep.subr.bf16.mxu0 %v10406_v37  ;;  %2178 = vmatprep.subr.bf16.mxu1 %v10408_v38  ;;  %v422_v36 = vld [vmem:[#allocation14 + $0x370] sm:$0xff]  ;;  %v419_v37 = vld [vmem:[#allocation14 + $0x358] sm:$0xff] }
 0x1ce   :  { %v423_v38 = vld [vmem:[#allocation14 + $0x378] sm:$0xff]  ;;  %v10462_v40 = vcombine.high %v418_v18, %v422_v36  ;;  %v10461_v47 = vcombine.low %v418_v18, %v422_v36 }
 0x1cf   :  { %v10464_v41 = vcombine.high %v419_v37, %v423_v38  ;;  %v10463_v28 = vcombine.low %v419_v37, %v423_v38  ;;  %v474_v38 = vld [vmem:[#allocation14 + $0x510] sm:$0xff] }
 0x1d0   :  { %2073 = vmatpush1.bf16.msra.mxu0 %v10405_v42  ;;  %2179 = vmatpush1.bf16.msra.mxu1 %v10407_v43  ;;  %v426_v42 = vld [vmem:[#allocation14 + $0x390] sm:$0xff] }
 0x1d1   :  { %2074 = vmatprep.subr.bf16.mxu0 %v10414_v45  ;;  %2180 = vmatprep.subr.bf16.mxu1 %v10416_v46  ;;  %v430_v43 = vld [vmem:[#allocation14 + $0x3b0] sm:$0xff]  ;;  %v427_v45 = vld [vmem:[#allocation14 + $0x398] sm:$0xff] }
 0x1d2   :  { %v431_v46 = vld [vmem:[#allocation14 + $0x3b8] sm:$0xff]  ;;  %v10470_v48 = vcombine.high %v426_v42, %v430_v43  ;;  %v10469_v54 = vcombine.low %v426_v42, %v430_v43 }
 0x1d3   :  { %v10472_v49 = vcombine.high %v427_v45, %v431_v46  ;;  %v10471_v55 = vcombine.low %v427_v45, %v431_v46  ;;  %v482_v45 = vld [vmem:[#allocation14 + $0x550] sm:$0xff] }
 0x1d4   :  { %2075 = vmatpush1.bf16.msra.mxu0 %v10413_v50  ;;  %2181 = vmatpush1.bf16.msra.mxu1 %v10415_v51  ;;  %v434_v50 = vld [vmem:[#allocation14 + $0x3d0] sm:$0xff] }
 0x1d5   :  { %2076 = vmatprep.subr.bf16.mxu0 %v10422_v52  ;;  %2182 = vmatprep.subr.bf16.mxu1 %v10424_v53  ;;  %v438_v51 = vld [vmem:[#allocation14 + $0x3f0] sm:$0xff]  ;;  %v435_v52 = vld [vmem:[#allocation14 + $0x3d8] sm:$0xff] }
 0x1d6   :  { %v439_v53 = vld [vmem:[#allocation14 + $0x3f8] sm:$0xff]  ;;  %v10478_v56 = vcombine.high %v434_v50, %v438_v51  ;;  %v10477_v1 = vcombine.low %v434_v50, %v438_v51  ;;  %v486_v46 = vld [vmem:[#allocation14 + $0x570] sm:$0xff] }
 0x1d7   :  { %v10480_v57 = vcombine.high %v435_v52, %v439_v53  ;;  %v10479_v12 = vcombine.low %v435_v52, %v439_v53  ;;  %v490_v51 = vld [vmem:[#allocation14 + $0x590] sm:$0xff]  ;;  %v495_v53 = vld [vmem:[#allocation14 + $0x5b8] sm:$0xff] }
 0x1d8   :  { %2077 = vmatpush1.bf16.msra.mxu0 %v10421_v58  ;;  %2183 = vmatpush1.bf16.msra.mxu1 %v10423_v59  ;;  %v442_v58 = vld [vmem:[#allocation14 + $0x410] sm:$0xff] }
 0x1d9   :  { %2078 = vmatprep.subr.bf16.mxu0 %v10430_v60  ;;  %2184 = vmatprep.subr.bf16.mxu1 %v10432_v62  ;;  %v446_v59 = vld [vmem:[#allocation14 + $0x430] sm:$0xff]  ;;  %v443_v60 = vld [vmem:[#allocation14 + $0x418] sm:$0xff] }
 0x1da   :  { %v447_v62 = vld [vmem:[#allocation14 + $0x438] sm:$0xff]  ;;  %v10486_v13 = vcombine.high %v442_v58, %v446_v59  ;;  %v10485_v26 = vcombine.low %v442_v58, %v446_v59  ;;  %v494_v52 = vld [vmem:[#allocation14 + $0x5b0] sm:$0xff] }
 0x1db   :  { %v10488_v16 = vcombine.high %v443_v60, %v447_v62  ;;  %v10487_v27 = vcombine.low %v443_v60, %v447_v62  ;;  %v498_v58 = vld [vmem:[#allocation14 + $0x5d0] sm:$0xff]  ;;  %v499_v60 = vld [vmem:[#allocation14 + $0x5d8] sm:$0xff] }
 0x1dc   :  { %2079 = vmatpush1.bf16.msra.mxu0 %v10429_v19  ;;  %2185 = vmatpush1.bf16.msra.mxu1 %v10431_v20  ;;  %v450_v19 = vld [vmem:[#allocation14 + $0x450] sm:$0xff]  ;;  %v503_v62 = vld [vmem:[#allocation14 + $0x5f8] sm:$0xff] }
 0x1dd   :  { %2080 = vmatprep.subr.bf16.mxu0 %v10438_v21  ;;  %2186 = vmatprep.subr.bf16.mxu1 %v10440_v23  ;;  %v454_v20 = vld [vmem:[#allocation14 + $0x470] sm:$0xff]  ;;  %v451_v21 = vld [vmem:[#allocation14 + $0x458] sm:$0xff] }
 0x1de   :  { %v455_v23 = vld [vmem:[#allocation14 + $0x478] sm:$0xff]  ;;  %v10494_v29 = vcombine.high %v450_v19, %v454_v20  ;;  %v10493_v34 = vcombine.low %v450_v19, %v454_v20  ;;  %v502_v59 = vld [vmem:[#allocation14 + $0x5f0] sm:$0xff] }
 0x1df   :  { %v10496_v30 = vcombine.high %v451_v21, %v455_v23  ;;  %v10495_v35 = vcombine.low %v451_v21, %v455_v23  ;;  %v506_v19 = vld [vmem:[#allocation14 + $0x610] sm:$0xff]  ;;  %v507_v21 = vld [vmem:[#allocation14 + $0x618] sm:$0xff] }
 0x1e0   :  { %2081 = vmatpush1.bf16.msra.mxu0 %v10437_v14  ;;  %2187 = vmatpush1.bf16.msra.mxu1 %v10439_v9  ;;  %v458_v14 = vld [vmem:[#allocation14 + $0x490] sm:$0xff]  ;;  %v511_v23 = vld [vmem:[#allocation14 + $0x638] sm:$0xff] }
 0x1e1   :  { %2082 = vmatprep.subr.bf16.mxu0 %v10446_v32  ;;  %2188 = vmatprep.subr.bf16.mxu1 %v10448_v33  ;;  %v462_v9 = vld [vmem:[#allocation14 + $0x4b0] sm:$0xff]  ;;  %v459_v32 = vld [vmem:[#allocation14 + $0x498] sm:$0xff] }
 0x1e2   :  { %v463_v33 = vld [vmem:[#allocation14 + $0x4b8] sm:$0xff]  ;;  %v10502_v22 = vcombine.high %v458_v14, %v462_v9  ;;  %v510_v20 = vld [vmem:[#allocation14 + $0x630] sm:$0xff] }
 0x1e3   :  { %v10504_v63 = vcombine.high %v459_v32, %v463_v33  ;;  %v10503_v18 = vcombine.low %v459_v32, %v463_v33  ;;  %v515_v32 = vld [vmem:[#allocation14 + $0x658] sm:$0xff] }
 0x1e4   :  { %2083 = vmatpush1.bf16.msra.mxu0 %v10445_v6  ;;  %2189 = vmatpush1.bf16.msra.mxu1 %v10447_v7  ;;  %v466_v6 = vld [vmem:[#allocation14 + $0x4d0] sm:$0xff]  ;;  %v519_v33 = vld [vmem:[#allocation14 + $0x678] sm:$0xff] }
 0x1e5   :  { %2084 = vmatprep.subr.bf16.mxu0 %v10454_v17  ;;  %2190 = vmatprep.subr.bf16.mxu1 %v10456_v15  ;;  %v470_v7 = vld [vmem:[#allocation14 + $0x4f0] sm:$0xff]  ;;  %v467_v17 = vld [vmem:[#allocation14 + $0x4d8] sm:$0xff] }
 0x1e6   :  { %v471_v15 = vld [vmem:[#allocation14 + $0x4f8] sm:$0xff]  ;;  %v10510_v36 = vcombine.high %v466_v6, %v470_v7 }
 0x1e7   :  { %v10512_v37 = vcombine.high %v467_v17, %v471_v15 }
 0x1e8   :  { %2085 = vmatpush1.bf16.msra.mxu0 %v10453_v10  ;;  %2191 = vmatpush1.bf16.msra.mxu1 %v10455_v39  ;;  %v475_v10 = vld [vmem:[#allocation14 + $0x518] sm:$0xff] }
 0x1e9   :  { %2086 = vmatprep.subr.bf16.mxu0 %v10462_v40  ;;  %2192 = vmatprep.subr.bf16.mxu1 %v10464_v41  ;;  %v479_v39 = vld [vmem:[#allocation14 + $0x538] sm:$0xff]  ;;  %v10509_v40 = vcombine.low %v466_v6, %v470_v7  ;;  %v10511_v41 = vcombine.low %v467_v17, %v471_v15  ;;  %v522_v6 = vld [vmem:[#allocation14 + $0x690] sm:$0xff] }
 0x1ea   :  { %v10520_v43 = vcombine.high %v475_v10, %v479_v39  ;;  %v526_v7 = vld [vmem:[#allocation14 + $0x6b0] sm:$0xff]  ;;  %v523_v17 = vld [vmem:[#allocation14 + $0x698] sm:$0xff] }
 0x1eb   :  { %v527_v15 = vld [vmem:[#allocation14 + $0x6b8] sm:$0xff] }
 0x1ec   :  { %2087 = vmatpush1.bf16.msra.mxu0 %v10461_v47  ;;  %2193 = vmatpush1.bf16.msra.mxu1 %v10463_v28  ;;  %v483_v47 = vld [vmem:[#allocation14 + $0x558] sm:$0xff] }
 0x1ed   :  { %2088 = vmatprep.subr.bf16.mxu0 %v10470_v48  ;;  %2194 = vmatprep.subr.bf16.mxu1 %v10472_v49  ;;  %v487_v28 = vld [vmem:[#allocation14 + $0x578] sm:$0xff]  ;;  %v10519_v48 = vcombine.low %v475_v10, %v479_v39  ;;  %v10526_v49 = vcombine.high %v482_v45, %v486_v46 }
 0x1ee   :  { %v10528_v50 = vcombine.high %v483_v47, %v487_v28  ;;  %v531_v10 = vld [vmem:[#allocation14 + $0x6d8] sm:$0xff] }
 0x1ef   :  { %v535_v39 = vld [vmem:[#allocation14 + $0x6f8] sm:$0xff] }
 0x1f0   :  { %2089 = vmatpush1.bf16.msra.mxu0 %v10469_v54  ;;  %2195 = vmatpush1.bf16.msra.mxu1 %v10471_v55  ;;  %v10525_v54 = vcombine.low %v482_v45, %v486_v46  ;;  %v10527_v55 = vcombine.low %v483_v47, %v487_v28  ;;  %v538_v45 = vld [vmem:[#allocation14 + $0x710] sm:$0xff]  ;;  %v539_v47 = vld [vmem:[#allocation14 + $0x718] sm:$0xff] }
 0x1f1   :  { %2090 = vmatprep.subr.bf16.mxu0 %v10478_v56  ;;  %2196 = vmatprep.subr.bf16.mxu1 %v10480_v57  ;;  %v10534_v56 = vcombine.high %v490_v51, %v494_v52  ;;  %v542_v46 = vld [vmem:[#allocation14 + $0x730] sm:$0xff]  ;;  %v543_v28 = vld [vmem:[#allocation14 + $0x738] sm:$0xff] }
 0x1f4   :  { %2091 = vmatpush1.bf16.msra.mxu0 %v10477_v1  ;;  %2197 = vmatpush1.bf16.msra.mxu1 %v10479_v12  ;;  %v10533_v1 = vcombine.low %v490_v51, %v494_v52  ;;  %v546_v51 = vld [vmem:[#allocation14 + $0x750] sm:$0xff] }
 0x1f5   :  { %2113 = vmatprep.subr.bf16.mxu0 %v10486_v13  ;;  %2219 = vmatprep.subr.bf16.mxu1 %v10488_v16  ;;  %v10542_v13 = vcombine.high %v498_v58, %v502_v59  ;;  %v10544_v16 = vcombine.high %v499_v60, %v503_v62  ;;  %v550_v52 = vld [vmem:[#allocation14 + $0x770] sm:$0xff] }
 0x1f7   :  { %2093 = vmatmul.mubr.bf16.vlgmr.msra.gmra.mrb[8].mxu0 %v13175_v0  ;;  %2199 = vmatmul.mubr.bf16.vlgmr.msra.gmra.mrb[8].mxu1 %v13175_v0  ;;  %v10501_v0 = vcombine.low %v458_v14, %v462_v9  ;;  %v514_v14 = vld [vmem:[#allocation14 + $0x650] sm:$0xff] }
 0x1f8   :  { %2102 = vmatprep.mubr.bf16.mxu0 %v13184_v24  ;;  %2114 = vmatpush1.bf16.msra.mxu0 %v10485_v26  ;;  %v10541_v26 = vcombine.low %v498_v58, %v502_v59  ;;  %v518_v9 = vld [vmem:[#allocation14 + $0x670] sm:$0xff] }
 0x1f9   :  { %2208 = vmatprep.mubr.bf16.mxu1 %v13184_v24  ;;  %2220 = vmatpush1.bf16.msra.mxu1 %v10487_v27  ;;  %v478_v24 = vld [vmem:[#allocation14 + $0x530] sm:$0xff]  ;;  %v10543_v27 = vcombine.low %v499_v60, %v503_v62  ;;  %v555_v60 = vld [vmem:[#allocation14 + $0x798] sm:$0xff] }
 0x1fa   :  { %2115 = vmatprep.subr.bf16.mxu0 %v10494_v29  ;;  %2221 = vmatprep.subr.bf16.mxu1 %v10496_v30  ;;  %v10518_v42 = vcombine.high %v474_v38, %v478_v24  ;;  %v10550_v29 = vcombine.high %v506_v19, %v510_v20  ;;  %v10552_v30 = vcombine.high %v507_v21, %v511_v23  ;;  %v554_v58 = vld [vmem:[#allocation14 + $0x790] sm:$0xff]  ;;  %v559_v62 = vld [vmem:[#allocation14 + $0x7b8] sm:$0xff] }
 0x1fb   :  { %v558_v59 = vld [vmem:[#allocation14 + $0x7b0] sm:$0xff] }
 0x1fc   :  { %2116 = vmatpush1.bf16.msra.mxu0 %v10493_v34  ;;  %v10549_v34 = vcombine.low %v506_v19, %v510_v20  ;;  %v562_v19 = vld [vmem:[#allocation14 + $0x7d0] sm:$0xff] }
 0x1fd   :  { %2222 = vmatpush1.bf16.msra.mxu1 %v10495_v35  ;;  %2117 = vmatprep.subr.bf16.mxu0 %v10502_v22  ;;  %v10551_v35 = vcombine.low %v507_v21, %v511_v23  ;;  %v10558_v22 = vcombine.high %v514_v14, %v518_v9  ;;  %v566_v20 = vld [vmem:[#allocation14 + $0x7f0] sm:$0xff]  ;;  %v563_v21 = vld [vmem:[#allocation14 + $0x7d8] sm:$0xff] }
 0x1fe   :  { %2223 = vmatprep.subr.bf16.mxu1 %v10504_v63  ;;  %v10560_v63 = vcombine.high %v515_v32, %v519_v33  ;;  %v567_v23 = vld [vmem:[#allocation14 + $0x7f8] sm:$0xff] }
 0x1ff   :  { %2103 = vmatmul.mubr.bf16.gmra.mrb[12].mxu0 %v13199_v8  ;;  %2209 = vmatmul.mubr.bf16.gmra.mrb[12].mxu1 %v13199_v8  ;;  %v10517_v8 = vcombine.low %v474_v38, %v478_v24  ;;  %v530_v38 = vld [vmem:[#allocation14 + $0x6d0] sm:$0xff] }
 0x200   :  { %2118 = vmatpush1.bf16.msra.mxu0 %v10501_v0  ;;  %2145 = vmatprep.mubr.bf16.mxu0 %v13205_v44  ;;  %v10557_v0 = vcombine.low %v514_v14, %v518_v9  ;;  %v534_v24 = vld [vmem:[#allocation14 + $0x6f0] sm:$0xff]  ;;  %v10605_v14 = vcombine.low %v562_v19, %v566_v20  ;;  %v10607_v9 = vcombine.low %v563_v21, %v567_v23 }
 0x201   :  { %2224 = vmatpush1.bf16.msra.mxu1 %v10503_v18  ;;  %2251 = vmatprep.mubr.bf16.mxu1 %v13205_v44  ;;  %v491_v44 = vld [vmem:[#allocation14 + $0x598] sm:$0xff]  ;;  %v10559_v18 = vcombine.low %v515_v32, %v519_v33 }
 0x202   :  { %2119 = vmatprep.subr.bf16.mxu0 %v10510_v36  ;;  %2225 = vmatprep.subr.bf16.mxu1 %v10512_v37  ;;  %v10536_v57 = vcombine.high %v491_v44, %v495_v53  ;;  %v10535_v12 = vcombine.low %v491_v44, %v495_v53  ;;  %v10566_v36 = vcombine.high %v522_v6, %v526_v7  ;;  %v547_v44 = vld [vmem:[#allocation14 + $0x758] sm:$0xff] }
 0x203   :  { %v10568_v37 = vcombine.high %v523_v17, %v527_v15  ;;  %v551_v53 = vld [vmem:[#allocation14 + $0x778] sm:$0xff] }
 0x204   :  { %2120 = vmatpush1.bf16.msra.mxu0 %v10509_v40  ;;  %v10565_v40 = vcombine.low %v522_v6, %v526_v7 }
 0x205   :  { %2226 = vmatpush1.bf16.msra.mxu1 %v10511_v41  ;;  %2121 = vmatprep.subr.bf16.mxu0 %v10518_v42  ;;  %v10567_v41 = vcombine.low %v523_v17, %v527_v15  ;;  %v10574_v42 = vcombine.high %v530_v38, %v534_v24 }
 0x206   :  { %2227 = vmatprep.subr.bf16.mxu1 %v10520_v43  ;;  %v10576_v43 = vcombine.high %v531_v10, %v535_v39 }
 0x208   :  { %2122 = vmatpush1.bf16.msra.mxu0 %v10517_v8  ;;  %v10573_v8 = vcombine.low %v530_v38, %v534_v24 }
 0x209   :  { %2228 = vmatpush1.bf16.msra.mxu1 %v10519_v48  ;;  %2123 = vmatprep.subr.bf16.mxu0 %v10526_v49  ;;  %v10575_v48 = vcombine.low %v531_v10, %v535_v39  ;;  %v10582_v49 = vcombine.high %v538_v45, %v542_v46 }
 0x20a   :  { %2229 = vmatprep.subr.bf16.mxu1 %v10528_v50  ;;  %v10584_v50 = vcombine.high %v539_v47, %v543_v28 }
 0x20c   :  { %2124 = vmatpush1.bf16.msra.mxu0 %v10525_v54  ;;  %v10581_v54 = vcombine.low %v538_v45, %v542_v46 }
 0x20d   :  { %2230 = vmatpush1.bf16.msra.mxu1 %v10527_v55  ;;  %2125 = vmatprep.subr.bf16.mxu0 %v10534_v56  ;;  %v10583_v55 = vcombine.low %v539_v47, %v543_v28  ;;  %v10590_v56 = vcombine.high %v546_v51, %v550_v52 }
 0x20e   :  { %2231 = vmatprep.subr.bf16.mxu1 %v10536_v57  ;;  %v10592_v57 = vcombine.high %v547_v44, %v551_v53 }
 0x210   :  { %2126 = vmatpush1.bf16.msra.mxu0 %v10533_v1  ;;  %v10589_v1 = vcombine.low %v546_v51, %v550_v52 }
 0x211   :  { %2232 = vmatpush1.bf16.msra.mxu1 %v10535_v12  ;;  %2127 = vmatprep.subr.bf16.mxu0 %v10542_v13  ;;  %v10591_v12 = vcombine.low %v547_v44, %v551_v53  ;;  %v10598_v13 = vcombine.high %v554_v58, %v558_v59 }
 0x212   :  { %2233 = vmatprep.subr.bf16.mxu1 %v10544_v16  ;;  %v10600_v16 = vcombine.high %v555_v60, %v559_v62 }
 0x214   :  { %2128 = vmatpush1.bf16.msra.mxu0 %v10541_v26  ;;  %v10597_v26 = vcombine.low %v554_v58, %v558_v59  ;;  %v13334_v58 = vld [vmem:[#allocation11 + $0x8] sm:$0xff] }
 0x215   :  { %2234 = vmatpush1.bf16.msra.mxu1 %v10543_v27  ;;  %2129 = vmatprep.subr.bf16.mxu0 %v10550_v29  ;;  %v10599_v27 = vcombine.low %v555_v60, %v559_v62  ;;  %v10606_v29 = vcombine.high %v562_v19, %v566_v20  ;;  %v13337_v60 = vld [vmem:[#allocation8] sm:$0xff]  ;;  %v13344_v19 = vld [vmem:[#allocation6 + $0x8] sm:$0xff] }
 0x216   :  { %2235 = vmatprep.subr.bf16.mxu1 %v10552_v30  ;;  %v10608_v30 = vcombine.high %v563_v21, %v567_v23  ;;  %v13346_v21 = vld [vmem:[#allocation8 + $0x8] sm:$0xff] }
 0x218   :  { %2130 = vmatpush1.bf16.msra.mxu0 %v10549_v34 }
 0x219   :  { %2236 = vmatpush1.bf16.msra.mxu1 %v10551_v35  ;;  %2131 = vmatprep.subr.bf16.mxu0 %v10558_v22 }
 0x21a   :  { %2237 = vmatprep.subr.bf16.mxu1 %v10560_v63 }
 0x21c   :  { %2132 = vmatpush1.bf16.msra.mxu0 %v10557_v0 }
 0x21d   :  { %2238 = vmatpush1.bf16.msra.mxu1 %v10559_v18  ;;  %2133 = vmatprep.subr.bf16.mxu0 %v10566_v36 }
 0x21e   :  { %2239 = vmatprep.subr.bf16.mxu1 %v10568_v37 }
 0x220   :  { %2134 = vmatpush1.bf16.msra.mxu0 %v10565_v40 }
 0x221   :  { %2240 = vmatpush1.bf16.msra.mxu1 %v10567_v41  ;;  %2135 = vmatprep.subr.bf16.mxu0 %v10574_v42 }
 0x222   :  { %2241 = vmatprep.subr.bf16.mxu1 %v10576_v43 }
 0x224   :  { %2136 = vmatpush1.bf16.msra.mxu0 %v10573_v8 }
 0x225   :  { %2242 = vmatpush1.bf16.msra.mxu1 %v10575_v48  ;;  %2137 = vmatprep.subr.bf16.mxu0 %v10582_v49 }
 0x226   :  { %2243 = vmatprep.subr.bf16.mxu1 %v10584_v50 }
 0x228   :  { %2138 = vmatpush1.bf16.msra.mxu0 %v10581_v54  ;;  %v13328_v54 = vld [vmem:[#allocation11] sm:$0xff] }
 0x229   :  { %2244 = vmatpush1.bf16.msra.mxu1 %v10583_v55  ;;  %2139 = vmatprep.subr.bf16.mxu0 %v10590_v56  ;;  %v13330_v55 = vld [vmem:[#allocation9] sm:$0xff]  ;;  %v13332_v56 = vld [vmem:[#allocation9 + $0x8] sm:$0xff] }
 0x22a   :  { %2245 = vmatprep.subr.bf16.mxu1 %v10592_v57 }
 0x22c   :  { %2140 = vmatpush1.bf16.msra.mxu0 %v10589_v1 }
 0x22d   :  { %2246 = vmatpush1.bf16.msra.mxu1 %v10591_v12  ;;  %2141 = vmatprep.subr.bf16.mxu0 %v10598_v13 }
 0x22e   :  { %2247 = vmatprep.subr.bf16.mxu1 %v10600_v16  ;;  %v13342_v16 = vld [vmem:[#allocation6] sm:$0xff] }
 0x230   :  { %2142 = vmatpush1.bf16.msra.mxu0 %v10597_v26 }
 0x231   :  { %2248 = vmatpush1.bf16.msra.mxu1 %v10599_v27  ;;  %2143 = vmatprep.subr.bf16.mxu0 %v10606_v29 }
 0x232   :  { %2249 = vmatprep.subr.bf16.mxu1 %v10608_v30 }
 0x234   :  { %2144 = vmatpush1.bf16.msra.mxu0 %v10605_v14 }
 0x235   :  { %2250 = vmatpush1.bf16.msra.mxu1 %v10607_v9 }
 0x237   :  { %2146 = vmatmul.mubr.bf16.vlgmr.msra.gmra.mrb[8].mxu0 %v13177_v2 }
 0x238   :  { %2252 = vmatmul.mubr.bf16.vlgmr.msra.gmra.mrb[8].mxu1 %v13177_v2  ;;  %2155 = vmatprep.mubr.bf16.mxu0 %v13186_v31 }
 0x239   :  { %2261 = vmatprep.mubr.bf16.mxu1 %v13186_v31 }
 0x23f   :  { %2156 = vmatmul.mubr.bf16.gmra.mrb[12].mxu0 %v13194_v25 }
 0x240   :  { %2262 = vmatmul.mubr.bf16.gmra.mrb[12].mxu1 %v13194_v25 }
 0x289   :  { %v13231_v32 = vpop.f32.mrb[0].mxu0  ;;  %v13233_v33 = vpop.f32.mrb[0].mxu1 }
 0x28a   :  { %v13235_v34 = vpop.f32.mrb[1].mxu1  ;;  %2294 = vrot.lane.b32.xlu1 %v13231_v32, %s12901_s20  ;;  %v13239_v35 = vpop.f32.mrb[1].mxu0  ;;  %v2292_v30 = vmul.f32 %v13342_v16, %v13231_v32 }
 0x28b   :  { %v13241_v2 = vpop.f32.mrb[2].mxu0  ;;  %v13243_v22 = vpop.f32.mrb[2].mxu1 }
 0x28c   :  { %v13245_v31 = vpop.f32.mrb[3].mxu0  ;;  %v13247_v63 = vpop.f32.mrb[3].mxu1  ;;  %v2293_v14 = vmul.f32 %v13344_v19, %v13241_v2 }
 0x28d   :  { %v2303_v32 = vmul.f32 %v13344_v19, %v13245_v31 }
 0x291   :  { %v13249_v25 = vpop.f32.mrb[4].mxu0  ;;  %v13251_v6 = vpop.f32.mrb[4].mxu1 }
 0x292   :  { %v13253_v7 = vpop.f32.mrb[5].mxu0  ;;  %v13255_v17 = vpop.f32.mrb[5].mxu1 }
 0x293   :  { %v13257_v15 = vpop.f32.mrb[6].mxu0  ;;  %v13259_v0 = vpop.f32.mrb[6].mxu1 }
 0x294   :  { %v13261_v18 = vpop.f32.mrb[7].mxu0  ;;  %v13263_v36 = vpop.f32.mrb[7].mxu1 }
 0x2fc   :  { %v2295_v53 = vpop.permute.xlu1 %2294 }
 0x2fd   :  { %v2298_v23 = vmul.f32 %v2295_v53, %v13337_v60 }
 0x30a   :  { %v2147_v37 = vpop.f32.mrb[8].mxu0 }
 0x30b   :  { %v2253_v38 = vpop.f32.mrb[8].mxu1  ;;  %2282 = vrot.lane.b32.xlu0 %v2147_v37, %s12901_s20  ;;  %v13266_v24 = vpop.f32.mrb[9].mxu0  ;;  %v2280_v1 = vmul.f32 %v13330_v55, %v2147_v37 }
 0x30c   :  { %v2255_v10 = vpop.f32.mrb[9].mxu1  ;;  %v2151_v39 = vpop.f32.mrb[10].mxu0 }
 0x30d   :  { %v2257_v40 = vpop.f32.mrb[10].mxu1  ;;  %2284 = vrot.lane.b32.xlu1 %v2151_v39, %s12901_s20  ;;  %v13269_v41 = vpop.f32.mrb[11].mxu0  ;;  %v2281_v12 = vmul.f32 %v13332_v56, %v2151_v39 }
 0x30e   :  { %v2291_v42 = vpack.c.bf16 %v2257_v40, %v2253_v38  ;;  %v2259_v43 = vpop.f32.mrb[11].mxu1 }
 0x30f   :  { %v13271_v45 = vpack.c.bf16 %v2259_v43, %v2255_v10  ;;  %2304 = vrot.lane.b32.xlu0 %v13239_v35, %s12901_s20  ;;  %v2300_v10 = vadd.f32 %v2298_v23, %v2292_v30  ;;  %v2302_v43 = vmul.f32 %v13342_v16, %v13239_v35 }
 0x310   :  { %11575 = vmatprep.subr.bf16.mxu1 %v2291_v42 }
 0x311   :  { %11576 = vmatpush3.bf16.msra.mxu1 %v2291_v42  ;;  %2296 = vrot.lane.b32.xlu1 %v13241_v2, %s12901_s20 }
 0x312   :  { %11587 = vmatprep.subr.bf16.mxu1 %v13271_v45  ;;  %v13278_v46 = vpop.f32.mrb[12].mxu0 }
 0x313   :  { %v2263_v47 = vpop.f32.mrb[12].mxu1  ;;  %2471 = vrot.lane.b32.xlu0 %v13266_v24, %s12901_s20  ;;  %v13282_v28 = vpop.f32.mrb[13].mxu0 }
 0x314   :  { %v2265_v8 = vpop.f32.mrb[13].mxu1  ;;  %v13284_v48 = vpop.f32.mrb[14].mxu0 }
 0x315   :  { %v2267_v49 = vpop.f32.mrb[14].mxu1  ;;  %2306 = vrot.lane.b32.xlu1 %v13245_v31, %s12901_s20  ;;  %v13288_v50 = vpop.f32.mrb[15].mxu0 }
 0x316   :  { %v13290_v51 = vpack.c.bf16 %v2267_v49, %v2263_v47  ;;  %v2269_v52 = vpop.f32.mrb[15].mxu1 }
 0x317   :  { %v13292_v44 = vpack.c.bf16 %v2269_v52, %v2265_v8  ;;  %2483 = vrot.lane.b32.xlu0 %v13233_v33, %s12901_s20 }
 0x319   :  { %2485 = vrot.lane.b32.xlu1 %v13243_v22, %s12901_s20 }
 0x31b   :  { %2493 = vrot.lane.b32.xlu0 %v13235_v34, %s12901_s20 }
 0x31d   :  { %2473 = vrot.lane.b32.xlu1 %v13269_v41, %s12901_s20 }
 0x31f   :  { %2659 = vrot.lane.b32.xlu0 %v13278_v46, %s12901_s20 }
 0x321   :  { %2495 = vrot.lane.b32.xlu1 %v13247_v63, %s12901_s20 }
 0x323   :  { %2671 = vrot.lane.b32.xlu0 %v13249_v25, %s12901_s20 }
 0x325   :  { %2661 = vrot.lane.b32.xlu1 %v13284_v48, %s12901_s20 }
 0x327   :  { %2681 = vrot.lane.b32.xlu0 %v13253_v7, %s12901_s20 }
 0x329   :  { %2673 = vrot.lane.b32.xlu1 %v13257_v15, %s12901_s20 }
 0x32b   :  { %2847 = vrot.lane.b32.xlu0 %v13282_v28, %s12901_s20 }
 0x32d   :  { %2683 = vrot.lane.b32.xlu1 %v13261_v18, %s12901_s20 }
 0x32f   :  { %2859 = vrot.lane.b32.xlu0 %v13251_v6, %s12901_s20 }
 0x331   :  { %2849 = vrot.lane.b32.xlu1 %v13288_v50, %s12901_s20 }
 0x333   :  { %2869 = vrot.lane.b32.xlu0 %v13255_v17, %s12901_s20 }
 0x335   :  { %2861 = vrot.lane.b32.xlu1 %v13259_v0, %s12901_s20 }
 0x339   :  { %2871 = vrot.lane.b32.xlu1 %v13263_v36, %s12901_s20 }
 0x37d   :  { %v2283_v57 = vpop.permute.xlu0 %2282 }
 0x37e   :  { %v2286_v59 = vmul.f32 %v2283_v57, %v13328_v54 }
 0x37f   :  { %v2285_v62 = vpop.permute.xlu1 %2284 }
 0x380   :  { %v2287_v13 = vmul.f32 %v2285_v62, %v13334_v58  ;;  %v2288_v26 = vadd.f32 %v2286_v59, %v2280_v1  ;;  %v2481_v59 = vmul.f32 %v13342_v16, %v13233_v33  ;;  %v2482_v62 = vmul.f32 %v13344_v19, %v13243_v22 }
 0x381   :  { %v2305_v20 = vpop.permute.xlu0 %2304 }
 0x382   :  { %v2289_v27 = vadd.f32 %v2287_v13, %v2281_v12  ;;  %v2308_v39 = vmul.f32 %v2305_v20, %v13337_v60 }
 0x383   :  { %v2297_v29 = vpop.permute.xlu1 %2296 }
 0x384   :  { %v2299_v9 = vmul.f32 %v2297_v29, %v13346_v21  ;;  %v2290_v37 = vpack.c.bf16 %v2289_v27, %v2288_v26  ;;  %v2310_v49 = vadd.f32 %v2308_v39, %v2302_v43  ;;  %v2469_v26 = vmul.f32 %v13330_v55, %v13266_v24 }
 0x385   :  { %v2472_v38 = vpop.permute.xlu0 %2471  ;;  %v2470_v27 = vmul.f32 %v13332_v56, %v13269_v41 }
 0x386   :  { %v2301_v40 = vadd.f32 %v2299_v9, %v2293_v14  ;;  %11569 = vmatprep.subr.bf16.mxu0 %v2290_v37  ;;  %v2475_v12 = vmul.f32 %v2472_v38, %v13328_v54  ;;  %v2491_v38 = vmul.f32 %v13342_v16, %v13235_v34  ;;  %v2658_v34 = vmul.f32 %v13332_v56, %v13284_v48 }
 0x387   :  { %v2307_v42 = vpop.permute.xlu1 %2306  ;;  %11570 = vmatpush3.bf16.xpose.msra.mxu0 %v2290_v37 }
 0x388   :  { %v2309_v47 = vmul.f32 %v2307_v42, %v13346_v21  ;;  %v2312_v2 = vpack.c.bf16 %v2301_v40, %v2300_v10  ;;  %v2477_v30 = vadd.f32 %v2475_v12, %v2469_v26  ;;  %v2492_v10 = vmul.f32 %v13344_v19, %v13247_v63 }
 0x389   :  { %v2484_v8 = vpop.permute.xlu0 %2483 }
 0x38a   :  { %v2311_v52 = vadd.f32 %v2309_v47, %v2303_v32  ;;  %v2487_v53 = vmul.f32 %v2484_v8, %v13337_v60  ;;  %11571 = vmatprep.mubr.bf16.mxu0 %v2312_v2  ;;  %v2657_v47 = vmul.f32 %v13330_v55, %v13278_v46 }
 0x38b   :  { %v2486_v57 = vpop.permute.xlu1 %2485 }
 0x38c   :  { %v2313_v35 = vpack.c.bf16 %v2311_v52, %v2310_v49  ;;  %v2488_v1 = vmul.f32 %v2486_v57, %v13346_v21  ;;  %v2489_v13 = vadd.f32 %v2487_v53, %v2481_v59  ;;  %v2669_v59 = vmul.f32 %v13342_v16, %v13249_v25 }
 0x38d   :  { %v2494_v31 = vpop.permute.xlu0 %2493  ;;  %v2680_v25 = vmul.f32 %v13344_v19, %v13261_v18 }
 0x38e   :  { %v2490_v20 = vadd.f32 %v2488_v1, %v2482_v62  ;;  %11572 = vmatmul.mubr.bf16.vlgmr.msra.gmra.mrb[16].mxu0 %v2313_v35  ;;  %v2497_v14 = vmul.f32 %v2494_v31, %v13337_v60  ;;  %v2670_v62 = vmul.f32 %v13344_v19, %v13257_v15 }
 0x38f   :  { %v2474_v23 = vpop.permute.xlu1 %2473 }
 0x390   :  { %v2476_v33 = vmul.f32 %v2474_v23, %v13334_v58  ;;  %v2501_v29 = vpack.c.bf16 %v2490_v20, %v2489_v13  ;;  %v2499_v40 = vadd.f32 %v2497_v14, %v2491_v38  ;;  %v2679_v20 = vmul.f32 %v13342_v16, %v13253_v7 }
 0x391   :  { %v2660_v22 = vpop.permute.xlu0 %2659  ;;  %v2846_v14 = vmul.f32 %v13332_v56, %v13288_v50 }
 0x392   :  { %v2478_v9 = vadd.f32 %v2476_v33, %v2470_v27  ;;  %11583 = vmatprep.mubr.bf16.mxu0 %v2501_v29  ;;  %v2663_v42 = vmul.f32 %v2660_v22, %v13328_v54 }
 0x393   :  { %v2496_v37 = vpop.permute.xlu1 %2495 }
 0x394   :  { %v2498_v24 = vmul.f32 %v2496_v37, %v13346_v21  ;;  %v2479_v39 = vpack.c.bf16 %v2478_v9, %v2477_v30  ;;  %v2665_v49 = vadd.f32 %v2663_v42, %v2657_v47  ;;  %v2845_v30 = vmul.f32 %v13330_v55, %v13282_v28 }
 0x395   :  { %v2672_v41 = vpop.permute.xlu0 %2671  ;;  %v2868_v42 = vmul.f32 %v13344_v19, %v13263_v36 }
 0x396   :  { %v2500_v43 = vadd.f32 %v2498_v24, %v2492_v10  ;;  %11581 = vmatprep.subr.bf16.mxu0 %v2479_v39  ;;  %v2675_v52 = vmul.f32 %v2672_v41, %v13337_v60 }
 0x397   :  { %11582 = vmatpush3.bf16.xpose.msra.mxu0 %v2479_v39  ;;  %v2662_v32 = vpop.permute.xlu1 %2661  ;;  %v2858_v39 = vmul.f32 %v13344_v19, %v13259_v0 }
 0x398   :  { %v2502_v2 = vpack.c.bf16 %v2500_v43, %v2499_v40  ;;  %v2664_v63 = vmul.f32 %v2662_v32, %v13334_v58  ;;  %v2677_v48 = vadd.f32 %v2675_v52, %v2669_v59  ;;  %v2867_v40 = vmul.f32 %v13342_v16, %v13255_v17 }
 0x399   :  { %v2682_v8 = vpop.permute.xlu0 %2681 }
 0x39a   :  { %v2666_v53 = vadd.f32 %v2664_v63, %v2658_v34  ;;  %v2685_v31 = vmul.f32 %v2682_v8, %v13337_v60 }
 0x39b   :  { %v2674_v57 = vpop.permute.xlu1 %2673 }
 0x39c   :  { %v2676_v46 = vmul.f32 %v2674_v57, %v13346_v21  ;;  %v2667_v35 = vpack.c.bf16 %v2666_v53, %v2665_v49  ;;  %v2687_v27 = vadd.f32 %v2685_v31, %v2679_v20 }
 0x39d   :  { %v2848_v1 = vpop.permute.xlu0 %2847 }
 0x39e   :  { %v2678_v12 = vadd.f32 %v2676_v46, %v2670_v62  ;;  %11584 = vmatmul.mubr.bf16.vlgmr.msra.gmra.mrb[20].mxu0 %v2502_v2  ;;  %11593 = vmatprep.subr.bf16.mxu0 %v2667_v35  ;;  %v2851_v33 = vmul.f32 %v2848_v1, %v13328_v54  ;;  %v2857_v54 = vmul.f32 %v13342_v16, %v13251_v6 }
 0x39f   :  { %v2684_v13 = vpop.permute.xlu1 %2683  ;;  %11594 = vmatpush3.bf16.xpose.msra.mxu0 %v2667_v35 }
 0x3a0   :  { %v2686_v15 = vmul.f32 %v2684_v13, %v13346_v21  ;;  %v2689_v23 = vpack.c.bf16 %v2678_v12, %v2677_v48  ;;  %v2853_v18 = vadd.f32 %v2851_v33, %v2845_v30 }
 0x3a1   :  { %v2860_v26 = vpop.permute.xlu0 %2859 }
 0x3a2   :  { %v2688_v29 = vadd.f32 %v2686_v15, %v2680_v25  ;;  %11595 = vmatprep.mubr.bf16.mxu0 %v2689_v23  ;;  %v2863_v37 = vmul.f32 %v2860_v26, %v13337_v60 }
 0x3a3   :  { %v2850_v22 = vpop.permute.xlu1 %2849 }
 0x3a4   :  { %v2690_v7 = vpack.c.bf16 %v2688_v29, %v2687_v27  ;;  %v2852_v9 = vmul.f32 %v2850_v22, %v13334_v58  ;;  %v2865_v50 = vadd.f32 %v2863_v37, %v2857_v54 }
 0x3a5   :  { %v2870_v10 = vpop.permute.xlu0 %2869 }
 0x3a6   :  { %v2854_v38 = vadd.f32 %v2852_v9, %v2846_v14  ;;  %11596 = vmatmul.mubr.bf16.vlgmr.msra.gmra.mrb[24].mxu0 %v2690_v7  ;;  %v2873_v56 = vmul.f32 %v2870_v10, %v13337_v60 }
 0x3a7   :  { %v2862_v24 = vpop.permute.xlu1 %2861 }
 0x3a8   :  { %v2864_v28 = vmul.f32 %v2862_v24, %v13346_v21  ;;  %v2855_v55 = vpack.c.bf16 %v2854_v38, %v2853_v18  ;;  %v2875_v0 = vadd.f32 %v2873_v56, %v2867_v40 }
 0x3aa   :  { %v2866_v58 = vadd.f32 %v2864_v28, %v2858_v39  ;;  %11605 = vmatprep.subr.bf16.mxu0 %v2855_v55 }
 0x3ab   :  { %v2872_v41 = vpop.permute.xlu1 %2871  ;;  %11606 = vmatpush3.bf16.xpose.msra.mxu0 %v2855_v55 }
 0x3ac   :  { %v2874_v6 = vmul.f32 %v2872_v41, %v13346_v21  ;;  %v2877_v43 = vpack.c.bf16 %v2866_v58, %v2865_v50 }
 0x3ae   :  { %v2876_v32 = vadd.f32 %v2874_v6, %v2868_v42  ;;  %11607 = vmatprep.mubr.bf16.mxu0 %v2877_v43 }
 0x3b0   :  { %v2878_v47 = vpack.c.bf16 %v2876_v32, %v2875_v0 }
 0x3b2   :  { %11608 = vmatmul.mubr.bf16.vlgmr.msra.gmra.mrb[28].mxu0 %v2878_v47 }
 0x461   :  { %v11573_v60 = vpop.f32.mrb[16].mxu0 }
 0x462   :  { %v2348_v34 = vpop.f32.mrb[17].mxu0  ;;  %v2370_v36 = vsel %vm2363_vm0, %v11573_v60, -inf }
 0x463   :  { %v11574_v2 = vpop.f32.mrb[18].mxu0  ;;  %v2364_v63 = vsel %vm2363_vm0, %v2348_v34, -inf }
 0x464   :  { %2365 = vmax.xlane.f32.xlu0 %v2364_v63  ;;  %v2351_v8 = vpop.f32.mrb[19].mxu0  ;;  %v2373_v16 = vsel %vm2363_vm0, %v11574_v2, -inf }
 0x465   :  { %v2367_v17 = vsel %vm2363_vm0, %v2351_v8, -inf }
 0x466   :  { %2368 = vmax.xlane.f32.xlu1 %v2367_v17 }
 0x468   :  { %2371 = vmax.xlane.f32.xlu0 %v2370_v36 }
 0x46c   :  { %2374 = vmax.xlane.f32.xlu0 %v2373_v16 }
 0x471   :  { %v13418_v19 = vpop.f32.mrb[20].mxu0 }
 0x472   :  { %v2537_v21 = vpop.f32.mrb[21].mxu0  ;;  %v2558_v59 = vsel %vm2363_vm0, %v13418_v19, -inf }
 0x473   :  { %v13420_v49 = vpop.f32.mrb[22].mxu0  ;;  %v2552_v52 = vsel %vm2363_vm0, %v2537_v21, -inf }
 0x474   :  { %2553 = vmax.xlane.f32.xlu0 %v2552_v52  ;;  %v2540_v53 = vpop.f32.mrb[23].mxu0  ;;  %v2561_v46 = vsel %vm2363_vm0, %v13420_v49, -inf }
 0x475   :  { %v2555_v57 = vsel %vm2363_vm0, %v2540_v53, -inf }
 0x476   :  { %2556 = vmax.xlane.f32.xlu1 %v2555_v57 }
 0x478   :  { %2559 = vmax.xlane.f32.xlu0 %v2558_v59 }
 0x479   :  { %v13426_v62 = vpop.f32.mrb[24].mxu0 }
 0x47a   :  { %v13430_v35 = vpop.f32.mrb[25].mxu0  ;;  %2562 = vmax.xlane.f32.xlu1 %v2561_v46  ;;  %v2746_v13 = vsel %vm2363_vm0, %v13426_v62, -inf }
 0x47b   :  { %v13432_v1 = vpop.f32.mrb[26].mxu0  ;;  %v2740_v48 = vsel %vm2363_vm0, %v13430_v35, -inf }
 0x47c   :  { %2741 = vmax.xlane.f32.xlu0 %v2740_v48  ;;  %v13436_v31 = vpop.f32.mrb[27].mxu0  ;;  %v2749_v20 = vsel %vm2363_vm0, %v13432_v1, -inf }
 0x47d   :  { %v2743_v12 = vsel %vm2363_vm0, %v13436_v31, -inf }
 0x47e   :  { %2744 = vmax.xlane.f32.xlu1 %v2743_v12 }
 0x480   :  { %2747 = vmax.xlane.f32.xlu0 %v2746_v13 }
 0x482   :  { %2750 = vmax.xlane.f32.xlu1 %v2749_v20 }
 0x485   :  { %v13444_v25 = vpop.f32.mrb[28].mxu0 }
 0x486   :  { %v13446_v15 = vpop.f32.mrb[29].mxu0  ;;  %v2934_v29 = vsel %vm2363_vm0, %v13444_v25, -inf }
 0x487   :  { %v13448_v23 = vpop.f32.mrb[30].mxu0  ;;  %v2928_v26 = vsel %vm2363_vm0, %v13446_v15, -inf }
 0x488   :  { %2929 = vmax.xlane.f32.xlu0 %v2928_v26  ;;  %v13452_v27 = vpop.f32.mrb[31].mxu0  ;;  %v2937_v22 = vsel %vm2363_vm0, %v13448_v23, -inf }
 0x489   :  { %v2931_v33 = vsel %vm2363_vm0, %v13452_v27, -inf }
 0x48a   :  { %2932 = vmax.xlane.f32.xlu1 %v2931_v33 }
 0x48c   :  { %2935 = vmax.xlane.f32.xlu0 %v2934_v29 }
 0x48e   :  { %2938 = vmax.xlane.f32.xlu1 %v2937_v22 }
 0x4f1   :  { %v2366_v30 = vpop.xlane.xlu0 %2365 }
 0x4f2   :  { %v2376_v14 = vsub.f32 %v2348_v34, %v2366_v30 }
 0x4f3   :  { %v2369_v7 = vpop.xlane.xlu1 %2368 }
 0x4f4   :  { %v2380_v9 = vmul.f32 1.442695, %v2376_v14  ;;  %v2377_v18 = vsub.f32 %v2351_v8, %v2369_v7 }
 0x4f5   :  { %v2372_v37 = vpop.xlane.xlu0 %2371 }
 0x4f6   :  { %v2382_v38 = vmul.f32 1.442695, %v2377_v18  ;;  %v2378_v10 = vsub.f32 %v11573_v60, %v2372_v37  ;;  %12381 = vpow2.f32 %v2380_v9 }
 0x4f8   :  { %12383 = vpow2.f32 %v2382_v38  ;;  %v2384_v24 = vmul.f32 1.442695, %v2378_v10 }
 0x4f9   :  { %v2375_v54 = vpop.xlane.xlu0 %2374 }
 0x4fa   :  { %12385 = vpow2.f32 %v2384_v24  ;;  %v2379_v39 = vsub.f32 %v11574_v2, %v2375_v54 }
 0x4fc   :  { %v2386_v28 = vmul.f32 1.442695, %v2379_v39 }
 0x4fe   :  { %12387 = vpow2.f32 %v2386_v28 }
 0x500   :  { %v12382_v55 = vpop.eup %12381 }
 0x501   :  { %v2554_v50 = vpop.xlane.xlu0 %2553  ;;  %v2388_v16 = vsel %vm2363_vm0, %v12382_v55, 0.0 }
 0x502   :  { %v12384_v56 = vpop.eup %12383  ;;  %v2564_v58 = vsub.f32 %v2537_v21, %v2554_v50  ;;  %v11799_v50 = vld [vmem:[#allocation15 + $0x4] ss:$16 sps:$4 sm:$0xff]  }
 0x503   :  { %v2557_v41 = vpop.xlane.xlu1 %2556  ;;  %v2400_v40 = vpack.c.bf16 %v12384_v56, %v12382_v55  ;;  %v2391_v46 = vsel %vm2363_vm0, %v12384_v56, 0.0  ;;  %v11797_v55 = vld [vmem:[#allocation15] ss:$16 sps:$4 sm:$0xff]   ;;  %3809 = vmatprep.subr.bf16.mxu0 %v11799_v50  ;;  %v11856_v50 = vld [vmem:[#allocation15 + $0x12c] ss:$16 sps:$4 sm:$0xff]  }
 0x504   :  { %v12386_v42 = vpop.eup %12385  ;;  %v2568_v6 = vmul.f32 1.442695, %v2564_v58  ;;  %v2565_v43 = vsub.f32 %v2540_v53, %v2557_v41  ;;  %3810 = vmatpush1.bf16.msra.mxu0 %v11797_v55  ;;  %v11848_v55 = vld [vmem:[#allocation15 + $0x108] ss:$16 sps:$4 sm:$0xff]  }
 0x505   :  { %v2560_v0 = vpop.xlane.xlu0 %2559  ;;  %11577 = vmatprep.mubr.msk.bf16.mxu1 %vm2363_vm0, %v2400_v40  ;;  %v2394_v32 = vsel %vm2363_vm0, %v12386_v42, 0.0 }
 0x506   :  { %v2570_v47 = vmul.f32 1.442695, %v2565_v43  ;;  %v2566_v60 = vsub.f32 %v13418_v19, %v2560_v0  ;;  %2395 = vadd.xlane.f32.xlu0 %v2394_v32  ;;  %12389 = vpow2.f32 %v2568_v6  ;;  %v11803_v6 = vld [vmem:[#allocation15 + $0x20] ss:$16 sps:$4 sm:$0xff]  }
 0x507   :  { %v2563_v34 = vpop.xlane.xlu1 %2562 }
 0x508   :  { %v12388_v2 = vpop.eup %12387  ;;  %12391 = vpow2.f32 %v2570_v47  ;;  %v2572_v63 = vmul.f32 1.442695, %v2566_v60  ;;  %v2567_v8 = vsub.f32 %v13420_v49, %v2563_v34 }
 0x509   :  { %v2401_v17 = vpack.c.bf16 %v12388_v2, %v12386_v42  ;;  %v2742_v36 = vpop.xlane.xlu0 %2741  ;;  %v2397_v21 = vsel %vm2363_vm0, %v12388_v2, 0.0  ;;  %v11802_v42 = vld [vmem:[#allocation15 + $0xc] ss:$16 sps:$4 sm:$0xff]  }
 0x50a   :  { %v2574_v52 = vmul.f32 1.442695, %v2567_v8  ;;  %v2752_v53 = vsub.f32 %v13430_v35, %v2742_v36  ;;  %2389 = vadd.xlane.f32.xlu0 %v2388_v16  ;;  %2398 = vadd.xlane.f32.xlu1 %v2397_v21  ;;  %12393 = vpow2.f32 %v2572_v63  ;;  %v11800_v8 = vld [vmem:[#allocation15 + $0x8] ss:$16 sps:$4 sm:$0xff]   ;;  %v11808_v16 = vld [vmem:[#allocation15 + $0x2c] ss:$16 sps:$4 sm:$0xff]  }
 0x50b   :  { %11578 = vmatmul.mubr.msk.bf16.vlgmr.msra.gmra.mrb[16].mxu1 %vm2363_vm0, %v2401_v17  ;;  %v2745_v19 = vpop.xlane.xlu1 %2744  ;;  %v11809_v21 = vld [vmem:[#allocation15 + $0x40] ss:$16 sps:$4 sm:$0xff]  }
 0x50c   :  { %12395 = vpow2.f32 %v2574_v52  ;;  %v2756_v57 = vmul.f32 1.442695, %v2752_v53  ;;  %11588 = vmatpush3.bf16.msra.mxu1 %v13271_v45  ;;  %v2753_v49 = vsub.f32 %v13436_v31, %v2745_v19  ;;  %v11811_v52 = vld [vmem:[#allocation15 + $0x44] ss:$16 sps:$4 sm:$0xff]   ;;  %v11806_v19 = vld [vmem:[#allocation15 + $0x28] ss:$16 sps:$4 sm:$0xff]  }
 0x50d   :  { %11599 = vmatprep.subr.bf16.mxu1 %v13290_v51  ;;  %v2748_v59 = vpop.xlane.xlu0 %2747 }
 0x50e   :  { %v2758_v48 = vmul.f32 1.442695, %v2753_v49  ;;  %v2754_v35 = vsub.f32 %v13426_v62, %v2748_v59  ;;  %2392 = vadd.xlane.f32.xlu1 %v2391_v46  ;;  %12397 = vpow2.f32 %v2756_v57  ;;  %v11814_v49 = vld [vmem:[#allocation15 + $0x4c] ss:$16 sps:$4 sm:$0xff]   ;;  %v11815_v59 = vld [vmem:[#allocation15 + $0x60] ss:$16 sps:$4 sm:$0xff]  }
 0x50f   :  { %v2751_v12 = vpop.xlane.xlu1 %2750  ;;  %v11817_v46 = vld [vmem:[#allocation15 + $0x64] ss:$16 sps:$4 sm:$0xff]  }
 0x510   :  { %12399 = vpow2.f32 %v2758_v48  ;;  %v2760_v13 = vmul.f32 1.442695, %v2754_v35  ;;  %v2755_v20 = vsub.f32 %v13432_v1, %v2751_v12  ;;  %v13474_v26 = vpop.eup %12389  ;;  %v11812_v35 = vld [vmem:[#allocation15 + $0x48] ss:$16 sps:$4 sm:$0xff]  }
 0x512   :  { %v13476_v45 = vpop.eup %12391  ;;  %12401 = vpow2.f32 %v2760_v13  ;;  %v2762_v31 = vmul.f32 1.442695, %v2755_v20  ;;  %v11820_v13 = vld [vmem:[#allocation15 + $0x6c] ss:$16 sps:$4 sm:$0xff]   ;;  %v11821_v20 = vld [vmem:[#allocation15 + $0x80] ss:$16 sps:$4 sm:$0xff]  }
 0x513   :  { %v2588_v33 = vpack.c.bf16 %v13476_v45, %v13474_v26  ;;  %v2579_v17 = vsel %vm2363_vm0, %v13476_v45, 0.0  ;;  %v11818_v45 = vld [vmem:[#allocation15 + $0x68] ss:$16 sps:$4 sm:$0xff]  }
 0x514   :  { %12403 = vpow2.f32 %v2762_v31  ;;  %v12394_v29 = vpop.eup %12393  ;;  %v11826_v31 = vld [vmem:[#allocation15 + $0x8c] ss:$16 sps:$4 sm:$0xff]  }
 0x515   :  { %v2930_v22 = vpop.xlane.xlu0 %2929  ;;  %11589 = vmatprep.mubr.msk.bf16.mxu1 %vm2363_vm0, %v2588_v33  ;;  %v2582_v32 = vsel %vm2363_vm0, %v12394_v29, 0.0  ;;  %v11827_v33 = vld [vmem:[#allocation15 + $0xa0] ss:$16 sps:$4 sm:$0xff]  }
 0x516   :  { %v12396_v62 = vpop.eup %12395  ;;  %v2940_v30 = vsub.f32 %v13446_v15, %v2930_v22  ;;  %v11824_v22 = vld [vmem:[#allocation15 + $0x88] ss:$16 sps:$4 sm:$0xff]  }
 0x517   :  { %v2933_v14 = vpop.xlane.xlu1 %2932  ;;  %v2589_v7 = vpack.c.bf16 %v12396_v62, %v12394_v29  ;;  %v2585_v60 = vsel %vm2363_vm0, %v12396_v62, 0.0  ;;  %v11829_v29 = vld [vmem:[#allocation15 + $0xa4] ss:$16 sps:$4 sm:$0xff]   ;;  %v11832_v62 = vld [vmem:[#allocation15 + $0xac] ss:$16 sps:$4 sm:$0xff]  }
 0x518   :  { %v2944_v1 = vmul.f32 1.442695, %v2940_v30  ;;  %v2941_v9 = vsub.f32 %v13452_v27, %v2933_v14  ;;  %v12398_v18 = vpop.eup %12397  ;;  %v11833_v30 = vld [vmem:[#allocation15 + $0xc0] ss:$16 sps:$4 sm:$0xff]   ;;  %v11835_v14 = vld [vmem:[#allocation15 + $0xc4] ss:$16 sps:$4 sm:$0xff]  }
 0x519   :  { %v2936_v37 = vpop.xlane.xlu0 %2935  ;;  %11590 = vmatmul.mubr.msk.bf16.vlgmr.msra.gmra.mrb[20].mxu1 %vm2363_vm0, %v2589_v7  ;;  %v11830_v7 = vld [vmem:[#allocation15 + $0xa8] ss:$16 sps:$4 sm:$0xff]  }
 0x51a   :  { %v12400_v38 = vpop.eup %12399  ;;  %v2946_v10 = vmul.f32 1.442695, %v2941_v9  ;;  %v2942_v24 = vsub.f32 %v13444_v25, %v2936_v37  ;;  %11600 = vmatpush3.bf16.msra.mxu1 %v13290_v51  ;;  %12405 = vpow2.f32 %v2944_v1  ;;  %v11805_v51 = vld [vmem:[#allocation15 + $0x24] ss:$16 sps:$4 sm:$0xff]   ;;  %v11838_v1 = vld [vmem:[#allocation15 + $0xcc] ss:$16 sps:$4 sm:$0xff]  }
 0x51b   :  { %11611 = vmatprep.subr.bf16.mxu1 %v13292_v44  ;;  %v2939_v54 = vpop.xlane.xlu1 %2938  ;;  %v2776_v15 = vpack.c.bf16 %v12400_v38, %v12398_v18  ;;  %3811 = vmatprep.subr.bf16.mxu0 %v11805_v51  ;;  %v2767_v43 = vsel %vm2363_vm0, %v12400_v38, 0.0  ;;  %v11839_v9 = vld [vmem:[#allocation15 + $0xe0] ss:$16 sps:$4 sm:$0xff]   ;;  %v11836_v37 = vld [vmem:[#allocation15 + $0xc8] ss:$16 sps:$4 sm:$0xff]  }
 0x51c   :  { %v12402_v39 = vpop.eup %12401  ;;  %12407 = vpow2.f32 %v2946_v10  ;;  %v2948_v28 = vmul.f32 1.442695, %v2942_v24  ;;  %v2943_v27 = vsub.f32 %v13448_v23, %v2939_v54  ;;  %v2764_v23 = vsel %vm2363_vm0, %v12398_v18, 0.0  ;;  %3812 = vmatpush1.bf16.msra.mxu0 %v11803_v6  ;;  %v11841_v18 = vld [vmem:[#allocation15 + $0xe4] ss:$16 sps:$4 sm:$0xff]  }
 0x51d   :  { %11601 = vmatprep.mubr.msk.bf16.mxu1 %vm2363_vm0, %v2776_v15  ;;  %v2770_v56 = vsel %vm2363_vm0, %v12402_v39, 0.0  ;;  %3813 = vmatprep.subr.bf16.mxu0 %v11811_v52  ;;  %v11847_v38 = vld [vmem:[#allocation15 + $0x104] ss:$16 sps:$4 sm:$0xff]   ;;  %v11844_v10 = vld [vmem:[#allocation15 + $0xec] ss:$16 sps:$4 sm:$0xff]  }
 0x51e   :  { %v12404_v58 = vpop.eup %12403  ;;  %v2950_v25 = vmul.f32 1.442695, %v2943_v27  ;;  %2771 = vadd.xlane.f32.xlu0 %v2770_v56  ;;  %12409 = vpow2.f32 %v2948_v28  ;;  %v11845_v24 = vld [vmem:[#allocation15 + $0x100] ss:$16 sps:$4 sm:$0xff]   ;;  %v11853_v54 = vld [vmem:[#allocation15 + $0x124] ss:$16 sps:$4 sm:$0xff]  }
 0x51f   :  { %v2773_v41 = vsel %vm2363_vm0, %v12404_v58, 0.0  ;;  %v2777_v40 = vpack.c.bf16 %v12404_v58, %v12402_v39  ;;  %v11842_v15 = vld [vmem:[#allocation15 + $0xe8] ss:$16 sps:$4 sm:$0xff]   ;;  %v11850_v39 = vld [vmem:[#allocation15 + $0x10c] ss:$16 sps:$4 sm:$0xff]  }
 0x520   :  { %12411 = vpow2.f32 %v2950_v25  ;;  %2774 = vadd.xlane.f32.xlu1 %v2773_v41  ;;  %3814 = vmatpush1.bf16.msra.mxu0 %v11809_v21  ;;  %v11851_v28 = vld [vmem:[#allocation15 + $0x120] ss:$16 sps:$4 sm:$0xff]   ;;  %v11859_v27 = vld [vmem:[#allocation15 + $0x144] ss:$16 sps:$4 sm:$0xff]   ;;  %v11854_v25 = vld [vmem:[#allocation15 + $0x128] ss:$16 sps:$4 sm:$0xff]  }
 0x521   :  { %11602 = vmatmul.mubr.msk.bf16.vlgmr.msra.gmra.mrb[24].mxu1 %vm2363_vm0, %v2777_v40  ;;  %3815 = vmatprep.subr.bf16.mxu0 %v11817_v46  ;;  %v11857_v56 = vld [vmem:[#allocation15 + $0x140] ss:$16 sps:$4 sm:$0xff]   ;;  %v11865_v58 = vld [vmem:[#allocation15 + $0x164] ss:$16 sps:$4 sm:$0xff]   ;;  %v11862_v51 = vld [vmem:[#allocation15 + $0x14c] ss:$16 sps:$4 sm:$0xff]  }
 0x522   :  { %11612 = vmatpush3.bf16.msra.mxu1 %v13292_v44  ;;  %2765 = vadd.xlane.f32.xlu0 %v2764_v23  ;;  %v2576_v44 = vsel %vm2363_vm0, %v13474_v26, 0.0  ;;  %v11823_v26 = vld [vmem:[#allocation15 + $0x84] ss:$16 sps:$4 sm:$0xff]   ;;  %v11863_v41 = vld [vmem:[#allocation15 + $0x160] ss:$16 sps:$4 sm:$0xff]  }
 0x523   :  { %3915 = vmatprep.subr.bf16.mxu1 %v11802_v42  ;;  %v11871_v40 = vld [vmem:[#allocation15 + $0x184] ss:$16 sps:$4 sm:$0xff]   ;;  %v11860_v42 = vld [vmem:[#allocation15 + $0x148] ss:$16 sps:$4 sm:$0xff]   ;;  %v11868_v6 = vld [vmem:[#allocation15 + $0x16c] ss:$16 sps:$4 sm:$0xff]  }
 0x524   :  { %2768 = vadd.xlane.f32.xlu1 %v2767_v43  ;;  %v12406_v0 = vpop.eup %12405  ;;  %3816 = vmatpush1.bf16.msra.mxu0 %v11815_v59  ;;  %v11869_v23 = vld [vmem:[#allocation15 + $0x180] ss:$16 sps:$4 sm:$0xff]   ;;  %v11877_v43 = vld [vmem:[#allocation15 + $0x1a4] ss:$16 sps:$4 sm:$0xff]   ;;  %v11892_v21 = vld [vmem:[#allocation15 + $0x1ec] ss:$16 sps:$4 sm:$0xff]  }
 0x525   :  { %v2952_v48 = vsel %vm2363_vm0, %v12406_v0, 0.0  ;;  %3817 = vmatprep.subr.bf16.mxu0 %v11823_v26  ;;  %v11895_v52 = vld [vmem:[#allocation15 + $0x204] ss:$16 sps:$4 sm:$0xff]  }
 0x526   :  { %v12408_v47 = vpop.eup %12407  ;;  %2583 = vadd.xlane.f32.xlu0 %v2582_v32  ;;  %v11874_v32 = vld [vmem:[#allocation15 + $0x18c] ss:$16 sps:$4 sm:$0xff]  }
 0x527   :  { %v2964_v34 = vpack.c.bf16 %v12408_v47, %v12406_v0  ;;  %v2955_v12 = vsel %vm2363_vm0, %v12408_v47, 0.0  ;;  %v11866_v0 = vld [vmem:[#allocation15 + $0x168] ss:$16 sps:$4 sm:$0xff]   ;;  %v11875_v47 = vld [vmem:[#allocation15 + $0x1a0] ss:$16 sps:$4 sm:$0xff]  }
 0x528   :  { %2586 = vadd.xlane.f32.xlu1 %v2585_v60  ;;  %v12410_v2 = vpop.eup %12409  ;;  %3818 = vmatpush1.bf16.msra.mxu0 %v11821_v20  ;;  %v11883_v60 = vld [vmem:[#allocation15 + $0x1c4] ss:$16 sps:$4 sm:$0xff]  }
 0x529   :  { %11613 = vmatprep.mubr.msk.bf16.mxu1 %vm2363_vm0, %v2964_v34  ;;  %v2958_v53 = vsel %vm2363_vm0, %v12410_v2, 0.0  ;;  %3819 = vmatprep.subr.bf16.mxu0 %v11829_v29  ;;  %v11872_v34 = vld [vmem:[#allocation15 + $0x188] ss:$16 sps:$4 sm:$0xff]  }
 0x52a   :  { %v12412_v63 = vpop.eup %12411  ;;  %2577 = vadd.xlane.f32.xlu0 %v2576_v44  ;;  %v11881_v44 = vld [vmem:[#allocation15 + $0x1c0] ss:$16 sps:$4 sm:$0xff]  }
 0x52b   :  { %v2965_v36 = vpack.c.bf16 %v12412_v63, %v12410_v2  ;;  %v2961_v57 = vsel %vm2363_vm0, %v12412_v63, 0.0  ;;  %v11880_v2 = vld [vmem:[#allocation15 + $0x1ac] ss:$16 sps:$4 sm:$0xff]   ;;  %v11878_v63 = vld [vmem:[#allocation15 + $0x1a8] ss:$16 sps:$4 sm:$0xff]  }
 0x52c   :  { %2580 = vadd.xlane.f32.xlu1 %v2579_v17  ;;  %3820 = vmatpush1.bf16.msra.mxu0 %v11827_v33  ;;  %v11889_v17 = vld [vmem:[#allocation15 + $0x1e4] ss:$16 sps:$4 sm:$0xff]  }
 0x52d   :  { %11614 = vmatmul.mubr.msk.bf16.vlgmr.msra.gmra.mrb[28].mxu1 %vm2363_vm0, %v2965_v36  ;;  %3821 = vmatprep.subr.bf16.mxu0 %v11835_v14  ;;  %v11887_v36 = vld [vmem:[#allocation15 + $0x1e0] ss:$16 sps:$4 sm:$0xff]  }
 0x52e   :  { %2959 = vadd.xlane.f32.xlu0 %v2958_v53  ;;  %3916 = vmatpush1.bf16.msra.mxu1 %v11800_v8  ;;  %v11886_v8 = vld [vmem:[#allocation15 + $0x1cc] ss:$16 sps:$4 sm:$0xff]   ;;  %v11890_v53 = vld [vmem:[#allocation15 + $0x1e8] ss:$16 sps:$4 sm:$0xff]  }
 0x52f   :  { %3917 = vmatprep.subr.bf16.mxu1 %v11808_v16  ;;  %v11884_v16 = vld [vmem:[#allocation15 + $0x1c8] ss:$16 sps:$4 sm:$0xff]  }
 0x530   :  { %2962 = vadd.xlane.f32.xlu1 %v2961_v57  ;;  %3822 = vmatpush1.bf16.msra.mxu0 %v11833_v30 }
 0x531   :  { %3823 = vmatprep.subr.bf16.mxu0 %v11841_v18 }
 0x532   :  { %2953 = vadd.xlane.f32.xlu0 %v2952_v48  ;;  %3918 = vmatpush1.bf16.msra.mxu1 %v11806_v19  ;;  %v11898_v19 = vld [vmem:[#allocation15 + $0x20c] ss:$16 sps:$4 sm:$0xff]  }
 0x533   :  { %3919 = vmatprep.subr.bf16.mxu1 %v11814_v49 }
 0x534   :  { %2956 = vadd.xlane.f32.xlu1 %v2955_v12  ;;  %3824 = vmatpush1.bf16.msra.mxu0 %v11839_v9 }
 0x535   :  { %3825 = vmatprep.subr.bf16.mxu0 %v11847_v38 }
 0x536   :  { %3920 = vmatpush1.bf16.msra.mxu1 %v11812_v35 }
 0x537   :  { %3921 = vmatprep.subr.bf16.mxu1 %v11820_v13 }
 0x538   :  { %3826 = vmatpush1.bf16.msra.mxu0 %v11845_v24  ;;  %v11893_v24 = vld [vmem:[#allocation15 + $0x200] ss:$16 sps:$4 sm:$0xff]  }
 0x539   :  { %3827 = vmatprep.subr.bf16.mxu0 %v11853_v54  ;;  %v11896_v54 = vld [vmem:[#allocation15 + $0x208] ss:$16 sps:$4 sm:$0xff]  }
 0x53a   :  { %3922 = vmatpush1.bf16.msra.mxu1 %v11818_v45 }
 0x53b   :  { %3923 = vmatprep.subr.bf16.mxu1 %v11826_v31 }
 0x53c   :  { %3828 = vmatpush1.bf16.msra.mxu0 %v11851_v28  ;;  %v11904_v28 = vld [vmem:[#allocation15 + $0x22c] ss:$16 sps:$4 sm:$0xff]  }
 0x53d   :  { %3829 = vmatprep.subr.bf16.mxu0 %v11859_v27  ;;  %v11899_v27 = vld [vmem:[#allocation15 + $0x220] ss:$16 sps:$4 sm:$0xff]  }
 0x53e   :  { %3924 = vmatpush1.bf16.msra.mxu1 %v11824_v22 }
 0x53f   :  { %3925 = vmatprep.subr.bf16.mxu1 %v11832_v62 }
 0x540   :  { %3830 = vmatpush1.bf16.msra.mxu0 %v11857_v56  ;;  %v11910_v56 = vld [vmem:[#allocation15 + $0x24c] ss:$16 sps:$4 sm:$0xff]  }
 0x541   :  { %3831 = vmatprep.subr.bf16.mxu0 %v11865_v58  ;;  %v11905_v58 = vld [vmem:[#allocation15 + $0x240] ss:$16 sps:$4 sm:$0xff]  }
 0x542   :  { %3926 = vmatpush1.bf16.msra.mxu1 %v11830_v7 }
 0x543   :  { %3927 = vmatprep.subr.bf16.mxu1 %v11838_v1 }
 0x544   :  { %3832 = vmatpush1.bf16.msra.mxu0 %v11863_v41 }
 0x545   :  { %3833 = vmatprep.subr.bf16.mxu0 %v11871_v40  ;;  %v11913_v40 = vld [vmem:[#allocation15 + $0x264] ss:$16 sps:$4 sm:$0xff]  }
 0x546   :  { %3928 = vmatpush1.bf16.msra.mxu1 %v11836_v37 }
 0x547   :  { %3929 = vmatprep.subr.bf16.mxu1 %v11844_v10 }
 0x548   :  { %3834 = vmatpush1.bf16.msra.mxu0 %v11869_v23 }
 0x549   :  { %3835 = vmatprep.subr.bf16.mxu0 %v11877_v43 }
 0x54a   :  { %3930 = vmatpush1.bf16.msra.mxu1 %v11842_v15 }
 0x54b   :  { %3931 = vmatprep.subr.bf16.mxu1 %v11850_v39  ;;  %v11901_v39 = vld [vmem:[#allocation15 + $0x224] ss:$16 sps:$4 sm:$0xff]  }
 0x54c   :  { %3836 = vmatpush1.bf16.msra.mxu0 %v11875_v47 }
 0x54d   :  { %3837 = vmatprep.subr.bf16.mxu0 %v11883_v60 }
 0x54e   :  { %3932 = vmatpush1.bf16.msra.mxu1 %v11848_v55  ;;  %v11902_v55 = vld [vmem:[#allocation15 + $0x228] ss:$16 sps:$4 sm:$0xff]  }
 0x54f   :  { %3933 = vmatprep.subr.bf16.mxu1 %v11856_v50  ;;  %v11907_v50 = vld [vmem:[#allocation15 + $0x244] ss:$16 sps:$4 sm:$0xff]  }
 0x550   :  { %3838 = vmatpush1.bf16.msra.mxu0 %v11881_v44  ;;  %v11911_v44 = vld [vmem:[#allocation15 + $0x260] ss:$16 sps:$4 sm:$0xff]  }
 0x551   :  { %3839 = vmatprep.subr.bf16.mxu0 %v11889_v17 }
 0x552   :  { %3934 = vmatpush1.bf16.msra.mxu1 %v11854_v25  ;;  %v11908_v25 = vld [vmem:[#allocation15 + $0x248] ss:$16 sps:$4 sm:$0xff]  }
 0x553   :  { %3935 = vmatprep.subr.bf16.mxu1 %v11862_v51 }
 0x554   :  { %3840 = vmatpush1.bf16.msra.mxu0 %v11887_v36 }
 0x555   :  { %3862 = vmatprep.subr.bf16.mxu0 %v11895_v52 }
 0x556   :  { %3936 = vmatpush1.bf16.msra.mxu1 %v11860_v42  ;;  %v11916_v42 = vld [vmem:[#allocation15 + $0x26c] ss:$16 sps:$4 sm:$0xff]  }
 0x557   :  { %3937 = vmatprep.subr.bf16.mxu1 %v11868_v6 }
 0x55a   :  { %3938 = vmatpush1.bf16.msra.mxu1 %v11866_v0 }
 0x55b   :  { %3939 = vmatprep.subr.bf16.mxu1 %v11874_v32 }
 0x55e   :  { %3940 = vmatpush1.bf16.msra.mxu1 %v11872_v34 }
 0x55f   :  { %3941 = vmatprep.subr.bf16.mxu1 %v11880_v2 }
 0x562   :  { %3942 = vmatpush1.bf16.msra.mxu1 %v11878_v63  ;;  %v11914_v63 = vld [vmem:[#allocation15 + $0x268] ss:$16 sps:$4 sm:$0xff]  }
 0x563   :  { %3943 = vmatprep.subr.bf16.mxu1 %v11886_v8 }
 0x566   :  { %3944 = vmatpush1.bf16.msra.mxu1 %v11884_v16  ;;  %v11919_v16 = vld [vmem:[#allocation15 + $0x284] ss:$16 sps:$4 sm:$0xff]  }
 0x567   :  { %3945 = vmatprep.subr.bf16.mxu1 %v11892_v21  ;;  %v11922_v21 = vld [vmem:[#allocation15 + $0x28c] ss:$16 sps:$4 sm:$0xff]  }
 0x56a   :  { %3946 = vmatpush1.bf16.msra.mxu1 %v11890_v53 }
 0x56b   :  { %3968 = vmatprep.subr.bf16.mxu1 %v11898_v19  ;;  %v11917_v19 = vld [vmem:[#allocation15 + $0x280] ss:$16 sps:$4 sm:$0xff]  }
 0x593   :  { %v2396_v57 = vpop.xlane.xlu0 %2395 }
 0x594   :  { %12413 = vrcp.f32 %v2396_v57  ;;  %v11920_v57 = vld [vmem:[#allocation15 + $0x288] ss:$16 sps:$4 sm:$0xff]  }
 0x597   :  { %v2399_v49 = vpop.xlane.xlu1 %2398  ;;  %v2390_v59 = vpop.xlane.xlu0 %2389 }
 0x598   :  { %12415 = vrcp.f32 %v2390_v59 }
 0x599   :  { %12417 = vrcp.f32 %v2399_v49 }
 0x59b   :  { %v2393_v46 = vpop.xlane.xlu1 %2392 }
 0x59c   :  { %12419 = vrcp.f32 %v2393_v46  ;;  %v11925_v46 = vld [vmem:[#allocation15 + $0x2a4] ss:$16 sps:$4 sm:$0xff]  }
 0x59e   :  { %v12414_v45 = vpop.eup %12413 }
 0x5a2   :  { %v12416_v33 = vpop.eup %12415 }
 0x5a3   :  { %v12418_v22 = vpop.eup %12417 }
 0x5a6   :  { %v12420_v30 = vpop.eup %12419 }
 0x5ab   :  { %v2772_v48 = vpop.xlane.xlu0 %2771 }
 0x5ad   :  { %v2775_v35 = vpop.xlane.xlu1 %2774 }
 0x5af   :  { %v2766_v12 = vpop.xlane.xlu0 %2765 }
 0x5b1   :  { %v2769_v13 = vpop.xlane.xlu1 %2768 }
 0x5b3   :  { %v2584_v20 = vpop.xlane.xlu0 %2583 }
 0x5b4   :  { %12421 = vrcp.f32 %v2584_v20 }
 0x5b5   :  { %v2587_v26 = vpop.xlane.xlu1 %2586 }
 0x5b6   :  { %12423 = vrcp.f32 %v2587_v26 }
 0x5b7   :  { %v2578_v14 = vpop.xlane.xlu0 %2577 }
 0x5b8   :  { %12425 = vrcp.f32 %v2578_v14 }
 0x5b9   :  { %v2581_v18 = vpop.xlane.xlu1 %2580 }
 0x5ba   :  { %12427 = vrcp.f32 %v2581_v18  ;;  %v11931_v18 = vld [vmem:[#allocation15 + $0x2c4] ss:$16 sps:$4 sm:$0xff]  }
 0x5bb   :  { %12429 = vrcp.f32 %v2772_v48  ;;  %v2960_v47 = vpop.xlane.xlu0 %2959  ;;  %v11928_v48 = vld [vmem:[#allocation15 + $0x2ac] ss:$16 sps:$4 sm:$0xff]  }
 0x5bc   :  { %12431 = vrcp.f32 %v2775_v35 }
 0x5bd   :  { %12433 = vrcp.f32 %v2766_v12  ;;  %v2963_v8 = vpop.xlane.xlu1 %2962 }
 0x5be   :  { %v12422_v51 = vpop.eup %12421  ;;  %12435 = vrcp.f32 %v2769_v13 }
 0x5bf   :  { %v2954_v12 = vpop.xlane.xlu0 %2953  ;;  %12437 = vrcp.f32 %v2960_v47 }
 0x5c0   :  { %v12424_v6 = vpop.eup %12423  ;;  %12439 = vrcp.f32 %v2963_v8  ;;  %v11955_v8 = vld [vmem:[#allocation15 + $0x344] ss:$16 sps:$4 sm:$0xff]  }
 0x5c1   :  { %v2957_v26 = vpop.xlane.xlu1 %2956  ;;  %12441 = vrcp.f32 %v2954_v12  ;;  %v11976_v12 = vld [vmem:[#allocation15 + $0x3ac] ss:$16 sps:$4 sm:$0xff]  }
 0x5c2   :  { %v12426_v43 = vpop.eup %12425  ;;  %12443 = vrcp.f32 %v2957_v26  ;;  %v11979_v26 = vld [vmem:[#allocation15 + $0x3c4] ss:$16 sps:$4 sm:$0xff]  }
 0x5c4   :  { %v12428_v32 = vpop.eup %12427 }
 0x5c5   :  { %v12430_v49 = vpop.eup %12429 }
 0x5c6   :  { %v12432_v35 = vpop.eup %12431 }
 0x5c7   :  { %v12434_v20 = vpop.eup %12433 }
 0x5de   :  { %v11579_v31 = vpop.f32.mrb[16].mxu1 }
 0x5df   :  { %v2442_v29 = vpop.f32.mrb[17].mxu1  ;;  %v2463_v7 = vmul.f32 %v12414_v45, %v11579_v31  ;;  %v12436_v31 = vpop.eup %12435 }
 0x5e0   :  { %v11580_v62 = vpop.f32.mrb[18].mxu1  ;;  %v2461_v37 = vmul.f32 %v12416_v33, %v2442_v29 }
 0x5e1   :  { %v2464_v1 = vmul.f32 %v12418_v22, %v11580_v62  ;;  %v2445_v9 = vpop.f32.mrb[19].mxu1  ;;  %v11923_v62 = vld [vmem:[#allocation15 + $0x2a0] ss:$16 sps:$4 sm:$0xff]  }
 0x5e2   :  { %v2462_v38 = vmul.f32 %v12420_v30, %v2445_v9  ;;  %v11926_v30 = vld [vmem:[#allocation15 + $0x2a8] ss:$16 sps:$4 sm:$0xff]  }
 0x5e3   :  { %v2467_v10 = vpack.c.bf16 %v2464_v1, %v2463_v7 }
 0x5e4   :  { %v2465_v15 = vpack.c.bf16 %v2462_v38, %v2461_v37  ;;  %v11934_v37 = vld [vmem:[#allocation15 + $0x2cc] ss:$16 sps:$4 sm:$0xff]   ;;  %v11929_v38 = vld [vmem:[#allocation15 + $0x2c0] ss:$16 sps:$4 sm:$0xff]  }
 0x5e5   :  { %3841 = vmatprep.mubr.bf16.mxu0 %v2467_v10  ;;  %3947 = vmatprep.mubr.bf16.mxu1 %v2467_v10  ;;  %v11932_v10 = vld [vmem:[#allocation15 + $0x2c8] ss:$16 sps:$4 sm:$0xff]  }
 0x5e6   :  { %3842 = vmatmul.mubr.bf16.vlgmr.msra.gmra.mrb[32].mxu0 %v2465_v15  ;;  %3948 = vmatmul.mubr.bf16.vlgmr.msra.gmra.mrb[32].mxu1 %v2465_v15  ;;  %v12438_v15 = vpop.eup %12437 }
 0x5e7   :  { %3863 = vmatpush1.bf16.msra.mxu0 %v11893_v24  ;;  %3969 = vmatpush1.bf16.msra.mxu1 %v11896_v54  ;;  %v11937_v24 = vld [vmem:[#allocation15 + $0x2e4] ss:$16 sps:$4 sm:$0xff]   ;;  %v11940_v54 = vld [vmem:[#allocation15 + $0x2ec] ss:$16 sps:$4 sm:$0xff]  }
 0x5e8   :  { %3864 = vmatprep.subr.bf16.mxu0 %v11901_v39  ;;  %3970 = vmatprep.subr.bf16.mxu1 %v11904_v28  ;;  %v11935_v28 = vld [vmem:[#allocation15 + $0x2e0] ss:$16 sps:$4 sm:$0xff]  }
 0x5eb   :  { %3865 = vmatpush1.bf16.msra.mxu0 %v11899_v27  ;;  %3971 = vmatpush1.bf16.msra.mxu1 %v11902_v55  ;;  %v11938_v27 = vld [vmem:[#allocation15 + $0x2e8] ss:$16 sps:$4 sm:$0xff]   ;;  %v12440_v55 = vpop.eup %12439 }
 0x5ec   :  { %v11591_v41 = vpop.f32.mrb[20].mxu1  ;;  %3866 = vmatprep.subr.bf16.mxu0 %v11907_v50  ;;  %3972 = vmatprep.subr.bf16.mxu1 %v11910_v56  ;;  %v11943_v56 = vld [vmem:[#allocation15 + $0x304] ss:$16 sps:$4 sm:$0xff]  }
 0x5ed   :  { %v2630_v23 = vpop.f32.mrb[21].mxu1  ;;  %v2651_v60 = vmul.f32 %v12422_v51, %v11591_v41 }
 0x5ee   :  { %v11592_v0 = vpop.f32.mrb[22].mxu1  ;;  %v2649_v17 = vmul.f32 %v12426_v43, %v2630_v23 }
 0x5ef   :  { %v2652_v34 = vmul.f32 %v12424_v6, %v11592_v0  ;;  %3867 = vmatpush1.bf16.msra.mxu0 %v11905_v58  ;;  %3973 = vmatpush1.bf16.msra.mxu1 %v11908_v25  ;;  %v2633_v2 = vpop.f32.mrb[23].mxu1  ;;  %v11946_v58 = vld [vmem:[#allocation15 + $0x30c] ss:$16 sps:$4 sm:$0xff]   ;;  %v12442_v25 = vpop.eup %12441  ;;  %v11941_v0 = vld [vmem:[#allocation15 + $0x300] ss:$16 sps:$4 sm:$0xff]  }
 0x5f0   :  { %v2650_v36 = vmul.f32 %v12428_v32, %v2633_v2  ;;  %3868 = vmatprep.subr.bf16.mxu0 %v11913_v40  ;;  %3974 = vmatprep.subr.bf16.mxu1 %v11916_v42  ;;  %v12444_v41 = vpop.eup %12443  ;;  %v11944_v32 = vld [vmem:[#allocation15 + $0x308] ss:$16 sps:$4 sm:$0xff]  }
 0x5f1   :  { %v2655_v52 = vpack.c.bf16 %v2652_v34, %v2651_v60  ;;  %v11949_v60 = vld [vmem:[#allocation15 + $0x324] ss:$16 sps:$4 sm:$0xff]   ;;  %v11952_v34 = vld [vmem:[#allocation15 + $0x32c] ss:$16 sps:$4 sm:$0xff]  }
 0x5f2   :  { %v13507_v53 = vpack.c.bf16 %v2650_v36, %v2649_v17  ;;  %v11958_v17 = vld [vmem:[#allocation15 + $0x34c] ss:$16 sps:$4 sm:$0xff]   ;;  %v11953_v36 = vld [vmem:[#allocation15 + $0x340] ss:$16 sps:$4 sm:$0xff]  }
 0x5f3   :  { %3869 = vmatpush1.bf16.msra.mxu0 %v11911_v44  ;;  %3975 = vmatpush1.bf16.msra.mxu1 %v11914_v63  ;;  %v11947_v44 = vld [vmem:[#allocation15 + $0x320] ss:$16 sps:$4 sm:$0xff]   ;;  %v11950_v63 = vld [vmem:[#allocation15 + $0x328] ss:$16 sps:$4 sm:$0xff]  }
 0x5f4   :  { %v11603_v59 = vpop.f32.mrb[24].mxu1  ;;  %3870 = vmatprep.subr.bf16.mxu0 %v11919_v16  ;;  %3976 = vmatprep.subr.bf16.mxu1 %v11922_v21  ;;  %v11956_v16 = vld [vmem:[#allocation15 + $0x348] ss:$16 sps:$4 sm:$0xff]   ;;  %v11961_v21 = vld [vmem:[#allocation15 + $0x364] ss:$16 sps:$4 sm:$0xff]  }
 0x5f5   :  { %v2818_v13 = vpop.f32.mrb[25].mxu1  ;;  %v2839_v33 = vmul.f32 %v12430_v49, %v11603_v59  ;;  %v11967_v49 = vld [vmem:[#allocation15 + $0x384] ss:$16 sps:$4 sm:$0xff]   ;;  %v11970_v59 = vld [vmem:[#allocation15 + $0x38c] ss:$16 sps:$4 sm:$0xff]  }
 0x5f6   :  { %v11604_v45 = vpop.f32.mrb[26].mxu1  ;;  %v2837_v14 = vmul.f32 %v12434_v20, %v2818_v13  ;;  %v11971_v13 = vld [vmem:[#allocation15 + $0x3a0] ss:$16 sps:$4 sm:$0xff]   ;;  %v11974_v20 = vld [vmem:[#allocation15 + $0x3a8] ss:$16 sps:$4 sm:$0xff]  }
 0x5f7   :  { %v2840_v29 = vmul.f32 %v12432_v35, %v11604_v45  ;;  %3871 = vmatpush1.bf16.msra.mxu0 %v11917_v19  ;;  %3977 = vmatpush1.bf16.msra.mxu1 %v11920_v57  ;;  %v2821_v22 = vpop.f32.mrb[27].mxu1  ;;  %v11959_v19 = vld [vmem:[#allocation15 + $0x360] ss:$16 sps:$4 sm:$0xff]   ;;  %v11962_v57 = vld [vmem:[#allocation15 + $0x368] ss:$16 sps:$4 sm:$0xff]  }
 0x5f8   :  { %v2838_v7 = vmul.f32 %v12436_v31, %v2821_v22  ;;  %3872 = vmatprep.subr.bf16.mxu0 %v11925_v46  ;;  %3978 = vmatprep.subr.bf16.mxu1 %v11928_v48  ;;  %v11965_v46 = vld [vmem:[#allocation15 + $0x380] ss:$16 sps:$4 sm:$0xff]   ;;  %v11968_v48 = vld [vmem:[#allocation15 + $0x388] ss:$16 sps:$4 sm:$0xff]   ;;  %v11973_v35 = vld [vmem:[#allocation15 + $0x3a4] ss:$16 sps:$4 sm:$0xff]  }
 0x5f9   :  { %v2843_v1 = vpack.c.bf16 %v2840_v29, %v2839_v33  ;;  %v11982_v45 = vld [vmem:[#allocation15 + $0x3cc] ss:$16 sps:$4 sm:$0xff]   ;;  %v11977_v31 = vld [vmem:[#allocation15 + $0x3c0] ss:$16 sps:$4 sm:$0xff]   ;;  %v11980_v33 = vld [vmem:[#allocation15 + $0x3c8] ss:$16 sps:$4 sm:$0xff]  }
 0x5fa   :  { %v2841_v9 = vpack.c.bf16 %v2838_v7, %v2837_v14  ;;  %v11985_v29 = vld [vmem:[#allocation15 + $0x3e4] ss:$16 sps:$4 sm:$0xff]   ;;  %v11988_v22 = vld [vmem:[#allocation15 + $0x3ec] ss:$16 sps:$4 sm:$0xff]  }
 0x5fb   :  { %3873 = vmatpush1.bf16.msra.mxu0 %v11923_v62  ;;  %3979 = vmatpush1.bf16.msra.mxu1 %v11926_v30  ;;  %v11983_v62 = vld [vmem:[#allocation15 + $0x3e0] ss:$16 sps:$4 sm:$0xff]   ;;  %v11986_v30 = vld [vmem:[#allocation15 + $0x3e8] ss:$16 sps:$4 sm:$0xff]  }
 0x5fc   :  { %3851 = vmatprep.mubr.bf16.mxu0 %v2843_v1  ;;  %3957 = vmatprep.mubr.bf16.mxu1 %v2843_v1  ;;  %v4147_v14 = vld [vmem:[#allocation18] sm:$0xff]  ;;  %v4148_v1 = vld [vmem:[#allocation18 + $0x8] sm:$0xff] }
 0x5fd   :  { %3852 = vmatmul.mubr.bf16.gmra.mrb[36].mxu0 %v2841_v9  ;;  %3958 = vmatmul.mubr.bf16.gmra.mrb[36].mxu1 %v2841_v9  ;;  %v4155_v7 = vld [vmem:[#allocation18 + $0x40] sm:$0xff] }
 0x5fe   :  { %3874 = vmatprep.subr.bf16.mxu0 %v11931_v18  ;;  %3894 = vmatprep.mubr.bf16.mxu0 %v2655_v52  ;;  %v10745_v9 = vcombine.low %v4147_v14, %v4155_v7  ;;  %v10746_v18 = vcombine.high %v4147_v14, %v4155_v7 }
 0x5ff   :  { %3980 = vmatprep.subr.bf16.mxu1 %v11934_v37  ;;  %4000 = vmatprep.mubr.bf16.mxu1 %v2655_v52  ;;  %v11964_v52 = vld [vmem:[#allocation15 + $0x36c] ss:$16 sps:$4 sm:$0xff]  }
 0x600   :  { %3875 = vmatpush1.bf16.msra.mxu0 %v11929_v38  ;;  %3981 = vmatpush1.bf16.msra.mxu1 %v11932_v10  ;;  %v11615_v39 = vpop.f32.mrb[28].mxu1  ;;  %v4156_v37 = vld [vmem:[#allocation18 + $0x48] sm:$0xff]  ;;  %v4163_v38 = vld [vmem:[#allocation18 + $0x80] sm:$0xff] }
 0x601   :  { %v3006_v50 = vpop.f32.mrb[29].mxu1  ;;  %3876 = vmatprep.subr.bf16.mxu0 %v11937_v24  ;;  %3982 = vmatprep.subr.bf16.mxu1 %v11940_v54  ;;  %v3027_v40 = vmul.f32 %v12438_v15, %v11615_v39  ;;  %v4171_v10 = vld [vmem:[#allocation18 + $0xc0] sm:$0xff]  ;;  %v10747_v24 = vcombine.low %v4148_v1, %v4156_v37  ;;  %v10748_v54 = vcombine.high %v4148_v1, %v4156_v37  ;;  %v4164_v39 = vld [vmem:[#allocation18 + $0x88] sm:$0xff] }
 0x602   :  { %v11616_v51 = vpop.f32.mrb[30].mxu1  ;;  %v3025_v23 = vmul.f32 %v12442_v25, %v3006_v50  ;;  %v10762_v15 = vcombine.high %v4163_v38, %v4171_v10  ;;  %v4180_v50 = vld [vmem:[#allocation18 + $0x108] sm:$0xff] }
 0x603   :  { %v3028_v42 = vmul.f32 %v12440_v55, %v11616_v51  ;;  %v3009_v6 = vpop.f32.mrb[31].mxu1  ;;  %v4187_v55 = vld [vmem:[#allocation18 + $0x140] sm:$0xff]  ;;  %v4276_v37 = vld [vmem:[#allocation18 + $0x408] sm:$0xff] }
 0x604   :  { %3877 = vmatpush1.bf16.msra.mxu0 %v11935_v28  ;;  %3983 = vmatpush1.bf16.msra.mxu1 %v11938_v27  ;;  %v3026_v43 = vmul.f32 %v12444_v41, %v3009_v6  ;;  %v4172_v28 = vld [vmem:[#allocation18 + $0xc8] sm:$0xff] }
 0x605   :  { %v13509_v47 = vpack.c.bf16 %v3028_v42, %v3027_v40  ;;  %3878 = vmatprep.subr.bf16.mxu0 %v11943_v56  ;;  %3984 = vmatprep.subr.bf16.mxu1 %v11946_v58  ;;  %v10764_v27 = vcombine.high %v4164_v39, %v4172_v28  ;;  %v4188_v56 = vld [vmem:[#allocation18 + $0x148] sm:$0xff]  ;;  %v10761_v58 = vcombine.low %v4163_v38, %v4171_v10  ;;  %v4195_v40 = vld [vmem:[#allocation18 + $0x180] sm:$0xff] }
 0x606   :  { %v3029_v2 = vpack.c.bf16 %v3026_v43, %v3025_v23  ;;  %v10763_v25 = vcombine.low %v4164_v39, %v4172_v28  ;;  %v10780_v41 = vcombine.high %v4180_v50, %v4188_v56  ;;  %v4203_v42 = vld [vmem:[#allocation18 + $0x1c0] sm:$0xff]  ;;  %v4196_v6 = vld [vmem:[#allocation18 + $0x188] sm:$0xff] }
 0x607   :  { %v4204_v23 = vld [vmem:[#allocation18 + $0x1c8] sm:$0xff]  ;;  %v4291_v39 = vld [vmem:[#allocation18 + $0x480] sm:$0xff] }
 0x608   :  { %3879 = vmatpush1.bf16.msra.mxu0 %v11941_v0  ;;  %3985 = vmatpush1.bf16.msra.mxu1 %v11944_v32  ;;  %v10779_v0 = vcombine.low %v4180_v50, %v4188_v56  ;;  %v10794_v32 = vcombine.high %v4195_v40, %v4203_v42  ;;  %v4284_v38 = vld [vmem:[#allocation18 + $0x448] sm:$0xff]  ;;  %v4299_v28 = vld [vmem:[#allocation18 + $0x4c0] sm:$0xff] }
 0x609   :  { %3880 = vmatprep.subr.bf16.mxu0 %v11949_v60  ;;  %3986 = vmatprep.subr.bf16.mxu1 %v11952_v34  ;;  %v4211_v60 = vld [vmem:[#allocation18 + $0x200] sm:$0xff]  ;;  %v10875_v50 = vcombine.low %v4276_v37, %v4284_v38  ;;  %v10890_v56 = vcombine.high %v4291_v39, %v4299_v28 }
 0x60a   :  { %v4219_v34 = vld [vmem:[#allocation18 + $0x240] sm:$0xff] }
 0x60c   :  { %3881 = vmatpush1.bf16.msra.mxu0 %v11947_v44  ;;  %3987 = vmatpush1.bf16.msra.mxu1 %v11950_v63  ;;  %v4220_v44 = vld [vmem:[#allocation18 + $0x248] sm:$0xff]  ;;  %v10793_v63 = vcombine.low %v4195_v40, %v4203_v42  ;;  %v10889_v42 = vcombine.low %v4291_v39, %v4299_v28 }
 0x60d   :  { %3882 = vmatprep.subr.bf16.mxu0 %v11955_v8  ;;  %3988 = vmatprep.subr.bf16.mxu1 %v11958_v17  ;;  %v10795_v8 = vcombine.low %v4196_v6, %v4204_v23  ;;  %v10810_v17 = vcombine.high %v4211_v60, %v4219_v34  ;;  %v4316_v40 = vld [vmem:[#allocation18 + $0x548] sm:$0xff] }
 0x60e   :  { %v12606_v39 = vld [vmem:[#allocation3 + $0x50] sm:$0xff] }
 0x610   :  { %3883 = vmatpush1.bf16.msra.mxu0 %v11953_v36  ;;  %3989 = vmatpush1.bf16.msra.mxu1 %v11956_v16  ;;  %v4227_v16 = vld [vmem:[#allocation18 + $0x280] sm:$0xff] }
 0x611   :  { %3884 = vmatprep.subr.bf16.mxu0 %v11961_v21  ;;  %3990 = vmatprep.subr.bf16.mxu1 %v11964_v52  ;;  %v4235_v21 = vld [vmem:[#allocation18 + $0x2c0] sm:$0xff]  ;;  %v4228_v52 = vld [vmem:[#allocation18 + $0x288] sm:$0xff] }
 0x614   :  { %3885 = vmatpush1.bf16.msra.mxu0 %v11959_v19  ;;  %3991 = vmatpush1.bf16.msra.mxu1 %v11962_v57  ;;  %v4236_v19 = vld [vmem:[#allocation18 + $0x2c8] sm:$0xff]  ;;  %v10809_v57 = vcombine.low %v4211_v60, %v4219_v34  ;;  %v12597_v34 = vld [vmem:[#allocation3] sm:$0xff] }
 0x615   :  { %3886 = vmatprep.subr.bf16.mxu0 %v11967_v49  ;;  %3992 = vmatprep.subr.bf16.mxu1 %v11970_v59  ;;  %v10826_v59 = vcombine.high %v4227_v16, %v4235_v21 }
 0x618   :  { %3887 = vmatpush1.bf16.msra.mxu0 %v11965_v46  ;;  %3993 = vmatpush1.bf16.msra.mxu1 %v11968_v48  ;;  %v10828_v46 = vcombine.high %v4228_v52, %v4236_v19  ;;  %v4243_v48 = vld [vmem:[#allocation18 + $0x300] sm:$0xff] }
 0x619   :  { %3888 = vmatprep.subr.bf16.mxu0 %v11973_v35  ;;  %3994 = vmatprep.subr.bf16.mxu1 %v11976_v12  ;;  %v4251_v35 = vld [vmem:[#allocation18 + $0x340] sm:$0xff]  ;;  %v4244_v12 = vld [vmem:[#allocation18 + $0x308] sm:$0xff] }
 0x61c   :  { %3889 = vmatpush1.bf16.msra.mxu0 %v11971_v13  ;;  %3995 = vmatpush1.bf16.msra.mxu1 %v11974_v20  ;;  %v4252_v13 = vld [vmem:[#allocation18 + $0x348] sm:$0xff]  ;;  %v10825_v20 = vcombine.low %v4227_v16, %v4235_v21 }
 0x61d   :  { %3890 = vmatprep.subr.bf16.mxu0 %v11979_v26  ;;  %3996 = vmatprep.subr.bf16.mxu1 %v11982_v45  ;;  %v10827_v26 = vcombine.low %v4228_v52, %v4236_v19  ;;  %v10842_v45 = vcombine.high %v4243_v48, %v4251_v35  ;;  %v10843_v14 = vcombine.low %v4244_v12, %v4252_v13 }
 0x620   :  { %3891 = vmatpush1.bf16.msra.mxu0 %v11977_v31  ;;  %3997 = vmatpush1.bf16.msra.mxu1 %v11980_v33  ;;  %v10844_v31 = vcombine.high %v4244_v12, %v4252_v13  ;;  %v4259_v33 = vld [vmem:[#allocation18 + $0x380] sm:$0xff]  ;;  %v12602_v13 = vld [vmem:[#allocation3 + $0x30] sm:$0xff] }
 0x621   :  { %3892 = vmatprep.subr.bf16.mxu0 %v11985_v29  ;;  %3998 = vmatprep.subr.bf16.mxu1 %v11988_v22  ;;  %v4267_v29 = vld [vmem:[#allocation18 + $0x3c0] sm:$0xff]  ;;  %v4260_v22 = vld [vmem:[#allocation18 + $0x388] sm:$0xff] }
 0x622   :  { %v10858_v7 = vcombine.high %v4259_v33, %v4267_v29  ;;  %v10857_v10 = vcombine.low %v4259_v33, %v4267_v29  ;;  %v12604_v33 = vld [vmem:[#allocation3 + $0x38] sm:$0xff] }
 0x624   :  { %3893 = vmatpush1.bf16.msra.mxu0 %v11983_v62  ;;  %3999 = vmatpush1.bf16.msra.mxu1 %v11986_v30  ;;  %v4268_v62 = vld [vmem:[#allocation18 + $0x3c8] sm:$0xff]  ;;  %v10841_v30 = vcombine.low %v4243_v48, %v4251_v35  ;;  %v12601_v35 = vld [vmem:[#allocation3 + $0x18] sm:$0xff] }
 0x625   :  { %7219 = vmatprep.subr.bf16.mxu0 %v10746_v18  ;;  %7325 = vmatprep.subr.bf16.mxu1 %v10748_v54  ;;  %v10860_v1 = vcombine.high %v4260_v22, %v4268_v62  ;;  %v4283_v18 = vld [vmem:[#allocation18 + $0x440] sm:$0xff] }
 0x627   :  { %3895 = vmatmul.mubr.bf16.vlgmr.msra.gmra.mrb[32].mxu0 %v13507_v53  ;;  %4001 = vmatmul.mubr.bf16.vlgmr.msra.gmra.mrb[32].mxu1 %v13507_v53  ;;  %v4179_v53 = vld [vmem:[#allocation18 + $0x100] sm:$0xff] }
 0x628   :  { %3904 = vmatprep.mubr.bf16.mxu0 %v13509_v47  ;;  %4010 = vmatprep.mubr.bf16.mxu1 %v13509_v47  ;;  %v10778_v51 = vcombine.high %v4179_v53, %v4187_v55  ;;  %v10777_v43 = vcombine.low %v4179_v53, %v4187_v55  ;;  %v10796_v47 = vcombine.high %v4196_v6, %v4204_v23  ;;  %v4292_v53 = vld [vmem:[#allocation18 + $0x488] sm:$0xff] }
 0x629   :  { %7220 = vmatpush1.bf16.msra.mxu0 %v10745_v9  ;;  %7326 = vmatpush1.bf16.msra.mxu1 %v10747_v24  ;;  %v4275_v9 = vld [vmem:[#allocation18 + $0x400] sm:$0xff]  ;;  %v10859_v24 = vcombine.low %v4260_v22, %v4268_v62 }
 0x62a   :  { %7221 = vmatprep.subr.bf16.mxu0 %v10762_v15  ;;  %7327 = vmatprep.subr.bf16.mxu1 %v10764_v27  ;;  %v10874_v54 = vcombine.high %v4275_v9, %v4283_v18  ;;  %v10876_v15 = vcombine.high %v4276_v37, %v4284_v38  ;;  %v4300_v27 = vld [vmem:[#allocation18 + $0x4c8] sm:$0xff]  ;;  %v10873_v55 = vcombine.low %v4275_v9, %v4283_v18  ;;  %v12605_v38 = vld [vmem:[#allocation3 + $0x40] sm:$0xff] }
 0x62b   :  { %v10891_v6 = vcombine.low %v4292_v53, %v4300_v27 }
 0x62d   :  { %7222 = vmatpush1.bf16.msra.mxu0 %v10761_v58  ;;  %7328 = vmatpush1.bf16.msra.mxu1 %v10763_v25  ;;  %v10892_v58 = vcombine.high %v4292_v53, %v4300_v27  ;;  %v4307_v25 = vld [vmem:[#allocation18 + $0x500] sm:$0xff] }
 0x62e   :  { %7223 = vmatprep.subr.bf16.mxu0 %v10778_v51  ;;  %7329 = vmatprep.subr.bf16.mxu1 %v10780_v41  ;;  %v4315_v51 = vld [vmem:[#allocation18 + $0x540] sm:$0xff]  ;;  %v4308_v41 = vld [vmem:[#allocation18 + $0x508] sm:$0xff] }
 0x62f   :  { %3905 = vmatmul.mubr.bf16.gmra.mrb[36].mxu0 %v3029_v2  ;;  %4011 = vmatmul.mubr.bf16.gmra.mrb[36].mxu1 %v3029_v2  ;;  %v4212_v2 = vld [vmem:[#allocation18 + $0x208] sm:$0xff]  ;;  %v10906_v23 = vcombine.high %v4307_v25, %v4315_v51  ;;  %v12607_v53 = vld [vmem:[#allocation3 + $0x48] sm:$0xff] }
 0x630   :  { %v10812_v36 = vcombine.high %v4212_v2, %v4220_v44  ;;  %v10811_v49 = vcombine.low %v4212_v2, %v4220_v44 }
 0x631   :  { %7224 = vmatpush1.bf16.msra.mxu0 %v10777_v43  ;;  %7330 = vmatpush1.bf16.msra.mxu1 %v10779_v0  ;;  %v10908_v43 = vcombine.high %v4308_v41, %v4316_v40  ;;  %v10905_v0 = vcombine.low %v4307_v25, %v4315_v51  ;;  %v12608_v51 = vld [vmem:[#allocation3 + $0x58] sm:$0xff] }
 0x632   :  { %7225 = vmatprep.subr.bf16.mxu0 %v10794_v32  ;;  %7331 = vmatprep.subr.bf16.mxu1 %v10796_v47  ;;  %v10907_v32 = vcombine.low %v4308_v41, %v4316_v40  ;;  %v12609_v40 = vld [vmem:[#allocation3 + $0x60] sm:$0xff] }
 0x635   :  { %7226 = vmatpush1.bf16.msra.mxu0 %v10793_v63  ;;  %7332 = vmatpush1.bf16.msra.mxu1 %v10795_v8  ;;  %v12598_v8 = vld [vmem:[#allocation3 + $0x10] sm:$0xff] }
 0x636   :  { %7227 = vmatprep.subr.bf16.mxu0 %v10810_v17  ;;  %7333 = vmatprep.subr.bf16.mxu1 %v10812_v36  ;;  %v12599_v36 = vld [vmem:[#allocation3 + $0x8] sm:$0xff] }
 0x639   :  { %7228 = vmatpush1.bf16.msra.mxu0 %v10809_v57  ;;  %7334 = vmatpush1.bf16.msra.mxu1 %v10811_v49  ;;  %v12600_v57 = vld [vmem:[#allocation3 + $0x20] sm:$0xff] }
 0x63a   :  { %7229 = vmatprep.subr.bf16.mxu0 %v10826_v59  ;;  %7335 = vmatprep.subr.bf16.mxu1 %v10828_v46 }
 0x63d   :  { %7230 = vmatpush1.bf16.msra.mxu0 %v10825_v20  ;;  %7336 = vmatpush1.bf16.msra.mxu1 %v10827_v26  ;;  %v12603_v26 = vld [vmem:[#allocation3 + $0x28] sm:$0xff] }
 0x63e   :  { %7231 = vmatprep.subr.bf16.mxu0 %v10842_v45  ;;  %7337 = vmatprep.subr.bf16.mxu1 %v10844_v31 }
 0x641   :  { %7232 = vmatpush1.bf16.msra.mxu0 %v10841_v30  ;;  %7338 = vmatpush1.bf16.msra.mxu1 %v10843_v14 }
 0x642   :  { %7233 = vmatprep.subr.bf16.mxu0 %v10858_v7  ;;  %7339 = vmatprep.subr.bf16.mxu1 %v10860_v1 }
 0x645   :  { %7234 = vmatpush1.bf16.msra.mxu0 %v10857_v10  ;;  %7340 = vmatpush1.bf16.msra.mxu1 %v10859_v24 }
 0x646   :  { %7235 = vmatprep.subr.bf16.mxu0 %v10874_v54  ;;  %7341 = vmatprep.subr.bf16.mxu1 %v10876_v15 }
 0x649   :  { %7236 = vmatpush1.bf16.msra.mxu0 %v10873_v55  ;;  %7342 = vmatpush1.bf16.msra.mxu1 %v10875_v50 }
 0x64a   :  { %7237 = vmatprep.subr.bf16.mxu0 %v10890_v56  ;;  %7343 = vmatprep.subr.bf16.mxu1 %v10892_v58 }
 0x64d   :  { %7238 = vmatpush1.bf16.msra.mxu0 %v10889_v42  ;;  %7344 = vmatpush1.bf16.msra.mxu1 %v10891_v6 }
 0x64e   :  { %7239 = vmatprep.subr.bf16.mxu0 %v10906_v23  ;;  %7345 = vmatprep.subr.bf16.mxu1 %v10908_v43 }
 0x651   :  { %7240 = vmatpush1.bf16.msra.mxu0 %v10905_v0  ;;  %7346 = vmatpush1.bf16.msra.mxu1 %v10907_v32  ;;  %v12610_v0 = vld [vmem:[#allocation3 + $0x70] sm:$0xff] }
 0x6fa   :  { %v3896_v47 = vpop.f32.mrb[32].mxu0  ;;  %v4002_v60 = vpop.f32.mrb[32].mxu1 }
 0x6fb   :  { %v13515_v2 = vadd.f32 %v12597_v34, %v3896_v47  ;;  %v3898_v44 = vpop.f32.mrb[33].mxu0  ;;  %v4004_v63 = vpop.f32.mrb[33].mxu1  ;;  %v13517_v17 = vadd.f32 %v12598_v8, %v4002_v60  ;;  %v12611_v47 = vld [vmem:[#allocation3 + $0x68] sm:$0xff] }
 0x6fc   :  { %v13519_v16 = vadd.f32 %v12599_v36, %v3898_v44  ;;  %v3900_v21 = vpop.f32.mrb[34].mxu0  ;;  %v4006_v52 = vpop.f32.mrb[34].mxu1  ;;  %v13527_v12 = vadd.f32 %v12601_v35, %v4004_v63  ;;  %v12612_v36 = vld [vmem:[#allocation3 + $0x78] sm:$0xff] }
 0x6fd   :  { %v4038_v19 = vmul.f32 %v13515_v2, %v13515_v2  ;;  %v13523_v49 = vadd.f32 %v12600_v57, %v3900_v21  ;;  %v3902_v59 = vpop.f32.mrb[35].mxu0  ;;  %v4008_v46 = vpop.f32.mrb[35].mxu1  ;;  %v13529_v20 = vadd.f32 %v12602_v13, %v4006_v52  ;;  %v4040_v22 = vmul.f32 %v13517_v17, %v13517_v17 }
 0x6fe   :  { %v4039_v48 = vmul.f32 %v13519_v16, %v13519_v16  ;;  %v13531_v45 = vadd.f32 %v12603_v26, %v3902_v59  ;;  %v13535_v29 = vadd.f32 %v12604_v33, %v4008_v46  ;;  %v4041_v9 = vmul.f32 %v13527_v12, %v13527_v12  ;;  %v4331_v33 = vld [vmem:[#allocation18 + $0x5c0] sm:$0xff] }
 0x6ff   :  { %13933 = vst [vmem:[#allocation29_spill] sm:$0xff] %v13529_v20  ;;  %v4042_v31 = vmul.f32 %v13523_v49, %v13523_v49  ;;  %v4044_v14 = vmul.f32 %v13529_v20, %v13529_v20 }
 0x700   :  { %13934 = vst [vmem:[#allocation30_spill] sm:$0xff] %v13531_v45  ;;  %13935 = vst [vmem:[#allocation31_spill] sm:$0xff] %v13535_v29  ;;  %v4043_v62 = vmul.f32 %v13531_v45, %v13531_v45  ;;  %v4054_v30 = vadd.f32 %v4039_v48, %v4038_v19  ;;  %v4045_v15 = vmul.f32 %v13535_v29, %v13535_v29 }
 0x702   :  { %v3906_v7 = vpop.f32.mrb[36].mxu0  ;;  %v4012_v1 = vpop.f32.mrb[36].mxu1  ;;  %v4055_v18 = vadd.f32 %v4054_v30, %v4040_v22  ;;  %v4059_v37 = vadd.f32 %v4043_v62, %v4042_v31  ;;  %v4323_v31 = vld [vmem:[#allocation18 + $0x580] sm:$0xff]  ;;  %v4324_v22 = vld [vmem:[#allocation18 + $0x588] sm:$0xff] }
 0x703   :  { %v13545_v10 = vadd.f32 %v12605_v38, %v3906_v7  ;;  %v3908_v24 = vpop.f32.mrb[37].mxu0  ;;  %v4014_v54 = vpop.f32.mrb[37].mxu1  ;;  %v13549_v28 = vadd.f32 %v12606_v39, %v4012_v1  ;;  %v10922_v62 = vcombine.high %v4323_v31, %v4331_v33  ;;  %v4332_v30 = vld [vmem:[#allocation18 + $0x5c8] sm:$0xff] }
 0x704   :  { %v13551_v27 = vadd.f32 %v12607_v53, %v3908_v24  ;;  %v3910_v55 = vpop.f32.mrb[38].mxu0  ;;  %v4016_v50 = vpop.f32.mrb[38].mxu1  ;;  %v4056_v56 = vadd.f32 %v4055_v18, %v4041_v9  ;;  %v4060_v58 = vadd.f32 %v4059_v37, %v4044_v14  ;;  %v13555_v41 = vadd.f32 %v12608_v51, %v4014_v54  ;;  %v4339_v9 = vld [vmem:[#allocation18 + $0x600] sm:$0xff]  ;;  %v4340_v37 = vld [vmem:[#allocation18 + $0x608] sm:$0xff] }
 0x705   :  { %13936 = vst [vmem:[#allocation32_spill] sm:$0xff] %v13545_v10  ;;  %13937 = vst [vmem:[#allocation33_spill] sm:$0xff] %v13549_v28  ;;  %v4046_v25 = vmul.f32 %v13545_v10, %v13545_v10  ;;  %v13557_v42 = vadd.f32 %v12609_v40, %v3910_v55  ;;  %v3912_v6 = vpop.f32.mrb[39].mxu0  ;;  %v4018_v23 = vpop.f32.mrb[39].mxu1  ;;  %v13561_v32 = vadd.f32 %v12610_v0, %v4016_v50  ;;  %7241 = vmatprep.subr.bf16.mxu0 %v10922_v62  ;;  %v4347_v18 = vld [vmem:[#allocation18 + $0x640] sm:$0xff]  ;;  %v4348_v54 = vld [vmem:[#allocation18 + $0x648] sm:$0xff] }
 0x706   :  { %13938 = vst [vmem:[#allocation34_spill] sm:$0xff] %v13551_v27  ;;  %13939 = vst [vmem:[#allocation35_spill] sm:$0xff] %v13555_v41  ;;  %v4047_v43 = vmul.f32 %v13551_v27, %v13551_v27  ;;  %v13563_v60 = vadd.f32 %v12611_v47, %v3912_v6  ;;  %4057 = vadd.xlane.f32.xlu0 %v4056_v56  ;;  %v4061_v34 = vadd.f32 %v4060_v58, %v4045_v15  ;;  %v4355_v53 = vld [vmem:[#allocation18 + $0x680] sm:$0xff]  ;;  %v4356_v50 = vld [vmem:[#allocation18 + $0x688] sm:$0xff] }
 0x707   :  { %13940 = vst [vmem:[#allocation36_spill] sm:$0xff] %v13557_v42  ;;  %13941 = vst [vmem:[#allocation37_spill] sm:$0xff] %v13561_v32  ;;  %v4050_v44 = vmul.f32 %v13557_v42, %v13557_v42  ;;  %v4048_v63 = vmul.f32 %v13549_v28, %v13549_v28  ;;  %v13571_v21 = vadd.f32 %v12612_v36, %v4018_v23  ;;  %v4363_v55 = vld [vmem:[#allocation18 + $0x6c0] sm:$0xff]  ;;  %v4364_v58 = vld [vmem:[#allocation18 + $0x6c8] sm:$0xff] }
 0x708   :  { %13942 = vst [vmem:[#allocation38_spill] sm:$0xff] %v13563_v60  ;;  %v4051_v8 = vmul.f32 %v13563_v60, %v13563_v60  ;;  %4062 = vadd.xlane.f32.xlu1 %v4061_v34  ;;  %v4064_v52 = vadd.f32 %v4047_v43, %v4046_v25  ;;  %v4052_v19 = vmul.f32 %v13561_v32, %v13561_v32  ;;  %v4371_v6 = vld [vmem:[#allocation18 + $0x700] sm:$0xff]  ;;  %v4372_v43 = vld [vmem:[#allocation18 + $0x708] sm:$0xff] }
 0x709   :  { %13943 = vst [vmem:[#allocation39_spill] sm:$0xff] %v13571_v21  ;;  %v4049_v57 = vmul.f32 %v13555_v41, %v13555_v41  ;;  %v4053_v35 = vmul.f32 %v13571_v21, %v13571_v21  ;;  %v10921_v14 = vcombine.low %v4323_v31, %v4331_v33  ;;  %v10923_v7 = vcombine.low %v4324_v22, %v4332_v30  ;;  %v4379_v23 = vld [vmem:[#allocation18 + $0x740] sm:$0xff]  ;;  %v4380_v34 = vld [vmem:[#allocation18 + $0x748] sm:$0xff] }
 0x70a   :  { %v4065_v59 = vadd.f32 %v4064_v52, %v4048_v63  ;;  %v4069_v46 = vadd.f32 %v4051_v8, %v4050_v44  ;;  %v10924_v1 = vcombine.high %v4324_v22, %v4332_v30  ;;  %v10937_v38 = vcombine.low %v4339_v9, %v4347_v18  ;;  %v4387_v44 = vld [vmem:[#allocation18 + $0x780] sm:$0xff]  ;;  %v13587_v33 = vld [vmem:[#allocation18 + $0x848] sm:$0xff] }
 0x70b   :  { %7242 = vmatpush1.bf16.msra.mxu0 %v10921_v14  ;;  %v10938_v24 = vcombine.high %v4339_v9, %v4347_v18  ;;  %v10939_v15 = vcombine.low %v4340_v37, %v4348_v54  ;;  %v10940_v39 = vcombine.high %v4340_v37, %v4348_v54  ;;  %v10954_v56 = vcombine.high %v4355_v53, %v4363_v55  ;;  %v4395_v63 = vld [vmem:[#allocation18 + $0x7c0] sm:$0xff] }
 0x70c   :  { %v4066_v48 = vadd.f32 %v4065_v59, %v4049_v57  ;;  %v4070_v13 = vadd.f32 %v4069_v46, %v4052_v19  ;;  %7347 = vmatprep.subr.bf16.mxu1 %v10924_v1  ;;  %v10953_v25 = vcombine.low %v4355_v53, %v4363_v55  ;;  %v10955_v51 = vcombine.low %v4356_v50, %v4364_v58  ;;  %v4388_v19 = vld [vmem:[#allocation18 + $0x788] sm:$0xff]  ;;  %v4037_v53 = vld [vmem:[#allocation17] sm:$0xf] }
 0x70d   :  { %7348 = vmatpush1.bf16.msra.mxu1 %v10923_v7  ;;  %7243 = vmatprep.subr.bf16.mxu0 %v10938_v24  ;;  %v10956_v40 = vcombine.high %v4356_v50, %v4364_v58  ;;  %v10969_v0 = vcombine.low %v4371_v6, %v4379_v23  ;;  %v10970_v47 = vcombine.high %v4371_v6, %v4379_v23  ;;  %v4396_v57 = vld [vmem:[#allocation18 + $0x7c8] sm:$0xff] }
 0x70e   :  { %4067 = vadd.xlane.f32.xlu0 %v4066_v48  ;;  %v4071_v26 = vadd.f32 %v4070_v13, %v4053_v35  ;;  %7349 = vmatprep.subr.bf16.mxu1 %v10940_v39  ;;  %v10971_v8 = vcombine.low %v4372_v43, %v4380_v34  ;;  %v10972_v36 = vcombine.high %v4372_v43, %v4380_v34  ;;  %v13579_v35 = vld [vmem:[#allocation18 + $0x800] sm:$0xff]  ;;  %v4420_v34 = vld [vmem:[#allocation18 + $0x888] sm:$0xff] }
 0x70f   :  { %7244 = vmatpush1.bf16.msra.mxu0 %v10937_v38  ;;  %v10986_v52 = vcombine.high %v4387_v44, %v4395_v63  ;;  %v10988_v59 = vcombine.high %v4388_v19, %v4396_v57  ;;  %v10985_v46 = vcombine.low %v4387_v44, %v4395_v63  ;;  %v10987_v48 = vcombine.low %v4388_v19, %v4396_v57  ;;  %v13581_v13 = vld [vmem:[#allocation18 + $0x840] sm:$0xff] }
 0x710   :  { %4072 = vadd.xlane.f32.xlu1 %v4071_v26  ;;  %7245 = vmatprep.subr.bf16.mxu0 %v10954_v56  ;;  %v13583_v26 = vld [vmem:[#allocation18 + $0x808] sm:$0xff]  ;;  %v11002_v31 = vcombine.high %v13579_v35, %v13581_v13  ;;  %v11001_v22 = vcombine.low %v13579_v35, %v13581_v13  ;;  %v4110_v56 = vrot.slane %v4037_v53, %v274_v4  ;;  %v4419_v4 = vld [vmem:[#allocation18 + $0x880] sm:$0xff] }
 0x711   :  { %7350 = vmatpush1.bf16.msra.mxu1 %v10939_v15  ;;  %v11003_v62 = vcombine.low %v13583_v26, %v13587_v33  ;;  %v11004_v30 = vcombine.high %v13583_v26, %v13587_v33  ;;  %v13599_v58 = vrot.slane %v4037_v53, %v278_v3  ;;  %v4428_v3 = vld [vmem:[#allocation18 + $0x8c8] sm:$0xff]  ;;  %v13608_v44 = vld [vmem:[#allocation18 + $0x900] sm:$0xff] }
 0x712   :  { %7351 = vmatprep.subr.bf16.mxu1 %v10956_v40  ;;  %v13612_v57 = vld [vmem:[#allocation18 + $0x940] sm:$0xff] }
 0x713   :  { %7246 = vmatpush1.bf16.msra.mxu0 %v10953_v25  ;;  %v4106_v25 = vrot.slane %v4037_v53, %v270_v5  ;;  %v11033_v26 = vcombine.low %v13608_v44, %v13612_v57 }
 0x714   :  { %7247 = vmatprep.subr.bf16.mxu0 %v10970_v47  ;;  %v4427_v47 = vld [vmem:[#allocation18 + $0x8c0] sm:$0xff] }
 0x715   :  { %7352 = vmatpush1.bf16.msra.mxu1 %v10955_v51 }
 0x716   :  { %7353 = vmatprep.subr.bf16.mxu1 %v10972_v36 }
 0x717   :  { %7248 = vmatpush1.bf16.msra.mxu0 %v10969_v0 }
 0x718   :  { %7249 = vmatprep.subr.bf16.mxu0 %v10986_v52 }
 0x719   :  { %7354 = vmatpush1.bf16.msra.mxu1 %v10971_v8 }
 0x71a   :  { %7355 = vmatprep.subr.bf16.mxu1 %v10988_v59  ;;  %v13614_v59 = vld [vmem:[#allocation18 + $0x908] sm:$0xff] }
 0x71b   :  { %7250 = vmatpush1.bf16.msra.mxu0 %v10985_v46  ;;  %v13616_v46 = vld [vmem:[#allocation18 + $0x948] sm:$0xff] }
 0x71c   :  { %7272 = vmatprep.subr.bf16.mxu0 %v11002_v31  ;;  %v11017_v31 = vcombine.low %v4419_v4, %v4427_v47  ;;  %v11035_v33 = vcombine.low %v13614_v59, %v13616_v46 }
 0x71d   :  { %7356 = vmatpush1.bf16.msra.mxu1 %v10987_v48  ;;  %v4118_v48 = vrot.slane %v4037_v53, %v282_v11 }
 0x71e   :  { %7378 = vmatprep.subr.bf16.mxu1 %v11004_v30 }
 0x793   :  { %v4058_v14 = vpop.xlane.xlu0 %4057 }
 0x794   :  { %v4074_v7 = vmul.f32 0.001953125, %v4058_v14 }
 0x795   :  { %v4063_v1 = vpop.xlane.xlu1 %4062 }
 0x796   :  { %v4078_v9 = vadd.f32 1e-05, %v4074_v7  ;;  %v4075_v18 = vmul.f32 0.001953125, %v4063_v1  ;;  %v11018_v1 = vcombine.high %v4419_v4, %v4427_v47 }
 0x798   :  { %12445 = vrsqrt.f32 %v4078_v9  ;;  %v4079_v37 = vadd.f32 1e-05, %v4075_v18  ;;  %v11019_v9 = vcombine.low %v4420_v34, %v4428_v3 }
 0x79a   :  { %12447 = vrsqrt.f32 %v4079_v37  ;;  %v11020_v37 = vcombine.high %v4420_v34, %v4428_v3  ;;  %v4451_v34 = vld [vmem:[#allocation18 + $0x980] sm:$0xff]  ;;  %v4452_v3 = vld [vmem:[#allocation18 + $0x988] sm:$0xff] }
 0x79b   :  { %v4068_v38 = vpop.xlane.xlu0 %4067 }
 0x79c   :  { %v4076_v24 = vmul.f32 0.001953125, %v4068_v38  ;;  %v11034_v38 = vcombine.high %v13608_v44, %v13612_v57  ;;  %v4467_v44 = vld [vmem:[#allocation18 + $0xa00] sm:$0xff] }
 0x79d   :  { %v4073_v54 = vpop.xlane.xlu1 %4072 }
 0x79e   :  { %v4080_v15 = vadd.f32 1e-05, %v4076_v24  ;;  %v4077_v39 = vmul.f32 0.001953125, %v4073_v54  ;;  %v11036_v24 = vcombine.high %v13614_v59, %v13616_v46  ;;  %v4475_v59 = vld [vmem:[#allocation18 + $0xa40] sm:$0xff]  ;;  %v4468_v46 = vld [vmem:[#allocation18 + $0xa08] sm:$0xff] }
 0x7a0   :  { %12449 = vrsqrt.f32 %v4080_v15  ;;  %v4081_v55 = vadd.f32 1e-05, %v4077_v39 }
 0x7a2   :  { %v12446_v50 = vpop.eup %12445  ;;  %12451 = vrsqrt.f32 %v4081_v55 }
 0x7a3   :  { %v4087_v51 = vmul.f32 %v12446_v50, %v13519_v16  ;;  %v4086_v40 = vmul.f32 %v12446_v50, %v13515_v2  ;;  %v4088_v6 = vmul.f32 %v12446_v50, %v13517_v17  ;;  %v4089_v53 = vmul.f32 %v12446_v50, %v13527_v12 }
 0x7a4   :  { %v12448_v23 = vpop.eup %12447 }
 0x7a5   :  { %v4091_v43 = vmul.f32 %v12448_v23, %v13531_v45  ;;  %v4090_v0 = vmul.f32 %v12448_v23, %v13523_v49  ;;  %v4092_v63 = vmul.f32 %v12448_v23, %v13529_v20  ;;  %v4125_v5 = vmul.f32 %v13599_v58, %v4088_v6 }
 0x7a6   :  { %v4124_v8 = vmul.f32 %v4110_v56, %v4087_v51  ;;  %v4123_v52 = vmul.f32 %v4106_v25, %v4086_v40  ;;  %v4093_v55 = vmul.f32 %v12448_v23, %v13535_v29 }
 0x7a7   :  { %v4128_v36 = vmul.f32 %v4110_v56, %v4091_v43  ;;  %v4127_v19 = vmul.f32 %v4106_v25, %v4090_v0  ;;  %v4129_v30 = vmul.f32 %v13599_v58, %v4092_v63  ;;  %v4460_v63 = vld [vmem:[#allocation18 + $0x9c8] sm:$0xff] }
 0x7a8   :  { %v11052_v57 = vcombine.high %v4452_v3, %v4460_v63 }
 0x7a9   :  { %v13621_v14 = vpack.c.bf16 %v4128_v36, %v4124_v8  ;;  %v13623_v7 = vpack.c.bf16 %v4127_v19, %v4123_v52  ;;  %v13629_v54 = vpack.c.bf16 %v4129_v30, %v4125_v5  ;;  %v4126_v36 = vmul.f32 %v4118_v48, %v4089_v53 }
 0x7aa   :  { %v12450_v18 = vpop.eup %12449 }
 0x7ab   :  { %7251 = vmatprep.mubr.bf16.mxu0 %v13621_v14  ;;  %7357 = vmatprep.mubr.bf16.mxu1 %v13621_v14  ;;  %v4095_v61 = vmul.f32 %v12450_v18, %v13551_v27  ;;  %v4094_v11 = vmul.f32 %v12450_v18, %v13545_v10  ;;  %v4097_v15 = vmul.f32 %v12450_v18, %v13555_v41  ;;  %v4561_v41 = vld [vmem:[#allocation18 + $0xcf0] sm:$0xff]  ;;  %v4562_v27 = vld [vmem:[#allocation18 + $0xcf8] sm:$0xff] }
 0x7ac   :  { %v12452_v39 = vpop.eup %12451  ;;  %7252 = vmatmul.mubr.bf16.vlgmr.msra.gmra.mrb[40].mxu0 %v13623_v7  ;;  %7358 = vmatmul.mubr.bf16.vlgmr.msra.gmra.mrb[40].mxu1 %v13623_v7  ;;  %v4096_v51 = vmul.f32 %v12450_v18, %v13549_v28  ;;  %v4570_v28 = vld [vmem:[#allocation18 + $0xd38] sm:$0xff] }
 0x7ad   :  { %7273 = vmatpush1.bf16.msra.mxu0 %v11001_v22  ;;  %7379 = vmatpush1.bf16.msra.mxu1 %v11003_v62  ;;  %v4099_v40 = vmul.f32 %v12452_v39, %v13563_v60  ;;  %v4132_v6 = vmul.f32 %v4110_v56, %v4095_v61  ;;  %v4098_v43 = vmul.f32 %v12452_v39, %v13557_v42  ;;  %v4459_v62 = vld [vmem:[#allocation18 + $0x9c0] sm:$0xff]  ;;  %v4492_v61 = vld [vmem:[#allocation18 + $0xac8] sm:$0xff]  ;;  %v4546_v60 = vld [vmem:[#allocation18 + $0xc78] sm:$0xff] }
 0x7ae   :  { %7274 = vmatprep.subr.bf16.mxu0 %v11018_v1  ;;  %7380 = vmatprep.subr.bf16.mxu1 %v11020_v37  ;;  %v4131_v50 = vmul.f32 %v4106_v25, %v4094_v11  ;;  %v4101_v23 = vmul.f32 %v12452_v39, %v13571_v21  ;;  %v4134_v0 = vmul.f32 %v4118_v48, %v4097_v15  ;;  %v4483_v37 = vld [vmem:[#allocation18 + $0xa80] sm:$0xff]  ;;  %v4538_v21 = vld [vmem:[#allocation18 + $0xc38] sm:$0xff]  ;;  %v4553_v42 = vld [vmem:[#allocation18 + $0xcb0] sm:$0xff] }
 0x7af   :  { %v4136_v4 = vmul.f32 %v4110_v56, %v4099_v40  ;;  %v4135_v47 = vmul.f32 %v4106_v25, %v4098_v43  ;;  %v4100_v35 = vmul.f32 %v12452_v39, %v13561_v32  ;;  %v4133_v13 = vmul.f32 %v13599_v58, %v4096_v51  ;;  %v4507_v51 = vld [vmem:[#allocation18 + $0xb40] sm:$0xff]  ;;  %v4500_v40 = vld [vmem:[#allocation18 + $0xb08] sm:$0xff]  ;;  %v4578_v10 = vld [vmem:[#allocation18 + $0xd78] sm:$0xff] }
 0x7b0   :  { %v4130_v22 = vmul.f32 %v4118_v48, %v4093_v55  ;;  %v4138_v5 = vmul.f32 %v4118_v48, %v4101_v23  ;;  %v11050_v19 = vcombine.high %v4451_v34, %v4459_v62  ;;  %v11049_v48 = vcombine.low %v4451_v34, %v4459_v62  ;;  %v4499_v55 = vld [vmem:[#allocation18 + $0xb00] sm:$0xff]  ;;  %v4516_v34 = vld [vmem:[#allocation18 + $0xb88] sm:$0xff] }
 0x7b1   :  { %7275 = vmatpush1.bf16.msra.mxu0 %v11017_v31  ;;  %7381 = vmatpush1.bf16.msra.mxu1 %v11019_v9  ;;  %v13656_v56 = vpack.c.bf16 %v4136_v4, %v4132_v6  ;;  %v13658_v25 = vpack.c.bf16 %v4135_v47, %v4131_v50  ;;  %v4137_v8 = vmul.f32 %v13599_v58, %v4100_v35  ;;  %v4476_v31 = vld [vmem:[#allocation18 + $0xa48] sm:$0xff]  ;;  %v4515_v4 = vld [vmem:[#allocation18 + $0xb80] sm:$0xff] }
 0x7b2   :  { %7276 = vmatprep.subr.bf16.mxu0 %v11034_v38  ;;  %7382 = vmatprep.subr.bf16.mxu1 %v11036_v24  ;;  %v13661_v52 = vpack.c.bf16 %v4138_v5, %v4134_v0  ;;  %v13669_v58 = vpack.c.bf16 %v4130_v22, %v4126_v36  ;;  %v11051_v1 = vcombine.low %v4452_v3, %v4460_v63  ;;  %v4491_v38 = vld [vmem:[#allocation18 + $0xac0] sm:$0xff]  ;;  %v4484_v24 = vld [vmem:[#allocation18 + $0xa88] sm:$0xff] }
 0x7b3   :  { %7261 = vmatprep.mubr.bf16.mxu0 %v13656_v56  ;;  %7367 = vmatprep.mubr.bf16.mxu1 %v13656_v56  ;;  %v13665_v30 = vpack.c.bf16 %v4137_v8, %v4133_v13  ;;  %v11066_v9 = vcombine.high %v4467_v44, %v4475_v59  ;;  %v11068_v18 = vcombine.high %v4468_v46, %v4476_v31  ;;  %v4508_v6 = vld [vmem:[#allocation18 + $0xb48] sm:$0xff]  ;;  %v4523_v47 = vld [vmem:[#allocation18 + $0xbc0] sm:$0xff] }
 0x7b4   :  { %7262 = vmatmul.mubr.bf16.gmra.mrb[44].mxu0 %v13658_v25  ;;  %7368 = vmatmul.mubr.bf16.gmra.mrb[44].mxu1 %v13658_v25  ;;  %v11065_v11 = vcombine.low %v4467_v44, %v4475_v59  ;;  %v11067_v15 = vcombine.low %v4468_v46, %v4476_v31  ;;  %v11082_v39 = vcombine.high %v4483_v37, %v4491_v38  ;;  %v4524_v35 = vld [vmem:[#allocation18 + $0xbc8] sm:$0xff]  ;;  %v4531_v62 = vld [vmem:[#allocation18 + $0xc00] sm:$0xff] }
 0x7b5   :  { %7277 = vmatpush1.bf16.msra.mxu0 %v11033_v26  ;;  %7383 = vmatpush1.bf16.msra.mxu1 %v11035_v33  ;;  %v11084_v53 = vcombine.high %v4484_v24, %v4492_v61  ;;  %v11081_v43 = vcombine.low %v4483_v37, %v4491_v38  ;;  %v11083_v50 = vcombine.low %v4484_v24, %v4492_v61  ;;  %v4539_v3 = vld [vmem:[#allocation18 + $0xc40] sm:$0xff]  ;;  %v4532_v63 = vld [vmem:[#allocation18 + $0xc08] sm:$0xff] }
 0x7b6   :  { %7304 = vmatprep.mubr.bf16.mxu0 %v13669_v58  ;;  %7410 = vmatprep.mubr.bf16.mxu1 %v13669_v58  ;;  %v11098_v23 = vcombine.high %v4499_v55, %v4507_v51  ;;  %v11100_v0 = vcombine.high %v4500_v40, %v4508_v6  ;;  %v11097_v13 = vcombine.low %v4499_v55, %v4507_v51  ;;  %v4540_v5 = vld [vmem:[#allocation18 + $0xc48] sm:$0xff]  ;;  %v4555_v59 = vld [vmem:[#allocation18 + $0xcc0] sm:$0xff] }
 0x7b7   :  { %7278 = vmatprep.subr.bf16.mxu0 %v11050_v19  ;;  %7384 = vmatprep.subr.bf16.mxu1 %v11052_v57  ;;  %v11099_v26 = vcombine.low %v4500_v40, %v4508_v6  ;;  %v11114_v33 = vcombine.high %v4515_v4, %v4523_v47  ;;  %v11116_v22 = vcombine.high %v4516_v34, %v4524_v35  ;;  %v4547_v57 = vld [vmem:[#allocation18 + $0xc80] sm:$0xff]  ;;  %v4548_v46 = vld [vmem:[#allocation18 + $0xc88] sm:$0xff] }
 0x7b8   :  { %v11113_v8 = vcombine.low %v4515_v4, %v4523_v47  ;;  %v11115_v36 = vcombine.low %v4516_v34, %v4524_v35  ;;  %v11130_v44 = vcombine.high %v4531_v62, %v4539_v3  ;;  %v11132_v19 = vcombine.high %v4532_v63, %v4540_v5  ;;  %v4556_v31 = vld [vmem:[#allocation18 + $0xcc8] sm:$0xff]  ;;  %v4563_v37 = vld [vmem:[#allocation18 + $0xd00] sm:$0xff] }
 0x7b9   :  { %7279 = vmatpush1.bf16.msra.mxu0 %v11049_v48  ;;  %7385 = vmatpush1.bf16.msra.mxu1 %v11051_v1  ;;  %v11129_v48 = vcombine.low %v4531_v62, %v4539_v3  ;;  %v11131_v1 = vcombine.low %v4532_v63, %v4540_v5  ;;  %v4571_v38 = vld [vmem:[#allocation18 + $0xd40] sm:$0xff]  ;;  %v4564_v24 = vld [vmem:[#allocation18 + $0xd08] sm:$0xff]  ;;  %v11176_v20 = vcombine.high %v4570_v28, %v4578_v10 }
 0x7ba   :  { %7280 = vmatprep.subr.bf16.mxu0 %v11066_v9  ;;  %7386 = vmatprep.subr.bf16.mxu1 %v11068_v18  ;;  %v11146_v9 = vcombine.high %v4547_v57, %v4555_v59  ;;  %v11148_v18 = vcombine.high %v4548_v46, %v4556_v31  ;;  %v4572_v61 = vld [vmem:[#allocation18 + $0xd48] sm:$0xff]  ;;  %v4579_v55 = vld [vmem:[#allocation18 + $0xd80] sm:$0xff] }
 0x7bb   :  { %v4587_v51 = vld [vmem:[#allocation18 + $0xdc0] sm:$0xff]  ;;  %v4580_v40 = vld [vmem:[#allocation18 + $0xd88] sm:$0xff] }
 0x7bc   :  { %v4588_v6 = vld [vmem:[#allocation18 + $0xdc8] sm:$0xff]  ;;  %v4595_v4 = vld [vmem:[#allocation18 + $0xe00] sm:$0xff] }
 0x7bd   :  { %7281 = vmatpush1.bf16.msra.mxu0 %v11065_v11  ;;  %7387 = vmatpush1.bf16.msra.mxu1 %v11067_v15  ;;  %v11145_v11 = vcombine.low %v4547_v57, %v4555_v59  ;;  %v11147_v15 = vcombine.low %v4548_v46, %v4556_v31  ;;  %v4603_v47 = vld [vmem:[#allocation18 + $0xe40] sm:$0xff]  ;;  %v4596_v34 = vld [vmem:[#allocation18 + $0xe08] sm:$0xff] }
 0x7be   :  { %7282 = vmatprep.subr.bf16.mxu0 %v11082_v39  ;;  %7388 = vmatprep.subr.bf16.mxu1 %v11084_v53  ;;  %v11162_v39 = vcombine.high %v4563_v37, %v4571_v38  ;;  %v11164_v53 = vcombine.high %v4564_v24, %v4572_v61  ;;  %v4604_v35 = vld [vmem:[#allocation18 + $0xe48] sm:$0xff]  ;;  %v4611_v62 = vld [vmem:[#allocation18 + $0xe80] sm:$0xff] }
 0x7bf   :  { %v4619_v3 = vld [vmem:[#allocation18 + $0xec0] sm:$0xff]  ;;  %v4612_v63 = vld [vmem:[#allocation18 + $0xe88] sm:$0xff] }
 0x7c0   :  { %v4620_v5 = vld [vmem:[#allocation18 + $0xec8] sm:$0xff]  ;;  %v4627_v57 = vld [vmem:[#allocation18 + $0xf00] sm:$0xff] }
 0x7c1   :  { %7283 = vmatpush1.bf16.msra.mxu0 %v11081_v43  ;;  %7389 = vmatpush1.bf16.msra.mxu1 %v11083_v50  ;;  %v11161_v43 = vcombine.low %v4563_v37, %v4571_v38  ;;  %v11163_v50 = vcombine.low %v4564_v24, %v4572_v61  ;;  %v4635_v59 = vld [vmem:[#allocation18 + $0xf40] sm:$0xff]  ;;  %v4628_v46 = vld [vmem:[#allocation18 + $0xf08] sm:$0xff] }
 0x7c2   :  { %7284 = vmatprep.subr.bf16.mxu0 %v11098_v23  ;;  %7390 = vmatprep.subr.bf16.mxu1 %v11100_v0  ;;  %v11178_v23 = vcombine.high %v4579_v55, %v4587_v51  ;;  %v11180_v0 = vcombine.high %v4580_v40, %v4588_v6  ;;  %v4636_v31 = vld [vmem:[#allocation18 + $0xf48] sm:$0xff]  ;;  %v4643_v37 = vld [vmem:[#allocation18 + $0xf80] sm:$0xff] }
 0x7c3   :  { %v4651_v38 = vld [vmem:[#allocation18 + $0xfc0] sm:$0xff]  ;;  %v4644_v24 = vld [vmem:[#allocation18 + $0xf88] sm:$0xff] }
 0x7c4   :  { %v4652_v61 = vld [vmem:[#allocation18 + $0xfc8] sm:$0xff] }
 0x7c5   :  { %7285 = vmatpush1.bf16.msra.mxu0 %v11097_v13  ;;  %7391 = vmatpush1.bf16.msra.mxu1 %v11099_v26  ;;  %v11177_v13 = vcombine.low %v4579_v55, %v4587_v51  ;;  %v11179_v26 = vcombine.low %v4580_v40, %v4588_v6  ;;  %v4149_v55 = vld [vmem:[#allocation18 + $0x10] sm:$0xff]  ;;  %v4150_v40 = vld [vmem:[#allocation18 + $0x18] sm:$0xff] }
 0x7c6   :  { %7286 = vmatprep.subr.bf16.mxu0 %v11114_v33  ;;  %7392 = vmatprep.subr.bf16.mxu1 %v11116_v22  ;;  %v11194_v33 = vcombine.high %v4595_v4, %v4603_v47  ;;  %v11196_v22 = vcombine.high %v4596_v34, %v4604_v35  ;;  %v4157_v51 = vld [vmem:[#allocation18 + $0x50] sm:$0xff]  ;;  %v4158_v6 = vld [vmem:[#allocation18 + $0x58] sm:$0xff] }
 0x7c9   :  { %7287 = vmatpush1.bf16.msra.mxu0 %v11113_v8  ;;  %7393 = vmatpush1.bf16.msra.mxu1 %v11115_v36  ;;  %v11193_v8 = vcombine.low %v4595_v4, %v4603_v47  ;;  %v11195_v36 = vcombine.low %v4596_v34, %v4604_v35  ;;  %v4165_v4 = vld [vmem:[#allocation18 + $0x90] sm:$0xff]  ;;  %v4166_v34 = vld [vmem:[#allocation18 + $0x98] sm:$0xff] }
 0x7ca   :  { %7288 = vmatprep.subr.bf16.mxu0 %v11130_v44  ;;  %7394 = vmatprep.subr.bf16.mxu1 %v11132_v19  ;;  %v11210_v44 = vcombine.high %v4611_v62, %v4619_v3  ;;  %v11212_v19 = vcombine.high %v4612_v63, %v4620_v5  ;;  %v4173_v47 = vld [vmem:[#allocation18 + $0xd0] sm:$0xff]  ;;  %v4174_v35 = vld [vmem:[#allocation18 + $0xd8] sm:$0xff] }
 0x7cd   :  { %7289 = vmatpush1.bf16.msra.mxu0 %v11129_v48  ;;  %7395 = vmatpush1.bf16.msra.mxu1 %v11131_v1  ;;  %v11209_v48 = vcombine.low %v4611_v62, %v4619_v3  ;;  %v11211_v1 = vcombine.low %v4612_v63, %v4620_v5  ;;  %v4181_v62 = vld [vmem:[#allocation18 + $0x110] sm:$0xff]  ;;  %v4182_v63 = vld [vmem:[#allocation18 + $0x118] sm:$0xff] }
 0x7ce   :  { %7290 = vmatprep.subr.bf16.mxu0 %v11146_v9  ;;  %7396 = vmatprep.subr.bf16.mxu1 %v11148_v18  ;;  %v11226_v9 = vcombine.high %v4627_v57, %v4635_v59  ;;  %v11228_v18 = vcombine.high %v4628_v46, %v4636_v31  ;;  %v4189_v3 = vld [vmem:[#allocation18 + $0x150] sm:$0xff]  ;;  %v4190_v5 = vld [vmem:[#allocation18 + $0x158] sm:$0xff] }
 0x7d1   :  { %7291 = vmatpush1.bf16.msra.mxu0 %v11145_v11  ;;  %7397 = vmatpush1.bf16.msra.mxu1 %v11147_v15  ;;  %v11225_v11 = vcombine.low %v4627_v57, %v4635_v59  ;;  %v11227_v15 = vcombine.low %v4628_v46, %v4636_v31  ;;  %v4197_v57 = vld [vmem:[#allocation18 + $0x190] sm:$0xff]  ;;  %v4198_v46 = vld [vmem:[#allocation18 + $0x198] sm:$0xff] }
 0x7d2   :  { %7292 = vmatprep.subr.bf16.mxu0 %v11162_v39  ;;  %7398 = vmatprep.subr.bf16.mxu1 %v11164_v53  ;;  %v11242_v39 = vcombine.high %v4643_v37, %v4651_v38  ;;  %v11244_v53 = vcombine.high %v4644_v24, %v4652_v61  ;;  %v4205_v59 = vld [vmem:[#allocation18 + $0x1d0] sm:$0xff]  ;;  %v4206_v31 = vld [vmem:[#allocation18 + $0x1d8] sm:$0xff] }
 0x7d5   :  { %7293 = vmatpush1.bf16.msra.mxu0 %v11161_v43  ;;  %7399 = vmatpush1.bf16.msra.mxu1 %v11163_v50  ;;  %v11241_v43 = vcombine.low %v4643_v37, %v4651_v38  ;;  %v11243_v50 = vcombine.low %v4644_v24, %v4652_v61  ;;  %v4213_v37 = vld [vmem:[#allocation18 + $0x210] sm:$0xff]  ;;  %v4214_v24 = vld [vmem:[#allocation18 + $0x218] sm:$0xff] }
 0x7d6   :  { %7294 = vmatprep.subr.bf16.mxu0 %v11178_v23  ;;  %7400 = vmatprep.subr.bf16.mxu1 %v11180_v0  ;;  %v10750_v23 = vcombine.high %v4149_v55, %v4157_v51  ;;  %v10752_v0 = vcombine.high %v4150_v40, %v4158_v6  ;;  %v4221_v38 = vld [vmem:[#allocation18 + $0x250] sm:$0xff]  ;;  %v4222_v61 = vld [vmem:[#allocation18 + $0x258] sm:$0xff] }
 0x7d9   :  { %7295 = vmatpush1.bf16.msra.mxu0 %v11177_v13  ;;  %7401 = vmatpush1.bf16.msra.mxu1 %v11179_v26  ;;  %v10749_v13 = vcombine.low %v4149_v55, %v4157_v51  ;;  %v10751_v26 = vcombine.low %v4150_v40, %v4158_v6  ;;  %v4229_v55 = vld [vmem:[#allocation18 + $0x290] sm:$0xff]  ;;  %v4230_v40 = vld [vmem:[#allocation18 + $0x298] sm:$0xff] }
 0x7da   :  { %7296 = vmatprep.subr.bf16.mxu0 %v11194_v33  ;;  %7402 = vmatprep.subr.bf16.mxu1 %v11196_v22  ;;  %v10766_v33 = vcombine.high %v4165_v4, %v4173_v47  ;;  %v10768_v22 = vcombine.high %v4166_v34, %v4174_v35  ;;  %v4237_v51 = vld [vmem:[#allocation18 + $0x2d0] sm:$0xff]  ;;  %v4238_v6 = vld [vmem:[#allocation18 + $0x2d8] sm:$0xff] }
 0x7dd   :  { %7297 = vmatpush1.bf16.msra.mxu0 %v11193_v8  ;;  %7403 = vmatpush1.bf16.msra.mxu1 %v11195_v36  ;;  %v10765_v8 = vcombine.low %v4165_v4, %v4173_v47  ;;  %v10767_v36 = vcombine.low %v4166_v34, %v4174_v35  ;;  %v4245_v4 = vld [vmem:[#allocation18 + $0x310] sm:$0xff]  ;;  %v4246_v34 = vld [vmem:[#allocation18 + $0x318] sm:$0xff] }
 0x7de   :  { %7298 = vmatprep.subr.bf16.mxu0 %v11210_v44  ;;  %7404 = vmatprep.subr.bf16.mxu1 %v11212_v19  ;;  %v10782_v44 = vcombine.high %v4181_v62, %v4189_v3  ;;  %v10784_v19 = vcombine.high %v4182_v63, %v4190_v5  ;;  %v4253_v47 = vld [vmem:[#allocation18 + $0x350] sm:$0xff]  ;;  %v4254_v35 = vld [vmem:[#allocation18 + $0x358] sm:$0xff] }
 0x7e1   :  { %7299 = vmatpush1.bf16.msra.mxu0 %v11209_v48  ;;  %7405 = vmatpush1.bf16.msra.mxu1 %v11211_v1  ;;  %v10781_v48 = vcombine.low %v4181_v62, %v4189_v3  ;;  %v10783_v1 = vcombine.low %v4182_v63, %v4190_v5  ;;  %v4261_v62 = vld [vmem:[#allocation18 + $0x390] sm:$0xff]  ;;  %v4262_v63 = vld [vmem:[#allocation18 + $0x398] sm:$0xff] }
 0x7e2   :  { %7300 = vmatprep.subr.bf16.mxu0 %v11226_v9  ;;  %7406 = vmatprep.subr.bf16.mxu1 %v11228_v18  ;;  %v10798_v9 = vcombine.high %v4197_v57, %v4205_v59  ;;  %v10800_v18 = vcombine.high %v4198_v46, %v4206_v31  ;;  %v4269_v3 = vld [vmem:[#allocation18 + $0x3d0] sm:$0xff]  ;;  %v4270_v5 = vld [vmem:[#allocation18 + $0x3d8] sm:$0xff] }
 0x7e5   :  { %7301 = vmatpush1.bf16.msra.mxu0 %v11225_v11  ;;  %7407 = vmatpush1.bf16.msra.mxu1 %v11227_v15  ;;  %v10797_v11 = vcombine.low %v4197_v57, %v4205_v59  ;;  %v10799_v15 = vcombine.low %v4198_v46, %v4206_v31  ;;  %v4277_v57 = vld [vmem:[#allocation18 + $0x410] sm:$0xff]  ;;  %v4278_v46 = vld [vmem:[#allocation18 + $0x418] sm:$0xff] }
 0x7e6   :  { %7302 = vmatprep.subr.bf16.mxu0 %v11242_v39  ;;  %7408 = vmatprep.subr.bf16.mxu1 %v11244_v53  ;;  %v10814_v39 = vcombine.high %v4213_v37, %v4221_v38  ;;  %v10816_v53 = vcombine.high %v4214_v24, %v4222_v61  ;;  %v4285_v59 = vld [vmem:[#allocation18 + $0x450] sm:$0xff]  ;;  %v4286_v31 = vld [vmem:[#allocation18 + $0x458] sm:$0xff] }
 0x7e9   :  { %7303 = vmatpush1.bf16.msra.mxu0 %v11241_v43  ;;  %7409 = vmatpush1.bf16.msra.mxu1 %v11243_v50  ;;  %v10813_v43 = vcombine.low %v4213_v37, %v4221_v38  ;;  %v10815_v50 = vcombine.low %v4214_v24, %v4222_v61  ;;  %v4293_v37 = vld [vmem:[#allocation18 + $0x490] sm:$0xff]  ;;  %v4294_v24 = vld [vmem:[#allocation18 + $0x498] sm:$0xff] }
 0x7ea   :  { %7431 = vmatprep.subr.bf16.mxu0 %v10750_v23  ;;  %7537 = vmatprep.subr.bf16.mxu1 %v10752_v0  ;;  %v10830_v23 = vcombine.high %v4229_v55, %v4237_v51  ;;  %v10832_v0 = vcombine.high %v4230_v40, %v4238_v6  ;;  %v4301_v38 = vld [vmem:[#allocation18 + $0x4d0] sm:$0xff]  ;;  %v4302_v61 = vld [vmem:[#allocation18 + $0x4d8] sm:$0xff] }
 0x7ec   :  { %7305 = vmatmul.mubr.bf16.vlgmr.msra.gmra.mrb[40].mxu0 %v13629_v54  ;;  %7411 = vmatmul.mubr.bf16.vlgmr.msra.gmra.mrb[40].mxu1 %v13629_v54 }
 0x7ed   :  { %7314 = vmatprep.mubr.bf16.mxu0 %v13661_v52  ;;  %7420 = vmatprep.mubr.bf16.mxu1 %v13661_v52 }
 0x7ee   :  { %7432 = vmatpush1.bf16.msra.mxu0 %v10749_v13  ;;  %7538 = vmatpush1.bf16.msra.mxu1 %v10751_v26  ;;  %v10829_v13 = vcombine.low %v4229_v55, %v4237_v51  ;;  %v10831_v26 = vcombine.low %v4230_v40, %v4238_v6  ;;  %v4309_v55 = vld [vmem:[#allocation18 + $0x510] sm:$0xff]  ;;  %v4310_v40 = vld [vmem:[#allocation18 + $0x518] sm:$0xff] }
 0x7ef   :  { %7433 = vmatprep.subr.bf16.mxu0 %v10766_v33  ;;  %7539 = vmatprep.subr.bf16.mxu1 %v10768_v22  ;;  %v10846_v33 = vcombine.high %v4245_v4, %v4253_v47  ;;  %v10848_v22 = vcombine.high %v4246_v34, %v4254_v35  ;;  %v4317_v51 = vld [vmem:[#allocation18 + $0x550] sm:$0xff]  ;;  %v4318_v6 = vld [vmem:[#allocation18 + $0x558] sm:$0xff] }
 0x7f2   :  { %7434 = vmatpush1.bf16.msra.mxu0 %v10765_v8  ;;  %7540 = vmatpush1.bf16.msra.mxu1 %v10767_v36  ;;  %v10845_v8 = vcombine.low %v4245_v4, %v4253_v47  ;;  %v10847_v36 = vcombine.low %v4246_v34, %v4254_v35  ;;  %v4325_v4 = vld [vmem:[#allocation18 + $0x590] sm:$0xff]  ;;  %v4326_v34 = vld [vmem:[#allocation18 + $0x598] sm:$0xff] }
 0x7f3   :  { %7435 = vmatprep.subr.bf16.mxu0 %v10782_v44  ;;  %7541 = vmatprep.subr.bf16.mxu1 %v10784_v19  ;;  %v10862_v44 = vcombine.high %v4261_v62, %v4269_v3  ;;  %v10864_v19 = vcombine.high %v4262_v63, %v4270_v5  ;;  %v4333_v47 = vld [vmem:[#allocation18 + $0x5d0] sm:$0xff]  ;;  %v4334_v35 = vld [vmem:[#allocation18 + $0x5d8] sm:$0xff] }
 0x7f4   :  { %7315 = vmatmul.mubr.bf16.gmra.mrb[44].mxu0 %v13665_v30  ;;  %7421 = vmatmul.mubr.bf16.gmra.mrb[44].mxu1 %v13665_v30 }
 0x7f5   :  { %7463 = vmatprep.mubr.bf16.mxu0 %v13621_v14  ;;  %7569 = vmatprep.mubr.bf16.mxu1 %v13621_v14 }
 0x7f6   :  { %7436 = vmatpush1.bf16.msra.mxu0 %v10781_v48  ;;  %7542 = vmatpush1.bf16.msra.mxu1 %v10783_v1  ;;  %v10861_v48 = vcombine.low %v4261_v62, %v4269_v3  ;;  %v10863_v1 = vcombine.low %v4262_v63, %v4270_v5  ;;  %v4341_v62 = vld [vmem:[#allocation18 + $0x610] sm:$0xff]  ;;  %v4342_v63 = vld [vmem:[#allocation18 + $0x618] sm:$0xff] }
 0x7f7   :  { %7437 = vmatprep.subr.bf16.mxu0 %v10798_v9  ;;  %7543 = vmatprep.subr.bf16.mxu1 %v10800_v18  ;;  %v10878_v9 = vcombine.high %v4277_v57, %v4285_v59  ;;  %v10880_v18 = vcombine.high %v4278_v46, %v4286_v31  ;;  %v4349_v3 = vld [vmem:[#allocation18 + $0x650] sm:$0xff]  ;;  %v4350_v5 = vld [vmem:[#allocation18 + $0x658] sm:$0xff] }
 0x7fa   :  { %7438 = vmatpush1.bf16.msra.mxu0 %v10797_v11  ;;  %7544 = vmatpush1.bf16.msra.mxu1 %v10799_v15  ;;  %v10877_v11 = vcombine.low %v4277_v57, %v4285_v59  ;;  %v10879_v15 = vcombine.low %v4278_v46, %v4286_v31  ;;  %v4357_v57 = vld [vmem:[#allocation18 + $0x690] sm:$0xff]  ;;  %v4358_v46 = vld [vmem:[#allocation18 + $0x698] sm:$0xff] }
 0x7fb   :  { %7439 = vmatprep.subr.bf16.mxu0 %v10814_v39  ;;  %7545 = vmatprep.subr.bf16.mxu1 %v10816_v53  ;;  %v10894_v39 = vcombine.high %v4293_v37, %v4301_v38  ;;  %v10896_v53 = vcombine.high %v4294_v24, %v4302_v61  ;;  %v4365_v59 = vld [vmem:[#allocation18 + $0x6d0] sm:$0xff]  ;;  %v4366_v31 = vld [vmem:[#allocation18 + $0x6d8] sm:$0xff] }
 0x7fe   :  { %7440 = vmatpush1.bf16.msra.mxu0 %v10813_v43  ;;  %7546 = vmatpush1.bf16.msra.mxu1 %v10815_v50  ;;  %v10893_v43 = vcombine.low %v4293_v37, %v4301_v38  ;;  %v10895_v50 = vcombine.low %v4294_v24, %v4302_v61  ;;  %v4373_v37 = vld [vmem:[#allocation18 + $0x710] sm:$0xff]  ;;  %v4374_v24 = vld [vmem:[#allocation18 + $0x718] sm:$0xff] }
 0x7ff   :  { %7441 = vmatprep.subr.bf16.mxu0 %v10830_v23  ;;  %7547 = vmatprep.subr.bf16.mxu1 %v10832_v0  ;;  %v10910_v23 = vcombine.high %v4309_v55, %v4317_v51  ;;  %v10912_v0 = vcombine.high %v4310_v40, %v4318_v6  ;;  %v4381_v38 = vld [vmem:[#allocation18 + $0x750] sm:$0xff]  ;;  %v4382_v61 = vld [vmem:[#allocation18 + $0x758] sm:$0xff] }
 0x802   :  { %7442 = vmatpush1.bf16.msra.mxu0 %v10829_v13  ;;  %7548 = vmatpush1.bf16.msra.mxu1 %v10831_v26  ;;  %v10909_v13 = vcombine.low %v4309_v55, %v4317_v51  ;;  %v10911_v26 = vcombine.low %v4310_v40, %v4318_v6  ;;  %v4389_v55 = vld [vmem:[#allocation18 + $0x790] sm:$0xff]  ;;  %v4390_v40 = vld [vmem:[#allocation18 + $0x798] sm:$0xff] }
 0x803   :  { %7443 = vmatprep.subr.bf16.mxu0 %v10846_v33  ;;  %7549 = vmatprep.subr.bf16.mxu1 %v10848_v22  ;;  %v10926_v33 = vcombine.high %v4325_v4, %v4333_v47  ;;  %v10928_v22 = vcombine.high %v4326_v34, %v4334_v35  ;;  %v4397_v51 = vld [vmem:[#allocation18 + $0x7d0] sm:$0xff]  ;;  %v4398_v6 = vld [vmem:[#allocation18 + $0x7d8] sm:$0xff] }
 0x806   :  { %7444 = vmatpush1.bf16.msra.mxu0 %v10845_v8  ;;  %7550 = vmatpush1.bf16.msra.mxu1 %v10847_v36  ;;  %v10925_v8 = vcombine.low %v4325_v4, %v4333_v47  ;;  %v10927_v36 = vcombine.low %v4326_v34, %v4334_v35  ;;  %v4405_v4 = vld [vmem:[#allocation18 + $0x810] sm:$0xff]  ;;  %v4406_v34 = vld [vmem:[#allocation18 + $0x818] sm:$0xff] }
 0x807   :  { %7445 = vmatprep.subr.bf16.mxu0 %v10862_v44  ;;  %7551 = vmatprep.subr.bf16.mxu1 %v10864_v19  ;;  %v10942_v44 = vcombine.high %v4341_v62, %v4349_v3  ;;  %v10944_v19 = vcombine.high %v4342_v63, %v4350_v5  ;;  %v4413_v47 = vld [vmem:[#allocation18 + $0x850] sm:$0xff]  ;;  %v4414_v35 = vld [vmem:[#allocation18 + $0x858] sm:$0xff] }
 0x80a   :  { %7446 = vmatpush1.bf16.msra.mxu0 %v10861_v48  ;;  %7552 = vmatpush1.bf16.msra.mxu1 %v10863_v1  ;;  %v10941_v48 = vcombine.low %v4341_v62, %v4349_v3  ;;  %v10943_v1 = vcombine.low %v4342_v63, %v4350_v5  ;;  %v4421_v62 = vld [vmem:[#allocation18 + $0x890] sm:$0xff]  ;;  %v4422_v63 = vld [vmem:[#allocation18 + $0x898] sm:$0xff] }
 0x80b   :  { %7447 = vmatprep.subr.bf16.mxu0 %v10878_v9  ;;  %7553 = vmatprep.subr.bf16.mxu1 %v10880_v18  ;;  %v10958_v9 = vcombine.high %v4357_v57, %v4365_v59  ;;  %v10960_v18 = vcombine.high %v4358_v46, %v4366_v31  ;;  %v4429_v3 = vld [vmem:[#allocation18 + $0x8d0] sm:$0xff]  ;;  %v4430_v5 = vld [vmem:[#allocation18 + $0x8d8] sm:$0xff] }
 0x80e   :  { %7448 = vmatpush1.bf16.msra.mxu0 %v10877_v11  ;;  %7554 = vmatpush1.bf16.msra.mxu1 %v10879_v15  ;;  %v10957_v11 = vcombine.low %v4357_v57, %v4365_v59  ;;  %v10959_v15 = vcombine.low %v4358_v46, %v4366_v31  ;;  %v4437_v57 = vld [vmem:[#allocation18 + $0x910] sm:$0xff]  ;;  %v4438_v46 = vld [vmem:[#allocation18 + $0x918] sm:$0xff] }
 0x80f   :  { %7449 = vmatprep.subr.bf16.mxu0 %v10894_v39  ;;  %7555 = vmatprep.subr.bf16.mxu1 %v10896_v53  ;;  %v10974_v39 = vcombine.high %v4373_v37, %v4381_v38  ;;  %v10976_v53 = vcombine.high %v4374_v24, %v4382_v61  ;;  %v4445_v59 = vld [vmem:[#allocation18 + $0x950] sm:$0xff]  ;;  %v4446_v31 = vld [vmem:[#allocation18 + $0x958] sm:$0xff] }
 0x812   :  { %7450 = vmatpush1.bf16.msra.mxu0 %v10893_v43  ;;  %7556 = vmatpush1.bf16.msra.mxu1 %v10895_v50  ;;  %v10973_v43 = vcombine.low %v4373_v37, %v4381_v38  ;;  %v10975_v50 = vcombine.low %v4374_v24, %v4382_v61  ;;  %v4453_v37 = vld [vmem:[#allocation18 + $0x990] sm:$0xff]  ;;  %v4454_v24 = vld [vmem:[#allocation18 + $0x998] sm:$0xff] }
 0x813   :  { %7451 = vmatprep.subr.bf16.mxu0 %v10910_v23  ;;  %7557 = vmatprep.subr.bf16.mxu1 %v10912_v0  ;;  %v10990_v23 = vcombine.high %v4389_v55, %v4397_v51  ;;  %v10992_v0 = vcombine.high %v4390_v40, %v4398_v6  ;;  %v4461_v38 = vld [vmem:[#allocation18 + $0x9d0] sm:$0xff]  ;;  %v4462_v61 = vld [vmem:[#allocation18 + $0x9d8] sm:$0xff] }
 0x816   :  { %7452 = vmatpush1.bf16.msra.mxu0 %v10909_v13  ;;  %7558 = vmatpush1.bf16.msra.mxu1 %v10911_v26  ;;  %v10989_v13 = vcombine.low %v4389_v55, %v4397_v51  ;;  %v10991_v26 = vcombine.low %v4390_v40, %v4398_v6  ;;  %v4469_v55 = vld [vmem:[#allocation18 + $0xa10] sm:$0xff]  ;;  %v4470_v40 = vld [vmem:[#allocation18 + $0xa18] sm:$0xff] }
 0x817   :  { %7453 = vmatprep.subr.bf16.mxu0 %v10926_v33  ;;  %7559 = vmatprep.subr.bf16.mxu1 %v10928_v22  ;;  %v11006_v33 = vcombine.high %v4405_v4, %v4413_v47  ;;  %v11008_v22 = vcombine.high %v4406_v34, %v4414_v35  ;;  %v4477_v51 = vld [vmem:[#allocation18 + $0xa50] sm:$0xff]  ;;  %v4478_v6 = vld [vmem:[#allocation18 + $0xa58] sm:$0xff] }
 0x81a   :  { %7454 = vmatpush1.bf16.msra.mxu0 %v10925_v8  ;;  %7560 = vmatpush1.bf16.msra.mxu1 %v10927_v36  ;;  %v11005_v8 = vcombine.low %v4405_v4, %v4413_v47  ;;  %v11007_v36 = vcombine.low %v4406_v34, %v4414_v35  ;;  %v4485_v4 = vld [vmem:[#allocation18 + $0xa90] sm:$0xff]  ;;  %v4486_v34 = vld [vmem:[#allocation18 + $0xa98] sm:$0xff] }
 0x81b   :  { %7455 = vmatprep.subr.bf16.mxu0 %v10942_v44  ;;  %7561 = vmatprep.subr.bf16.mxu1 %v10944_v19  ;;  %v11022_v44 = vcombine.high %v4421_v62, %v4429_v3  ;;  %v11024_v19 = vcombine.high %v4422_v63, %v4430_v5  ;;  %v4493_v47 = vld [vmem:[#allocation18 + $0xad0] sm:$0xff]  ;;  %v4494_v35 = vld [vmem:[#allocation18 + $0xad8] sm:$0xff] }
 0x81e   :  { %7456 = vmatpush1.bf16.msra.mxu0 %v10941_v48  ;;  %7562 = vmatpush1.bf16.msra.mxu1 %v10943_v1  ;;  %v11021_v48 = vcombine.low %v4421_v62, %v4429_v3  ;;  %v11023_v1 = vcombine.low %v4422_v63, %v4430_v5  ;;  %v4501_v62 = vld [vmem:[#allocation18 + $0xb10] sm:$0xff]  ;;  %v4502_v63 = vld [vmem:[#allocation18 + $0xb18] sm:$0xff] }
 0x81f   :  { %7457 = vmatprep.subr.bf16.mxu0 %v10958_v9  ;;  %7563 = vmatprep.subr.bf16.mxu1 %v10960_v18  ;;  %v11038_v9 = vcombine.high %v4437_v57, %v4445_v59  ;;  %v11040_v18 = vcombine.high %v4438_v46, %v4446_v31  ;;  %v4509_v3 = vld [vmem:[#allocation18 + $0xb50] sm:$0xff]  ;;  %v4510_v5 = vld [vmem:[#allocation18 + $0xb58] sm:$0xff] }
 0x822   :  { %7458 = vmatpush1.bf16.msra.mxu0 %v10957_v11  ;;  %7564 = vmatpush1.bf16.msra.mxu1 %v10959_v15  ;;  %v11037_v11 = vcombine.low %v4437_v57, %v4445_v59  ;;  %v11039_v15 = vcombine.low %v4438_v46, %v4446_v31  ;;  %v4517_v57 = vld [vmem:[#allocation18 + $0xb90] sm:$0xff]  ;;  %v4518_v46 = vld [vmem:[#allocation18 + $0xb98] sm:$0xff] }
 0x823   :  { %7459 = vmatprep.subr.bf16.mxu0 %v10974_v39  ;;  %7565 = vmatprep.subr.bf16.mxu1 %v10976_v53  ;;  %v11054_v39 = vcombine.high %v4453_v37, %v4461_v38  ;;  %v11056_v53 = vcombine.high %v4454_v24, %v4462_v61  ;;  %v4525_v59 = vld [vmem:[#allocation18 + $0xbd0] sm:$0xff]  ;;  %v4526_v31 = vld [vmem:[#allocation18 + $0xbd8] sm:$0xff] }
 0x826   :  { %7460 = vmatpush1.bf16.msra.mxu0 %v10973_v43  ;;  %7566 = vmatpush1.bf16.msra.mxu1 %v10975_v50  ;;  %v11053_v43 = vcombine.low %v4453_v37, %v4461_v38  ;;  %v11055_v50 = vcombine.low %v4454_v24, %v4462_v61  ;;  %v4533_v37 = vld [vmem:[#allocation18 + $0xc10] sm:$0xff]  ;;  %v4534_v24 = vld [vmem:[#allocation18 + $0xc18] sm:$0xff] }
 0x827   :  { %7461 = vmatprep.subr.bf16.mxu0 %v10990_v23  ;;  %7567 = vmatprep.subr.bf16.mxu1 %v10992_v0  ;;  %v11070_v23 = vcombine.high %v4469_v55, %v4477_v51  ;;  %v11072_v0 = vcombine.high %v4470_v40, %v4478_v6  ;;  %v4541_v38 = vld [vmem:[#allocation18 + $0xc50] sm:$0xff]  ;;  %v4542_v61 = vld [vmem:[#allocation18 + $0xc58] sm:$0xff] }
 0x82a   :  { %7462 = vmatpush1.bf16.msra.mxu0 %v10989_v13  ;;  %7568 = vmatpush1.bf16.msra.mxu1 %v10991_v26  ;;  %v11069_v13 = vcombine.low %v4469_v55, %v4477_v51  ;;  %v11071_v26 = vcombine.low %v4470_v40, %v4478_v6  ;;  %v4549_v55 = vld [vmem:[#allocation18 + $0xc90] sm:$0xff]  ;;  %v4550_v40 = vld [vmem:[#allocation18 + $0xc98] sm:$0xff] }
 0x82b   :  { %7484 = vmatprep.subr.bf16.mxu0 %v11006_v33  ;;  %7590 = vmatprep.subr.bf16.mxu1 %v11008_v22  ;;  %v11086_v33 = vcombine.high %v4485_v4, %v4493_v47  ;;  %v11088_v22 = vcombine.high %v4486_v34, %v4494_v35  ;;  %v4557_v51 = vld [vmem:[#allocation18 + $0xcd0] sm:$0xff]  ;;  %v4558_v6 = vld [vmem:[#allocation18 + $0xcd8] sm:$0xff] }
 0x82d   :  { %7464 = vmatmul.mubr.bf16.vlgmr.msra.gmra.mrb[48].mxu0 %v13623_v7  ;;  %7570 = vmatmul.mubr.bf16.vlgmr.msra.gmra.mrb[48].mxu1 %v13623_v7 }
 0x82e   :  { %7473 = vmatprep.mubr.bf16.mxu0 %v13656_v56  ;;  %7485 = vmatpush1.bf16.msra.mxu0 %v11005_v8  ;;  %v11085_v8 = vcombine.low %v4485_v4, %v4493_v47  ;;  %v4565_v4 = vld [vmem:[#allocation18 + $0xd10] sm:$0xff] }
 0x82f   :  { %7579 = vmatprep.mubr.bf16.mxu1 %v13656_v56  ;;  %7591 = vmatpush1.bf16.msra.mxu1 %v11007_v36  ;;  %v11087_v36 = vcombine.low %v4486_v34, %v4494_v35  ;;  %v4573_v47 = vld [vmem:[#allocation18 + $0xd50] sm:$0xff]  ;;  %v4566_v34 = vld [vmem:[#allocation18 + $0xd18] sm:$0xff] }
 0x830   :  { %7486 = vmatprep.subr.bf16.mxu0 %v11022_v44  ;;  %7592 = vmatprep.subr.bf16.mxu1 %v11024_v19  ;;  %v11102_v44 = vcombine.high %v4501_v62, %v4509_v3  ;;  %v11104_v19 = vcombine.high %v4502_v63, %v4510_v5  ;;  %v4574_v35 = vld [vmem:[#allocation18 + $0xd58] sm:$0xff] }
 0x832   :  { %7487 = vmatpush1.bf16.msra.mxu0 %v11021_v48  ;;  %v11101_v48 = vcombine.low %v4501_v62, %v4509_v3  ;;  %v4581_v62 = vld [vmem:[#allocation18 + $0xd90] sm:$0xff] }
 0x833   :  { %7593 = vmatpush1.bf16.msra.mxu1 %v11023_v1  ;;  %7488 = vmatprep.subr.bf16.mxu0 %v11038_v9  ;;  %v11103_v1 = vcombine.low %v4502_v63, %v4510_v5  ;;  %v11118_v9 = vcombine.high %v4517_v57, %v4525_v59  ;;  %v4589_v3 = vld [vmem:[#allocation18 + $0xdd0] sm:$0xff]  ;;  %v4582_v63 = vld [vmem:[#allocation18 + $0xd98] sm:$0xff] }
 0x834   :  { %7594 = vmatprep.subr.bf16.mxu1 %v11040_v18  ;;  %v11120_v18 = vcombine.high %v4518_v46, %v4526_v31  ;;  %v4590_v5 = vld [vmem:[#allocation18 + $0xdd8] sm:$0xff] }
 0x835   :  { %7474 = vmatmul.mubr.bf16.gmra.mrb[52].mxu0 %v13658_v25  ;;  %7580 = vmatmul.mubr.bf16.gmra.mrb[52].mxu1 %v13658_v25 }
 0x836   :  { %7489 = vmatpush1.bf16.msra.mxu0 %v11037_v11  ;;  %7516 = vmatprep.mubr.bf16.mxu0 %v13669_v58  ;;  %v11117_v11 = vcombine.low %v4517_v57, %v4525_v59  ;;  %v4597_v57 = vld [vmem:[#allocation18 + $0xe10] sm:$0xff] }
 0x837   :  { %7595 = vmatpush1.bf16.msra.mxu1 %v11039_v15  ;;  %7622 = vmatprep.mubr.bf16.mxu1 %v13669_v58  ;;  %v11119_v15 = vcombine.low %v4518_v46, %v4526_v31  ;;  %v4605_v59 = vld [vmem:[#allocation18 + $0xe50] sm:$0xff]  ;;  %v4598_v46 = vld [vmem:[#allocation18 + $0xe18] sm:$0xff] }
 0x838   :  { %7490 = vmatprep.subr.bf16.mxu0 %v11054_v39  ;;  %7596 = vmatprep.subr.bf16.mxu1 %v11056_v53  ;;  %v11134_v39 = vcombine.high %v4533_v37, %v4541_v38  ;;  %v11136_v53 = vcombine.high %v4534_v24, %v4542_v61  ;;  %v4606_v31 = vld [vmem:[#allocation18 + $0xe58] sm:$0xff] }
 0x83a   :  { %7491 = vmatpush1.bf16.msra.mxu0 %v11053_v43  ;;  %v11133_v43 = vcombine.low %v4533_v37, %v4541_v38  ;;  %v4613_v37 = vld [vmem:[#allocation18 + $0xe90] sm:$0xff] }
 0x83b   :  { %7597 = vmatpush1.bf16.msra.mxu1 %v11055_v50  ;;  %7492 = vmatprep.subr.bf16.mxu0 %v11070_v23  ;;  %v11135_v50 = vcombine.low %v4534_v24, %v4542_v61  ;;  %v11150_v23 = vcombine.high %v4549_v55, %v4557_v51  ;;  %v4621_v38 = vld [vmem:[#allocation18 + $0xed0] sm:$0xff]  ;;  %v4614_v24 = vld [vmem:[#allocation18 + $0xe98] sm:$0xff] }
 0x83c   :  { %7598 = vmatprep.subr.bf16.mxu1 %v11072_v0  ;;  %v11152_v0 = vcombine.high %v4550_v40, %v4558_v6  ;;  %v4622_v61 = vld [vmem:[#allocation18 + $0xed8] sm:$0xff] }
 0x83e   :  { %7493 = vmatpush1.bf16.msra.mxu0 %v11069_v13  ;;  %v11149_v13 = vcombine.low %v4549_v55, %v4557_v51  ;;  %v4629_v55 = vld [vmem:[#allocation18 + $0xf10] sm:$0xff] }
 0x83f   :  { %7599 = vmatpush1.bf16.msra.mxu1 %v11071_v26  ;;  %7494 = vmatprep.subr.bf16.mxu0 %v11086_v33  ;;  %v11151_v26 = vcombine.low %v4550_v40, %v4558_v6  ;;  %v11166_v33 = vcombine.high %v4565_v4, %v4573_v47  ;;  %v4637_v51 = vld [vmem:[#allocation18 + $0xf50] sm:$0xff]  ;;  %v4630_v40 = vld [vmem:[#allocation18 + $0xf18] sm:$0xff] }
 0x840   :  { %7600 = vmatprep.subr.bf16.mxu1 %v11088_v22  ;;  %v11168_v22 = vcombine.high %v4566_v34, %v4574_v35  ;;  %v4638_v6 = vld [vmem:[#allocation18 + $0xf58] sm:$0xff] }
 0x842   :  { %7495 = vmatpush1.bf16.msra.mxu0 %v11085_v8  ;;  %v11165_v8 = vcombine.low %v4565_v4, %v4573_v47  ;;  %v4645_v4 = vld [vmem:[#allocation18 + $0xf90] sm:$0xff] }
 0x843   :  { %7601 = vmatpush1.bf16.msra.mxu1 %v11087_v36  ;;  %7496 = vmatprep.subr.bf16.mxu0 %v11102_v44  ;;  %v11167_v36 = vcombine.low %v4566_v34, %v4574_v35  ;;  %v11182_v44 = vcombine.high %v4581_v62, %v4589_v3  ;;  %v4653_v47 = vld [vmem:[#allocation18 + $0xfd0] sm:$0xff]  ;;  %v4646_v34 = vld [vmem:[#allocation18 + $0xf98] sm:$0xff] }
 0x844   :  { %7602 = vmatprep.subr.bf16.mxu1 %v11104_v19  ;;  %v11184_v19 = vcombine.high %v4582_v63, %v4590_v5  ;;  %v4654_v35 = vld [vmem:[#allocation18 + $0xfd8] sm:$0xff] }
 0x846   :  { %7497 = vmatpush1.bf16.msra.mxu0 %v11101_v48  ;;  %v11181_v48 = vcombine.low %v4581_v62, %v4589_v3  ;;  %v4151_v62 = vld [vmem:[#allocation18 + $0x20] sm:$0xff] }
 0x847   :  { %7603 = vmatpush1.bf16.msra.mxu1 %v11103_v1  ;;  %7498 = vmatprep.subr.bf16.mxu0 %v11118_v9  ;;  %v11183_v1 = vcombine.low %v4582_v63, %v4590_v5  ;;  %v11198_v9 = vcombine.high %v4597_v57, %v4605_v59  ;;  %v4159_v3 = vld [vmem:[#allocation18 + $0x60] sm:$0xff]  ;;  %v4152_v63 = vld [vmem:[#allocation18 + $0x28] sm:$0xff] }
 0x848   :  { %7604 = vmatprep.subr.bf16.mxu1 %v11120_v18  ;;  %v11200_v18 = vcombine.high %v4598_v46, %v4606_v31  ;;  %v4160_v5 = vld [vmem:[#allocation18 + $0x68] sm:$0xff] }
 0x84a   :  { %7499 = vmatpush1.bf16.msra.mxu0 %v11117_v11  ;;  %v11197_v11 = vcombine.low %v4597_v57, %v4605_v59  ;;  %v4167_v57 = vld [vmem:[#allocation18 + $0xa0] sm:$0xff] }
 0x84b   :  { %7605 = vmatpush1.bf16.msra.mxu1 %v11119_v15  ;;  %7500 = vmatprep.subr.bf16.mxu0 %v11134_v39  ;;  %v11199_v15 = vcombine.low %v4598_v46, %v4606_v31  ;;  %v11214_v39 = vcombine.high %v4613_v37, %v4621_v38  ;;  %v4175_v59 = vld [vmem:[#allocation18 + $0xe0] sm:$0xff]  ;;  %v4168_v46 = vld [vmem:[#allocation18 + $0xa8] sm:$0xff] }
 0x84c   :  { %7606 = vmatprep.subr.bf16.mxu1 %v11136_v53  ;;  %v11216_v53 = vcombine.high %v4614_v24, %v4622_v61  ;;  %v4176_v31 = vld [vmem:[#allocation18 + $0xe8] sm:$0xff] }
 0x84e   :  { %7501 = vmatpush1.bf16.msra.mxu0 %v11133_v43  ;;  %v11213_v43 = vcombine.low %v4613_v37, %v4621_v38  ;;  %v4183_v37 = vld [vmem:[#allocation18 + $0x120] sm:$0xff] }
 0x84f   :  { %7607 = vmatpush1.bf16.msra.mxu1 %v11135_v50  ;;  %7502 = vmatprep.subr.bf16.mxu0 %v11150_v23  ;;  %v11215_v50 = vcombine.low %v4614_v24, %v4622_v61  ;;  %v11230_v23 = vcombine.high %v4629_v55, %v4637_v51  ;;  %v4191_v38 = vld [vmem:[#allocation18 + $0x160] sm:$0xff]  ;;  %v4184_v24 = vld [vmem:[#allocation18 + $0x128] sm:$0xff] }
 0x850   :  { %7608 = vmatprep.subr.bf16.mxu1 %v11152_v0  ;;  %v11232_v0 = vcombine.high %v4630_v40, %v4638_v6  ;;  %v4192_v61 = vld [vmem:[#allocation18 + $0x168] sm:$0xff] }
 0x852   :  { %7503 = vmatpush1.bf16.msra.mxu0 %v11149_v13  ;;  %v11229_v13 = vcombine.low %v4629_v55, %v4637_v51  ;;  %v4199_v55 = vld [vmem:[#allocation18 + $0x1a0] sm:$0xff] }
 0x853   :  { %7609 = vmatpush1.bf16.msra.mxu1 %v11151_v26  ;;  %7504 = vmatprep.subr.bf16.mxu0 %v11166_v33  ;;  %v11231_v26 = vcombine.low %v4630_v40, %v4638_v6  ;;  %v11246_v33 = vcombine.high %v4645_v4, %v4653_v47  ;;  %v4207_v51 = vld [vmem:[#allocation18 + $0x1e0] sm:$0xff]  ;;  %v4200_v40 = vld [vmem:[#allocation18 + $0x1a8] sm:$0xff] }
 0x854   :  { %7610 = vmatprep.subr.bf16.mxu1 %v11168_v22  ;;  %v11248_v22 = vcombine.high %v4646_v34, %v4654_v35  ;;  %v4208_v6 = vld [vmem:[#allocation18 + $0x1e8] sm:$0xff] }
 0x856   :  { %7505 = vmatpush1.bf16.msra.mxu0 %v11165_v8  ;;  %v11245_v8 = vcombine.low %v4645_v4, %v4653_v47  ;;  %v4215_v4 = vld [vmem:[#allocation18 + $0x220] sm:$0xff] }
 0x857   :  { %7611 = vmatpush1.bf16.msra.mxu1 %v11167_v36  ;;  %7506 = vmatprep.subr.bf16.mxu0 %v11182_v44  ;;  %v11247_v36 = vcombine.low %v4646_v34, %v4654_v35  ;;  %v10754_v44 = vcombine.high %v4151_v62, %v4159_v3  ;;  %v4223_v47 = vld [vmem:[#allocation18 + $0x260] sm:$0xff]  ;;  %v4216_v34 = vld [vmem:[#allocation18 + $0x228] sm:$0xff] }
 0x858   :  { %7612 = vmatprep.subr.bf16.mxu1 %v11184_v19  ;;  %v10756_v19 = vcombine.high %v4152_v63, %v4160_v5  ;;  %v4224_v35 = vld [vmem:[#allocation18 + $0x268] sm:$0xff] }
 0x85a   :  { %7507 = vmatpush1.bf16.msra.mxu0 %v11181_v48  ;;  %v10753_v48 = vcombine.low %v4151_v62, %v4159_v3  ;;  %v4231_v62 = vld [vmem:[#allocation18 + $0x2a0] sm:$0xff] }
 0x85b   :  { %7613 = vmatpush1.bf16.msra.mxu1 %v11183_v1  ;;  %7508 = vmatprep.subr.bf16.mxu0 %v11198_v9  ;;  %v10755_v1 = vcombine.low %v4152_v63, %v4160_v5  ;;  %v10770_v9 = vcombine.high %v4167_v57, %v4175_v59  ;;  %v4239_v3 = vld [vmem:[#allocation18 + $0x2e0] sm:$0xff]  ;;  %v4232_v63 = vld [vmem:[#allocation18 + $0x2a8] sm:$0xff] }
 0x85c   :  { %7614 = vmatprep.subr.bf16.mxu1 %v11200_v18  ;;  %v10772_v18 = vcombine.high %v4168_v46, %v4176_v31  ;;  %v4240_v5 = vld [vmem:[#allocation18 + $0x2e8] sm:$0xff] }
 0x85e   :  { %7509 = vmatpush1.bf16.msra.mxu0 %v11197_v11  ;;  %v10769_v11 = vcombine.low %v4167_v57, %v4175_v59  ;;  %v4247_v57 = vld [vmem:[#allocation18 + $0x320] sm:$0xff] }
 0x85f   :  { %7615 = vmatpush1.bf16.msra.mxu1 %v11199_v15  ;;  %7510 = vmatprep.subr.bf16.mxu0 %v11214_v39  ;;  %v10771_v15 = vcombine.low %v4168_v46, %v4176_v31  ;;  %v10786_v39 = vcombine.high %v4183_v37, %v4191_v38  ;;  %v4255_v59 = vld [vmem:[#allocation18 + $0x360] sm:$0xff]  ;;  %v4248_v46 = vld [vmem:[#allocation18 + $0x328] sm:$0xff] }
 0x860   :  { %7616 = vmatprep.subr.bf16.mxu1 %v11216_v53  ;;  %v10788_v53 = vcombine.high %v4184_v24, %v4192_v61  ;;  %v4256_v31 = vld [vmem:[#allocation18 + $0x368] sm:$0xff] }
 0x862   :  { %7511 = vmatpush1.bf16.msra.mxu0 %v11213_v43  ;;  %v10785_v43 = vcombine.low %v4183_v37, %v4191_v38  ;;  %v4263_v37 = vld [vmem:[#allocation18 + $0x3a0] sm:$0xff] }
 0x863   :  { %7617 = vmatpush1.bf16.msra.mxu1 %v11215_v50  ;;  %7512 = vmatprep.subr.bf16.mxu0 %v11230_v23  ;;  %v10787_v50 = vcombine.low %v4184_v24, %v4192_v61  ;;  %v10802_v23 = vcombine.high %v4199_v55, %v4207_v51  ;;  %v4271_v38 = vld [vmem:[#allocation18 + $0x3e0] sm:$0xff]  ;;  %v4264_v24 = vld [vmem:[#allocation18 + $0x3a8] sm:$0xff] }
 0x864   :  { %7618 = vmatprep.subr.bf16.mxu1 %v11232_v0  ;;  %v10804_v0 = vcombine.high %v4200_v40, %v4208_v6  ;;  %v4272_v61 = vld [vmem:[#allocation18 + $0x3e8] sm:$0xff] }
 0x866   :  { %7513 = vmatpush1.bf16.msra.mxu0 %v11229_v13  ;;  %v10801_v13 = vcombine.low %v4199_v55, %v4207_v51  ;;  %v4279_v55 = vld [vmem:[#allocation18 + $0x420] sm:$0xff] }
 0x867   :  { %7619 = vmatpush1.bf16.msra.mxu1 %v11231_v26  ;;  %7514 = vmatprep.subr.bf16.mxu0 %v11246_v33  ;;  %v10803_v26 = vcombine.low %v4200_v40, %v4208_v6  ;;  %v10818_v33 = vcombine.high %v4215_v4, %v4223_v47  ;;  %v4287_v51 = vld [vmem:[#allocation18 + $0x460] sm:$0xff]  ;;  %v4280_v40 = vld [vmem:[#allocation18 + $0x428] sm:$0xff] }
 0x868   :  { %7620 = vmatprep.subr.bf16.mxu1 %v11248_v22  ;;  %v10820_v22 = vcombine.high %v4216_v34, %v4224_v35  ;;  %v4288_v6 = vld [vmem:[#allocation18 + $0x468] sm:$0xff] }
 0x86a   :  { %7515 = vmatpush1.bf16.msra.mxu0 %v11245_v8  ;;  %v10817_v8 = vcombine.low %v4215_v4, %v4223_v47  ;;  %v4295_v4 = vld [vmem:[#allocation18 + $0x4a0] sm:$0xff] }
 0x86b   :  { %7621 = vmatpush1.bf16.msra.mxu1 %v11247_v36  ;;  %7643 = vmatprep.subr.bf16.mxu0 %v10754_v44  ;;  %v10819_v36 = vcombine.low %v4216_v34, %v4224_v35  ;;  %v10834_v44 = vcombine.high %v4231_v62, %v4239_v3  ;;  %v4303_v47 = vld [vmem:[#allocation18 + $0x4e0] sm:$0xff]  ;;  %v4296_v34 = vld [vmem:[#allocation18 + $0x4a8] sm:$0xff] }
 0x86c   :  { %7749 = vmatprep.subr.bf16.mxu1 %v10756_v19  ;;  %v10836_v19 = vcombine.high %v4232_v63, %v4240_v5  ;;  %v4304_v35 = vld [vmem:[#allocation18 + $0x4e8] sm:$0xff] }
 0x86d   :  { %7517 = vmatmul.mubr.bf16.vlgmr.msra.gmra.mrb[48].mxu0 %v13629_v54 }
 0x86e   :  { %7623 = vmatmul.mubr.bf16.vlgmr.msra.gmra.mrb[48].mxu1 %v13629_v54  ;;  %7526 = vmatprep.mubr.bf16.mxu0 %v13661_v52 }
 0x86f   :  { %7632 = vmatprep.mubr.bf16.mxu1 %v13661_v52  ;;  %7644 = vmatpush1.bf16.msra.mxu0 %v10753_v48  ;;  %v10833_v48 = vcombine.low %v4231_v62, %v4239_v3  ;;  %v4311_v62 = vld [vmem:[#allocation18 + $0x520] sm:$0xff] }
 0x870   :  { %7750 = vmatpush1.bf16.msra.mxu1 %v10755_v1  ;;  %7645 = vmatprep.subr.bf16.mxu0 %v10770_v9  ;;  %v10835_v1 = vcombine.low %v4232_v63, %v4240_v5  ;;  %v10850_v9 = vcombine.high %v4247_v57, %v4255_v59  ;;  %v4319_v3 = vld [vmem:[#allocation18 + $0x560] sm:$0xff]  ;;  %v4312_v63 = vld [vmem:[#allocation18 + $0x528] sm:$0xff] }
 0x871   :  { %7751 = vmatprep.subr.bf16.mxu1 %v10772_v18  ;;  %v10852_v18 = vcombine.high %v4248_v46, %v4256_v31  ;;  %v4320_v5 = vld [vmem:[#allocation18 + $0x568] sm:$0xff] }
 0x873   :  { %7646 = vmatpush1.bf16.msra.mxu0 %v10769_v11  ;;  %v10849_v11 = vcombine.low %v4247_v57, %v4255_v59  ;;  %v4327_v57 = vld [vmem:[#allocation18 + $0x5a0] sm:$0xff] }
 0x874   :  { %7752 = vmatpush1.bf16.msra.mxu1 %v10771_v15  ;;  %7647 = vmatprep.subr.bf16.mxu0 %v10786_v39  ;;  %v10851_v15 = vcombine.low %v4248_v46, %v4256_v31  ;;  %v10866_v39 = vcombine.high %v4263_v37, %v4271_v38  ;;  %v4335_v59 = vld [vmem:[#allocation18 + $0x5e0] sm:$0xff]  ;;  %v4328_v46 = vld [vmem:[#allocation18 + $0x5a8] sm:$0xff] }
 0x875   :  { %7527 = vmatmul.mubr.bf16.gmra.mrb[52].mxu0 %v13665_v30  ;;  %7753 = vmatprep.subr.bf16.mxu1 %v10788_v53  ;;  %v10868_v53 = vcombine.high %v4264_v24, %v4272_v61  ;;  %v4336_v31 = vld [vmem:[#allocation18 + $0x5e8] sm:$0xff] }
 0x876   :  { %7633 = vmatmul.mubr.bf16.gmra.mrb[52].mxu1 %v13665_v30  ;;  %7675 = vmatprep.mubr.bf16.mxu0 %v13621_v14 }
 0x877   :  { %7648 = vmatpush1.bf16.msra.mxu0 %v10785_v43  ;;  %7781 = vmatprep.mubr.bf16.mxu1 %v13621_v14  ;;  %v10865_v43 = vcombine.low %v4263_v37, %v4271_v38  ;;  %v4343_v37 = vld [vmem:[#allocation18 + $0x620] sm:$0xff] }
 0x878   :  { %7754 = vmatpush1.bf16.msra.mxu1 %v10787_v50  ;;  %7649 = vmatprep.subr.bf16.mxu0 %v10802_v23  ;;  %v10867_v50 = vcombine.low %v4264_v24, %v4272_v61  ;;  %v10882_v23 = vcombine.high %v4279_v55, %v4287_v51  ;;  %v4351_v38 = vld [vmem:[#allocation18 + $0x660] sm:$0xff]  ;;  %v4344_v24 = vld [vmem:[#allocation18 + $0x628] sm:$0xff] }
 0x879   :  { %7755 = vmatprep.subr.bf16.mxu1 %v10804_v0  ;;  %v10884_v0 = vcombine.high %v4280_v40, %v4288_v6  ;;  %v4352_v61 = vld [vmem:[#allocation18 + $0x668] sm:$0xff] }
 0x87b   :  { %7650 = vmatpush1.bf16.msra.mxu0 %v10801_v13  ;;  %v10881_v13 = vcombine.low %v4279_v55, %v4287_v51  ;;  %v4359_v55 = vld [vmem:[#allocation18 + $0x6a0] sm:$0xff] }
 0x87c   :  { %7756 = vmatpush1.bf16.msra.mxu1 %v10803_v26  ;;  %7651 = vmatprep.subr.bf16.mxu0 %v10818_v33  ;;  %v10883_v26 = vcombine.low %v4280_v40, %v4288_v6  ;;  %v10898_v33 = vcombine.high %v4295_v4, %v4303_v47  ;;  %v4367_v51 = vld [vmem:[#allocation18 + $0x6e0] sm:$0xff]  ;;  %v4360_v40 = vld [vmem:[#allocation18 + $0x6a8] sm:$0xff] }
 0x87d   :  { %7757 = vmatprep.subr.bf16.mxu1 %v10820_v22  ;;  %v10900_v22 = vcombine.high %v4296_v34, %v4304_v35  ;;  %v4368_v6 = vld [vmem:[#allocation18 + $0x6e8] sm:$0xff] }
 0x87f   :  { %7652 = vmatpush1.bf16.msra.mxu0 %v10817_v8  ;;  %v10897_v8 = vcombine.low %v4295_v4, %v4303_v47  ;;  %v4375_v4 = vld [vmem:[#allocation18 + $0x720] sm:$0xff] }
 0x880   :  { %7758 = vmatpush1.bf16.msra.mxu1 %v10819_v36  ;;  %7653 = vmatprep.subr.bf16.mxu0 %v10834_v44  ;;  %v10899_v36 = vcombine.low %v4296_v34, %v4304_v35  ;;  %v10914_v44 = vcombine.high %v4311_v62, %v4319_v3  ;;  %v4383_v47 = vld [vmem:[#allocation18 + $0x760] sm:$0xff]  ;;  %v4376_v34 = vld [vmem:[#allocation18 + $0x728] sm:$0xff] }
 0x881   :  { %7759 = vmatprep.subr.bf16.mxu1 %v10836_v19  ;;  %v10916_v19 = vcombine.high %v4312_v63, %v4320_v5  ;;  %v4384_v35 = vld [vmem:[#allocation18 + $0x768] sm:$0xff] }
 0x883   :  { %7654 = vmatpush1.bf16.msra.mxu0 %v10833_v48  ;;  %v10913_v48 = vcombine.low %v4311_v62, %v4319_v3  ;;  %v4391_v62 = vld [vmem:[#allocation18 + $0x7a0] sm:$0xff] }
 0x884   :  { %7760 = vmatpush1.bf16.msra.mxu1 %v10835_v1  ;;  %7655 = vmatprep.subr.bf16.mxu0 %v10850_v9  ;;  %v10915_v1 = vcombine.low %v4312_v63, %v4320_v5  ;;  %v10930_v9 = vcombine.high %v4327_v57, %v4335_v59  ;;  %v4399_v3 = vld [vmem:[#allocation18 + $0x7e0] sm:$0xff]  ;;  %v4392_v63 = vld [vmem:[#allocation18 + $0x7a8] sm:$0xff] }
 0x885   :  { %7761 = vmatprep.subr.bf16.mxu1 %v10852_v18  ;;  %v10932_v18 = vcombine.high %v4328_v46, %v4336_v31  ;;  %v4400_v5 = vld [vmem:[#allocation18 + $0x7e8] sm:$0xff] }
 0x887   :  { %7656 = vmatpush1.bf16.msra.mxu0 %v10849_v11  ;;  %v10929_v11 = vcombine.low %v4327_v57, %v4335_v59  ;;  %v4407_v57 = vld [vmem:[#allocation18 + $0x820] sm:$0xff] }
 0x888   :  { %7762 = vmatpush1.bf16.msra.mxu1 %v10851_v15  ;;  %7657 = vmatprep.subr.bf16.mxu0 %v10866_v39  ;;  %v10931_v15 = vcombine.low %v4328_v46, %v4336_v31  ;;  %v10946_v39 = vcombine.high %v4343_v37, %v4351_v38  ;;  %v4415_v59 = vld [vmem:[#allocation18 + $0x860] sm:$0xff]  ;;  %v4408_v46 = vld [vmem:[#allocation18 + $0x828] sm:$0xff] }
 0x889   :  { %7763 = vmatprep.subr.bf16.mxu1 %v10868_v53  ;;  %v10948_v53 = vcombine.high %v4344_v24, %v4352_v61  ;;  %v4416_v31 = vld [vmem:[#allocation18 + $0x868] sm:$0xff] }
 0x88b   :  { %7658 = vmatpush1.bf16.msra.mxu0 %v10865_v43  ;;  %v10945_v43 = vcombine.low %v4343_v37, %v4351_v38  ;;  %v4423_v37 = vld [vmem:[#allocation18 + $0x8a0] sm:$0xff] }
 0x88c   :  { %7764 = vmatpush1.bf16.msra.mxu1 %v10867_v50  ;;  %7659 = vmatprep.subr.bf16.mxu0 %v10882_v23  ;;  %v10947_v50 = vcombine.low %v4344_v24, %v4352_v61  ;;  %v10962_v23 = vcombine.high %v4359_v55, %v4367_v51  ;;  %v4431_v38 = vld [vmem:[#allocation18 + $0x8e0] sm:$0xff]  ;;  %v4424_v24 = vld [vmem:[#allocation18 + $0x8a8] sm:$0xff] }
 0x88d   :  { %7765 = vmatprep.subr.bf16.mxu1 %v10884_v0  ;;  %v10964_v0 = vcombine.high %v4360_v40, %v4368_v6  ;;  %v4432_v61 = vld [vmem:[#allocation18 + $0x8e8] sm:$0xff] }
 0x88f   :  { %7660 = vmatpush1.bf16.msra.mxu0 %v10881_v13  ;;  %v10961_v13 = vcombine.low %v4359_v55, %v4367_v51  ;;  %v4439_v55 = vld [vmem:[#allocation18 + $0x920] sm:$0xff] }
 0x890   :  { %7766 = vmatpush1.bf16.msra.mxu1 %v10883_v26  ;;  %7661 = vmatprep.subr.bf16.mxu0 %v10898_v33  ;;  %v10963_v26 = vcombine.low %v4360_v40, %v4368_v6  ;;  %v10978_v33 = vcombine.high %v4375_v4, %v4383_v47  ;;  %v4447_v51 = vld [vmem:[#allocation18 + $0x960] sm:$0xff]  ;;  %v4440_v40 = vld [vmem:[#allocation18 + $0x928] sm:$0xff] }
 0x891   :  { %7767 = vmatprep.subr.bf16.mxu1 %v10900_v22  ;;  %v10980_v22 = vcombine.high %v4376_v34, %v4384_v35  ;;  %v4448_v6 = vld [vmem:[#allocation18 + $0x968] sm:$0xff] }
 0x893   :  { %7662 = vmatpush1.bf16.msra.mxu0 %v10897_v8  ;;  %v10977_v8 = vcombine.low %v4375_v4, %v4383_v47  ;;  %v4455_v4 = vld [vmem:[#allocation18 + $0x9a0] sm:$0xff] }
 0x894   :  { %7768 = vmatpush1.bf16.msra.mxu1 %v10899_v36  ;;  %7663 = vmatprep.subr.bf16.mxu0 %v10914_v44  ;;  %v10979_v36 = vcombine.low %v4376_v34, %v4384_v35  ;;  %v10994_v44 = vcombine.high %v4391_v62, %v4399_v3  ;;  %v4463_v47 = vld [vmem:[#allocation18 + $0x9e0] sm:$0xff]  ;;  %v4456_v34 = vld [vmem:[#allocation18 + $0x9a8] sm:$0xff] }
 0x895   :  { %7769 = vmatprep.subr.bf16.mxu1 %v10916_v19  ;;  %v10996_v19 = vcombine.high %v4392_v63, %v4400_v5  ;;  %v4464_v35 = vld [vmem:[#allocation18 + $0x9e8] sm:$0xff] }
 0x897   :  { %7664 = vmatpush1.bf16.msra.mxu0 %v10913_v48  ;;  %v10993_v48 = vcombine.low %v4391_v62, %v4399_v3  ;;  %v4471_v62 = vld [vmem:[#allocation18 + $0xa20] sm:$0xff] }
 0x898   :  { %7770 = vmatpush1.bf16.msra.mxu1 %v10915_v1  ;;  %7665 = vmatprep.subr.bf16.mxu0 %v10930_v9  ;;  %v10995_v1 = vcombine.low %v4392_v63, %v4400_v5  ;;  %v11010_v9 = vcombine.high %v4407_v57, %v4415_v59  ;;  %v4479_v3 = vld [vmem:[#allocation18 + $0xa60] sm:$0xff]  ;;  %v4472_v63 = vld [vmem:[#allocation18 + $0xa28] sm:$0xff] }
 0x899   :  { %7771 = vmatprep.subr.bf16.mxu1 %v10932_v18  ;;  %v11012_v18 = vcombine.high %v4408_v46, %v4416_v31  ;;  %v4480_v5 = vld [vmem:[#allocation18 + $0xa68] sm:$0xff] }
 0x89b   :  { %7666 = vmatpush1.bf16.msra.mxu0 %v10929_v11  ;;  %v11009_v11 = vcombine.low %v4407_v57, %v4415_v59  ;;  %v4487_v57 = vld [vmem:[#allocation18 + $0xaa0] sm:$0xff] }
 0x89c   :  { %7772 = vmatpush1.bf16.msra.mxu1 %v10931_v15  ;;  %7667 = vmatprep.subr.bf16.mxu0 %v10946_v39  ;;  %v11011_v15 = vcombine.low %v4408_v46, %v4416_v31  ;;  %v11026_v39 = vcombine.high %v4423_v37, %v4431_v38  ;;  %v4495_v59 = vld [vmem:[#allocation18 + $0xae0] sm:$0xff]  ;;  %v4488_v46 = vld [vmem:[#allocation18 + $0xaa8] sm:$0xff] }
 0x89d   :  { %7773 = vmatprep.subr.bf16.mxu1 %v10948_v53  ;;  %v11028_v53 = vcombine.high %v4424_v24, %v4432_v61  ;;  %v4496_v31 = vld [vmem:[#allocation18 + $0xae8] sm:$0xff] }
 0x89f   :  { %7668 = vmatpush1.bf16.msra.mxu0 %v10945_v43  ;;  %v11025_v43 = vcombine.low %v4423_v37, %v4431_v38  ;;  %v4503_v37 = vld [vmem:[#allocation18 + $0xb20] sm:$0xff] }
 0x8a0   :  { %7774 = vmatpush1.bf16.msra.mxu1 %v10947_v50  ;;  %7669 = vmatprep.subr.bf16.mxu0 %v10962_v23  ;;  %v11027_v50 = vcombine.low %v4424_v24, %v4432_v61  ;;  %v11042_v23 = vcombine.high %v4439_v55, %v4447_v51  ;;  %v4511_v38 = vld [vmem:[#allocation18 + $0xb60] sm:$0xff] }
 0x8a1   :  { %7775 = vmatprep.subr.bf16.mxu1 %v10964_v0  ;;  %v11044_v0 = vcombine.high %v4440_v40, %v4448_v6 }
 0x8a3   :  { %7670 = vmatpush1.bf16.msra.mxu0 %v10961_v13  ;;  %v11041_v13 = vcombine.low %v4439_v55, %v4447_v51  ;;  %v11089_v55 = vcombine.low %v4487_v57, %v4495_v59  ;;  %v11091_v51 = vcombine.low %v4488_v46, %v4496_v31 }
 0x8a4   :  { %7776 = vmatpush1.bf16.msra.mxu1 %v10963_v26  ;;  %7671 = vmatprep.subr.bf16.mxu0 %v10978_v33  ;;  %v11043_v26 = vcombine.low %v4440_v40, %v4448_v6  ;;  %v11058_v33 = vcombine.high %v4455_v4, %v4463_v47 }
 0x8a5   :  { %7777 = vmatprep.subr.bf16.mxu1 %v10980_v22  ;;  %v11060_v22 = vcombine.high %v4456_v34, %v4464_v35 }
 0x8a7   :  { %7672 = vmatpush1.bf16.msra.mxu0 %v10977_v8  ;;  %v11057_v8 = vcombine.low %v4455_v4, %v4463_v47  ;;  %v4519_v4 = vld [vmem:[#allocation18 + $0xba0] sm:$0xff] }
 0x8a8   :  { %7778 = vmatpush1.bf16.msra.mxu1 %v10979_v36  ;;  %7673 = vmatprep.subr.bf16.mxu0 %v10994_v44  ;;  %v11059_v36 = vcombine.low %v4456_v34, %v4464_v35  ;;  %v11074_v44 = vcombine.high %v4471_v62, %v4479_v3  ;;  %v4527_v47 = vld [vmem:[#allocation18 + $0xbe0] sm:$0xff]  ;;  %v4520_v34 = vld [vmem:[#allocation18 + $0xba8] sm:$0xff] }
 0x8a9   :  { %7779 = vmatprep.subr.bf16.mxu1 %v10996_v19  ;;  %v11076_v19 = vcombine.high %v4472_v63, %v4480_v5  ;;  %v4528_v35 = vld [vmem:[#allocation18 + $0xbe8] sm:$0xff] }
 0x8ab   :  { %7674 = vmatpush1.bf16.msra.mxu0 %v10993_v48  ;;  %v11073_v48 = vcombine.low %v4471_v62, %v4479_v3  ;;  %v4535_v62 = vld [vmem:[#allocation18 + $0xc20] sm:$0xff] }
 0x8ac   :  { %7780 = vmatpush1.bf16.msra.mxu1 %v10995_v1  ;;  %7696 = vmatprep.subr.bf16.mxu0 %v11010_v9  ;;  %v11075_v1 = vcombine.low %v4472_v63, %v4480_v5  ;;  %v11090_v9 = vcombine.high %v4487_v57, %v4495_v59  ;;  %v4543_v3 = vld [vmem:[#allocation18 + $0xc60] sm:$0xff]  ;;  %v11121_v57 = vcombine.low %v4519_v4, %v4527_v47 }
 0x8ad   :  { %7802 = vmatprep.subr.bf16.mxu1 %v11012_v18  ;;  %v11092_v18 = vcombine.high %v4488_v46, %v4496_v31  ;;  %v11123_v59 = vcombine.low %v4520_v34, %v4528_v35 }
 0x8ae   :  { %7676 = vmatmul.mubr.bf16.vlgmr.msra.gmra.mrb[56].mxu0 %v13623_v7 }
 0x8af   :  { %7782 = vmatmul.mubr.bf16.vlgmr.msra.gmra.mrb[56].mxu1 %v13623_v7  ;;  %7685 = vmatprep.mubr.bf16.mxu0 %v13656_v56 }
 0x8b0   :  { %7697 = vmatpush1.bf16.msra.mxu0 %v11009_v11  ;;  %7791 = vmatprep.mubr.bf16.mxu1 %v13656_v56  ;;  %v4504_v11 = vld [vmem:[#allocation18 + $0xb28] sm:$0xff] }
 0x8b1   :  { %7803 = vmatpush1.bf16.msra.mxu1 %v11011_v15  ;;  %7698 = vmatprep.subr.bf16.mxu0 %v11026_v39  ;;  %v4512_v15 = vld [vmem:[#allocation18 + $0xb68] sm:$0xff] }
 0x8b2   :  { %7804 = vmatprep.subr.bf16.mxu1 %v11028_v53 }
 0x8b4   :  { %7699 = vmatpush1.bf16.msra.mxu0 %v11025_v43  ;;  %v11106_v43 = vcombine.high %v4503_v37, %v4511_v38 }
 0x8b5   :  { %7805 = vmatpush1.bf16.msra.mxu1 %v11027_v50  ;;  %7700 = vmatprep.subr.bf16.mxu0 %v11042_v23 }
 0x8b6   :  { %7686 = vmatmul.mubr.bf16.gmra.mrb[60].mxu0 %v13658_v25  ;;  %7806 = vmatprep.subr.bf16.mxu1 %v11044_v0  ;;  %v11108_v0 = vcombine.high %v4504_v11, %v4512_v15 }
 0x8b7   :  { %7792 = vmatmul.mubr.bf16.gmra.mrb[60].mxu1 %v13658_v25  ;;  %7728 = vmatprep.mubr.bf16.mxu0 %v13669_v58 }
 0x8b8   :  { %7701 = vmatpush1.bf16.msra.mxu0 %v11041_v13  ;;  %7834 = vmatprep.mubr.bf16.mxu1 %v13669_v58  ;;  %v11105_v13 = vcombine.low %v4503_v37, %v4511_v38  ;;  %v4551_v37 = vld [vmem:[#allocation18 + $0xca0] sm:$0xff] }
 0x8b9   :  { %7807 = vmatpush1.bf16.msra.mxu1 %v11043_v26  ;;  %7702 = vmatprep.subr.bf16.mxu0 %v11058_v33  ;;  %v11107_v26 = vcombine.low %v4504_v11, %v4512_v15  ;;  %v11122_v33 = vcombine.high %v4519_v4, %v4527_v47  ;;  %v4559_v38 = vld [vmem:[#allocation18 + $0xce0] sm:$0xff]  ;;  %v4552_v11 = vld [vmem:[#allocation18 + $0xca8] sm:$0xff] }
 0x8ba   :  { %7808 = vmatprep.subr.bf16.mxu1 %v11060_v22  ;;  %v11124_v22 = vcombine.high %v4520_v34, %v4528_v35  ;;  %v4560_v15 = vld [vmem:[#allocation18 + $0xce8] sm:$0xff]  ;;  %v4567_v4 = vld [vmem:[#allocation18 + $0xd20] sm:$0xff] }
 0x8bb   :  { %v4575_v47 = vld [vmem:[#allocation18 + $0xd60] sm:$0xff]  ;;  %v4568_v34 = vld [vmem:[#allocation18 + $0xd28] sm:$0xff] }
 0x8bc   :  { %7703 = vmatpush1.bf16.msra.mxu0 %v11057_v8  ;;  %v4536_v8 = vld [vmem:[#allocation18 + $0xc28] sm:$0xff] }
 0x8bd   :  { %7809 = vmatpush1.bf16.msra.mxu1 %v11059_v36  ;;  %7704 = vmatprep.subr.bf16.mxu0 %v11074_v44  ;;  %v4544_v36 = vld [vmem:[#allocation18 + $0xc68] sm:$0xff] }
 0x8be   :  { %7810 = vmatprep.subr.bf16.mxu1 %v11076_v19  ;;  %v4576_v35 = vld [vmem:[#allocation18 + $0xd68] sm:$0xff] }
 0x8bf   :  { %v13705_v24 = vpop.f32.mrb[40].mxu0  ;;  %v13707_v61 = vpop.f32.mrb[40].mxu1 }
 0x8c0   :  { %7705 = vmatpush1.bf16.msra.mxu0 %v11073_v48  ;;  %v13709_v39 = vpop.f32.mrb[41].mxu0  ;;  %v13711_v53 = vpop.f32.mrb[41].mxu1  ;;  %v11138_v48 = vcombine.high %v4535_v62, %v4543_v3 }
 0x8c1   :  { %7811 = vmatpush1.bf16.msra.mxu1 %v11075_v1  ;;  %7706 = vmatprep.subr.bf16.mxu0 %v11090_v9  ;;  %v13713_v40 = vpop.f32.mrb[42].mxu0  ;;  %v13715_v6 = vpop.f32.mrb[42].mxu1 }
 0x8c2   :  { %7812 = vmatprep.subr.bf16.mxu1 %v11092_v18  ;;  %v13717_v50 = vpop.f32.mrb[43].mxu0  ;;  %v13719_v23 = vpop.f32.mrb[43].mxu1  ;;  %v11140_v18 = vcombine.high %v4536_v8, %v4544_v36 }
 0x8c4   :  { %7707 = vmatpush1.bf16.msra.mxu0 %v11089_v55  ;;  %v11137_v55 = vcombine.low %v4535_v62, %v4543_v3  ;;  %v4591_v62 = vld [vmem:[#allocation18 + $0xde0] sm:$0xff]  ;;  %v4584_v3 = vld [vmem:[#allocation18 + $0xda8] sm:$0xff] }
 0x8c5   :  { %7813 = vmatpush1.bf16.msra.mxu1 %v11091_v51  ;;  %7708 = vmatprep.subr.bf16.mxu0 %v11106_v43  ;;  %v11139_v51 = vcombine.low %v4536_v8, %v4544_v36  ;;  %v11154_v43 = vcombine.high %v4551_v37, %v4559_v38  ;;  %v11169_v8 = vcombine.low %v4567_v4, %v4575_v47 }
 0x8c6   :  { %7814 = vmatprep.subr.bf16.mxu1 %v11108_v0  ;;  %v11156_v0 = vcombine.high %v4552_v11, %v4560_v15  ;;  %v11171_v36 = vcombine.low %v4568_v34, %v4576_v35 }
 0x8c7   :  { %v13721_v63 = vpop.f32.mrb[44].mxu0  ;;  %v13723_v5 = vpop.f32.mrb[44].mxu1 }
 0x8c8   :  { %7709 = vmatpush1.bf16.msra.mxu0 %v11105_v13  ;;  %v13725_v44 = vpop.f32.mrb[45].mxu0  ;;  %v13727_v19 = vpop.f32.mrb[45].mxu1  ;;  %v11153_v13 = vcombine.low %v4551_v37, %v4559_v38  ;;  %v4607_v37 = vld [vmem:[#allocation18 + $0xe60] sm:$0xff]  ;;  %v4600_v38 = vld [vmem:[#allocation18 + $0xe28] sm:$0xff] }
 0x8c9   :  { %7815 = vmatpush1.bf16.msra.mxu1 %v11107_v26  ;;  %7710 = vmatprep.subr.bf16.mxu0 %v11122_v33  ;;  %v13729_v46 = vpop.f32.mrb[46].mxu0  ;;  %v13731_v31 = vpop.f32.mrb[46].mxu1  ;;  %v11155_v26 = vcombine.low %v4552_v11, %v4560_v15  ;;  %v11170_v33 = vcombine.high %v4567_v4, %v4575_v47  ;;  %v4623_v4 = vld [vmem:[#allocation18 + $0xee0] sm:$0xff]  ;;  %v4616_v47 = vld [vmem:[#allocation18 + $0xea8] sm:$0xff] }
 0x8ca   :  { %7816 = vmatprep.subr.bf16.mxu1 %v11124_v22  ;;  %v13733_v1 = vpop.f32.mrb[47].mxu0  ;;  %v13735_v9 = vpop.f32.mrb[47].mxu1  ;;  %v11172_v22 = vcombine.high %v4568_v34, %v4576_v35 }
 0x8cc   :  { %7711 = vmatpush1.bf16.msra.mxu0 %v11121_v57  ;;  %v4583_v57 = vld [vmem:[#allocation18 + $0xda0] sm:$0xff] }
 0x8cd   :  { %7817 = vmatpush1.bf16.msra.mxu1 %v11123_v59  ;;  %7712 = vmatprep.subr.bf16.mxu0 %v11138_v48  ;;  %v4592_v59 = vld [vmem:[#allocation18 + $0xde8] sm:$0xff]  ;;  %v11186_v48 = vcombine.high %v4583_v57, %v4591_v62  ;;  %v11185_v11 = vcombine.low %v4583_v57, %v4591_v62  ;;  %v4639_v57 = vld [vmem:[#allocation18 + $0xf60] sm:$0xff] }
 0x8ce   :  { %7818 = vmatprep.subr.bf16.mxu1 %v11140_v18  ;;  %v11188_v18 = vcombine.high %v4584_v3, %v4592_v59  ;;  %v11187_v15 = vcombine.low %v4584_v3, %v4592_v59  ;;  %v4632_v62 = vld [vmem:[#allocation18 + $0xf28] sm:$0xff] }
 0x8d0   :  { %7713 = vmatpush1.bf16.msra.mxu0 %v11137_v55  ;;  %v4599_v55 = vld [vmem:[#allocation18 + $0xe20] sm:$0xff] }
 0x8d1   :  { %7819 = vmatpush1.bf16.msra.mxu1 %v11139_v51  ;;  %7714 = vmatprep.subr.bf16.mxu0 %v11154_v43  ;;  %v4608_v51 = vld [vmem:[#allocation18 + $0xe68] sm:$0xff]  ;;  %v11202_v43 = vcombine.high %v4599_v55, %v4607_v37  ;;  %v11201_v34 = vcombine.low %v4599_v55, %v4607_v37  ;;  %v4655_v55 = vld [vmem:[#allocation18 + $0xfe0] sm:$0xff] }
 0x8d2   :  { %7820 = vmatprep.subr.bf16.mxu1 %v11156_v0  ;;  %v11204_v0 = vcombine.high %v4600_v38, %v4608_v51  ;;  %v11203_v35 = vcombine.low %v4600_v38, %v4608_v51  ;;  %v4648_v37 = vld [vmem:[#allocation18 + $0xfa8] sm:$0xff] }
 0x8d4   :  { %7715 = vmatpush1.bf16.msra.mxu0 %v11153_v13  ;;  %v4615_v13 = vld [vmem:[#allocation18 + $0xea0] sm:$0xff] }
 0x8d5   :  { %7821 = vmatpush1.bf16.msra.mxu1 %v11155_v26  ;;  %7716 = vmatprep.subr.bf16.mxu0 %v11170_v33  ;;  %v4624_v26 = vld [vmem:[#allocation18 + $0xee8] sm:$0xff]  ;;  %v11218_v33 = vcombine.high %v4615_v13, %v4623_v4  ;;  %v11217_v3 = vcombine.low %v4615_v13, %v4623_v4  ;;  %v4161_v13 = vld [vmem:[#allocation18 + $0x70] sm:$0xff]  ;;  %v4154_v4 = vld [vmem:[#allocation18 + $0x38] sm:$0xff] }
 0x8d6   :  { %7822 = vmatprep.subr.bf16.mxu1 %v11172_v22  ;;  %v11220_v22 = vcombine.high %v4616_v47, %v4624_v26  ;;  %v11219_v59 = vcombine.low %v4616_v47, %v4624_v26 }
 0x8d8   :  { %7717 = vmatpush1.bf16.msra.mxu0 %v11169_v8  ;;  %v4631_v8 = vld [vmem:[#allocation18 + $0xf20] sm:$0xff] }
 0x8d9   :  { %7823 = vmatpush1.bf16.msra.mxu1 %v11171_v36  ;;  %7718 = vmatprep.subr.bf16.mxu0 %v11186_v48  ;;  %v4640_v36 = vld [vmem:[#allocation18 + $0xf68] sm:$0xff]  ;;  %v11234_v48 = vcombine.high %v4631_v8, %v4639_v57  ;;  %v11233_v38 = vcombine.low %v4631_v8, %v4639_v57  ;;  %v4177_v8 = vld [vmem:[#allocation18 + $0xf0] sm:$0xff]  ;;  %v4170_v57 = vld [vmem:[#allocation18 + $0xb8] sm:$0xff] }
 0x8da   :  { %7824 = vmatprep.subr.bf16.mxu1 %v11188_v18  ;;  %v11236_v18 = vcombine.high %v4632_v62, %v4640_v36  ;;  %v11235_v51 = vcombine.low %v4632_v62, %v4640_v36  ;;  %v4178_v62 = vld [vmem:[#allocation18 + $0xf8] sm:$0xff] }
 0x8dc   :  { %7719 = vmatpush1.bf16.msra.mxu0 %v11185_v11  ;;  %v4647_v11 = vld [vmem:[#allocation18 + $0xfa0] sm:$0xff] }
 0x8dd   :  { %7825 = vmatpush1.bf16.msra.mxu1 %v11187_v15  ;;  %7720 = vmatprep.subr.bf16.mxu0 %v11202_v43  ;;  %v4656_v15 = vld [vmem:[#allocation18 + $0xfe8] sm:$0xff]  ;;  %v11250_v43 = vcombine.high %v4647_v11, %v4655_v55  ;;  %v11249_v47 = vcombine.low %v4647_v11, %v4655_v55  ;;  %v4185_v11 = vld [vmem:[#allocation18 + $0x130] sm:$0xff] }
 0x8de   :  { %7826 = vmatprep.subr.bf16.mxu1 %v11204_v0  ;;  %v11252_v0 = vcombine.high %v4648_v37, %v4656_v15  ;;  %v11251_v26 = vcombine.low %v4648_v37, %v4656_v15  ;;  %v4193_v55 = vld [vmem:[#allocation18 + $0x170] sm:$0xff]  ;;  %v4186_v37 = vld [vmem:[#allocation18 + $0x138] sm:$0xff] }
 0x8df   :  { %v4194_v15 = vld [vmem:[#allocation18 + $0x178] sm:$0xff] }
 0x8e0   :  { %7721 = vmatpush1.bf16.msra.mxu0 %v11201_v34  ;;  %v4153_v34 = vld [vmem:[#allocation18 + $0x30] sm:$0xff] }
 0x8e1   :  { %7827 = vmatpush1.bf16.msra.mxu1 %v11203_v35  ;;  %7722 = vmatprep.subr.bf16.mxu0 %v11218_v33  ;;  %v4162_v35 = vld [vmem:[#allocation18 + $0x78] sm:$0xff]  ;;  %v10758_v33 = vcombine.high %v4153_v34, %v4161_v13  ;;  %v10757_v36 = vcombine.low %v4153_v34, %v4161_v13  ;;  %v4201_v34 = vld [vmem:[#allocation18 + $0x1b0] sm:$0xff] }
 0x8e2   :  { %7828 = vmatprep.subr.bf16.mxu1 %v11220_v22  ;;  %v10760_v22 = vcombine.high %v4154_v4, %v4162_v35  ;;  %v4209_v13 = vld [vmem:[#allocation18 + $0x1f0] sm:$0xff] }
 0x8e4   :  { %7723 = vmatpush1.bf16.msra.mxu0 %v11217_v3  ;;  %v4169_v3 = vld [vmem:[#allocation18 + $0xb0] sm:$0xff] }
 0x8e5   :  { %7829 = vmatpush1.bf16.msra.mxu1 %v11219_v59  ;;  %7724 = vmatprep.subr.bf16.mxu0 %v11234_v48  ;;  %v10759_v59 = vcombine.low %v4154_v4, %v4162_v35  ;;  %v10774_v48 = vcombine.high %v4169_v3, %v4177_v8  ;;  %v4202_v4 = vld [vmem:[#allocation18 + $0x1b8] sm:$0xff] }
 0x8e6   :  { %7830 = vmatprep.subr.bf16.mxu1 %v11236_v18  ;;  %v10776_v18 = vcombine.high %v4170_v57, %v4178_v62  ;;  %v4210_v35 = vld [vmem:[#allocation18 + $0x1f8] sm:$0xff] }
 0x8e8   :  { %7725 = vmatpush1.bf16.msra.mxu0 %v11233_v38  ;;  %v10773_v38 = vcombine.low %v4169_v3, %v4177_v8  ;;  %v4217_v3 = vld [vmem:[#allocation18 + $0x230] sm:$0xff] }
 0x8e9   :  { %7831 = vmatpush1.bf16.msra.mxu1 %v11235_v51  ;;  %7726 = vmatprep.subr.bf16.mxu0 %v11250_v43  ;;  %v10775_v51 = vcombine.low %v4170_v57, %v4178_v62  ;;  %v10790_v43 = vcombine.high %v4185_v11, %v4193_v55  ;;  %v4225_v8 = vld [vmem:[#allocation18 + $0x270] sm:$0xff]  ;;  %v4218_v57 = vld [vmem:[#allocation18 + $0x238] sm:$0xff] }
 0x8ea   :  { %7832 = vmatprep.subr.bf16.mxu1 %v11252_v0  ;;  %v10792_v0 = vcombine.high %v4186_v37, %v4194_v15  ;;  %v4226_v62 = vld [vmem:[#allocation18 + $0x278] sm:$0xff] }
 0x8ec   :  { %7727 = vmatpush1.bf16.msra.mxu0 %v11249_v47  ;;  %v10789_v47 = vcombine.low %v4185_v11, %v4193_v55  ;;  %v4233_v11 = vld [vmem:[#allocation18 + $0x2b0] sm:$0xff] }
 0x8ed   :  { %7833 = vmatpush1.bf16.msra.mxu1 %v11251_v26  ;;  %7855 = vmatprep.subr.bf16.mxu0 %v10758_v33  ;;  %v10791_v26 = vcombine.low %v4186_v37, %v4194_v15  ;;  %v10806_v33 = vcombine.high %v4201_v34, %v4209_v13  ;;  %v4241_v55 = vld [vmem:[#allocation18 + $0x2f0] sm:$0xff]  ;;  %v4234_v37 = vld [vmem:[#allocation18 + $0x2b8] sm:$0xff] }
 0x8ee   :  { %7961 = vmatprep.subr.bf16.mxu1 %v10760_v22  ;;  %v10808_v22 = vcombine.high %v4202_v4, %v4210_v35  ;;  %v4242_v15 = vld [vmem:[#allocation18 + $0x2f8] sm:$0xff] }
 0x8ef   :  { %7729 = vmatmul.mubr.bf16.vlgmr.msra.gmra.mrb[56].mxu0 %v13629_v54 }
 0x8f0   :  { %7835 = vmatmul.mubr.bf16.vlgmr.msra.gmra.mrb[56].mxu1 %v13629_v54  ;;  %7738 = vmatprep.mubr.bf16.mxu0 %v13661_v52 }
 0x8f1   :  { %7844 = vmatprep.mubr.bf16.mxu1 %v13661_v52  ;;  %7856 = vmatpush1.bf16.msra.mxu0 %v10757_v36  ;;  %v10805_v36 = vcombine.low %v4201_v34, %v4209_v13  ;;  %v4257_v34 = vld [vmem:[#allocation18 + $0x370] sm:$0xff]  ;;  %v4250_v13 = vld [vmem:[#allocation18 + $0x338] sm:$0xff] }
 0x8f2   :  { %7962 = vmatpush1.bf16.msra.mxu1 %v10759_v59  ;;  %7857 = vmatprep.subr.bf16.mxu0 %v10774_v48  ;;  %v10807_v59 = vcombine.low %v4202_v4, %v4210_v35  ;;  %v10822_v48 = vcombine.high %v4217_v3, %v4225_v8  ;;  %v10837_v4 = vcombine.low %v4233_v11, %v4241_v55 }
 0x8f3   :  { %7963 = vmatprep.subr.bf16.mxu1 %v10776_v18  ;;  %v10824_v18 = vcombine.high %v4218_v57, %v4226_v62  ;;  %v10839_v35 = vcombine.low %v4234_v37, %v4242_v15 }
 0x8f5   :  { %7858 = vmatpush1.bf16.msra.mxu0 %v10773_v38  ;;  %v10821_v38 = vcombine.low %v4217_v3, %v4225_v8  ;;  %v4273_v3 = vld [vmem:[#allocation18 + $0x3f0] sm:$0xff]  ;;  %v4266_v8 = vld [vmem:[#allocation18 + $0x3b8] sm:$0xff] }
 0x8f6   :  { %7964 = vmatpush1.bf16.msra.mxu1 %v10775_v51  ;;  %7859 = vmatprep.subr.bf16.mxu0 %v10790_v43  ;;  %v10823_v51 = vcombine.low %v4218_v57, %v4226_v62  ;;  %v10838_v43 = vcombine.high %v4233_v11, %v4241_v55  ;;  %v4289_v11 = vld [vmem:[#allocation18 + $0x470] sm:$0xff]  ;;  %v4282_v55 = vld [vmem:[#allocation18 + $0x438] sm:$0xff] }
 0x8f7   :  { %7739 = vmatmul.mubr.bf16.gmra.mrb[60].mxu0 %v13665_v30  ;;  %7965 = vmatprep.subr.bf16.mxu1 %v10792_v0  ;;  %v10840_v0 = vcombine.high %v4234_v37, %v4242_v15 }
 0x8f8   :  { %7845 = vmatmul.mubr.bf16.gmra.mrb[60].mxu1 %v13665_v30  ;;  %7887 = vmatprep.mubr.bf16.mxu0 %v13621_v14 }
 0x8f9   :  { %7860 = vmatpush1.bf16.msra.mxu0 %v10789_v47  ;;  %7993 = vmatprep.mubr.bf16.mxu1 %v13621_v14  ;;  %v4249_v14 = vld [vmem:[#allocation18 + $0x330] sm:$0xff]  ;;  %v4258_v47 = vld [vmem:[#allocation18 + $0x378] sm:$0xff] }
 0x8fa   :  { %7966 = vmatpush1.bf16.msra.mxu1 %v10791_v26  ;;  %7861 = vmatprep.subr.bf16.mxu0 %v10806_v33  ;;  %v10854_v26 = vcombine.high %v4249_v14, %v4257_v34  ;;  %v10856_v33 = vcombine.high %v4250_v13, %v4258_v47  ;;  %v10853_v57 = vcombine.low %v4249_v14, %v4257_v34  ;;  %v4305_v14 = vld [vmem:[#allocation18 + $0x4f0] sm:$0xff]  ;;  %v4298_v34 = vld [vmem:[#allocation18 + $0x4b8] sm:$0xff] }
 0x8fb   :  { %7967 = vmatprep.subr.bf16.mxu1 %v10808_v22  ;;  %v4265_v22 = vld [vmem:[#allocation18 + $0x3b0] sm:$0xff]  ;;  %v10855_v62 = vcombine.low %v4250_v13, %v4258_v47 }
 0x8fc   :  { %v10869_v37 = vcombine.low %v4265_v22, %v4273_v3 }
 0x8fd   :  { %7862 = vmatpush1.bf16.msra.mxu0 %v10805_v36  ;;  %v4274_v36 = vld [vmem:[#allocation18 + $0x3f8] sm:$0xff] }
 0x8fe   :  { %7968 = vmatpush1.bf16.msra.mxu1 %v10807_v59  ;;  %7863 = vmatprep.subr.bf16.mxu0 %v10822_v48  ;;  %v10870_v59 = vcombine.high %v4265_v22, %v4273_v3  ;;  %v10872_v48 = vcombine.high %v4266_v8, %v4274_v36  ;;  %v10871_v15 = vcombine.low %v4266_v8, %v4274_v36  ;;  %v4321_v22 = vld [vmem:[#allocation18 + $0x570] sm:$0xff]  ;;  %v4314_v3 = vld [vmem:[#allocation18 + $0x538] sm:$0xff] }
 0x8ff   :  { %7969 = vmatprep.subr.bf16.mxu1 %v10824_v18  ;;  %v4281_v18 = vld [vmem:[#allocation18 + $0x430] sm:$0xff] }
 0x900   :  { %v10885_v13 = vcombine.low %v4281_v18, %v4289_v11 }
 0x901   :  { %7864 = vmatpush1.bf16.msra.mxu0 %v10821_v38  ;;  %v4290_v38 = vld [vmem:[#allocation18 + $0x478] sm:$0xff] }
 0x902   :  { %7970 = vmatpush1.bf16.msra.mxu1 %v10823_v51  ;;  %7865 = vmatprep.subr.bf16.mxu0 %v10838_v43  ;;  %v10886_v51 = vcombine.high %v4281_v18, %v4289_v11  ;;  %v10888_v43 = vcombine.high %v4282_v55, %v4290_v38  ;;  %v10887_v47 = vcombine.low %v4282_v55, %v4290_v38  ;;  %v4337_v18 = vld [vmem:[#allocation18 + $0x5f0] sm:$0xff]  ;;  %v4330_v11 = vld [vmem:[#allocation18 + $0x5b8] sm:$0xff] }
 0x903   :  { %7971 = vmatprep.subr.bf16.mxu1 %v10840_v0  ;;  %v4297_v0 = vld [vmem:[#allocation18 + $0x4b0] sm:$0xff] }
 0x904   :  { %v10901_v8 = vcombine.low %v4297_v0, %v4305_v14 }
 0x905   :  { %7866 = vmatpush1.bf16.msra.mxu0 %v10837_v4  ;;  %v4306_v4 = vld [vmem:[#allocation18 + $0x4f8] sm:$0xff] }
 0x906   :  { %7972 = vmatpush1.bf16.msra.mxu1 %v10839_v35  ;;  %7867 = vmatprep.subr.bf16.mxu0 %v10854_v26  ;;  %v10902_v35 = vcombine.high %v4297_v0, %v4305_v14  ;;  %v10904_v26 = vcombine.high %v4298_v34, %v4306_v4  ;;  %v10903_v36 = vcombine.low %v4298_v34, %v4306_v4  ;;  %v4353_v0 = vld [vmem:[#allocation18 + $0x670] sm:$0xff]  ;;  %v4346_v14 = vld [vmem:[#allocation18 + $0x638] sm:$0xff] }
 0x907   :  { %7973 = vmatprep.subr.bf16.mxu1 %v10856_v33  ;;  %v4313_v33 = vld [vmem:[#allocation18 + $0x530] sm:$0xff] }
 0x908   :  { %v10917_v55 = vcombine.low %v4313_v33, %v4321_v22 }
 0x909   :  { %7868 = vmatpush1.bf16.msra.mxu0 %v10853_v57  ;;  %v4322_v57 = vld [vmem:[#allocation18 + $0x578] sm:$0xff] }
 0x90a   :  { %7974 = vmatpush1.bf16.msra.mxu1 %v10855_v62  ;;  %7869 = vmatprep.subr.bf16.mxu0 %v10870_v59  ;;  %v10918_v62 = vcombine.high %v4313_v33, %v4321_v22  ;;  %v10920_v59 = vcombine.high %v4314_v3, %v4322_v57  ;;  %v10919_v38 = vcombine.low %v4314_v3, %v4322_v57  ;;  %v4369_v33 = vld [vmem:[#allocation18 + $0x6f0] sm:$0xff]  ;;  %v4362_v22 = vld [vmem:[#allocation18 + $0x6b8] sm:$0xff] }
 0x90b   :  { %7975 = vmatprep.subr.bf16.mxu1 %v10872_v48  ;;  %v4329_v48 = vld [vmem:[#allocation18 + $0x5b0] sm:$0xff] }
 0x90c   :  { %v10933_v34 = vcombine.low %v4329_v48, %v4337_v18 }
 0x90d   :  { %7870 = vmatpush1.bf16.msra.mxu0 %v10869_v37  ;;  %v4338_v37 = vld [vmem:[#allocation18 + $0x5f8] sm:$0xff] }
 0x90e   :  { %7976 = vmatpush1.bf16.msra.mxu1 %v10871_v15  ;;  %7871 = vmatprep.subr.bf16.mxu0 %v10886_v51  ;;  %v10934_v15 = vcombine.high %v4329_v48, %v4337_v18  ;;  %v10936_v51 = vcombine.high %v4330_v11, %v4338_v37  ;;  %v10935_v4 = vcombine.low %v4330_v11, %v4338_v37  ;;  %v4385_v48 = vld [vmem:[#allocation18 + $0x770] sm:$0xff]  ;;  %v4378_v18 = vld [vmem:[#allocation18 + $0x738] sm:$0xff] }
 0x90f   :  { %7977 = vmatprep.subr.bf16.mxu1 %v10888_v43  ;;  %v4345_v43 = vld [vmem:[#allocation18 + $0x630] sm:$0xff] }
 0x910   :  { %v10949_v3 = vcombine.low %v4345_v43, %v4353_v0 }
 0x911   :  { %7872 = vmatpush1.bf16.msra.mxu0 %v10885_v13  ;;  %v4354_v13 = vld [vmem:[#allocation18 + $0x678] sm:$0xff] }
 0x912   :  { %7978 = vmatpush1.bf16.msra.mxu1 %v10887_v47  ;;  %7873 = vmatprep.subr.bf16.mxu0 %v10902_v35  ;;  %v10950_v47 = vcombine.high %v4345_v43, %v4353_v0  ;;  %v10952_v35 = vcombine.high %v4346_v14, %v4354_v13  ;;  %v10951_v57 = vcombine.low %v4346_v14, %v4354_v13  ;;  %v4401_v43 = vld [vmem:[#allocation18 + $0x7f0] sm:$0xff]  ;;  %v4394_v0 = vld [vmem:[#allocation18 + $0x7b8] sm:$0xff] }
 0x913   :  { %7979 = vmatprep.subr.bf16.mxu1 %v10904_v26  ;;  %v4361_v26 = vld [vmem:[#allocation18 + $0x6b0] sm:$0xff] }
 0x914   :  { %v10965_v11 = vcombine.low %v4361_v26, %v4369_v33 }
 0x915   :  { %7874 = vmatpush1.bf16.msra.mxu0 %v10901_v8  ;;  %v4370_v8 = vld [vmem:[#allocation18 + $0x6f8] sm:$0xff] }
 0x916   :  { %7980 = vmatpush1.bf16.msra.mxu1 %v10903_v36  ;;  %7875 = vmatprep.subr.bf16.mxu0 %v10918_v62  ;;  %v10966_v36 = vcombine.high %v4361_v26, %v4369_v33  ;;  %v10968_v62 = vcombine.high %v4362_v22, %v4370_v8  ;;  %v10967_v37 = vcombine.low %v4362_v22, %v4370_v8  ;;  %v4417_v26 = vld [vmem:[#allocation18 + $0x870] sm:$0xff]  ;;  %v4410_v33 = vld [vmem:[#allocation18 + $0x838] sm:$0xff] }
 0x917   :  { %7981 = vmatprep.subr.bf16.mxu1 %v10920_v59  ;;  %v4377_v59 = vld [vmem:[#allocation18 + $0x730] sm:$0xff] }
 0x918   :  { %v10981_v14 = vcombine.low %v4377_v59, %v4385_v48 }
 0x919   :  { %7876 = vmatpush1.bf16.msra.mxu0 %v10917_v55  ;;  %v4386_v55 = vld [vmem:[#allocation18 + $0x778] sm:$0xff] }
 0x91a   :  { %7982 = vmatpush1.bf16.msra.mxu1 %v10919_v38  ;;  %7877 = vmatprep.subr.bf16.mxu0 %v10934_v15  ;;  %v10982_v38 = vcombine.high %v4377_v59, %v4385_v48  ;;  %v10984_v15 = vcombine.high %v4378_v18, %v4386_v55  ;;  %v10983_v13 = vcombine.low %v4378_v18, %v4386_v55  ;;  %v4433_v59 = vld [vmem:[#allocation18 + $0x8f0] sm:$0xff]  ;;  %v4426_v48 = vld [vmem:[#allocation18 + $0x8b8] sm:$0xff] }
 0x91b   :  { %7983 = vmatprep.subr.bf16.mxu1 %v10936_v51  ;;  %v4393_v51 = vld [vmem:[#allocation18 + $0x7b0] sm:$0xff]  ;;  %v4434_v18 = vld [vmem:[#allocation18 + $0x8f8] sm:$0xff] }
 0x91c   :  { %v10997_v22 = vcombine.low %v4393_v51, %v4401_v43 }
 0x91d   :  { %7878 = vmatpush1.bf16.msra.mxu0 %v10933_v34  ;;  %v4402_v34 = vld [vmem:[#allocation18 + $0x7f8] sm:$0xff] }
 0x91e   :  { %7984 = vmatpush1.bf16.msra.mxu1 %v10935_v4  ;;  %7879 = vmatprep.subr.bf16.mxu0 %v10950_v47  ;;  %v10998_v4 = vcombine.high %v4393_v51, %v4401_v43  ;;  %v11000_v47 = vcombine.high %v4394_v0, %v4402_v34  ;;  %v10999_v8 = vcombine.low %v4394_v0, %v4402_v34  ;;  %v4449_v51 = vld [vmem:[#allocation18 + $0x970] sm:$0xff]  ;;  %v4442_v43 = vld [vmem:[#allocation18 + $0x938] sm:$0xff] }
 0x91f   :  { %7985 = vmatprep.subr.bf16.mxu1 %v10952_v35  ;;  %v4409_v35 = vld [vmem:[#allocation18 + $0x830] sm:$0xff]  ;;  %v4450_v0 = vld [vmem:[#allocation18 + $0x978] sm:$0xff] }
 0x920   :  { %v11013_v55 = vcombine.low %v4409_v35, %v4417_v26 }
 0x921   :  { %7880 = vmatpush1.bf16.msra.mxu0 %v10949_v3  ;;  %v4418_v3 = vld [vmem:[#allocation18 + $0x878] sm:$0xff] }
 0x922   :  { %7986 = vmatpush1.bf16.msra.mxu1 %v10951_v57  ;;  %7881 = vmatprep.subr.bf16.mxu0 %v10966_v36  ;;  %v11014_v57 = vcombine.high %v4409_v35, %v4417_v26  ;;  %v11016_v36 = vcombine.high %v4410_v33, %v4418_v3  ;;  %v4465_v35 = vld [vmem:[#allocation18 + $0x9f0] sm:$0xff]  ;;  %v4458_v26 = vld [vmem:[#allocation18 + $0x9b8] sm:$0xff] }
 0x923   :  { %7987 = vmatprep.subr.bf16.mxu1 %v10968_v62  ;;  %v4425_v62 = vld [vmem:[#allocation18 + $0x8b0] sm:$0xff] }
 0x924   :  { %v11029_v34 = vcombine.low %v4425_v62, %v4433_v59 }
 0x925   :  { %7882 = vmatpush1.bf16.msra.mxu0 %v10965_v11  ;;  %v11015_v11 = vcombine.low %v4410_v33, %v4418_v3  ;;  %v4466_v33 = vld [vmem:[#allocation18 + $0x9f8] sm:$0xff]  ;;  %v11047_v3 = vcombine.low %v4442_v43, %v4450_v0 }
 0x926   :  { %7988 = vmatpush1.bf16.msra.mxu1 %v10967_v37  ;;  %7883 = vmatprep.subr.bf16.mxu0 %v10982_v38  ;;  %v11030_v37 = vcombine.high %v4425_v62, %v4433_v59  ;;  %v11032_v38 = vcombine.high %v4426_v48, %v4434_v18  ;;  %v4482_v62 = vld [vmem:[#allocation18 + $0xa78] sm:$0xff] }
 0x927   :  { %7989 = vmatprep.subr.bf16.mxu1 %v10984_v15  ;;  %v4441_v15 = vld [vmem:[#allocation18 + $0x930] sm:$0xff] }
 0x929   :  { %7884 = vmatpush1.bf16.msra.mxu0 %v10981_v14  ;;  %v11031_v14 = vcombine.low %v4426_v48, %v4434_v18  ;;  %v11063_v48 = vcombine.low %v4458_v26, %v4466_v33 }
 0x92a   :  { %7990 = vmatpush1.bf16.msra.mxu1 %v10983_v13  ;;  %7885 = vmatprep.subr.bf16.mxu0 %v10998_v4  ;;  %v11046_v13 = vcombine.high %v4441_v15, %v4449_v51  ;;  %v11048_v4 = vcombine.high %v4442_v43, %v4450_v0 }
 0x92b   :  { %7991 = vmatprep.subr.bf16.mxu1 %v11000_v47  ;;  %v4457_v47 = vld [vmem:[#allocation18 + $0x9b0] sm:$0xff] }
 0x92c   :  { %v11061_v59 = vcombine.low %v4457_v47, %v4465_v35 }
 0x92d   :  { %7886 = vmatpush1.bf16.msra.mxu0 %v10997_v22  ;;  %v11062_v22 = vcombine.high %v4457_v47, %v4465_v35  ;;  %v4506_v47 = vld [vmem:[#allocation18 + $0xb38] sm:$0xff] }
 0x92e   :  { %7992 = vmatpush1.bf16.msra.mxu1 %v10999_v8  ;;  %7908 = vmatprep.subr.bf16.mxu0 %v11014_v57  ;;  %v4473_v8 = vld [vmem:[#allocation18 + $0xa30] sm:$0xff]  ;;  %v4514_v35 = vld [vmem:[#allocation18 + $0xb78] sm:$0xff] }
 0x92f   :  { %8014 = vmatprep.subr.bf16.mxu1 %v11016_v36  ;;  %v4481_v57 = vld [vmem:[#allocation18 + $0xa70] sm:$0xff]  ;;  %v4474_v36 = vld [vmem:[#allocation18 + $0xa38] sm:$0xff] }
 0x930   :  { %7888 = vmatmul.mubr.bf16.vlgmr.msra.gmra.mrb[64].mxu0 %v13623_v7  ;;  %v11078_v18 = vcombine.high %v4473_v8, %v4481_v57 }
 0x931   :  { %7994 = vmatmul.mubr.bf16.vlgmr.msra.gmra.mrb[64].mxu1 %v13623_v7  ;;  %7897 = vmatprep.mubr.bf16.mxu0 %v13656_v56  ;;  %v11045_v7 = vcombine.low %v4441_v15, %v4449_v51  ;;  %v4498_v15 = vld [vmem:[#allocation18 + $0xaf8] sm:$0xff]  ;;  %v11079_v51 = vcombine.low %v4474_v36, %v4482_v62 }
 0x932   :  { %7909 = vmatpush1.bf16.msra.mxu0 %v11013_v55  ;;  %8003 = vmatprep.mubr.bf16.mxu1 %v13656_v56  ;;  %v11064_v56 = vcombine.high %v4458_v26, %v4466_v33  ;;  %v11080_v55 = vcombine.high %v4474_v36, %v4482_v62  ;;  %v11112_v36 = vcombine.high %v4506_v47, %v4514_v35  ;;  %v4521_v62 = vld [vmem:[#allocation18 + $0xbb0] sm:$0xff] }
 0x933   :  { %8015 = vmatpush1.bf16.msra.mxu1 %v11015_v11  ;;  %7910 = vmatprep.subr.bf16.mxu0 %v11030_v37  ;;  %v4489_v11 = vld [vmem:[#allocation18 + $0xab0] sm:$0xff] }
 0x934   :  { %8016 = vmatprep.subr.bf16.mxu1 %v11032_v38  ;;  %v4497_v37 = vld [vmem:[#allocation18 + $0xaf0] sm:$0xff]  ;;  %v4490_v38 = vld [vmem:[#allocation18 + $0xab8] sm:$0xff] }
 0x935   :  { %v11094_v43 = vcombine.high %v4489_v11, %v4497_v37  ;;  %v11093_v33 = vcombine.low %v4489_v11, %v4497_v37  ;;  %v11111_v11 = vcombine.low %v4506_v47, %v4514_v35 }
 0x936   :  { %7911 = vmatpush1.bf16.msra.mxu0 %v11029_v34  ;;  %v4505_v34 = vld [vmem:[#allocation18 + $0xb30] sm:$0xff] }
 0x937   :  { %8017 = vmatpush1.bf16.msra.mxu1 %v11031_v14  ;;  %7912 = vmatprep.subr.bf16.mxu0 %v11046_v13  ;;  %v4513_v14 = vld [vmem:[#allocation18 + $0xb70] sm:$0xff] }
 0x938   :  { %7898 = vmatmul.mubr.bf16.gmra.mrb[68].mxu0 %v13658_v25  ;;  %8018 = vmatprep.subr.bf16.mxu1 %v11048_v4 }
 0x939   :  { %8004 = vmatmul.mubr.bf16.gmra.mrb[68].mxu1 %v13658_v25  ;;  %7940 = vmatprep.mubr.bf16.mxu0 %v13669_v58  ;;  %v11077_v25 = vcombine.low %v4473_v8, %v4481_v57  ;;  %v11110_v8 = vcombine.high %v4505_v34, %v4513_v14 }
 0x93a   :  { %7913 = vmatpush1.bf16.msra.mxu0 %v11045_v7  ;;  %8046 = vmatprep.mubr.bf16.mxu1 %v13669_v58  ;;  %v11096_v58 = vcombine.high %v4490_v38, %v4498_v15 }
 0x93b   :  { %8019 = vmatpush1.bf16.msra.mxu1 %v11047_v3  ;;  %7914 = vmatprep.subr.bf16.mxu0 %v11062_v22  ;;  %v11095_v3 = vcombine.low %v4490_v38, %v4498_v15 }
 0x93c   :  { %8020 = vmatprep.subr.bf16.mxu1 %v11064_v56 }
 0x93e   :  { %7915 = vmatpush1.bf16.msra.mxu0 %v11061_v59  ;;  %v4529_v59 = vld [vmem:[#allocation18 + $0xbf0] sm:$0xff] }
 0x93f   :  { %8021 = vmatpush1.bf16.msra.mxu1 %v11063_v48  ;;  %7916 = vmatprep.subr.bf16.mxu0 %v11078_v18  ;;  %v4522_v48 = vld [vmem:[#allocation18 + $0xbb8] sm:$0xff]  ;;  %v11126_v37 = vcombine.high %v4521_v62, %v4529_v59 }
 0x940   :  { %8022 = vmatprep.subr.bf16.mxu1 %v11080_v55  ;;  %v13753_v0 = vpop.f32.mrb[48].mxu0  ;;  %v4530_v18 = vld [vmem:[#allocation18 + $0xbf8] sm:$0xff]  ;;  %v11109_v55 = vcombine.low %v4505_v34, %v4513_v14  ;;  %v11125_v34 = vcombine.low %v4521_v62, %v4529_v59  ;;  %v11143_v59 = vcombine.low %v4538_v21, %v4546_v60 }
 0x941   :  { %v13755_v13 = vpop.f32.mrb[48].mxu1  ;;  %v13757_v4 = vpop.f32.mrb[49].mxu0  ;;  %v11128_v15 = vcombine.high %v4522_v48, %v4530_v18  ;;  %v11127_v47 = vcombine.low %v4522_v48, %v4530_v18  ;;  %v4569_v18 = vld [vmem:[#allocation18 + $0xd30] sm:$0xff] }
 0x942   :  { %7917 = vmatpush1.bf16.msra.mxu0 %v11077_v25  ;;  %v13759_v26 = vpop.f32.mrb[49].mxu1  ;;  %v13761_v7 = vpop.f32.mrb[50].mxu0  ;;  %v4537_v25 = vld [vmem:[#allocation18 + $0xc30] sm:$0xff] }
 0x943   :  { %8023 = vmatpush1.bf16.msra.mxu1 %v11079_v51  ;;  %7918 = vmatprep.subr.bf16.mxu0 %v11094_v43  ;;  %v13763_v22 = vpop.f32.mrb[50].mxu1  ;;  %v13765_v56 = vpop.f32.mrb[51].mxu0  ;;  %v4545_v51 = vld [vmem:[#allocation18 + $0xc70] sm:$0xff] }
 0x944   :  { %8024 = vmatprep.subr.bf16.mxu1 %v11096_v58  ;;  %v13767_v57 = vpop.f32.mrb[51].mxu1  ;;  %v11141_v62 = vcombine.low %v4537_v25, %v4545_v51 }
 0x946   :  { %7919 = vmatpush1.bf16.msra.mxu0 %v11093_v33 }
 0x947   :  { %8025 = vmatpush1.bf16.msra.mxu1 %v11095_v3  ;;  %7920 = vmatprep.subr.bf16.mxu0 %v11110_v8  ;;  %v11142_v3 = vcombine.high %v4537_v25, %v4545_v51  ;;  %v4593_v25 = vld [vmem:[#allocation18 + $0xdf0] sm:$0xff]  ;;  %v4586_v51 = vld [vmem:[#allocation18 + $0xdb8] sm:$0xff] }
 0x948   :  { %8026 = vmatprep.subr.bf16.mxu1 %v11112_v36  ;;  %v13769_v38 = vpop.f32.mrb[52].mxu0  ;;  %v11144_v36 = vcombine.high %v4538_v21, %v4546_v60  ;;  %v11175_v21 = vcombine.low %v4570_v28, %v4578_v10 }
 0x949   :  { %v13771_v43 = vpop.f32.mrb[52].mxu1  ;;  %v13773_v58 = vpop.f32.mrb[53].mxu0 }
 0x94a   :  { %7921 = vmatpush1.bf16.msra.mxu0 %v11109_v55  ;;  %v13775_v32 = vpop.f32.mrb[53].mxu1  ;;  %v13777_v14 = vpop.f32.mrb[54].mxu0  ;;  %v4554_v55 = vld [vmem:[#allocation18 + $0xcb8] sm:$0xff] }
 0x94b   :  { %8027 = vmatpush1.bf16.msra.mxu1 %v11111_v11  ;;  %7922 = vmatprep.subr.bf16.mxu0 %v11126_v37  ;;  %v13779_v35 = vpop.f32.mrb[54].mxu1  ;;  %v13781_v33 = vpop.f32.mrb[55].mxu0  ;;  %v11158_v11 = vcombine.high %v4553_v42, %v4561_v41  ;;  %v11160_v48 = vcombine.high %v4554_v55, %v4562_v27  ;;  %v4577_v37 = vld [vmem:[#allocation18 + $0xd70] sm:$0xff]  ;;  %v11159_v29 = vcombine.low %v4554_v55, %v4562_v27 }
 0x94c   :  { %8028 = vmatprep.subr.bf16.mxu1 %v11128_v15  ;;  %v13783_v8 = vpop.f32.mrb[55].mxu1  ;;  %v11157_v15 = vcombine.low %v4553_v42, %v4561_v41  ;;  %v11174_v45 = vcombine.high %v4569_v18, %v4577_v37  ;;  %v11173_v60 = vcombine.low %v4569_v18, %v4577_v37  ;;  %v4609_v41 = vld [vmem:[#allocation18 + $0xe70] sm:$0xff]  ;;  %v4602_v42 = vld [vmem:[#allocation18 + $0xe38] sm:$0xff] }
 0x94d   :  { %v4625_v18 = vld [vmem:[#allocation18 + $0xef0] sm:$0xff] }
 0x94e   :  { %7923 = vmatpush1.bf16.msra.mxu0 %v11125_v34  ;;  %v4585_v34 = vld [vmem:[#allocation18 + $0xdb0] sm:$0xff] }
 0x94f   :  { %8029 = vmatpush1.bf16.msra.mxu1 %v11127_v47  ;;  %7924 = vmatprep.subr.bf16.mxu0 %v11142_v3  ;;  %v4594_v47 = vld [vmem:[#allocation18 + $0xdf8] sm:$0xff]  ;;  %v11190_v3 = vcombine.high %v4585_v34, %v4593_v25  ;;  %v11189_v27 = vcombine.low %v4585_v34, %v4593_v25  ;;  %v4641_v34 = vld [vmem:[#allocation18 + $0xf70] sm:$0xff] }
 0x950   :  { %8030 = vmatprep.subr.bf16.mxu1 %v11144_v36  ;;  %v11192_v36 = vcombine.high %v4586_v51, %v4594_v47  ;;  %v11191_v55 = vcombine.low %v4586_v51, %v4594_v47  ;;  %v4634_v25 = vld [vmem:[#allocation18 + $0xf38] sm:$0xff] }
 0x952   :  { %7925 = vmatpush1.bf16.msra.mxu0 %v11141_v62  ;;  %v4601_v62 = vld [vmem:[#allocation18 + $0xe30] sm:$0xff] }
 0x953   :  { %8031 = vmatpush1.bf16.msra.mxu1 %v11143_v59  ;;  %7926 = vmatprep.subr.bf16.mxu0 %v11158_v11  ;;  %v4610_v59 = vld [vmem:[#allocation18 + $0xe78] sm:$0xff]  ;;  %v11206_v11 = vcombine.high %v4601_v62, %v4609_v41  ;;  %v11205_v10 = vcombine.low %v4601_v62, %v4609_v41  ;;  %v4657_v62 = vld [vmem:[#allocation18 + $0xff0] sm:$0xff] }
 0x954   :  { %8032 = vmatprep.subr.bf16.mxu1 %v11160_v48  ;;  %v11208_v48 = vcombine.high %v4602_v42, %v4610_v59  ;;  %v4650_v41 = vld [vmem:[#allocation18 + $0xfb8] sm:$0xff] }
 0x956   :  { %7927 = vmatpush1.bf16.msra.mxu0 %v11157_v15  ;;  %v4617_v15 = vld [vmem:[#allocation18 + $0xeb0] sm:$0xff] }
 0x957   :  { %8033 = vmatpush1.bf16.msra.mxu1 %v11159_v29  ;;  %7928 = vmatprep.subr.bf16.mxu0 %v11174_v45  ;;  %v4618_v29 = vld [vmem:[#allocation18 + $0xeb8] sm:$0xff]  ;;  %v11222_v28 = vcombine.high %v4617_v15, %v4625_v18  ;;  %v11221_v51 = vcombine.low %v4617_v15, %v4625_v18 }
 0x958   :  { %8034 = vmatprep.subr.bf16.mxu1 %v11176_v20  ;;  %v4626_v45 = vld [vmem:[#allocation18 + $0xef8] sm:$0xff]  ;;  %v11207_v20 = vcombine.low %v4602_v42, %v4610_v59 }
 0x959   :  { %v11224_v37 = vcombine.high %v4618_v29, %v4626_v45  ;;  %v11223_v47 = vcombine.low %v4618_v29, %v4626_v45  ;;  %v11991_v29 = vld [vmem:[#allocation20 + $0x4] ss:$16 sps:$4 sm:$0xff]   ;;  %v11994_v45 = vld [vmem:[#allocation20 + $0xc] ss:$16 sps:$4 sm:$0xff]  }
 0x95a   :  { %7929 = vmatpush1.bf16.msra.mxu0 %v11173_v60  ;;  %v4633_v60 = vld [vmem:[#allocation18 + $0xf30] sm:$0xff] }
 0x95b   :  { %8035 = vmatpush1.bf16.msra.mxu1 %v11175_v21  ;;  %7930 = vmatprep.subr.bf16.mxu0 %v11190_v3  ;;  %v4642_v21 = vld [vmem:[#allocation18 + $0xf78] sm:$0xff]  ;;  %v11238_v3 = vcombine.high %v4633_v60, %v4641_v34  ;;  %v11237_v42 = vcombine.low %v4633_v60, %v4641_v34  ;;  %v11995_v60 = vld [vmem:[#allocation20 + $0x20] ss:$16 sps:$4 sm:$0xff]  }
 0x95c   :  { %8036 = vmatprep.subr.bf16.mxu1 %v11192_v36  ;;  %v11240_v36 = vcombine.high %v4634_v25, %v4642_v21  ;;  %v11239_v59 = vcombine.low %v4634_v25, %v4642_v21  ;;  %v11998_v34 = vld [vmem:[#allocation20 + $0x28] ss:$16 sps:$4 sm:$0xff]   ;;  %v12003_v25 = vld [vmem:[#allocation20 + $0x44] ss:$16 sps:$4 sm:$0xff]   ;;  %v12006_v21 = vld [vmem:[#allocation20 + $0x4c] ss:$16 sps:$4 sm:$0xff]  }
 0x95e   :  { %7931 = vmatpush1.bf16.msra.mxu0 %v11189_v27  ;;  %v4649_v27 = vld [vmem:[#allocation18 + $0xfb0] sm:$0xff] }
 0x95f   :  { %8037 = vmatpush1.bf16.msra.mxu1 %v11191_v55  ;;  %7932 = vmatprep.subr.bf16.mxu0 %v11206_v11  ;;  %v4658_v55 = vld [vmem:[#allocation18 + $0xff8] sm:$0xff]  ;;  %v11254_v11 = vcombine.high %v4649_v27, %v4657_v62  ;;  %v11253_v15 = vcombine.low %v4649_v27, %v4657_v62  ;;  %v12015_v27 = vld [vmem:[#allocation20 + $0x84] ss:$16 sps:$4 sm:$0xff]  }
 0x960   :  { %8038 = vmatprep.subr.bf16.mxu1 %v11208_v48  ;;  %v11256_v48 = vcombine.high %v4650_v41, %v4658_v55  ;;  %v11255_v18 = vcombine.low %v4650_v41, %v4658_v55  ;;  %v12018_v62 = vld [vmem:[#allocation20 + $0x8c] ss:$16 sps:$4 sm:$0xff]   ;;  %v12013_v41 = vld [vmem:[#allocation20 + $0x80] ss:$16 sps:$4 sm:$0xff]   ;;  %v12016_v55 = vld [vmem:[#allocation20 + $0x88] ss:$16 sps:$4 sm:$0xff]  }
 0x962   :  { %7933 = vmatpush1.bf16.msra.mxu0 %v11205_v10  ;;  %v11989_v10 = vld [vmem:[#allocation20] ss:$16 sps:$4 sm:$0xff]  }
 0x963   :  { %8039 = vmatpush1.bf16.msra.mxu1 %v11207_v20  ;;  %7934 = vmatprep.subr.bf16.mxu0 %v11222_v28  ;;  %v11992_v20 = vld [vmem:[#allocation20 + $0x8] ss:$16 sps:$4 sm:$0xff]   ;;  %v11997_v28 = vld [vmem:[#allocation20 + $0x24] ss:$16 sps:$4 sm:$0xff]  }
 0x964   :  { %8040 = vmatprep.subr.bf16.mxu1 %v11224_v37  ;;  %v12000_v37 = vld [vmem:[#allocation20 + $0x2c] ss:$16 sps:$4 sm:$0xff]  }
 0x966   :  { %7935 = vmatpush1.bf16.msra.mxu0 %v11221_v51  ;;  %v12001_v51 = vld [vmem:[#allocation20 + $0x40] ss:$16 sps:$4 sm:$0xff]  }
 0x967   :  { %8041 = vmatpush1.bf16.msra.mxu1 %v11223_v47  ;;  %7936 = vmatprep.subr.bf16.mxu0 %v11238_v3  ;;  %v12004_v47 = vld [vmem:[#allocation20 + $0x48] ss:$16 sps:$4 sm:$0xff]   ;;  %v12009_v3 = vld [vmem:[#allocation20 + $0x64] ss:$16 sps:$4 sm:$0xff]  }
 0x968   :  { %8042 = vmatprep.subr.bf16.mxu1 %v11240_v36  ;;  %v12010_v36 = vld [vmem:[#allocation20 + $0x68] ss:$16 sps:$4 sm:$0xff]  }
 0x96a   :  { %7937 = vmatpush1.bf16.msra.mxu0 %v11237_v42  ;;  %v12021_v42 = vld [vmem:[#allocation20 + $0xa4] ss:$16 sps:$4 sm:$0xff]  }
 0x96b   :  { %8043 = vmatpush1.bf16.msra.mxu1 %v11239_v59  ;;  %7938 = vmatprep.subr.bf16.mxu0 %v11254_v11  ;;  %v12024_v59 = vld [vmem:[#allocation20 + $0xac] ss:$16 sps:$4 sm:$0xff]   ;;  %v12019_v11 = vld [vmem:[#allocation20 + $0xa0] ss:$16 sps:$4 sm:$0xff]  }
 0x96c   :  { %8044 = vmatprep.subr.bf16.mxu1 %v11256_v48  ;;  %v12027_v48 = vld [vmem:[#allocation20 + $0xc4] ss:$16 sps:$4 sm:$0xff]  }
 0x96e   :  { %7939 = vmatpush1.bf16.msra.mxu0 %v11253_v15  ;;  %v12030_v15 = vld [vmem:[#allocation20 + $0xcc] ss:$16 sps:$4 sm:$0xff]  }
 0x96f   :  { %8045 = vmatpush1.bf16.msra.mxu1 %v11255_v18  ;;  %9875 = vmatprep.subr.bf16.mxu0 %v11991_v29  ;;  %v12025_v18 = vld [vmem:[#allocation20 + $0xc0] ss:$16 sps:$4 sm:$0xff]   ;;  %v12028_v29 = vld [vmem:[#allocation20 + $0xc8] ss:$16 sps:$4 sm:$0xff]  }
 0x970   :  { %10087 = vmatprep.subr.bf16.mxu1 %v11994_v45  ;;  %v12033_v45 = vld [vmem:[#allocation20 + $0xe4] ss:$16 sps:$4 sm:$0xff]  }
 0x971   :  { %7941 = vmatmul.mubr.bf16.vlgmr.msra.gmra.mrb[64].mxu0 %v13629_v54 }
 0x972   :  { %8047 = vmatmul.mubr.bf16.vlgmr.msra.gmra.mrb[64].mxu1 %v13629_v54  ;;  %7950 = vmatprep.mubr.bf16.mxu0 %v13661_v52  ;;  %v12012_v54 = vld [vmem:[#allocation20 + $0x6c] ss:$16 sps:$4 sm:$0xff]  }
 0x973   :  { %8056 = vmatprep.mubr.bf16.mxu1 %v13661_v52  ;;  %9876 = vmatpush1.bf16.msra.mxu0 %v11989_v10  ;;  %v12007_v52 = vld [vmem:[#allocation20 + $0x60] ss:$16 sps:$4 sm:$0xff]   ;;  %v12036_v10 = vld [vmem:[#allocation20 + $0xec] ss:$16 sps:$4 sm:$0xff]  }
 0x974   :  { %10088 = vmatpush1.bf16.msra.mxu1 %v11992_v20  ;;  %9877 = vmatprep.subr.bf16.mxu0 %v11997_v28  ;;  %v12031_v20 = vld [vmem:[#allocation20 + $0xe0] ss:$16 sps:$4 sm:$0xff]   ;;  %v12034_v28 = vld [vmem:[#allocation20 + $0xe8] ss:$16 sps:$4 sm:$0xff]  }
 0x975   :  { %10089 = vmatprep.subr.bf16.mxu1 %v12000_v37  ;;  %v12039_v37 = vld [vmem:[#allocation20 + $0x104] ss:$16 sps:$4 sm:$0xff]  }
 0x977   :  { %9878 = vmatpush1.bf16.msra.mxu0 %v11995_v60  ;;  %v12042_v60 = vld [vmem:[#allocation20 + $0x10c] ss:$16 sps:$4 sm:$0xff]  }
 0x978   :  { %10090 = vmatpush1.bf16.msra.mxu1 %v11998_v34  ;;  %9879 = vmatprep.subr.bf16.mxu0 %v12003_v25  ;;  %v12037_v34 = vld [vmem:[#allocation20 + $0x100] ss:$16 sps:$4 sm:$0xff]   ;;  %v12040_v25 = vld [vmem:[#allocation20 + $0x108] ss:$16 sps:$4 sm:$0xff]  }
 0x979   :  { %7951 = vmatmul.mubr.bf16.gmra.mrb[68].mxu0 %v13665_v30  ;;  %10091 = vmatprep.subr.bf16.mxu1 %v12006_v21  ;;  %v12045_v21 = vld [vmem:[#allocation20 + $0x124] ss:$16 sps:$4 sm:$0xff]  }
 0x97a   :  { %8057 = vmatmul.mubr.bf16.gmra.mrb[68].mxu1 %v13665_v30  ;;  %v12022_v30 = vld [vmem:[#allocation20 + $0xa8] ss:$16 sps:$4 sm:$0xff]  }
 0x97b   :  { %9880 = vmatpush1.bf16.msra.mxu0 %v12001_v51  ;;  %v12048_v51 = vld [vmem:[#allocation20 + $0x12c] ss:$16 sps:$4 sm:$0xff]  }
 0x97c   :  { %10092 = vmatpush1.bf16.msra.mxu1 %v12004_v47  ;;  %9881 = vmatprep.subr.bf16.mxu0 %v12009_v3  ;;  %v12043_v47 = vld [vmem:[#allocation20 + $0x120] ss:$16 sps:$4 sm:$0xff]   ;;  %v12046_v3 = vld [vmem:[#allocation20 + $0x128] ss:$16 sps:$4 sm:$0xff]  }
 0x97d   :  { %10093 = vmatprep.subr.bf16.mxu1 %v12012_v54  ;;  %v12051_v54 = vld [vmem:[#allocation20 + $0x144] ss:$16 sps:$4 sm:$0xff]  }
 0x97f   :  { %9882 = vmatpush1.bf16.msra.mxu0 %v12007_v52  ;;  %v12054_v52 = vld [vmem:[#allocation20 + $0x14c] ss:$16 sps:$4 sm:$0xff]  }
 0x980   :  { %10094 = vmatpush1.bf16.msra.mxu1 %v12010_v36  ;;  %9883 = vmatprep.subr.bf16.mxu0 %v12015_v27  ;;  %v12049_v36 = vld [vmem:[#allocation20 + $0x140] ss:$16 sps:$4 sm:$0xff]   ;;  %v12052_v27 = vld [vmem:[#allocation20 + $0x148] ss:$16 sps:$4 sm:$0xff]  }
 0x981   :  { %10095 = vmatprep.subr.bf16.mxu1 %v12018_v62  ;;  %v12057_v62 = vld [vmem:[#allocation20 + $0x164] ss:$16 sps:$4 sm:$0xff]  }
 0x983   :  { %9884 = vmatpush1.bf16.msra.mxu0 %v12013_v41  ;;  %v12060_v41 = vld [vmem:[#allocation20 + $0x16c] ss:$16 sps:$4 sm:$0xff]  }
 0x984   :  { %10096 = vmatpush1.bf16.msra.mxu1 %v12016_v55  ;;  %9885 = vmatprep.subr.bf16.mxu0 %v12021_v42  ;;  %v12055_v55 = vld [vmem:[#allocation20 + $0x160] ss:$16 sps:$4 sm:$0xff]   ;;  %v11257_v42 = vmul.f32 -1.442695, %v13705_v24 }
 0x985   :  { %10097 = vmatprep.subr.bf16.mxu1 %v12024_v59  ;;  %v12058_v59 = vld [vmem:[#allocation20 + $0x168] ss:$16 sps:$4 sm:$0xff]  }
 0x986   :  { %12453 = vpow2.f32 %v11257_v42  ;;  %v11283_v42 = vmul.f32 -1.442695, %v13731_v31 }
 0x987   :  { %9886 = vmatpush1.bf16.msra.mxu0 %v12019_v11  ;;  %v12063_v11 = vld [vmem:[#allocation20 + $0x184] ss:$16 sps:$4 sm:$0xff]  }
 0x988   :  { %10098 = vmatpush1.bf16.msra.mxu1 %v12022_v30  ;;  %9887 = vmatprep.subr.bf16.mxu0 %v12027_v48  ;;  %v11259_v30 = vmul.f32 -1.442695, %v13707_v61  ;;  %v12066_v48 = vld [vmem:[#allocation20 + $0x18c] ss:$16 sps:$4 sm:$0xff]  }
 0x989   :  { %10099 = vmatprep.subr.bf16.mxu1 %v12030_v15  ;;  %v11258_v15 = vmul.f32 -1.442695, %v13709_v39 }
 0x98a   :  { %12455 = vpow2.f32 %v11259_v30  ;;  %v11282_v30 = vmul.f32 -1.442695, %v13733_v1 }
 0x98b   :  { %9888 = vmatpush1.bf16.msra.mxu0 %v12025_v18  ;;  %v11260_v18 = vmul.f32 -1.442695, %v13711_v53  ;;  %12457 = vpow2.f32 %v11258_v15  ;;  %v11284_v15 = vmul.f32 -1.442695, %v13735_v9 }
 0x98c   :  { %10100 = vmatpush1.bf16.msra.mxu1 %v12028_v29  ;;  %9889 = vmatprep.subr.bf16.mxu0 %v12033_v45  ;;  %v12061_v29 = vld [vmem:[#allocation20 + $0x180] ss:$16 sps:$4 sm:$0xff]   ;;  %v11265_v45 = vmul.f32 -1.442695, %v13713_v40 }
 0x98d   :  { %10101 = vmatprep.subr.bf16.mxu1 %v12036_v10  ;;  %v12064_v10 = vld [vmem:[#allocation20 + $0x188] ss:$16 sps:$4 sm:$0xff]   ;;  %12459 = vpow2.f32 %v11260_v18  ;;  %v12079_v18 = vld [vmem:[#allocation20 + $0x1e0] ss:$16 sps:$4 sm:$0xff]  }
 0x98e   :  { %12461 = vpow2.f32 %v11265_v45  ;;  %v12082_v45 = vld [vmem:[#allocation20 + $0x1e8] ss:$16 sps:$4 sm:$0xff]  }
 0x98f   :  { %9890 = vmatpush1.bf16.msra.mxu0 %v12031_v20  ;;  %v12069_v20 = vld [vmem:[#allocation20 + $0x1a4] ss:$16 sps:$4 sm:$0xff]  }
 0x990   :  { %10102 = vmatpush1.bf16.msra.mxu1 %v12034_v28  ;;  %9891 = vmatprep.subr.bf16.mxu0 %v12039_v37  ;;  %v11267_v28 = vmul.f32 -1.442695, %v13715_v6  ;;  %v12072_v37 = vld [vmem:[#allocation20 + $0x1ac] ss:$16 sps:$4 sm:$0xff]  }
 0x991   :  { %10103 = vmatprep.subr.bf16.mxu1 %v12042_v60  ;;  %v11266_v60 = vmul.f32 -1.442695, %v13717_v50 }
 0x992   :  { %12463 = vpow2.f32 %v11267_v28 }
 0x993   :  { %9892 = vmatpush1.bf16.msra.mxu0 %v12037_v34  ;;  %v11268_v34 = vmul.f32 -1.442695, %v13719_v23  ;;  %12465 = vpow2.f32 %v11266_v60 }
 0x994   :  { %10104 = vmatpush1.bf16.msra.mxu1 %v12040_v25  ;;  %9893 = vmatprep.subr.bf16.mxu0 %v12045_v21  ;;  %v12067_v25 = vld [vmem:[#allocation20 + $0x1a0] ss:$16 sps:$4 sm:$0xff]   ;;  %v11273_v21 = vmul.f32 -1.442695, %v13721_v63 }
 0x995   :  { %10105 = vmatprep.subr.bf16.mxu1 %v12048_v51  ;;  %v12070_v51 = vld [vmem:[#allocation20 + $0x1a8] ss:$16 sps:$4 sm:$0xff]   ;;  %12467 = vpow2.f32 %v11268_v34 }
 0x996   :  { %12469 = vpow2.f32 %v11273_v21 }
 0x997   :  { %9894 = vmatpush1.bf16.msra.mxu0 %v12043_v47  ;;  %v12075_v47 = vld [vmem:[#allocation20 + $0x1c4] ss:$16 sps:$4 sm:$0xff]  }
 0x998   :  { %10106 = vmatpush1.bf16.msra.mxu1 %v12046_v3  ;;  %9895 = vmatprep.subr.bf16.mxu0 %v12051_v54  ;;  %v11275_v3 = vmul.f32 -1.442695, %v13723_v5  ;;  %v12078_v54 = vld [vmem:[#allocation20 + $0x1cc] ss:$16 sps:$4 sm:$0xff]  }
 0x999   :  { %10107 = vmatprep.subr.bf16.mxu1 %v12054_v52  ;;  %v11274_v52 = vmul.f32 -1.442695, %v13725_v44 }
 0x99a   :  { %12471 = vpow2.f32 %v11275_v3 }
 0x99b   :  { %9896 = vmatpush1.bf16.msra.mxu0 %v12049_v36  ;;  %v11276_v36 = vmul.f32 -1.442695, %v13727_v19  ;;  %12473 = vpow2.f32 %v11274_v52 }
 0x99c   :  { %10108 = vmatpush1.bf16.msra.mxu1 %v12052_v27  ;;  %9897 = vmatprep.subr.bf16.mxu0 %v12057_v62  ;;  %v12073_v27 = vld [vmem:[#allocation20 + $0x1c0] ss:$16 sps:$4 sm:$0xff]   ;;  %v11281_v62 = vmul.f32 -1.442695, %v13729_v46 }
 0x99d   :  { %10109 = vmatprep.subr.bf16.mxu1 %v12060_v41  ;;  %v12076_v41 = vld [vmem:[#allocation20 + $0x1c8] ss:$16 sps:$4 sm:$0xff]   ;;  %12475 = vpow2.f32 %v11276_v36 }
 0x99e   :  { %12477 = vpow2.f32 %v11281_v62 }
 0x99f   :  { %9898 = vmatpush1.bf16.msra.mxu0 %v12055_v55  ;;  %v12081_v55 = vld [vmem:[#allocation20 + $0x1e4] ss:$16 sps:$4 sm:$0xff]   ;;  %12479 = vpow2.f32 %v11283_v42 }
 0x9a0   :  { %10110 = vmatpush1.bf16.msra.mxu1 %v12058_v59  ;;  %9899 = vmatprep.subr.bf16.mxu0 %v12063_v11  ;;  %v12084_v59 = vld [vmem:[#allocation20 + $0x1ec] ss:$16 sps:$4 sm:$0xff]   ;;  %v12454_v11 = vpop.eup %12453  ;;  %12481 = vpow2.f32 %v11282_v30 }
 0x9a1   :  { %10111 = vmatprep.subr.bf16.mxu1 %v12066_v48  ;;  %v12456_v48 = vpop.eup %12455  ;;  %v8163_v28 = vadd.f32 1.0, %v12454_v11  ;;  %12483 = vpow2.f32 %v11284_v15 }
 0x9a2   :  { %v8165_v34 = vadd.f32 1.0, %v12456_v48 }
 0x9a3   :  { %9900 = vmatpush1.bf16.msra.mxu0 %v12061_v29  ;;  %v12458_v29 = vpop.eup %12457  ;;  %12485 = vrcp.f32 %v8163_v28 }
 0x9a4   :  { %10112 = vmatpush1.bf16.msra.mxu1 %v12064_v10  ;;  %9901 = vmatprep.subr.bf16.mxu0 %v12069_v20  ;;  %v12087_v10 = vld [vmem:[#allocation20 + $0x204] ss:$16 sps:$4 sm:$0xff]   ;;  %v12460_v20 = vpop.eup %12459  ;;  %v8164_v21 = vadd.f32 1.0, %v12458_v29  ;;  %12487 = vrcp.f32 %v8165_v34 }
 0x9a5   :  { %10113 = vmatprep.subr.bf16.mxu1 %v12072_v37  ;;  %v12090_v37 = vld [vmem:[#allocation20 + $0x20c] ss:$16 sps:$4 sm:$0xff]   ;;  %v12462_v60 = vpop.eup %12461 }
 0x9a6   :  { %12489 = vrcp.f32 %v8164_v21 }
 0x9a7   :  { %9902 = vmatpush1.bf16.msra.mxu0 %v12067_v25  ;;  %v12464_v25 = vpop.eup %12463 }
 0x9a8   :  { %10114 = vmatpush1.bf16.msra.mxu1 %v12070_v51  ;;  %9903 = vmatprep.subr.bf16.mxu0 %v12075_v47  ;;  %v12466_v51 = vpop.eup %12465  ;;  %v8166_v47 = vadd.f32 1.0, %v12460_v20  ;;  %v8173_v36 = vadd.f32 1.0, %v12464_v25 }
 0x9a9   :  { %10115 = vmatprep.subr.bf16.mxu1 %v12078_v54  ;;  %v12468_v3 = vpop.eup %12467  ;;  %v8171_v54 = vadd.f32 1.0, %v12462_v60  ;;  %v8172_v62 = vadd.f32 1.0, %v12466_v51 }
 0x9aa   :  { %v12470_v52 = vpop.eup %12469  ;;  %12491 = vrcp.f32 %v8166_v47 }
 0x9ab   :  { %9904 = vmatpush1.bf16.msra.mxu0 %v12073_v27  ;;  %v12472_v27 = vpop.eup %12471  ;;  %12493 = vrcp.f32 %v8171_v54 }
 0x9ac   :  { %10116 = vmatpush1.bf16.msra.mxu1 %v12076_v41  ;;  %9905 = vmatprep.subr.bf16.mxu0 %v12081_v55  ;;  %v12474_v41 = vpop.eup %12473  ;;  %v8174_v55 = vadd.f32 1.0, %v12468_v3  ;;  %12495 = vrcp.f32 %v8173_v36  ;;  %v8181_v30 = vadd.f32 1.0, %v12472_v27 }
 0x9ad   :  { %10117 = vmatprep.subr.bf16.mxu1 %v12084_v59  ;;  %v12476_v42 = vpop.eup %12475  ;;  %v8179_v59 = vadd.f32 1.0, %v12470_v52  ;;  %12497 = vrcp.f32 %v8172_v62  ;;  %v8180_v15 = vadd.f32 1.0, %v12474_v41 }
 0x9ae   :  { %v12478_v11 = vpop.eup %12477  ;;  %12499 = vrcp.f32 %v8174_v55  ;;  %v8182_v29 = vadd.f32 1.0, %v12476_v42 }
 0x9af   :  { %9906 = vmatpush1.bf16.msra.mxu0 %v12079_v18  ;;  %v12480_v48 = vpop.eup %12479  ;;  %12501 = vrcp.f32 %v8179_v59 }
 0x9b0   :  { %10118 = vmatpush1.bf16.msra.mxu1 %v12082_v45  ;;  %9928 = vmatprep.subr.bf16.mxu0 %v12087_v10  ;;  %v12482_v18 = vpop.eup %12481  ;;  %v8187_v10 = vadd.f32 1.0, %v12478_v11  ;;  %12503 = vrcp.f32 %v8181_v30  ;;  %v8189_v20 = vadd.f32 1.0, %v12480_v48 }
 0x9b1   :  { %10140 = vmatprep.subr.bf16.mxu1 %v12090_v37  ;;  %v12484_v45 = vpop.eup %12483  ;;  %12505 = vrcp.f32 %v8180_v15  ;;  %v8188_v37 = vadd.f32 1.0, %v12482_v18 }
 0x9b2   :  { %v12486_v28 = vpop.eup %12485  ;;  %12507 = vrcp.f32 %v8182_v29  ;;  %v8190_v34 = vadd.f32 1.0, %v12484_v45 }
 0x9b3   :  { %v12488_v60 = vpop.eup %12487  ;;  %12509 = vrcp.f32 %v8187_v10  ;;  %v8259_v54 = vmul.f32 %v12486_v28, %v13705_v24 }
 0x9b4   :  { %v12490_v25 = vpop.eup %12489  ;;  %12511 = vrcp.f32 %v8189_v20  ;;  %v8261_v36 = vmul.f32 %v12488_v60, %v13707_v61 }
 0x9b5   :  { %v12492_v21 = vpop.eup %12491  ;;  %12513 = vrcp.f32 %v8188_v37  ;;  %v8260_v27 = vmul.f32 %v12490_v25, %v13709_v39 }
 0x9b6   :  { %v12494_v51 = vpop.eup %12493  ;;  %12515 = vrcp.f32 %v8190_v34  ;;  %v8262_v55 = vmul.f32 %v12492_v21, %v13711_v53 }
 0x9b7   :  { %v12496_v47 = vpop.eup %12495  ;;  %v8267_v42 = vmul.f32 %v12494_v51, %v13713_v40 }
 0x9b8   :  { %v12498_v3 = vpop.eup %12497  ;;  %v8269_v15 = vmul.f32 %v12496_v47, %v13715_v6 }
 0x9b9   :  { %v12500_v52 = vpop.eup %12499  ;;  %v8268_v18 = vmul.f32 %v12498_v3, %v13717_v50 }
 0x9ba   :  { %v12502_v41 = vpop.eup %12501  ;;  %v8270_v39 = vmul.f32 %v12500_v52, %v13719_v23 }
 0x9bb   :  { %v12504_v48 = vpop.eup %12503  ;;  %v8275_v23 = vmul.f32 %v12502_v41, %v13721_v63 }
 0x9bc   :  { %v12506_v10 = vpop.eup %12505 }
 0x9bd   :  { %v12508_v40 = vpop.eup %12507 }
 0x9be   :  { %v12510_v21 = vpop.eup %12509 }
 0x9bf   :  { %v12512_v47 = vpop.eup %12511 }
 0x9c2   :  { %v7730_v62 = vpop.f32.mrb[56].mxu0 }
 0x9c3   :  { %v8291_v59 = vmul.f32 %v8259_v54, %v7730_v62  ;;  %v7836_v11 = vpop.f32.mrb[56].mxu1  ;;  %v7732_v30 = vpop.f32.mrb[57].mxu0  ;;  %v12085_v54 = vld [vmem:[#allocation20 + $0x200] ss:$16 sps:$4 sm:$0xff]   ;;  %v12093_v62 = vld [vmem:[#allocation20 + $0x224] ss:$16 sps:$4 sm:$0xff]  }
 0x9c4   :  { %v8293_v24 = vmul.f32 %v8261_v36, %v7836_v11  ;;  %v8292_v29 = vmul.f32 %v8260_v27, %v7732_v30  ;;  %v7838_v45 = vpop.f32.mrb[57].mxu1  ;;  %v7734_v61 = vpop.f32.mrb[58].mxu0  ;;  %v12088_v36 = vld [vmem:[#allocation20 + $0x208] ss:$16 sps:$4 sm:$0xff]   ;;  %v8277_v11 = vmul.f32 %v12504_v48, %v13723_v5  ;;  %v8276_v30 = vmul.f32 %v12506_v10, %v13725_v44 }
 0x9c5   :  { %v8294_v20 = vmul.f32 %v8262_v55, %v7838_v45  ;;  %v8299_v28 = vmul.f32 %v8267_v42, %v7734_v61  ;;  %v7840_v53 = vpop.f32.mrb[58].mxu1  ;;  %v7736_v37 = vpop.f32.mrb[59].mxu0  ;;  %v12096_v55 = vld [vmem:[#allocation20 + $0x22c] ss:$16 sps:$4 sm:$0xff]   ;;  %v12094_v10 = vld [vmem:[#allocation20 + $0x228] ss:$16 sps:$4 sm:$0xff]  }
 0x9c6   :  { %v8301_v60 = vmul.f32 %v8269_v15, %v7840_v53  ;;  %v8300_v34 = vmul.f32 %v8268_v18, %v7736_v37  ;;  %v7842_v25 = vpop.f32.mrb[59].mxu1  ;;  %v12514_v27 = vpop.eup %12513  ;;  %v8283_v18 = vmul.f32 %v12510_v21, %v13729_v46  ;;  %v12099_v53 = vld [vmem:[#allocation20 + $0x244] ss:$16 sps:$4 sm:$0xff]   ;;  %v12102_v37 = vld [vmem:[#allocation20 + $0x24c] ss:$16 sps:$4 sm:$0xff]  }
 0x9c7   :  { %v8323_v51 = vpack.c.bf16 %v8299_v28, %v8291_v59  ;;  %v8302_v6 = vmul.f32 %v8270_v39, %v7842_v25  ;;  %v12516_v42 = vpop.eup %12515  ;;  %v8278_v59 = vmul.f32 %v12508_v40, %v13727_v19  ;;  %v8284_v41 = vmul.f32 %v12514_v27, %v13733_v1  ;;  %v12091_v19 = vld [vmem:[#allocation20 + $0x220] ss:$16 sps:$4 sm:$0xff]   ;;  %v12106_v27 = vld [vmem:[#allocation20 + $0x268] ss:$16 sps:$4 sm:$0xff]  }
 0x9c8   :  { %v13815_v50 = vpack.c.bf16 %v8301_v60, %v8293_v24  ;;  %v8324_v3 = vpack.c.bf16 %v8300_v34, %v8292_v29  ;;  %v8285_v24 = vmul.f32 %v12512_v47, %v13731_v31  ;;  %v8286_v39 = vmul.f32 %v12516_v42, %v13735_v9  ;;  %v12100_v9 = vld [vmem:[#allocation20 + $0x248] ss:$16 sps:$4 sm:$0xff]  }
 0x9c9   :  { %v8326_v52 = vpack.c.bf16 %v8302_v6, %v8294_v20  ;;  %v12097_v6 = vld [vmem:[#allocation20 + $0x240] ss:$16 sps:$4 sm:$0xff]   ;;  %v12112_v42 = vld [vmem:[#allocation20 + $0x288] ss:$16 sps:$4 sm:$0xff]  }
 0x9ca   :  { %v7740_v15 = vpop.f32.mrb[60].mxu0  ;;  %9907 = vmatprep.mubr.bf16.mxu0 %v8324_v3  ;;  %10119 = vmatprep.mubr.bf16.mxu1 %v8324_v3  ;;  %v12105_v3 = vld [vmem:[#allocation20 + $0x264] ss:$16 sps:$4 sm:$0xff]  }
 0x9cb   :  { %v8307_v29 = vmul.f32 %v8275_v23, %v7740_v15  ;;  %v7846_v45 = vpop.f32.mrb[60].mxu1  ;;  %v7742_v63 = vpop.f32.mrb[61].mxu0  ;;  %9908 = vmatmul.mubr.bf16.vlgmr.msra.gmra.mrb[72].mxu0 %v8323_v51  ;;  %10120 = vmatmul.mubr.bf16.vlgmr.msra.gmra.mrb[72].mxu1 %v8323_v51  ;;  %v12111_v23 = vld [vmem:[#allocation20 + $0x284] ss:$16 sps:$4 sm:$0xff]   ;;  %v12118_v15 = vld [vmem:[#allocation20 + $0x2a8] ss:$16 sps:$4 sm:$0xff]  }
 0x9cc   :  { %v8309_v61 = vmul.f32 %v8277_v11, %v7846_v45  ;;  %v8308_v5 = vmul.f32 %v8276_v30, %v7742_v63  ;;  %v7848_v48 = vpop.f32.mrb[61].mxu1  ;;  %9929 = vmatpush1.bf16.msra.mxu0 %v12085_v54  ;;  %10141 = vmatpush1.bf16.msra.mxu1 %v12088_v36  ;;  %v7744_v44 = vpop.f32.mrb[62].mxu0  ;;  %v12108_v54 = vld [vmem:[#allocation20 + $0x26c] ss:$16 sps:$4 sm:$0xff]   ;;  %v12103_v36 = vld [vmem:[#allocation20 + $0x260] ss:$16 sps:$4 sm:$0xff]  }
 0x9cd   :  { %v8310_v46 = vmul.f32 %v8278_v59, %v7848_v48  ;;  %v8315_v20 = vmul.f32 %v8283_v18, %v7744_v44  ;;  %v7850_v31 = vpop.f32.mrb[62].mxu1  ;;  %v7746_v28 = vpop.f32.mrb[63].mxu0  ;;  %9930 = vmatprep.subr.bf16.mxu0 %v12093_v62  ;;  %10142 = vmatprep.subr.bf16.mxu1 %v12096_v55  ;;  %v12114_v62 = vld [vmem:[#allocation20 + $0x28c] ss:$16 sps:$4 sm:$0xff]   ;;  %v12109_v55 = vld [vmem:[#allocation20 + $0x280] ss:$16 sps:$4 sm:$0xff]  }
 0x9ce   :  { %v8317_v40 = vmul.f32 %v8285_v24, %v7850_v31  ;;  %v8316_v1 = vmul.f32 %v8284_v41, %v7746_v28  ;;  %v7852_v60 = vpop.f32.mrb[63].mxu1  ;;  %v12117_v11 = vld [vmem:[#allocation20 + $0x2a4] ss:$16 sps:$4 sm:$0xff]   ;;  %v12120_v30 = vld [vmem:[#allocation20 + $0x2ac] ss:$16 sps:$4 sm:$0xff]  }
 0x9cf   :  { %v8331_v34 = vpack.c.bf16 %v8315_v20, %v8307_v29  ;;  %v8318_v25 = vmul.f32 %v8286_v39, %v7852_v60  ;;  %v12115_v59 = vld [vmem:[#allocation20 + $0x2a0] ss:$16 sps:$4 sm:$0xff]   ;;  %v12123_v18 = vld [vmem:[#allocation20 + $0x2c4] ss:$16 sps:$4 sm:$0xff]   ;;  %v12124_v29 = vld [vmem:[#allocation20 + $0x2c8] ss:$16 sps:$4 sm:$0xff]  }
 0x9d0   :  { %v13825_v21 = vpack.c.bf16 %v8317_v40, %v8309_v61  ;;  %v8332_v51 = vpack.c.bf16 %v8316_v1, %v8308_v5  ;;  %9931 = vmatpush1.bf16.msra.mxu0 %v12091_v19  ;;  %10143 = vmatpush1.bf16.msra.mxu1 %v12094_v10  ;;  %v12121_v24 = vld [vmem:[#allocation20 + $0x2c0] ss:$16 sps:$4 sm:$0xff]   ;;  %v12129_v45 = vld [vmem:[#allocation20 + $0x2e4] ss:$16 sps:$4 sm:$0xff]   ;;  %v12132_v63 = vld [vmem:[#allocation20 + $0x2ec] ss:$16 sps:$4 sm:$0xff]  }
 0x9d1   :  { %v13827_v47 = vpack.c.bf16 %v8318_v25, %v8310_v46  ;;  %9932 = vmatprep.subr.bf16.mxu0 %v12099_v53  ;;  %10144 = vmatprep.subr.bf16.mxu1 %v12102_v37  ;;  %v12127_v41 = vld [vmem:[#allocation20 + $0x2e0] ss:$16 sps:$4 sm:$0xff]   ;;  %v12130_v61 = vld [vmem:[#allocation20 + $0x2e8] ss:$16 sps:$4 sm:$0xff]   ;;  %v12135_v5 = vld [vmem:[#allocation20 + $0x304] ss:$16 sps:$4 sm:$0xff]  }
 0x9d2   :  { %9917 = vmatprep.mubr.bf16.mxu0 %v8332_v51  ;;  %10129 = vmatprep.mubr.bf16.mxu1 %v8332_v51  ;;  %v12138_v48 = vld [vmem:[#allocation20 + $0x30c] ss:$16 sps:$4 sm:$0xff]   ;;  %v12133_v44 = vld [vmem:[#allocation20 + $0x300] ss:$16 sps:$4 sm:$0xff]   ;;  %v12136_v19 = vld [vmem:[#allocation20 + $0x308] ss:$16 sps:$4 sm:$0xff]  }
 0x9d3   :  { %9918 = vmatmul.mubr.bf16.gmra.mrb[76].mxu0 %v8331_v34  ;;  %10130 = vmatmul.mubr.bf16.gmra.mrb[76].mxu1 %v8331_v34  ;;  %v12141_v10 = vld [vmem:[#allocation20 + $0x324] ss:$16 sps:$4 sm:$0xff]   ;;  %v12144_v39 = vld [vmem:[#allocation20 + $0x32c] ss:$16 sps:$4 sm:$0xff]   ;;  %v12139_v46 = vld [vmem:[#allocation20 + $0x320] ss:$16 sps:$4 sm:$0xff]  }
 0x9d4   :  { %9933 = vmatpush1.bf16.msra.mxu0 %v12097_v6  ;;  %10145 = vmatpush1.bf16.msra.mxu1 %v12100_v9  ;;  %v12142_v20 = vld [vmem:[#allocation20 + $0x328] ss:$16 sps:$4 sm:$0xff]   ;;  %v12147_v31 = vld [vmem:[#allocation20 + $0x344] ss:$16 sps:$4 sm:$0xff]   ;;  %v12150_v28 = vld [vmem:[#allocation20 + $0x34c] ss:$16 sps:$4 sm:$0xff]  }
 0x9d5   :  { %9960 = vmatprep.mubr.bf16.mxu0 %v8326_v52  ;;  %10172 = vmatprep.mubr.bf16.mxu1 %v8326_v52  ;;  %v12126_v52 = vld [vmem:[#allocation20 + $0x2cc] ss:$16 sps:$4 sm:$0xff]   ;;  %v12145_v53 = vld [vmem:[#allocation20 + $0x340] ss:$16 sps:$4 sm:$0xff]   ;;  %v12148_v37 = vld [vmem:[#allocation20 + $0x348] ss:$16 sps:$4 sm:$0xff]  }
 0x9d6   :  { %9934 = vmatprep.subr.bf16.mxu0 %v12105_v3  ;;  %10146 = vmatprep.subr.bf16.mxu1 %v12108_v54  ;;  %v12153_v40 = vld [vmem:[#allocation20 + $0x364] ss:$16 sps:$4 sm:$0xff]   ;;  %v12156_v1 = vld [vmem:[#allocation20 + $0x36c] ss:$16 sps:$4 sm:$0xff]   ;;  %v12151_v60 = vld [vmem:[#allocation20 + $0x360] ss:$16 sps:$4 sm:$0xff]  }
 0x9d7   :  { %v12154_v34 = vld [vmem:[#allocation20 + $0x368] ss:$16 sps:$4 sm:$0xff]   ;;  %v12159_v25 = vld [vmem:[#allocation20 + $0x384] ss:$16 sps:$4 sm:$0xff]   ;;  %v12162_v51 = vld [vmem:[#allocation20 + $0x38c] ss:$16 sps:$4 sm:$0xff]  }
 0x9d8   :  { %9935 = vmatpush1.bf16.msra.mxu0 %v12103_v36  ;;  %10147 = vmatpush1.bf16.msra.mxu1 %v12106_v27  ;;  %v12157_v6 = vld [vmem:[#allocation20 + $0x380] ss:$16 sps:$4 sm:$0xff]   ;;  %v12160_v9 = vld [vmem:[#allocation20 + $0x388] ss:$16 sps:$4 sm:$0xff]   ;;  %v12165_v3 = vld [vmem:[#allocation20 + $0x3a4] ss:$16 sps:$4 sm:$0xff]  }
 0x9d9   :  { %9936 = vmatprep.subr.bf16.mxu0 %v12111_v23  ;;  %10148 = vmatprep.subr.bf16.mxu1 %v12114_v62  ;;  %v12168_v54 = vld [vmem:[#allocation20 + $0x3ac] ss:$16 sps:$4 sm:$0xff]   ;;  %v12163_v36 = vld [vmem:[#allocation20 + $0x3a0] ss:$16 sps:$4 sm:$0xff]   ;;  %v12166_v27 = vld [vmem:[#allocation20 + $0x3a8] ss:$16 sps:$4 sm:$0xff]  }
 0x9da   :  { %v12171_v23 = vld [vmem:[#allocation20 + $0x3c4] ss:$16 sps:$4 sm:$0xff]   ;;  %v12174_v62 = vld [vmem:[#allocation20 + $0x3cc] ss:$16 sps:$4 sm:$0xff]  }
 0x9dc   :  { %9937 = vmatpush1.bf16.msra.mxu0 %v12109_v55  ;;  %10149 = vmatpush1.bf16.msra.mxu1 %v12112_v42  ;;  %v12169_v55 = vld [vmem:[#allocation20 + $0x3c0] ss:$16 sps:$4 sm:$0xff]   ;;  %v12172_v42 = vld [vmem:[#allocation20 + $0x3c8] ss:$16 sps:$4 sm:$0xff]  }
 0x9dd   :  { %9938 = vmatprep.subr.bf16.mxu0 %v12117_v11  ;;  %10150 = vmatprep.subr.bf16.mxu1 %v12120_v30  ;;  %v12177_v11 = vld [vmem:[#allocation20 + $0x3e4] ss:$16 sps:$4 sm:$0xff]   ;;  %v12180_v30 = vld [vmem:[#allocation20 + $0x3ec] ss:$16 sps:$4 sm:$0xff]  }
 0x9e0   :  { %9939 = vmatpush1.bf16.msra.mxu0 %v12115_v59  ;;  %10151 = vmatpush1.bf16.msra.mxu1 %v12118_v15  ;;  %v12175_v59 = vld [vmem:[#allocation20 + $0x3e0] ss:$16 sps:$4 sm:$0xff]   ;;  %v12178_v15 = vld [vmem:[#allocation20 + $0x3e8] ss:$16 sps:$4 sm:$0xff]  }
 0x9e1   :  { %9940 = vmatprep.subr.bf16.mxu0 %v12123_v18  ;;  %10152 = vmatprep.subr.bf16.mxu1 %v12126_v52  ;;  %v12183_v18 = vld [vmem:[#allocation20 + $0x404] ss:$16 sps:$4 sm:$0xff]   ;;  %v12186_v52 = vld [vmem:[#allocation20 + $0x40c] ss:$16 sps:$4 sm:$0xff]  }
 0x9e4   :  { %9941 = vmatpush1.bf16.msra.mxu0 %v12121_v24  ;;  %10153 = vmatpush1.bf16.msra.mxu1 %v12124_v29  ;;  %v12181_v24 = vld [vmem:[#allocation20 + $0x400] ss:$16 sps:$4 sm:$0xff]   ;;  %v12184_v29 = vld [vmem:[#allocation20 + $0x408] ss:$16 sps:$4 sm:$0xff]  }
 0x9e5   :  { %9942 = vmatprep.subr.bf16.mxu0 %v12129_v45  ;;  %10154 = vmatprep.subr.bf16.mxu1 %v12132_v63  ;;  %v12189_v45 = vld [vmem:[#allocation20 + $0x424] ss:$16 sps:$4 sm:$0xff]   ;;  %v12192_v63 = vld [vmem:[#allocation20 + $0x42c] ss:$16 sps:$4 sm:$0xff]  }
 0x9e8   :  { %9943 = vmatpush1.bf16.msra.mxu0 %v12127_v41  ;;  %10155 = vmatpush1.bf16.msra.mxu1 %v12130_v61  ;;  %v12187_v41 = vld [vmem:[#allocation20 + $0x420] ss:$16 sps:$4 sm:$0xff]   ;;  %v12190_v61 = vld [vmem:[#allocation20 + $0x428] ss:$16 sps:$4 sm:$0xff]  }
 0x9e9   :  { %9944 = vmatprep.subr.bf16.mxu0 %v12135_v5  ;;  %10156 = vmatprep.subr.bf16.mxu1 %v12138_v48  ;;  %v12195_v5 = vld [vmem:[#allocation20 + $0x444] ss:$16 sps:$4 sm:$0xff]   ;;  %v12198_v48 = vld [vmem:[#allocation20 + $0x44c] ss:$16 sps:$4 sm:$0xff]  }
 0x9ec   :  { %9945 = vmatpush1.bf16.msra.mxu0 %v12133_v44  ;;  %10157 = vmatpush1.bf16.msra.mxu1 %v12136_v19  ;;  %v12193_v44 = vld [vmem:[#allocation20 + $0x440] ss:$16 sps:$4 sm:$0xff]   ;;  %v12196_v19 = vld [vmem:[#allocation20 + $0x448] ss:$16 sps:$4 sm:$0xff]  }
 0x9ed   :  { %9946 = vmatprep.subr.bf16.mxu0 %v12141_v10  ;;  %10158 = vmatprep.subr.bf16.mxu1 %v12144_v39  ;;  %v12201_v10 = vld [vmem:[#allocation20 + $0x464] ss:$16 sps:$4 sm:$0xff]   ;;  %v12202_v39 = vld [vmem:[#allocation20 + $0x468] ss:$16 sps:$4 sm:$0xff]  }
 0x9f0   :  { %9947 = vmatpush1.bf16.msra.mxu0 %v12139_v46  ;;  %10159 = vmatpush1.bf16.msra.mxu1 %v12142_v20  ;;  %v12207_v46 = vld [vmem:[#allocation20 + $0x484] ss:$16 sps:$4 sm:$0xff]   ;;  %v12210_v20 = vld [vmem:[#allocation20 + $0x48c] ss:$16 sps:$4 sm:$0xff]  }
 0x9f1   :  { %9948 = vmatprep.subr.bf16.mxu0 %v12147_v31  ;;  %10160 = vmatprep.subr.bf16.mxu1 %v12150_v28  ;;  %v12205_v31 = vld [vmem:[#allocation20 + $0x480] ss:$16 sps:$4 sm:$0xff]   ;;  %v12208_v28 = vld [vmem:[#allocation20 + $0x488] ss:$16 sps:$4 sm:$0xff]  }
 0x9f4   :  { %9949 = vmatpush1.bf16.msra.mxu0 %v12145_v53  ;;  %10161 = vmatpush1.bf16.msra.mxu1 %v12148_v37  ;;  %v12213_v53 = vld [vmem:[#allocation20 + $0x4a4] ss:$16 sps:$4 sm:$0xff]   ;;  %v12216_v37 = vld [vmem:[#allocation20 + $0x4ac] ss:$16 sps:$4 sm:$0xff]  }
 0x9f5   :  { %9950 = vmatprep.subr.bf16.mxu0 %v12153_v40  ;;  %10162 = vmatprep.subr.bf16.mxu1 %v12156_v1  ;;  %v12211_v40 = vld [vmem:[#allocation20 + $0x4a0] ss:$16 sps:$4 sm:$0xff]   ;;  %v12219_v1 = vld [vmem:[#allocation20 + $0x4c4] ss:$16 sps:$4 sm:$0xff]  }
 0x9f8   :  { %9951 = vmatpush1.bf16.msra.mxu0 %v12151_v60  ;;  %10163 = vmatpush1.bf16.msra.mxu1 %v12154_v34  ;;  %v11261_v60 = vmul.f32 -1.442695, %v13753_v0  ;;  %v12222_v34 = vld [vmem:[#allocation20 + $0x4cc] ss:$16 sps:$4 sm:$0xff]  }
 0x9f9   :  { %9952 = vmatprep.subr.bf16.mxu0 %v12159_v25  ;;  %10164 = vmatprep.subr.bf16.mxu1 %v12162_v51  ;;  %v11263_v25 = vmul.f32 -1.442695, %v13755_v13  ;;  %v11262_v51 = vmul.f32 -1.442695, %v13757_v4 }
 0x9fa   :  { %12517 = vpow2.f32 %v11261_v60  ;;  %v12244_v60 = vld [vmem:[#allocation20 + $0x548] ss:$16 sps:$4 sm:$0xff]  }
 0x9fb   :  { %12519 = vpow2.f32 %v11263_v25 }
 0x9fc   :  { %9953 = vmatpush1.bf16.msra.mxu0 %v12157_v6  ;;  %10165 = vmatpush1.bf16.msra.mxu1 %v12160_v9  ;;  %v12217_v6 = vld [vmem:[#allocation20 + $0x4c0] ss:$16 sps:$4 sm:$0xff]   ;;  %v11264_v9 = vmul.f32 -1.442695, %v13759_v26  ;;  %12521 = vpow2.f32 %v11262_v51 }
 0x9fd   :  { %9954 = vmatprep.subr.bf16.mxu0 %v12165_v3  ;;  %10166 = vmatprep.subr.bf16.mxu1 %v12168_v54  ;;  %v12220_v3 = vld [vmem:[#allocation20 + $0x4c8] ss:$16 sps:$4 sm:$0xff]   ;;  %v12225_v54 = vld [vmem:[#allocation20 + $0x4e4] ss:$16 sps:$4 sm:$0xff]  }
 0x9fe   :  { %12523 = vpow2.f32 %v11264_v9 }
 0xa00   :  { %9955 = vmatpush1.bf16.msra.mxu0 %v12163_v36  ;;  %10167 = vmatpush1.bf16.msra.mxu1 %v12166_v27  ;;  %v11269_v36 = vmul.f32 -1.442695, %v13761_v7  ;;  %v12228_v27 = vld [vmem:[#allocation20 + $0x4ec] ss:$16 sps:$4 sm:$0xff]  }
 0xa01   :  { %9956 = vmatprep.subr.bf16.mxu0 %v12171_v23  ;;  %10168 = vmatprep.subr.bf16.mxu1 %v12174_v62  ;;  %v11271_v23 = vmul.f32 -1.442695, %v13763_v22  ;;  %v11270_v62 = vmul.f32 -1.442695, %v13765_v56 }
 0xa02   :  { %12525 = vpow2.f32 %v11269_v36 }
 0xa03   :  { %12527 = vpow2.f32 %v11271_v23 }
 0xa04   :  { %9957 = vmatpush1.bf16.msra.mxu0 %v12169_v55  ;;  %10169 = vmatpush1.bf16.msra.mxu1 %v12172_v42  ;;  %v12223_v55 = vld [vmem:[#allocation20 + $0x4e0] ss:$16 sps:$4 sm:$0xff]   ;;  %v11272_v42 = vmul.f32 -1.442695, %v13767_v57  ;;  %12529 = vpow2.f32 %v11270_v62 }
 0xa05   :  { %9958 = vmatprep.subr.bf16.mxu0 %v12177_v11  ;;  %10170 = vmatprep.subr.bf16.mxu1 %v12180_v30  ;;  %v12226_v11 = vld [vmem:[#allocation20 + $0x4e8] ss:$16 sps:$4 sm:$0xff]   ;;  %v12231_v30 = vld [vmem:[#allocation20 + $0x504] ss:$16 sps:$4 sm:$0xff]  }
 0xa06   :  { %12531 = vpow2.f32 %v11272_v42  ;;  %v12255_v42 = vld [vmem:[#allocation20 + $0x584] ss:$16 sps:$4 sm:$0xff]  }
 0xa08   :  { %9959 = vmatpush1.bf16.msra.mxu0 %v12175_v59  ;;  %10171 = vmatpush1.bf16.msra.mxu1 %v12178_v15  ;;  %v11277_v59 = vmul.f32 -1.442695, %v13769_v38  ;;  %v12234_v15 = vld [vmem:[#allocation20 + $0x50c] ss:$16 sps:$4 sm:$0xff]  }
 0xa09   :  { %9981 = vmatprep.subr.bf16.mxu0 %v12183_v18  ;;  %10193 = vmatprep.subr.bf16.mxu1 %v12186_v52  ;;  %v11279_v18 = vmul.f32 -1.442695, %v13771_v43  ;;  %v11278_v52 = vmul.f32 -1.442695, %v13773_v58 }
 0xa0a   :  { %12533 = vpow2.f32 %v11277_v59  ;;  %v12258_v59 = vld [vmem:[#allocation20 + $0x58c] ss:$16 sps:$4 sm:$0xff]  }
 0xa0b   :  { %9961 = vmatmul.mubr.bf16.vlgmr.msra.gmra.mrb[72].mxu0 %v13815_v50  ;;  %10173 = vmatmul.mubr.bf16.vlgmr.msra.gmra.mrb[72].mxu1 %v13815_v50  ;;  %v12204_v50 = vld [vmem:[#allocation20 + $0x46c] ss:$16 sps:$4 sm:$0xff]   ;;  %12535 = vpow2.f32 %v11279_v18 }
 0xa0c   :  { %9970 = vmatprep.mubr.bf16.mxu0 %v13827_v47  ;;  %9982 = vmatpush1.bf16.msra.mxu0 %v12181_v24  ;;  %v12229_v24 = vld [vmem:[#allocation20 + $0x500] ss:$16 sps:$4 sm:$0xff]   ;;  %12537 = vpow2.f32 %v11278_v52 }
 0xa0d   :  { %10182 = vmatprep.mubr.bf16.mxu1 %v13827_v47  ;;  %10194 = vmatpush1.bf16.msra.mxu1 %v12184_v29  ;;  %v12199_v47 = vld [vmem:[#allocation20 + $0x460] ss:$16 sps:$4 sm:$0xff]   ;;  %v11280_v29 = vmul.f32 -1.442695, %v13775_v32 }
 0xa0e   :  { %9983 = vmatprep.subr.bf16.mxu0 %v12189_v45  ;;  %10195 = vmatprep.subr.bf16.mxu1 %v12192_v63  ;;  %v12232_v45 = vld [vmem:[#allocation20 + $0x508] ss:$16 sps:$4 sm:$0xff]   ;;  %v12237_v63 = vld [vmem:[#allocation20 + $0x524] ss:$16 sps:$4 sm:$0xff]  }
 0xa0f   :  { %12539 = vpow2.f32 %v11280_v29  ;;  %v12253_v29 = vld [vmem:[#allocation20 + $0x580] ss:$16 sps:$4 sm:$0xff]  }
 0xa10   :  { %9984 = vmatpush1.bf16.msra.mxu0 %v12187_v41  ;;  %v11285_v41 = vmul.f32 -1.442695, %v13777_v14 }
 0xa11   :  { %10196 = vmatpush1.bf16.msra.mxu1 %v12190_v61  ;;  %9985 = vmatprep.subr.bf16.mxu0 %v12195_v5  ;;  %v12240_v61 = vld [vmem:[#allocation20 + $0x52c] ss:$16 sps:$4 sm:$0xff]   ;;  %v11287_v5 = vmul.f32 -1.442695, %v13779_v35 }
 0xa12   :  { %10197 = vmatprep.subr.bf16.mxu1 %v12198_v48  ;;  %v12518_v48 = vpop.eup %12517  ;;  %12541 = vpow2.f32 %v11285_v41  ;;  %v12256_v41 = vld [vmem:[#allocation20 + $0x588] ss:$16 sps:$4 sm:$0xff]  }
 0xa13   :  { %9971 = vmatmul.mubr.bf16.gmra.mrb[76].mxu0 %v13825_v21  ;;  %10183 = vmatmul.mubr.bf16.gmra.mrb[76].mxu1 %v13825_v21  ;;  %v12214_v21 = vld [vmem:[#allocation20 + $0x4a8] ss:$16 sps:$4 sm:$0xff]   ;;  %12543 = vpow2.f32 %v11287_v5 }
 0xa14   :  { %9986 = vmatpush1.bf16.msra.mxu0 %v12193_v44  ;;  %v11286_v44 = vmul.f32 -1.442695, %v13781_v33 }
 0xa15   :  { %10198 = vmatpush1.bf16.msra.mxu1 %v12196_v19  ;;  %9987 = vmatprep.subr.bf16.mxu0 %v12201_v10  ;;  %v12235_v19 = vld [vmem:[#allocation20 + $0x520] ss:$16 sps:$4 sm:$0xff]   ;;  %v12520_v10 = vpop.eup %12519 }
 0xa16   :  { %10199 = vmatprep.subr.bf16.mxu1 %v12204_v50  ;;  %v11288_v50 = vmul.f32 -1.442695, %v13783_v8  ;;  %12545 = vpow2.f32 %v11286_v44  ;;  %v12264_v44 = vld [vmem:[#allocation20 + $0x5ac] ss:$16 sps:$4 sm:$0xff]  }
 0xa18   :  { %9988 = vmatpush1.bf16.msra.mxu0 %v12199_v47  ;;  %v12238_v47 = vld [vmem:[#allocation20 + $0x528] ss:$16 sps:$4 sm:$0xff]   ;;  %12547 = vpow2.f32 %v11288_v50 }
 0xa19   :  { %10200 = vmatpush1.bf16.msra.mxu1 %v12202_v39  ;;  %9989 = vmatprep.subr.bf16.mxu0 %v12207_v46  ;;  %v12243_v39 = vld [vmem:[#allocation20 + $0x544] ss:$16 sps:$4 sm:$0xff]   ;;  %v12522_v46 = vpop.eup %12521 }
 0xa1a   :  { %10201 = vmatprep.subr.bf16.mxu1 %v12210_v20  ;;  %v12246_v20 = vld [vmem:[#allocation20 + $0x54c] ss:$16 sps:$4 sm:$0xff]  }
 0xa1c   :  { %9990 = vmatpush1.bf16.msra.mxu0 %v12205_v31  ;;  %v12524_v31 = vpop.eup %12523 }
 0xa1d   :  { %10202 = vmatpush1.bf16.msra.mxu1 %v12208_v28  ;;  %9991 = vmatprep.subr.bf16.mxu0 %v12213_v53  ;;  %v8167_v28 = vadd.f32 1.0, %v12518_v48  ;;  %v12526_v53 = vpop.eup %12525  ;;  %v8170_v51 = vadd.f32 1.0, %v12524_v31  ;;  %v12267_v31 = vld [vmem:[#allocation20 + $0x5c4] ss:$16 sps:$4 sm:$0xff]  }
 0xa1e   :  { %10203 = vmatprep.subr.bf16.mxu1 %v12216_v37  ;;  %v8169_v37 = vadd.f32 1.0, %v12520_v10 }
 0xa1f   :  { %12549 = vrcp.f32 %v8167_v28 }
 0xa20   :  { %9992 = vmatpush1.bf16.msra.mxu0 %v12211_v40  ;;  %v12241_v40 = vld [vmem:[#allocation20 + $0x540] ss:$16 sps:$4 sm:$0xff]   ;;  %12551 = vrcp.f32 %v8169_v37  ;;  %v12270_v37 = vld [vmem:[#allocation20 + $0x5cc] ss:$16 sps:$4 sm:$0xff]  }
 0xa21   :  { %10204 = vmatpush1.bf16.msra.mxu1 %v12214_v21  ;;  %9993 = vmatprep.subr.bf16.mxu0 %v12219_v1  ;;  %v12528_v21 = vpop.eup %12527  ;;  %v8168_v1 = vadd.f32 1.0, %v12522_v46 }
 0xa22   :  { %10205 = vmatprep.subr.bf16.mxu1 %v12222_v34  ;;  %v12249_v34 = vld [vmem:[#allocation20 + $0x564] ss:$16 sps:$4 sm:$0xff]   ;;  %v12530_v25 = vpop.eup %12529  ;;  %v8177_v36 = vadd.f32 1.0, %v12528_v21 }
 0xa23   :  { %v12532_v9 = vpop.eup %12531  ;;  %12553 = vrcp.f32 %v8168_v1  ;;  %v8176_v62 = vadd.f32 1.0, %v12530_v25  ;;  %v12265_v1 = vld [vmem:[#allocation20 + $0x5c0] ss:$16 sps:$4 sm:$0xff]   ;;  %v12273_v25 = vld [vmem:[#allocation20 + $0x5e4] ss:$16 sps:$4 sm:$0xff]  }
 0xa24   :  { %9994 = vmatpush1.bf16.msra.mxu0 %v12217_v6  ;;  %v12252_v6 = vld [vmem:[#allocation20 + $0x56c] ss:$16 sps:$4 sm:$0xff]   ;;  %12555 = vrcp.f32 %v8170_v51 }
 0xa25   :  { %10206 = vmatpush1.bf16.msra.mxu1 %v12220_v3  ;;  %9995 = vmatprep.subr.bf16.mxu0 %v12225_v54  ;;  %v8175_v3 = vadd.f32 1.0, %v12526_v53  ;;  %v12534_v54 = vpop.eup %12533 }
 0xa26   :  { %10207 = vmatprep.subr.bf16.mxu1 %v12228_v27  ;;  %v12247_v27 = vld [vmem:[#allocation20 + $0x560] ss:$16 sps:$4 sm:$0xff]   ;;  %v12536_v23 = vpop.eup %12535  ;;  %v8183_v18 = vadd.f32 1.0, %v12534_v54 }
 0xa27   :  { %12557 = vrcp.f32 %v8175_v3 }
 0xa28   :  { %9996 = vmatpush1.bf16.msra.mxu0 %v12223_v55  ;;  %v12250_v55 = vld [vmem:[#allocation20 + $0x568] ss:$16 sps:$4 sm:$0xff]   ;;  %12559 = vrcp.f32 %v8177_v36 }
 0xa29   :  { %10208 = vmatpush1.bf16.msra.mxu1 %v12226_v11  ;;  %9997 = vmatprep.subr.bf16.mxu0 %v12231_v30  ;;  %v12538_v11 = vpop.eup %12537  ;;  %v8178_v30 = vadd.f32 1.0, %v12532_v9  ;;  %12561 = vrcp.f32 %v8176_v62  ;;  %v12271_v62 = vld [vmem:[#allocation20 + $0x5e0] ss:$16 sps:$4 sm:$0xff]  }
 0xa2a   :  { %10209 = vmatprep.subr.bf16.mxu1 %v12234_v15  ;;  %v12540_v15 = vpop.eup %12539 }
 0xa2b   :  { %v12542_v52 = vpop.eup %12541  ;;  %12563 = vrcp.f32 %v8178_v30  ;;  %v8186_v48 = vadd.f32 1.0, %v12540_v15 }
 0xa2c   :  { %9998 = vmatpush1.bf16.msra.mxu0 %v12229_v24  ;;  %v8185_v24 = vadd.f32 1.0, %v12536_v23  ;;  %12565 = vrcp.f32 %v8183_v18  ;;  %v8191_v10 = vadd.f32 1.0, %v12542_v52  ;;  %v12274_v18 = vld [vmem:[#allocation20 + $0x5e8] ss:$16 sps:$4 sm:$0xff]  }
 0xa2d   :  { %10210 = vmatpush1.bf16.msra.mxu1 %v12232_v45  ;;  %9999 = vmatprep.subr.bf16.mxu0 %v12237_v63  ;;  %v12544_v45 = vpop.eup %12543  ;;  %v8184_v63 = vadd.f32 1.0, %v12538_v11 }
 0xa2e   :  { %10211 = vmatprep.subr.bf16.mxu1 %v12240_v61  ;;  %v12261_v61 = vld [vmem:[#allocation20 + $0x5a4] ss:$16 sps:$4 sm:$0xff]   ;;  %v12546_v5 = vpop.eup %12545  ;;  %12567 = vrcp.f32 %v8185_v24  ;;  %v8193_v50 = vadd.f32 1.0, %v12544_v45 }
 0xa2f   :  { %12569 = vrcp.f32 %v8184_v63  ;;  %v8192_v46 = vadd.f32 1.0, %v12546_v5 }
 0xa30   :  { %10000 = vmatpush1.bf16.msra.mxu0 %v12235_v19  ;;  %v12548_v19 = vpop.eup %12547  ;;  %12571 = vrcp.f32 %v8186_v48 }
 0xa31   :  { %10212 = vmatpush1.bf16.msra.mxu1 %v12238_v47  ;;  %10001 = vmatprep.subr.bf16.mxu0 %v12243_v39  ;;  %v12259_v47 = vld [vmem:[#allocation20 + $0x5a0] ss:$16 sps:$4 sm:$0xff]   ;;  %v12550_v39 = vpop.eup %12549  ;;  %v8194_v53 = vadd.f32 1.0, %v12548_v19  ;;  %12573 = vrcp.f32 %v8191_v10 }
 0xa32   :  { %10213 = vmatprep.subr.bf16.mxu1 %v12246_v20  ;;  %v12262_v20 = vld [vmem:[#allocation20 + $0x5a8] ss:$16 sps:$4 sm:$0xff]   ;;  %v12552_v28 = vpop.eup %12551  ;;  %12575 = vrcp.f32 %v8193_v50  ;;  %v8263_v3 = vmul.f32 %v12550_v39, %v13753_v0  ;;  %v12279_v0 = vld [vmem:[#allocation20 + $0x604] ss:$16 sps:$4 sm:$0xff]  }
 0xa33   :  { %12577 = vrcp.f32 %v8192_v46  ;;  %v8265_v36 = vmul.f32 %v12552_v28, %v13755_v13  ;;  %v12277_v28 = vld [vmem:[#allocation20 + $0x600] ss:$16 sps:$4 sm:$0xff]  }
 0xa34   :  { %10002 = vmatpush1.bf16.msra.mxu0 %v12241_v40  ;;  %v12554_v40 = vpop.eup %12553  ;;  %12579 = vrcp.f32 %v8194_v53 }
 0xa35   :  { %10214 = vmatpush1.bf16.msra.mxu1 %v12244_v60  ;;  %10003 = vmatprep.subr.bf16.mxu0 %v12249_v34  ;;  %v12556_v21 = vpop.eup %12555  ;;  %v12268_v34 = vld [vmem:[#allocation20 + $0x5c8] ss:$16 sps:$4 sm:$0xff]  }
 0xa36   :  { %10215 = vmatprep.subr.bf16.mxu1 %v12252_v6  ;;  %v12558_v60 = vpop.eup %12557  ;;  %v12276_v6 = vld [vmem:[#allocation20 + $0x5ec] ss:$16 sps:$4 sm:$0xff]  }
 0xa37   :  { %v12560_v51 = vpop.eup %12559  ;;  %v8271_v11 = vmul.f32 %v12558_v60, %v13761_v7 }
 0xa38   :  { %10004 = vmatpush1.bf16.msra.mxu0 %v12247_v27  ;;  %v12562_v9 = vpop.eup %12561  ;;  %v8264_v27 = vmul.f32 %v12554_v40, %v13757_v4  ;;  %v8273_v13 = vmul.f32 %v12560_v51, %v13763_v22 }
 0xa39   :  { %10216 = vmatpush1.bf16.msra.mxu1 %v12250_v55  ;;  %10005 = vmatprep.subr.bf16.mxu0 %v12255_v42  ;;  %v12564_v54 = vpop.eup %12563  ;;  %v8266_v42 = vmul.f32 %v12556_v21, %v13759_v26  ;;  %v8272_v4 = vmul.f32 %v12562_v9, %v13765_v56  ;;  %v12282_v26 = vld [vmem:[#allocation20 + $0x60c] ss:$16 sps:$4 sm:$0xff]   ;;  %v12285_v21 = vld [vmem:[#allocation20 + $0x624] ss:$16 sps:$4 sm:$0xff]  }
 0xa3a   :  { %10217 = vmatprep.subr.bf16.mxu1 %v12258_v59  ;;  %v12566_v55 = vpop.eup %12565  ;;  %v8274_v7 = vmul.f32 %v12564_v54, %v13767_v57  ;;  %v12280_v57 = vld [vmem:[#allocation20 + $0x608] ss:$16 sps:$4 sm:$0xff]  }
 0xa3b   :  { %v12568_v52 = vpop.eup %12567 }
 0xa3c   :  { %10006 = vmatpush1.bf16.msra.mxu0 %v12253_v29 }
 0xa3d   :  { %10218 = vmatpush1.bf16.msra.mxu1 %v12256_v41  ;;  %10007 = vmatprep.subr.bf16.mxu0 %v12261_v61  ;;  %v12570_v41 = vpop.eup %12569 }
 0xa3e   :  { %10219 = vmatprep.subr.bf16.mxu1 %v12264_v44  ;;  %v12572_v19 = vpop.eup %12571 }
 0xa3f   :  { %v12574_v22 = vpop.eup %12573  ;;  %v8282_v51 = vmul.f32 %v12572_v19, %v13775_v32  ;;  %v12309_v19 = vld [vmem:[#allocation20 + $0x6a4] ss:$16 sps:$4 sm:$0xff]  }
 0xa40   :  { %10008 = vmatpush1.bf16.msra.mxu0 %v12259_v47  ;;  %v12576_v46 = vpop.eup %12575  ;;  %v8287_v9 = vmul.f32 %v12574_v22, %v13777_v14  ;;  %v12315_v22 = vld [vmem:[#allocation20 + $0x6c4] ss:$16 sps:$4 sm:$0xff]  }
 0xa41   :  { %10220 = vmatpush1.bf16.msra.mxu1 %v12262_v20  ;;  %10009 = vmatprep.subr.bf16.mxu0 %v12267_v31  ;;  %v12578_v53 = vpop.eup %12577 }
 0xa42   :  { %10221 = vmatprep.subr.bf16.mxu1 %v12270_v37  ;;  %v8279_v37 = vmul.f32 %v12566_v55, %v13769_v38  ;;  %v12580_v60 = vpop.eup %12579  ;;  %v12286_v55 = vld [vmem:[#allocation20 + $0x628] ss:$16 sps:$4 sm:$0xff]  }
 0xa44   :  { %v7942_v23 = vpop.f32.mrb[64].mxu0  ;;  %10010 = vmatpush1.bf16.msra.mxu0 %v12265_v1  ;;  %v12288_v1 = vld [vmem:[#allocation20 + $0x62c] ss:$16 sps:$4 sm:$0xff]  }
 0xa45   :  { %v8295_v30 = vmul.f32 %v8263_v3, %v7942_v23  ;;  %v8048_v59 = vpop.f32.mrb[64].mxu1  ;;  %v7944_v15 = vpop.f32.mrb[65].mxu0  ;;  %10222 = vmatpush1.bf16.msra.mxu1 %v12268_v34  ;;  %10011 = vmatprep.subr.bf16.mxu0 %v12273_v25  ;;  %v8281_v34 = vmul.f32 %v12568_v52, %v13771_v43  ;;  %v8280_v25 = vmul.f32 %v12570_v41, %v13773_v58  ;;  %v12283_v58 = vld [vmem:[#allocation20 + $0x620] ss:$16 sps:$4 sm:$0xff]  }
 0xa46   :  { %v8297_v24 = vmul.f32 %v8265_v36, %v8048_v59  ;;  %v8296_v29 = vmul.f32 %v8264_v27, %v7944_v15  ;;  %v8050_v45 = vpop.f32.mrb[65].mxu1  ;;  %v7946_v63 = vpop.f32.mrb[66].mxu0  ;;  %10223 = vmatprep.subr.bf16.mxu1 %v12276_v6  ;;  %v8289_v3 = vmul.f32 %v12576_v46, %v13779_v35  ;;  %v8288_v27 = vmul.f32 %v12578_v53, %v13781_v33  ;;  %v12291_v59 = vld [vmem:[#allocation20 + $0x644] ss:$16 sps:$4 sm:$0xff]   ;;  %v12294_v15 = vld [vmem:[#allocation20 + $0x64c] ss:$16 sps:$4 sm:$0xff]  }
 0xa47   :  { %v8298_v61 = vmul.f32 %v8266_v42, %v8050_v45  ;;  %v8303_v5 = vmul.f32 %v8271_v11, %v7946_v63  ;;  %v8052_v48 = vpop.f32.mrb[66].mxu1  ;;  %v7948_v44 = vpop.f32.mrb[67].mxu0  ;;  %v8290_v42 = vmul.f32 %v12580_v60, %v13783_v8  ;;  %v12292_v8 = vld [vmem:[#allocation20 + $0x648] ss:$16 sps:$4 sm:$0xff]   ;;  %v12297_v63 = vld [vmem:[#allocation20 + $0x664] ss:$16 sps:$4 sm:$0xff]  }
 0xa48   :  { %v8305_v10 = vmul.f32 %v8273_v13, %v8052_v48  ;;  %v8304_v50 = vmul.f32 %v8272_v4, %v7948_v44  ;;  %v8054_v47 = vpop.f32.mrb[67].mxu1  ;;  %10012 = vmatpush1.bf16.msra.mxu0 %v12271_v62  ;;  %v12295_v41 = vld [vmem:[#allocation20 + $0x660] ss:$16 sps:$4 sm:$0xff]   ;;  %v12304_v44 = vld [vmem:[#allocation20 + $0x688] ss:$16 sps:$4 sm:$0xff]  }
 0xa49   :  { %v8327_v56 = vpack.c.bf16 %v8303_v5, %v8295_v30  ;;  %v8306_v39 = vmul.f32 %v8274_v7, %v8054_v47  ;;  %10224 = vmatpush1.bf16.msra.mxu1 %v12274_v18  ;;  %10034 = vmatprep.subr.bf16.mxu0 %v12279_v0  ;;  %v12298_v7 = vld [vmem:[#allocation20 + $0x668] ss:$16 sps:$4 sm:$0xff]   ;;  %v12306_v5 = vld [vmem:[#allocation20 + $0x68c] ss:$16 sps:$4 sm:$0xff]   ;;  %v12301_v48 = vld [vmem:[#allocation20 + $0x680] ss:$16 sps:$4 sm:$0xff]  }
 0xa4a   :  { %v13859_v20 = vpack.c.bf16 %v8305_v10, %v8297_v24  ;;  %v8328_v31 = vpack.c.bf16 %v8304_v50, %v8296_v29  ;;  %10246 = vmatprep.subr.bf16.mxu1 %v12282_v26  ;;  %v12289_v29 = vld [vmem:[#allocation20 + $0x640] ss:$16 sps:$4 sm:$0xff]   ;;  %v12300_v26 = vld [vmem:[#allocation20 + $0x66c] ss:$16 sps:$4 sm:$0xff]   ;;  %v12310_v47 = vld [vmem:[#allocation20 + $0x6a8] ss:$16 sps:$4 sm:$0xff]  }
 0xa4b   :  { %v8330_v40 = vpack.c.bf16 %v8306_v39, %v8298_v61  ;;  %v12303_v61 = vld [vmem:[#allocation20 + $0x684] ss:$16 sps:$4 sm:$0xff]   ;;  %v12312_v10 = vld [vmem:[#allocation20 + $0x6ac] ss:$16 sps:$4 sm:$0xff]   ;;  %v12307_v50 = vld [vmem:[#allocation20 + $0x6a0] ss:$16 sps:$4 sm:$0xff]  }
 0xa4c   :  { %v7952_v6 = vpop.f32.mrb[68].mxu0  ;;  %10013 = vmatprep.mubr.bf16.mxu0 %v8328_v31  ;;  %10225 = vmatprep.mubr.bf16.mxu1 %v8328_v31  ;;  %v12313_v39 = vld [vmem:[#allocation20 + $0x6c0] ss:$16 sps:$4 sm:$0xff]   ;;  %v12316_v46 = vld [vmem:[#allocation20 + $0x6c8] ss:$16 sps:$4 sm:$0xff]  }
 0xa4d   :  { %v8311_v54 = vmul.f32 %v8279_v37, %v7952_v6  ;;  %v8058_v36 = vpop.f32.mrb[68].mxu1  ;;  %v7954_v38 = vpop.f32.mrb[69].mxu0  ;;  %10014 = vmatmul.mubr.bf16.vlgmr.msra.gmra.mrb[72].mxu0 %v8327_v56  ;;  %10226 = vmatmul.mubr.bf16.vlgmr.msra.gmra.mrb[72].mxu1 %v8327_v56  ;;  %v12318_v56 = vld [vmem:[#allocation20 + $0x6cc] ss:$16 sps:$4 sm:$0xff]   ;;  %v12321_v31 = vld [vmem:[#allocation20 + $0x6e4] ss:$16 sps:$4 sm:$0xff]  }
 0xa4e   :  { %v8313_v23 = vmul.f32 %v8281_v34, %v8058_v36  ;;  %v8312_v43 = vmul.f32 %v8280_v25, %v7954_v38  ;;  %v8060_v62 = vpop.f32.mrb[69].mxu1  ;;  %10035 = vmatpush1.bf16.msra.mxu0 %v12277_v28  ;;  %10247 = vmatpush1.bf16.msra.mxu1 %v12280_v57  ;;  %v7956_v32 = vpop.f32.mrb[70].mxu0  ;;  %v12324_v28 = vld [vmem:[#allocation20 + $0x6ec] ss:$16 sps:$4 sm:$0xff]   ;;  %v12319_v57 = vld [vmem:[#allocation20 + $0x6e0] ss:$16 sps:$4 sm:$0xff]  }
 0xa4f   :  { %v8314_v14 = vmul.f32 %v8282_v51, %v8060_v62  ;;  %v8319_v11 = vmul.f32 %v8287_v9, %v7956_v32  ;;  %v8062_v35 = vpop.f32.mrb[70].mxu1  ;;  %v7958_v30 = vpop.f32.mrb[71].mxu0  ;;  %10036 = vmatprep.subr.bf16.mxu0 %v12285_v21  ;;  %10248 = vmatprep.subr.bf16.mxu1 %v12288_v1  ;;  %v12322_v53 = vld [vmem:[#allocation20 + $0x6e8] ss:$16 sps:$4 sm:$0xff]   ;;  %v12327_v37 = vld [vmem:[#allocation20 + $0x704] ss:$16 sps:$4 sm:$0xff]  }
 0xa50   :  { %v8321_v18 = vmul.f32 %v8289_v3, %v8062_v35  ;;  %v8320_v33 = vmul.f32 %v8288_v27, %v7958_v30  ;;  %v8064_v0 = vpop.f32.mrb[71].mxu1  ;;  %v12325_v21 = vld [vmem:[#allocation20 + $0x700] ss:$16 sps:$4 sm:$0xff]   ;;  %v12328_v1 = vld [vmem:[#allocation20 + $0x708] ss:$16 sps:$4 sm:$0xff]  }
 0xa51   :  { %v8335_v52 = vpack.c.bf16 %v8319_v11, %v8311_v54  ;;  %v8322_v13 = vmul.f32 %v8290_v42, %v8064_v0  ;;  %v12333_v60 = vld [vmem:[#allocation20 + $0x724] ss:$16 sps:$4 sm:$0xff]   ;;  %v12336_v34 = vld [vmem:[#allocation20 + $0x72c] ss:$16 sps:$4 sm:$0xff]   ;;  %v12331_v25 = vld [vmem:[#allocation20 + $0x720] ss:$16 sps:$4 sm:$0xff]  }
 0xa52   :  { %v13869_v4 = vpack.c.bf16 %v8321_v18, %v8313_v23  ;;  %v8336_v24 = vpack.c.bf16 %v8320_v33, %v8312_v43  ;;  %10037 = vmatpush1.bf16.msra.mxu0 %v12283_v58  ;;  %10249 = vmatpush1.bf16.msra.mxu1 %v12286_v55  ;;  %v12334_v51 = vld [vmem:[#allocation20 + $0x728] ss:$16 sps:$4 sm:$0xff]   ;;  %v12339_v6 = vld [vmem:[#allocation20 + $0x744] ss:$16 sps:$4 sm:$0xff]   ;;  %v12342_v9 = vld [vmem:[#allocation20 + $0x74c] ss:$16 sps:$4 sm:$0xff]  }
 0xa53   :  { %v13871_v45 = vpack.c.bf16 %v8322_v13, %v8314_v14  ;;  %10038 = vmatprep.subr.bf16.mxu0 %v12291_v59  ;;  %10250 = vmatprep.subr.bf16.mxu1 %v12294_v15  ;;  %v12337_v3 = vld [vmem:[#allocation20 + $0x740] ss:$16 sps:$4 sm:$0xff]   ;;  %v12340_v54 = vld [vmem:[#allocation20 + $0x748] ss:$16 sps:$4 sm:$0xff]   ;;  %v12345_v36 = vld [vmem:[#allocation20 + $0x764] ss:$16 sps:$4 sm:$0xff]  }
 0xa54   :  { %10023 = vmatprep.mubr.bf16.mxu0 %v8336_v24  ;;  %10235 = vmatprep.mubr.bf16.mxu1 %v8336_v24  ;;  %v12348_v38 = vld [vmem:[#allocation20 + $0x76c] ss:$16 sps:$4 sm:$0xff]   ;;  %v12343_v27 = vld [vmem:[#allocation20 + $0x760] ss:$16 sps:$4 sm:$0xff]   ;;  %v12346_v23 = vld [vmem:[#allocation20 + $0x768] ss:$16 sps:$4 sm:$0xff]  }
 0xa55   :  { %10024 = vmatmul.mubr.bf16.gmra.mrb[76].mxu0 %v8335_v52  ;;  %10236 = vmatmul.mubr.bf16.gmra.mrb[76].mxu1 %v8335_v52  ;;  %v12351_v43 = vld [vmem:[#allocation20 + $0x784] ss:$16 sps:$4 sm:$0xff]   ;;  %v12354_v62 = vld [vmem:[#allocation20 + $0x78c] ss:$16 sps:$4 sm:$0xff]   ;;  %v12349_v32 = vld [vmem:[#allocation20 + $0x780] ss:$16 sps:$4 sm:$0xff]  }
 0xa56   :  { %10039 = vmatpush1.bf16.msra.mxu0 %v12289_v29  ;;  %10251 = vmatpush1.bf16.msra.mxu1 %v12292_v8  ;;  %v12352_v58 = vld [vmem:[#allocation20 + $0x788] ss:$16 sps:$4 sm:$0xff]   ;;  %v12357_v55 = vld [vmem:[#allocation20 + $0x7a4] ss:$16 sps:$4 sm:$0xff]   ;;  %v12360_v42 = vld [vmem:[#allocation20 + $0x7ac] ss:$16 sps:$4 sm:$0xff]  }
 0xa57   :  { %10066 = vmatprep.mubr.bf16.mxu0 %v8330_v40  ;;  %10278 = vmatprep.mubr.bf16.mxu1 %v8330_v40  ;;  %v12330_v40 = vld [vmem:[#allocation20 + $0x70c] ss:$16 sps:$4 sm:$0xff]   ;;  %v12355_v14 = vld [vmem:[#allocation20 + $0x7a0] ss:$16 sps:$4 sm:$0xff]   ;;  %v12358_v11 = vld [vmem:[#allocation20 + $0x7a8] ss:$16 sps:$4 sm:$0xff]  }
 0xa58   :  { %10040 = vmatprep.subr.bf16.mxu0 %v12297_v63  ;;  %10252 = vmatprep.subr.bf16.mxu1 %v12300_v26  ;;  %v12363_v35 = vld [vmem:[#allocation20 + $0x7c4] ss:$16 sps:$4 sm:$0xff]   ;;  %v12366_v30 = vld [vmem:[#allocation20 + $0x7cc] ss:$16 sps:$4 sm:$0xff]   ;;  %v12361_v59 = vld [vmem:[#allocation20 + $0x7c0] ss:$16 sps:$4 sm:$0xff]  }
 0xa59   :  { %v12364_v15 = vld [vmem:[#allocation20 + $0x7c8] ss:$16 sps:$4 sm:$0xff]   ;;  %v12369_v18 = vld [vmem:[#allocation20 + $0x7e4] ss:$16 sps:$4 sm:$0xff]   ;;  %v12372_v33 = vld [vmem:[#allocation20 + $0x7ec] ss:$16 sps:$4 sm:$0xff]  }
 0xa5a   :  { %10041 = vmatpush1.bf16.msra.mxu0 %v12295_v41  ;;  %10253 = vmatpush1.bf16.msra.mxu1 %v12298_v7  ;;  %v12367_v0 = vld [vmem:[#allocation20 + $0x7e0] ss:$16 sps:$4 sm:$0xff]   ;;  %v12370_v52 = vld [vmem:[#allocation20 + $0x7e8] ss:$16 sps:$4 sm:$0xff]  }
 0xa5b   :  { %10042 = vmatprep.subr.bf16.mxu0 %v12303_v61  ;;  %10254 = vmatprep.subr.bf16.mxu1 %v12306_v5  ;;  %v13944_v5 = vld [vmem:[#allocation29_spill] sm:$0xff] }
 0xa5e   :  { %10043 = vmatpush1.bf16.msra.mxu0 %v12301_v48  ;;  %10255 = vmatpush1.bf16.msra.mxu1 %v12304_v44 }
 0xa5f   :  { %10044 = vmatprep.subr.bf16.mxu0 %v12309_v19  ;;  %10256 = vmatprep.subr.bf16.mxu1 %v12312_v10  ;;  %v13946_v19 = vld [vmem:[#allocation31_spill] sm:$0xff] }
 0xa62   :  { %10045 = vmatpush1.bf16.msra.mxu0 %v12307_v50  ;;  %10257 = vmatpush1.bf16.msra.mxu1 %v12310_v47  ;;  %v13947_v50 = vld [vmem:[#allocation32_spill] sm:$0xff] }
 0xa63   :  { %10046 = vmatprep.subr.bf16.mxu0 %v12315_v22  ;;  %10258 = vmatprep.subr.bf16.mxu1 %v12318_v56  ;;  %v13948_v22 = vld [vmem:[#allocation33_spill] sm:$0xff] }
 0xa66   :  { %10047 = vmatpush1.bf16.msra.mxu0 %v12313_v39  ;;  %10259 = vmatpush1.bf16.msra.mxu1 %v12316_v46  ;;  %v13949_v46 = vld [vmem:[#allocation34_spill] sm:$0xff] }
 0xa67   :  { %10048 = vmatprep.subr.bf16.mxu0 %v12321_v31  ;;  %10260 = vmatprep.subr.bf16.mxu1 %v12324_v28  ;;  %v13950_v28 = vld [vmem:[#allocation35_spill] sm:$0xff] }
 0xa6a   :  { %10049 = vmatpush1.bf16.msra.mxu0 %v12319_v57  ;;  %10261 = vmatpush1.bf16.msra.mxu1 %v12322_v53 }
 0xa6b   :  { %10050 = vmatprep.subr.bf16.mxu0 %v12327_v37  ;;  %10262 = vmatprep.subr.bf16.mxu1 %v12330_v40  ;;  %v13951_v40 = vld [vmem:[#allocation36_spill] sm:$0xff] }
 0xa6e   :  { %10051 = vmatpush1.bf16.msra.mxu0 %v12325_v21  ;;  %10263 = vmatpush1.bf16.msra.mxu1 %v12328_v1  ;;  %v13952_v1 = vld [vmem:[#allocation37_spill] sm:$0xff] }
 0xa6f   :  { %10052 = vmatprep.subr.bf16.mxu0 %v12333_v60  ;;  %10264 = vmatprep.subr.bf16.mxu1 %v12336_v34 }
 0xa72   :  { %10053 = vmatpush1.bf16.msra.mxu0 %v12331_v25  ;;  %10265 = vmatpush1.bf16.msra.mxu1 %v12334_v51  ;;  %v13953_v51 = vld [vmem:[#allocation38_spill] sm:$0xff] }
 0xa73   :  { %10054 = vmatprep.subr.bf16.mxu0 %v12339_v6  ;;  %10266 = vmatprep.subr.bf16.mxu1 %v12342_v9  ;;  %v13954_v9 = vld [vmem:[#allocation39_spill] sm:$0xff] }
 0xa76   :  { %10055 = vmatpush1.bf16.msra.mxu0 %v12337_v3  ;;  %10267 = vmatpush1.bf16.msra.mxu1 %v12340_v54 }
 0xa77   :  { %10056 = vmatprep.subr.bf16.mxu0 %v12345_v36  ;;  %10268 = vmatprep.subr.bf16.mxu1 %v12348_v38 }
 0xa7a   :  { %10057 = vmatpush1.bf16.msra.mxu0 %v12343_v27  ;;  %10269 = vmatpush1.bf16.msra.mxu1 %v12346_v23 }
 0xa7b   :  { %10058 = vmatprep.subr.bf16.mxu0 %v12351_v43  ;;  %10270 = vmatprep.subr.bf16.mxu1 %v12354_v62 }
 0xa7e   :  { %10059 = vmatpush1.bf16.msra.mxu0 %v12349_v32  ;;  %10271 = vmatpush1.bf16.msra.mxu1 %v12352_v58 }
 0xa7f   :  { %10060 = vmatprep.subr.bf16.mxu0 %v12357_v55  ;;  %10272 = vmatprep.subr.bf16.mxu1 %v12360_v42 }
 0xa82   :  { %10061 = vmatpush1.bf16.msra.mxu0 %v12355_v14  ;;  %10273 = vmatpush1.bf16.msra.mxu1 %v12358_v11 }
 0xa83   :  { %10062 = vmatprep.subr.bf16.mxu0 %v12363_v35  ;;  %10274 = vmatprep.subr.bf16.mxu1 %v12366_v30 }
 0xa86   :  { %10063 = vmatpush1.bf16.msra.mxu0 %v12361_v59  ;;  %10275 = vmatpush1.bf16.msra.mxu1 %v12364_v15 }
 0xa87   :  { %10064 = vmatprep.subr.bf16.mxu0 %v12369_v18  ;;  %10276 = vmatprep.subr.bf16.mxu1 %v12372_v33 }
 0xa8a   :  { %10065 = vmatpush1.bf16.msra.mxu0 %v12367_v0  ;;  %10277 = vmatpush1.bf16.msra.mxu1 %v12370_v52 }
 0xa8d   :  { %10067 = vmatmul.mubr.bf16.vlgmr.msra.gmra.mrb[72].mxu0 %v13859_v20  ;;  %10279 = vmatmul.mubr.bf16.vlgmr.msra.gmra.mrb[72].mxu1 %v13859_v20 }
 0xa8e   :  { %10076 = vmatprep.mubr.bf16.mxu0 %v13871_v45  ;;  %10288 = vmatprep.mubr.bf16.mxu1 %v13871_v45 }
 0xa95   :  { %10077 = vmatmul.mubr.bf16.gmra.mrb[76].mxu0 %v13869_v4  ;;  %10289 = vmatmul.mubr.bf16.gmra.mrb[76].mxu1 %v13869_v4 }
 0xb60   :  { %v10068_v13 = vpop.f32.mrb[72].mxu0  ;;  %v10280_v24 = vpop.f32.mrb[72].mxu1 }
 0xb61   :  { %v10299_v29 = vadd.f32 %v10068_v13, %v13515_v2  ;;  %v10301_v8 = vadd.f32 %v10280_v24, %v13517_v17  ;;  %v10070_v63 = vpop.f32.mrb[73].mxu0  ;;  %v10282_v26 = vpop.f32.mrb[73].mxu1  ;;  %v13945_v2 = vld [vmem:[#allocation30_spill] sm:$0xff] }
 0xb62   :  { %v10300_v41 = vadd.f32 %v10070_v63, %v13519_v16  ;;  %v10302_v20 = vadd.f32 %v10282_v26, %v13527_v12  ;;  %v10072_v7 = vpop.f32.mrb[74].mxu0  ;;  %v10284_v61 = vpop.f32.mrb[74].mxu1 }
 0xb63   :  { %10315 = vst [vmem:[#allocation21] sm:$0xff] %v10299_v29  ;;  %10317 = vst [vmem:[#allocation21 + $0x10] sm:$0xff] %v10301_v8  ;;  %v10303_v45 = vadd.f32 %v10072_v7, %v13523_v49  ;;  %v10305_v4 = vadd.f32 %v10284_v61, %v13944_v5  ;;  %v10074_v48 = vpop.f32.mrb[75].mxu0  ;;  %v10286_v44 = vpop.f32.mrb[75].mxu1 }
 0xb64   :  { %10316 = vst [vmem:[#allocation21 + $0x8] sm:$0xff] %v10300_v41  ;;  %10318 = vst [vmem:[#allocation21 + $0x18] sm:$0xff] %v10302_v20  ;;  %v10304_v17 = vadd.f32 %v10074_v48, %v13945_v2  ;;  %v10306_v10 = vadd.f32 %v10286_v44, %v13946_v19 }
 0xb65   :  { %10319 = vst [vmem:[#allocation21 + $0x20] sm:$0xff] %v10303_v45  ;;  %10321 = vst [vmem:[#allocation21 + $0x30] sm:$0xff] %v10305_v4 }
 0xb66   :  { %10320 = vst [vmem:[#allocation21 + $0x28] sm:$0xff] %v10304_v17  ;;  %10322 = vst [vmem:[#allocation21 + $0x38] sm:$0xff] %v10306_v10 }
 0xb68   :  { %v10078_v16 = vpop.f32.mrb[76].mxu0  ;;  %v10290_v12 = vpop.f32.mrb[76].mxu1 }
 0xb69   :  { %v10307_v47 = vadd.f32 %v10078_v16, %v13947_v50  ;;  %v10309_v49 = vadd.f32 %v10290_v12, %v13948_v22  ;;  %v10080_v56 = vpop.f32.mrb[77].mxu0  ;;  %v10292_v39 = vpop.f32.mrb[77].mxu1 }
 0xb6a   :  { %v10308_v31 = vadd.f32 %v10080_v56, %v13949_v46  ;;  %v10310_v57 = vadd.f32 %v10292_v39, %v13950_v28  ;;  %v10082_v53 = vpop.f32.mrb[78].mxu0  ;;  %v10294_v37 = vpop.f32.mrb[78].mxu1 }
 0xb6b   :  { %10323 = vst [vmem:[#allocation21 + $0x40] sm:$0xff] %v10307_v47  ;;  %10325 = vst [vmem:[#allocation21 + $0x50] sm:$0xff] %v10309_v49  ;;  %v10311_v21 = vadd.f32 %v10082_v53, %v13951_v40  ;;  %v10313_v60 = vadd.f32 %v10294_v37, %v13952_v1  ;;  %v10084_v34 = vpop.f32.mrb[79].mxu0  ;;  %v10296_v25 = vpop.f32.mrb[79].mxu1 }
 0xb6c   :  { %10324 = vst [vmem:[#allocation21 + $0x48] sm:$0xff] %v10308_v31  ;;  %10326 = vst [vmem:[#allocation21 + $0x58] sm:$0xff] %v10310_v57  ;;  %v10312_v6 = vadd.f32 %v10084_v34, %v13953_v51  ;;  %v10314_v3 = vadd.f32 %v10296_v25, %v13954_v9 }
 0xb6d   :  { %10327 = vst [vmem:[#allocation21 + $0x60] sm:$0xff] %v10311_v21  ;;  %10329 = vst [vmem:[#allocation21 + $0x70] sm:$0xff] %v10313_v60 }
 0xb6e   :  { %10328 = vst [vmem:[#allocation21 + $0x68] sm:$0xff] %v10312_v6  ;;  %10330 = vst [vmem:[#allocation21 + $0x78] sm:$0xff] %v10314_v3 }
 0xb6f   :  { %12866 = shalt.err (!%p12863_p8)
}
 0xb70   :  { %s12867_s28 = scalar_lea.hbm %s13921_s11, 2048 }
 0xb71   :  { %p12868_p9 = scmp.ne.s32.totalorder %s13921_s11, %s12867_s28  ;;  %p12871_p10 = scmp.lt.u32.totalorder %s12867_s28, %s13921_s11 }
 0xb73   :  { %p12873_p11 = pnand %p12871_p10, %p12868_p9 }
 0xb75   :  { %12876 = shalt.err (!%p12873_p11)
}
 0xb76   :  { %10342 = dma.vmem_to_hbm [thread:$0]  %s10337_s5, 2048, %s13921_s11, [#allocation5], %s12903_s9, %s12903_s9, %s12904_s14  }
 0xb77   :  { %12889 = dma.done.wait [#allocation5], 2048  }
 0xb78   :  { %12890 = vsyncadd [#allocation5], 4294965248 }
 0xb79   :  { %10346 = vsyncpa [#allocation4], 1 }
 0xb7a   :  { %10347 = vsyncpa [#allocation7], 1 }
 0xb7b   :  { %10348 = vsyncpa [#allocation10], 1 }
 0xb7c   :  { %10349 = vsyncpa [#allocation13], 1 }
 0xb7d   :  { %10350 = vsyncpa [#allocation16], 1 }
 0xb7e   :  { %10351 = vsyncpa [#allocation19], 1 }
 0xb7f   :  { %10352 = vsyncpa [#allocation5], 1 }

</bundles_post_ra>
